<compile_context>
chip_gen: v6e
topology: v6e:2x2x1
jax: 0.10.0
libtpu: 0.0.40
codegen_flags: <defaults>
</compile_context>

<pallas_src>
import functools

import jax
import jax.numpy as jnp
from jax import lax
from jax.experimental import pallas as pl
from jax.experimental.pallas import tpu as pltpu


# --------------------------------------------------------------------------
# small helpers
# --------------------------------------------------------------------------
def _largest_divisor_leq(n, cap):
    d = min(n, cap)
    while n % d != 0:
        d -= 1
    return d


def _pick_flat_tile(length, cap=32768):
    """Pick a tile for a flattened lane-dense axis (multiple of 128 when possible)."""
    if length <= cap:
        return length
    if length % 128 == 0:
        t = cap - cap % 128
        while t >= 128:
            if length % t == 0:
                return t
            t -= 128
    return _largest_divisor_leq(length, cap)


def _cparams(sems, block_bytes):
    # 2x for double-buffered pipelining + slack for in-kernel temporaries.
    need = 2 * int(block_bytes) + (8 << 20)
    limit = int(min(max(need, 32 << 20), 64 << 20))   # cap sized for v7x VMEM
    return pltpu.CompilerParams(dimension_semantics=sems,
                                vmem_limit_bytes=limit)


# --------------------------------------------------------------------------
# CEBlurNet: coded-exposure temporal blur as one MXU contraction over T
# frames flattened to (B, T, L) with L = C*H*W  (lane-dense, contiguous DMA)
# --------------------------------------------------------------------------
def _ce_blur_kernel(w_ref, frames_ref, out_ref):
    # w_ref: (1, T) prescaled weights; frames_ref: (1, T, TL); out_ref: (1, 1, TL)
    f = frames_ref[0].astype(jnp.float32)                     # (T, TL)
    w = w_ref[...].astype(jnp.float32)                        # (1, T)
    out_ref[0] = lax.dot_general(
        w, f, (((1,), (0,)), ((), ())),
        preferred_element_type=jnp.float32).astype(out_ref.dtype)


def ce_blur(frames_flat, frame_weights, ce_code_n):
    # frames_flat: (B, T, L) float32   ->   (B, L) float32
    B, T, L = frames_flat.shape
    TL = _pick_flat_tile(L)
    w = (frame_weights.astype(jnp.float32) / float(ce_code_n)).reshape(1, T)
    blk_bytes = 4 * (T + T * TL + TL)
    out = pl.pallas_call(
        _ce_blur_kernel,
        out_shape=jax.ShapeDtypeStruct((B, 1, L), jnp.float32),
        grid=(B, L // TL),
        in_specs=[
            pl.BlockSpec((1, T), lambda b, l: (0, 0)),
            pl.BlockSpec((1, T, TL), lambda b, l: (b, 0, l)),
        ],
        out_specs=pl.BlockSpec((1, 1, TL), lambda b, l: (b, 0, l)),
        compiler_params=_cparams(("parallel", "parallel"), blk_bytes),
    )(w, frames_flat)
    return out.reshape(B, L)


# --------------------------------------------------------------------------
# 3x3 "same" convolution as im2col + single bf16 matmul (in-kernel zero pad)
# --------------------------------------------------------------------------
def _conv3x3_im2col(x_f32, w_bf16, b_f32, relu):
    # x_f32: (H, W, Cin) f32; w_bf16: (9*Cin, Cout) bf16; b_f32: (1, Cout) f32
    H, W, Cin = x_f32.shape
    zr = jnp.zeros((1, W, Cin), jnp.float32)
    xp = jnp.concatenate([zr, x_f32, zr], axis=0)              # (H+2, W, Cin)
    zc = jnp.zeros((H + 2, 1, Cin), jnp.float32)
    xp = jnp.concatenate([zc, xp, zc], axis=1)                 # (H+2, W+2, Cin)
    patches = [xp[dy:dy + H, dx:dx + W, :]
               for dy in range(3) for dx in range(3)]
    pm = jnp.concatenate(patches, axis=-1).astype(jnp.bfloat16)  # (H, W, 9*Cin)
    acc = lax.dot_general(pm, w_bf16, (((2,), (0,)), ((), ())),
                          preferred_element_type=jnp.float32)    # (H, W, Cout)
    acc = acc + b_f32
    if relu:
        acc = jnp.maximum(acc, 0.0)
    return acc


# Fused: feat = relu(conv3x3(x, w_in)); spatial = conv3x3(feat, w_sp)
def _encode_spatial_kernel(x_ref, w_in_ref, b_in_ref, w_sp_ref, b_sp_ref,
                           feat_ref, sp_ref):
    x = x_ref[0].astype(jnp.float32)
    feat = _conv3x3_im2col(x, w_in_ref[...], b_in_ref[...].astype(jnp.float32),
                           relu=True)
    feat_ref[0] = feat.astype(feat_ref.dtype)
    sp = _conv3x3_im2col(feat, w_sp_ref[...], b_sp_ref[...].astype(jnp.float32),
                         relu=False)
    sp_ref[0] = sp.astype(sp_ref.dtype)


def encode_spatial(x, w_in, b_in, w_sp, b_sp):
    # x: (B, H, W, Cin)  ->  feat, spatial: (B, H, W, Ch)
    B, H, W, Cin = x.shape
    Ch = w_in.shape[-1]
    win = w_in.reshape(9 * Cin, Ch).astype(jnp.bfloat16)
    wsp = w_sp.reshape(9 * Ch, Ch).astype(jnp.bfloat16)
    bi = b_in.reshape(1, Ch).astype(jnp.float32)
    bs = b_sp.reshape(1, Ch).astype(jnp.float32)
    blk_bytes = 4 * H * W * (Cin + 2 * Ch) + 2 * (9 * Cin * Ch + 9 * Ch * Ch)
    # TODO(synk): for large H a row-strip grid with halo (manual DMA or Element
    # index_map) is needed; whole-image blocks are fine at these shapes.
    return pl.pallas_call(
        _encode_spatial_kernel,
        out_shape=(jax.ShapeDtypeStruct((B, H, W, Ch), jnp.float32),
                   jax.ShapeDtypeStruct((B, H, W, Ch), jnp.float32)),
        grid=(B,),
        in_specs=[
            pl.BlockSpec((1, H, W, Cin), lambda b: (b, 0, 0, 0)),
            pl.BlockSpec((9 * Cin, Ch), lambda b: (0, 0)),
            pl.BlockSpec((1, Ch), lambda b: (0, 0)),
            pl.BlockSpec((9 * Ch, Ch), lambda b: (0, 0)),
            pl.BlockSpec((1, Ch), lambda b: (0, 0)),
        ],
        out_specs=(pl.BlockSpec((1, H, W, Ch), lambda b: (b, 0, 0, 0)),
                   pl.BlockSpec((1, H, W, Ch), lambda b: (b, 0, 0, 0))),
        compiler_params=_cparams(("parallel",), blk_bytes),
    )(x, win, bi, wsp, bs)


# --------------------------------------------------------------------------
# Frequency branch: complex 1x1 conv -> ReLU -> complex 1x1 conv packed as
# real block matmuls on [xr | xi] with weights [[Wr, Wi], [-Wi, Wr]]
# --------------------------------------------------------------------------
def _cplx_pw_kernel(x_ref, w1_ref, w2_ref, y_ref):
    dn = (((2,), (0,)), ((), ()))
    x = x_ref[0]                                               # (TH, Wf, 2C) bf16
    h = lax.dot_general(x, w1_ref[...], dn, preferred_element_type=jnp.float32)
    h = jnp.maximum(h, 0.0).astype(jnp.bfloat16)
    y = lax.dot_general(h, w2_ref[...], dn, preferred_element_type=jnp.float32)
    y_ref[0] = y.astype(y_ref.dtype)


def _cplx_block(wr, wi):
    top = jnp.concatenate([wr, wi], axis=1)
    bot = jnp.concatenate([-wi, wr], axis=1)
    return jnp.concatenate([top, bot], axis=0)                 # (2C, 2C)


def cplx_pointwise(xr, xi, w1r, w1i, w2r, w2i):
    # xr, xi: (B, H, Wf, C)  ->  (yr, yi) each (B, H, Wf, C)
    B, H, Wf, C = xr.shape
    xpk = jnp.concatenate([xr, xi], axis=-1).astype(jnp.bfloat16)   # (B,H,Wf,2C)
    w1 = _cplx_block(w1r, w1i).astype(jnp.bfloat16)
    w2 = _cplx_block(w2r, w2i).astype(jnp.bfloat16)
    TH = _largest_divisor_leq(H, 64)
    blk_bytes = 2 * TH * Wf * 2 * C + 4 * TH * Wf * 2 * C + 2 * 2 * (2 * C) ** 2
    y = pl.pallas_call(
        _cplx_pw_kernel,
        out_shape=jax.ShapeDtypeStruct((B, H, Wf, 2 * C), jnp.float32),
        grid=(B, H // TH),
        in_specs=[
            pl.BlockSpec((1, TH, Wf, 2 * C), lambda b, t: (b, t, 0, 0)),
            pl.BlockSpec((2 * C, 2 * C), lambda b, t: (0, 0)),
            pl.BlockSpec((2 * C, 2 * C), lambda b, t: (0, 0)),
        ],
        out_specs=pl.BlockSpec((1, TH, Wf, 2 * C), lambda b, t: (b, t, 0, 0)),
        compiler_params=_cparams(("parallel", "parallel"), blk_bytes),
    )(xpk, w1, w2)
    return y[..., :C], y[..., C:]


# --------------------------------------------------------------------------
# Fused tail: feat2 = relu(feat + spatial + freq); out = conv3x3(feat2) + blur
# --------------------------------------------------------------------------
def _fuse_decode_kernel(feat_ref, sp_ref, fq_ref, blur_ref, w_out_ref, b_out_ref,
                        out_ref):
    feat2 = jnp.maximum(
        feat_ref[0].astype(jnp.float32)
        + sp_ref[0].astype(jnp.float32)
        + fq_ref[0].astype(jnp.float32), 0.0)
    y = _conv3x3_im2col(feat2, w_out_ref[...],
                        b_out_ref[...].astype(jnp.float32), relu=False)
    out_ref[0] = (y + blur_ref[0].astype(jnp.float32)).astype(out_ref.dtype)


def fuse_decode(feat, spatial, freq, blur, w_out, b_out):
    B, H, W, Ch = feat.shape
    Cout = w_out.shape[-1]
    wo = w_out.reshape(9 * Ch, Cout).astype(jnp.bfloat16)
    bo = b_out.reshape(1, Cout).astype(jnp.float32)
    blk_bytes = 4 * H * W * (3 * Ch + 2 * Cout) + 2 * 9 * Ch * Cout
    # TODO(synk): Cout=3 makes the final store lane-masked; a transposed
    # (Cout, H*W) output layout would make the writeback fully lane-dense.
    return pl.pallas_call(
        _fuse_decode_kernel,
        out_shape=jax.ShapeDtypeStruct((B, H, W, Cout), jnp.float32),
        grid=(B,),
        in_specs=[
            pl.BlockSpec((1, H, W, Ch), lambda b: (b, 0, 0, 0)),
            pl.BlockSpec((1, H, W, Ch), lambda b: (b, 0, 0, 0)),
            pl.BlockSpec((1, H, W, Ch), lambda b: (b, 0, 0, 0)),
            pl.BlockSpec((1, H, W, Cout), lambda b: (b, 0, 0, 0)),
            pl.BlockSpec((9 * Ch, Cout), lambda b: (0, 0)),
            pl.BlockSpec((1, Cout), lambda b: (0, 0)),
        ],
        out_specs=pl.BlockSpec((1, H, W, Cout), lambda b: (b, 0, 0, 0)),
        compiler_params=_cparams(("parallel",), blk_bytes),
    )(feat, spatial, freq, blur, wo, bo)


# --------------------------------------------------------------------------
# Full forward:  (ce_blur_img_noisy, output) = OptceDeblurNet(frames)
# --------------------------------------------------------------------------
def optce_deblur_forward(frames, params, *, ce_code_n, sigma=0.0, noise_key=None):
    # frames: (B, T, C, H, W)  -- PyTorch convention at the boundary
    B, T, C, H, W = frames.shape
    L = C * H * W

    # --- CEBlurNet (layout-agnostic temporal reduction, no transpose needed) ---
    frames_flat = frames.reshape(B, T, L).astype(jnp.float32)
    blur_nchw = ce_blur(frames_flat, params["frame_weights"],
                        ce_code_n).reshape(B, C, H, W)
    if sigma > 0.0 and noise_key is not None:
        # TODO(synk): generate noise in-kernel with pltpu.prng_seed/prng_random_bits
        # to avoid the extra HBM pass; sigma_range=0 (module default) -> no noise.
        blur_nchw = blur_nchw + sigma * jax.random.normal(
            noise_key, blur_nchw.shape, jnp.float32)

    blur_cl = jnp.transpose(blur_nchw, (0, 2, 3, 1))           # (B, H, W, C)

    # --- DeepRFT (single-scale Res-FFT block) ---
    feat, spatial = encode_spatial(blur_cl, params["w_in"], params["b_in"],
                                   params["w_sp"], params["b_sp"])

    # TODO(synk): rfft2 / irfft2 have no Pallas primitive; computed with XLA FFT.
    fr = jnp.fft.rfft2(feat, axes=(1, 2))
    yr, yi = cplx_pointwise(jnp.real(fr).astype(jnp.float32),
                            jnp.imag(fr).astype(jnp.float32),
                            params["w1r"], params["w1i"],
                            params["w2r"], params["w2i"])
    freq = jnp.fft.irfft2(yr + 1j * yi, s=(H, W), axes=(1, 2)).astype(jnp.float32)

    out_cl = fuse_decode(feat, spatial, freq, blur_cl,
                         params["w_out"], params["b_out"])
    out_nchw = jnp.transpose(out_cl, (0, 3, 1, 2))
    return blur_nchw, out_nchw


# --------------------------------------------------------------------------
# Deterministic parameter init
# --------------------------------------------------------------------------
def init_params(key, *, ce_code_n, frame_n, in_ch, hidden):
    keys = jax.random.split(key, 10)
    # binary CE code (ce_code_init=None -> random binary), upsampled to frame_n
    ce_code = jax.random.bernoulli(keys[0], 0.5, (ce_code_n,)).astype(jnp.float32)
    frame_weights = jnp.repeat(ce_code, frame_n // ce_code_n)   # (frame_n,)

    def w(k, shape, scale=0.05):
        return scale * jax.random.normal(k, shape, jnp.float32)

    return {
        "frame_weights": frame_weights,
        "w_in":  w(keys[1], (3, 3, in_ch, hidden)),
        "b_in":  jnp.zeros((hidden,), jnp.float32),
        "w_sp":  w(keys[2], (3, 3, hidden, hidden)),
        "b_sp":  jnp.zeros((hidden,), jnp.float32),
        "w1r":   w(keys[3], (hidden, hidden)),
        "w1i":   w(keys[4], (hidden, hidden)),
        "w2r":   w(keys[5], (hidden, hidden)),
        "w2i":   w(keys[6], (hidden, hidden)),
        "w_out": w(keys[7], (3, 3, hidden, in_ch)),
        "b_out": jnp.zeros((in_ch,), jnp.float32),
    }


if __name__ == "__main__":
    key = jax.random.PRNGKey(0)
    k_param, k_frames = jax.random.split(key)

    # small shapes consistent with the module (frame_n multiple of ce_code_n)
    B, T, C, H, W = 2, 8, 3, 16, 16
    ce_code_n = 4
    hidden = 32

    params = init_params(k_param, ce_code_n=ce_code_n, frame_n=T,
                         in_ch=C, hidden=hidden)
    frames = jax.random.uniform(k_frames, (B, T, C, H, W), jnp.float32)

    fwd = jax.jit(functools.partial(optce_deblur_forward,
                                    ce_code_n=ce_code_n, sigma=0.0))
    ce_blur_img_noisy, output = fwd(frames, params)
    jax.block_until_ready((ce_blur_img_noisy, output))

    assert ce_blur_img_noisy.shape == (B, C, H, W)
    assert output.shape == (B, C, H, W)
    assert bool(jnp.all(jnp.isfinite(ce_blur_img_noisy)))
    assert bool(jnp.all(jnp.isfinite(output)))
    print("KERNEL_OK")
</pallas_src>

<mosaic_0001>
module attributes {stable_mosaic.version = 11 : i64} {
  func.func @_ce_blur_kernel(%arg0: i32, %arg1: i32, %arg2: memref<1x8xf32, #tpu.memory_space<vmem>>, %arg3: memref<1x8x768xf32, #tpu.memory_space<vmem>>, %arg4: memref<1x1x768xf32, #tpu.memory_space<vmem>>) attributes {dimension_semantics = [#tpu.dimension_semantics<parallel>, #tpu.dimension_semantics<parallel>], iteration_bounds = array<i64: 2, 1>, scalar_prefetch = 0 : i64, scratch_operands = 0 : i64, tpu.core_type = #tpu.core_type<tc>, window_params = [{pipeline_mode = #tpu.pipeline_mode<synchronous>, transform_indices = @transform_0, window_bounds = array<i64: 1, 8>}, {transform_indices = @transform_1, window_bounds = array<i64: 1, 8, 768>}, {transform_indices = @transform_2, window_bounds = array<i64: 1, 1, 768>}]} {
    %c0 = arith.constant 0 : index
    %c0_0 = arith.constant 0 : index
    %c0_1 = arith.constant 0 : index
    %0 = vector.load %arg3[%c0, %c0_0, %c0_1] : memref<1x8x768xf32, #tpu.memory_space<vmem>>, vector<1x8x768xf32>
    %1 = vector.shape_cast %0 : vector<1x8x768xf32> to vector<8x768xf32>
    %c0_2 = arith.constant 0 : index
    %c0_3 = arith.constant 0 : index
    %2 = vector.load %arg2[%c0_2, %c0_3] : memref<1x8xf32, #tpu.memory_space<vmem>>, vector<1x8xf32>
    %cst = arith.constant dense<0.000000e+00> : vector<1x768xf32>
    %3 = tpu.matmul %2, %1, %cst {dimension_numbers = #tpu.dot_dimension_numbers<[1], [0], [0], [1], [0, 0, 1, 1], [], []>} : vector<1x8xf32>, vector<8x768xf32>, vector<1x768xf32> -> vector<1x768xf32>
    %c0_4 = arith.constant 0 : index
    %c0_5 = arith.constant 0 : index
    %c0_6 = arith.constant 0 : index
    %4 = vector.load %arg4[%c0_4, %c0_5, %c0_6] : memref<1x1x768xf32, #tpu.memory_space<vmem>>, vector<1x1x768xf32>
    %5 = vector.shape_cast %4 : vector<1x1x768xf32> to vector<1x768xf32>
    %6 = vector.shape_cast %3 : vector<1x768xf32> to vector<1x1x768xf32>
    tpu.vector_store %arg4[%c0_4, %c0_5, %c0_6], %6 {strides = array<i32>} : memref<1x1x768xf32, #tpu.memory_space<vmem>>, vector<1x1x768xf32>,
    return
  }
  func.func @transform_0(%arg0: i32, %arg1: i32) -> (i32, i32) {
    %c0_i32 = arith.constant 0 : i32
    %c0_i32_0 = arith.constant 0 : i32
    %c0_i32_1 = arith.constant 0 : i32
    return %c0_i32, %c0_i32_0 : i32, i32
  }
  func.func @transform_1(%arg0: i32, %arg1: i32) -> (i32, i32, i32) {
    %c0_i32 = arith.constant 0 : i32
    %c0_i32_0 = arith.constant 0 : i32
    return %arg0, %c0_i32, %arg1 : i32, i32, i32
  }
  func.func @transform_2(%arg0: i32, %arg1: i32) -> (i32, i32, i32) {
    %c0_i32 = arith.constant 0 : i32
    %c0_i32_0 = arith.constant 0 : i32
    return %arg0, %c0_i32, %arg1 : i32, i32, i32
  }
}

module attributes {stable_mosaic.version = 11 : i64} {
  func.func @_encode_spatial_kernel(%arg0: i32, %arg1: memref<1x16x16x3xf32, #tpu.memory_space<vmem>>, %arg2: memref<27x32xbf16, #tpu.memory_space<vmem>>, %arg3: memref<1x32xf32, #tpu.memory_space<vmem>>, %arg4: memref<288x32xbf16, #tpu.memory_space<vmem>>, %arg5: memref<1x32xf32, #tpu.memory_space<vmem>>, %arg6: memref<1x16x16x32xf32, #tpu.memory_space<vmem>>, %arg7: memref<1x16x16x32xf32, #tpu.memory_space<vmem>>) attributes {dimension_semantics = [#tpu.dimension_semantics<parallel>], iteration_bounds = array<i64: 2>, scalar_prefetch = 0 : i64, scratch_operands = 0 : i64, tpu.core_type = #tpu.core_type<tc>, window_params = [{transform_indices = @transform_0, window_bounds = array<i64: 1, 16, 16, 3>}, {pipeline_mode = #tpu.pipeline_mode<synchronous>, transform_indices = @transform_1, window_bounds = array<i64: 27, 32>}, {pipeline_mode = #tpu.pipeline_mode<synchronous>, transform_indices = @transform_2, window_bounds = array<i64: 1, 32>}, {pipeline_mode = #tpu.pipeline_mode<synchronous>, transform_indices = @transform_3, window_bounds = array<i64: 288, 32>}, {pipeline_mode = #tpu.pipeline_mode<synchronous>, transform_indices = @transform_4, window_bounds = array<i64: 1, 32>}, {transform_indices = @transform_5, window_bounds = array<i64: 1, 16, 16, 32>}, {transform_indices = @transform_6, window_bounds = array<i64: 1, 16, 16, 32>}]} {
    %c0 = arith.constant 0 : index
    %c0_0 = arith.constant 0 : index
    %c0_1 = arith.constant 0 : index
    %c0_2 = arith.constant 0 : index
    %0 = vector.load %arg1[%c0, %c0_0, %c0_1, %c0_2] : memref<1x16x16x3xf32, #tpu.memory_space<vmem>>, vector<1x16x16x3xf32>
    %1 = vector.shape_cast %0 : vector<1x16x16x3xf32> to vector<16x16x3xf32>
    %c0_3 = arith.constant 0 : index
    %c0_4 = arith.constant 0 : index
    %2 = vector.load %arg2[%c0_3, %c0_4] : memref<27x32xbf16, #tpu.memory_space<vmem>>, vector<27x32xbf16>
    %c0_5 = arith.constant 0 : index
    %c0_6 = arith.constant 0 : index
    %3 = vector.load %arg3[%c0_5, %c0_6] : memref<1x32xf32, #tpu.memory_space<vmem>>, vector<1x32xf32>
    %cst = arith.constant 0.000000e+00 : f32
    %4 = vector.broadcast %cst : f32 to vector<1x16x3xf32>
    %5 = tpu.concatenate %4, %1, %4 in 0 : vector<1x16x3xf32>, vector<16x16x3xf32>, vector<1x16x3xf32> -> vector<18x16x3xf32>
    %cst_7 = arith.constant 0.000000e+00 : f32
    %6 = vector.broadcast %cst_7 : f32 to vector<18x1x3xf32>
    %7 = tpu.concatenate %6, %5, %6 in 1 : vector<18x1x3xf32>, vector<18x16x3xf32>, vector<18x1x3xf32> -> vector<18x18x3xf32>
    %8 = vector.extract_strided_slice %7 {offsets = [0, 0, 0], sizes = [16, 16, 3], strides = [1, 1, 1]} : vector<18x18x3xf32> to vector<16x16x3xf32>
    %9 = vector.extract_strided_slice %7 {offsets = [0, 1, 0], sizes = [16, 16, 3], strides = [1, 1, 1]} : vector<18x18x3xf32> to vector<16x16x3xf32>
    %10 = vector.extract_strided_slice %7 {offsets = [0, 2, 0], sizes = [16, 16, 3], strides = [1, 1, 1]} : vector<18x18x3xf32> to vector<16x16x3xf32>
    %11 = vector.extract_strided_slice %7 {offsets = [1, 0, 0], sizes = [16, 16, 3], strides = [1, 1, 1]} : vector<18x18x3xf32> to vector<16x16x3xf32>
    %12 = vector.extract_strided_slice %7 {offsets = [1, 1, 0], sizes = [16, 16, 3], strides = [1, 1, 1]} : vector<18x18x3xf32> to vector<16x16x3xf32>
    %13 = vector.extract_strided_slice %7 {offsets = [1, 2, 0], sizes = [16, 16, 3], strides = [1, 1, 1]} : vector<18x18x3xf32> to vector<16x16x3xf32>
    %14 = vector.extract_strided_slice %7 {offsets = [2, 0, 0], sizes = [16, 16, 3], strides = [1, 1, 1]} : vector<18x18x3xf32> to vector<16x16x3xf32>
    %15 = vector.extract_strided_slice %7 {offsets = [2, 1, 0], sizes = [16, 16, 3], strides = [1, 1, 1]} : vector<18x18x3xf32> to vector<16x16x3xf32>
    %16 = vector.extract_strided_slice %7 {offsets = [2, 2, 0], sizes = [16, 16, 3], strides = [1, 1, 1]} : vector<18x18x3xf32> to vector<16x16x3xf32>
    %17 = tpu.concatenate %8, %9, %10, %11, %12, %13, %14, %15, %16 in 2 : vector<16x16x3xf32>, vector<16x16x3xf32>, vector<16x16x3xf32>, vector<16x16x3xf32>, vector<16x16x3xf32>, vector<16x16x3xf32>, vector<16x16x3xf32>, vector<16x16x3xf32>, vector<16x16x3xf32> -> vector<16x16x27xf32>
    %18 = arith.truncf %17 : vector<16x16x27xf32> to vector<16x16x27xbf16>
    %cst_8 = arith.constant dense<0.000000e+00> : vector<16x16x32xf32>
    %19 = tpu.matmul %18, %2, %cst_8 {dimension_numbers = #tpu.dot_dimension_numbers<[2], [0], [0, 1], [1], [0, 0, 0, 1, 1, 1], [], []>} : vector<16x16x27xbf16>, vector<27x32xbf16>, vector<16x16x32xf32> -> vector<16x16x32xf32>
    %20 = vector.shape_cast %3 : vector<1x32xf32> to vector<1x1x32xf32>
    %21 = vector.broadcast %20 : vector<1x1x32xf32> to vector<16x16x32xf32>
    %22 = arith.addf %19, %21 : vector<16x16x32xf32>
    %cst_9 = arith.constant 0.000000e+00 : f32
    %23 = vector.broadcast %cst_9 : f32 to vector<16x16x32xf32>
    %24 = arith.maximumf %22, %23 : vector<16x16x32xf32>
    %c0_10 = arith.constant 0 : index
    %c0_11 = arith.constant 0 : index
    %c0_12 = arith.constant 0 : index
    %c0_13 = arith.constant 0 : index
    %25 = vector.load %arg6[%c0_10, %c0_11, %c0_12, %c0_13] : memref<1x16x16x32xf32, #tpu.memory_space<vmem>>, vector<1x16x16x32xf32>
    %26 = vector.shape_cast %25 : vector<1x16x16x32xf32> to vector<16x16x32xf32>
    %27 = vector.shape_cast %24 : vector<16x16x32xf32> to vector<1x16x16x32xf32>
    tpu.vector_store %arg6[%c0_10, %c0_11, %c0_12, %c0_13], %27 {strides = array<i32>} : memref<1x16x16x32xf32, #tpu.memory_space<vmem>>, vector<1x16x16x32xf32>,
    %c0_14 = arith.constant 0 : index
    %c0_15 = arith.constant 0 : index
    %28 = vector.load %arg4[%c0_14, %c0_15] : memref<288x32xbf16, #tpu.memory_space<vmem>>, vector<288x32xbf16>
    %c0_16 = arith.constant 0 : index
    %c0_17 = arith.constant 0 : index
    %29 = vector.load %arg5[%c0_16, %c0_17] : memref<1x32xf32, #tpu.memory_space<vmem>>, vector<1x32xf32>
    %cst_18 = arith.constant 0.000000e+00 : f32
    %30 = vector.broadcast %cst_18 : f32 to vector<1x16x32xf32>
    %31 = tpu.concatenate %30, %24, %30 in 0 : vector<1x16x32xf32>, vector<16x16x32xf32>, vector<1x16x32xf32> -> vector<18x16x32xf32>
    %cst_19 = arith.constant 0.000000e+00 : f32
    %32 = vector.broadcast %cst_19 : f32 to vector<18x1x32xf32>
    %33 = tpu.concatenate %32, %31, %32 in 1 : vector<18x1x32xf32>, vector<18x16x32xf32>, vector<18x1x32xf32> -> vector<18x18x32xf32>
    %34 = vector.extract_strided_slice %33 {offsets = [0, 0, 0], sizes = [16, 16, 32], strides = [1, 1, 1]} : vector<18x18x32xf32> to vector<16x16x32xf32>
    %35 = vector.extract_strided_slice %33 {offsets = [0, 1, 0], sizes = [16, 16, 32], strides = [1, 1, 1]} : vector<18x18x32xf32> to vector<16x16x32xf32>
    %36 = vector.extract_strided_slice %33 {offsets = [0, 2, 0], sizes = [16, 16, 32], strides = [1, 1, 1]} : vector<18x18x32xf32> to vector<16x16x32xf32>
    %37 = vector.extract_strided_slice %33 {offsets = [1, 0, 0], sizes = [16, 16, 32], strides = [1, 1, 1]} : vector<18x18x32xf32> to vector<16x16x32xf32>
    %38 = vector.extract_strided_slice %33 {offsets = [1, 1, 0], sizes = [16, 16, 32], strides = [1, 1, 1]} : vector<18x18x32xf32> to vector<16x16x32xf32>
    %39 = vector.extract_strided_slice %33 {offsets = [1, 2, 0], sizes = [16, 16, 32], strides = [1, 1, 1]} : vector<18x18x32xf32> to vector<16x16x32xf32>
    %40 = vector.extract_strided_slice %33 {offsets = [2, 0, 0], sizes = [16, 16, 32], strides = [1, 1, 1]} : vector<18x18x32xf32> to vector<16x16x32xf32>
    %41 = vector.extract_strided_slice %33 {offsets = [2, 1, 0], sizes = [16, 16, 32], strides = [1, 1, 1]} : vector<18x18x32xf32> to vector<16x16x32xf32>
    %42 = vector.extract_strided_slice %33 {offsets = [2, 2, 0], sizes = [16, 16, 32], strides = [1, 1, 1]} : vector<18x18x32xf32> to vector<16x16x32xf32>
    %43 = tpu.concatenate %34, %35, %36, %37, %38, %39, %40, %41, %42 in 2 : vector<16x16x32xf32>, vector<16x16x32xf32>, vector<16x16x32xf32>, vector<16x16x32xf32>, vector<16x16x32xf32>, vector<16x16x32xf32>, vector<16x16x32xf32>, vector<16x16x32xf32>, vector<16x16x32xf32> -> vector<16x16x288xf32>
    %44 = arith.truncf %43 : vector<16x16x288xf32> to vector<16x16x288xbf16>
    %cst_20 = arith.constant dense<0.000000e+00> : vector<16x16x32xf32>
    %45 = tpu.matmul %44, %28, %cst_20 {dimension_numbers = #tpu.dot_dimension_numbers<[2], [0], [0, 1], [1], [0, 0, 0, 1, 1, 1], [], []>} : vector<16x16x288xbf16>, vector<288x32xbf16>, vector<16x16x32xf32> -> vector<16x16x32xf32>
    %46 = vector.shape_cast %29 : vector<1x32xf32> to vector<1x1x32xf32>
    %47 = vector.broadcast %46 : vector<1x1x32xf32> to vector<16x16x32xf32>
    %48 = arith.addf %45, %47 : vector<16x16x32xf32>
    %c0_21 = arith.constant 0 : index
    %c0_22 = arith.constant 0 : index
    %c0_23 = arith.constant 0 : index
    %c0_24 = arith.constant 0 : index
    %49 = vector.load %arg7[%c0_21, %c0_22, %c0_23, %c0_24] : memref<1x16x16x32xf32, #tpu.memory_space<vmem>>, vector<1x16x16x32xf32>
    %50 = vector.shape_cast %49 : vector<1x16x16x32xf32> to vector<16x16x32xf32>
    %51 = vector.shape_cast %48 : vector<16x16x32xf32> to vector<1x16x16x32xf32>
    tpu.vector_store %arg7[%c0_21, %c0_22, %c0_23, %c0_24], %51 {strides = array<i32>} : memref<1x16x16x32xf32, #tpu.memory_space<vmem>>, vector<1x16x16x32xf32>,
    return
  }
  func.func @transform_0(%arg0: i32) -> (i32, i32, i32, i32) {
    %c0_i32 = arith.constant 0 : i32
    %c0_i32_0 = arith.constant 0 : i32
    %c0_i32_1 = arith.constant 0 : i32
    %c0_i32_2 = arith.constant 0 : i32
    return %arg0, %c0_i32, %c0_i32_0, %c0_i32_1 : i32, i32, i32, i32
  }
  func.func @transform_1(%arg0: i32) -> (i32, i32) {
    %c0_i32 = arith.constant 0 : i32
    %c0_i32_0 = arith.constant 0 : i32
    %c0_i32_1 = arith.constant 0 : i32
    return %c0_i32, %c0_i32_0 : i32, i32
  }
  func.func @transform_2(%arg0: i32) -> (i32, i32) {
    %c0_i32 = arith.constant 0 : i32
    %c0_i32_0 = arith.constant 0 : i32
    %c0_i32_1 = arith.constant 0 : i32
    return %c0_i32, %c0_i32_0 : i32, i32
  }
  func.func @transform_3(%arg0: i32) -> (i32, i32) {
    %c0_i32 = arith.constant 0 : i32
    %c0_i32_0 = arith.constant 0 : i32
    %c0_i32_1 = arith.constant 0 : i32
    return %c0_i32, %c0_i32_0 : i32, i32
  }
  func.func @transform_4(%arg0: i32) -> (i32, i32) {
    %c0_i32 = arith.constant 0 : i32
    %c0_i32_0 = arith.constant 0 : i32
    %c0_i32_1 = arith.constant 0 : i32
    return %c0_i32, %c0_i32_0 : i32, i32
  }
  func.func @transform_5(%arg0: i32) -> (i32, i32, i32, i32) {
    %c0_i32 = arith.constant 0 : i32
    %c0_i32_0 = arith.constant 0 : i32
    %c0_i32_1 = arith.constant 0 : i32
    %c0_i32_2 = arith.constant 0 : i32
    return %arg0, %c0_i32, %c0_i32_0, %c0_i32_1 : i32, i32, i32, i32
  }
  func.func @transform_6(%arg0: i32) -> (i32, i32, i32, i32) {
    %c0_i32 = arith.constant 0 : i32
    %c0_i32_0 = arith.constant 0 : i32
    %c0_i32_1 = arith.constant 0 : i32
    %c0_i32_2 = arith.constant 0 : i32
    return %arg0, %c0_i32, %c0_i32_0, %c0_i32_1 : i32, i32, i32, i32
  }
}

module attributes {stable_mosaic.version = 11 : i64} {
  func.func @_cplx_pw_kernel(%arg0: i32, %arg1: i32, %arg2: memref<1x16x9x64xbf16, #tpu.memory_space<vmem>>, %arg3: memref<64x64xbf16, #tpu.memory_space<vmem>>, %arg4: memref<64x64xbf16, #tpu.memory_space<vmem>>, %arg5: memref<1x16x9x64xf32, #tpu.memory_space<vmem>>) attributes {dimension_semantics = [#tpu.dimension_semantics<parallel>, #tpu.dimension_semantics<parallel>], iteration_bounds = array<i64: 2, 1>, scalar_prefetch = 0 : i64, scratch_operands = 0 : i64, tpu.core_type = #tpu.core_type<tc>, window_params = [{transform_indices = @transform_0, window_bounds = array<i64: 1, 16, 9, 64>}, {pipeline_mode = #tpu.pipeline_mode<synchronous>, transform_indices = @transform_1, window_bounds = array<i64: 64, 64>}, {pipeline_mode = #tpu.pipeline_mode<synchronous>, transform_indices = @transform_2, window_bounds = array<i64: 64, 64>}, {transform_indices = @transform_3, window_bounds = array<i64: 1, 16, 9, 64>}]} {
    %c0 = arith.constant 0 : index
    %c0_0 = arith.constant 0 : index
    %c0_1 = arith.constant 0 : index
    %c0_2 = arith.constant 0 : index
    %0 = vector.load %arg2[%c0, %c0_0, %c0_1, %c0_2] : memref<1x16x9x64xbf16, #tpu.memory_space<vmem>>, vector<1x16x9x64xbf16>
    %1 = vector.shape_cast %0 : vector<1x16x9x64xbf16> to vector<16x9x64xbf16>
    %c0_3 = arith.constant 0 : index
    %c0_4 = arith.constant 0 : index
    %2 = vector.load %arg3[%c0_3, %c0_4] : memref<64x64xbf16, #tpu.memory_space<vmem>>, vector<64x64xbf16>
    %cst = arith.constant dense<0.000000e+00> : vector<16x9x64xf32>
    %3 = tpu.matmul %1, %2, %cst {dimension_numbers = #tpu.dot_dimension_numbers<[2], [0], [0, 1], [1], [0, 0, 0, 1, 1, 1], [], []>} : vector<16x9x64xbf16>, vector<64x64xbf16>, vector<16x9x64xf32> -> vector<16x9x64xf32>
    %cst_5 = arith.constant 0.000000e+00 : f32
    %4 = vector.broadcast %cst_5 : f32 to vector<16x9x64xf32>
    %5 = arith.maximumf %3, %4 : vector<16x9x64xf32>
    %6 = arith.truncf %5 : vector<16x9x64xf32> to vector<16x9x64xbf16>
    %c0_6 = arith.constant 0 : index
    %c0_7 = arith.constant 0 : index
    %7 = vector.load %arg4[%c0_6, %c0_7] : memref<64x64xbf16, #tpu.memory_space<vmem>>, vector<64x64xbf16>
    %cst_8 = arith.constant dense<0.000000e+00> : vector<16x9x64xf32>
    %8 = tpu.matmul %6, %7, %cst_8 {dimension_numbers = #tpu.dot_dimension_numbers<[2], [0], [0, 1], [1], [0, 0, 0, 1, 1, 1], [], []>} : vector<16x9x64xbf16>, vector<64x64xbf16>, vector<16x9x64xf32> -> vector<16x9x64xf32>
    %c0_9 = arith.constant 0 : index
    %c0_10 = arith.constant 0 : index
    %c0_11 = arith.constant 0 : index
    %c0_12 = arith.constant 0 : index
    %9 = vector.load %arg5[%c0_9, %c0_10, %c0_11, %c0_12] : memref<1x16x9x64xf32, #tpu.memory_space<vmem>>, vector<1x16x9x64xf32>
    %10 = vector.shape_cast %9 : vector<1x16x9x64xf32> to vector<16x9x64xf32>
    %11 = vector.shape_cast %8 : vector<16x9x64xf32> to vector<1x16x9x64xf32>
    tpu.vector_store %arg5[%c0_9, %c0_10, %c0_11, %c0_12], %11 {strides = array<i32>} : memref<1x16x9x64xf32, #tpu.memory_space<vmem>>, vector<1x16x9x64xf32>,
    return
  }
  func.func @transform_0(%arg0: i32, %arg1: i32) -> (i32, i32, i32, i32) {
    %c0_i32 = arith.constant 0 : i32
    %c0_i32_0 = arith.constant 0 : i32
    %c0_i32_1 = arith.constant 0 : i32
    return %arg0, %arg1, %c0_i32, %c0_i32_0 : i32, i32, i32, i32
  }
  func.func @transform_1(%arg0: i32, %arg1: i32) -> (i32, i32) {
    %c0_i32 = arith.constant 0 : i32
    %c0_i32_0 = arith.constant 0 : i32
    %c0_i32_1 = arith.constant 0 : i32
    return %c0_i32, %c0_i32_0 : i32, i32
  }
  func.func @transform_2(%arg0: i32, %arg1: i32) -> (i32, i32) {
    %c0_i32 = arith.constant 0 : i32
    %c0_i32_0 = arith.constant 0 : i32
    %c0_i32_1 = arith.constant 0 : i32
    return %c0_i32, %c0_i32_0 : i32, i32
  }
  func.func @transform_3(%arg0: i32, %arg1: i32) -> (i32, i32, i32, i32) {
    %c0_i32 = arith.constant 0 : i32
    %c0_i32_0 = arith.constant 0 : i32
    %c0_i32_1 = arith.constant 0 : i32
    return %arg0, %arg1, %c0_i32, %c0_i32_0 : i32, i32, i32, i32
  }
}

module attributes {stable_mosaic.version = 11 : i64} {
  func.func @_fuse_decode_kernel(%arg0: i32, %arg1: memref<1x16x16x32xf32, #tpu.memory_space<vmem>>, %arg2: memref<1x16x16x32xf32, #tpu.memory_space<vmem>>, %arg3: memref<1x16x16x32xf32, #tpu.memory_space<vmem>>, %arg4: memref<1x16x16x3xf32, #tpu.memory_space<vmem>>, %arg5: memref<288x3xbf16, #tpu.memory_space<vmem>>, %arg6: memref<1x3xf32, #tpu.memory_space<vmem>>, %arg7: memref<1x16x16x3xf32, #tpu.memory_space<vmem>>) attributes {dimension_semantics = [#tpu.dimension_semantics<parallel>], iteration_bounds = array<i64: 2>, scalar_prefetch = 0 : i64, scratch_operands = 0 : i64, tpu.core_type = #tpu.core_type<tc>, window_params = [{transform_indices = @transform_0, window_bounds = array<i64: 1, 16, 16, 32>}, {transform_indices = @transform_1, window_bounds = array<i64: 1, 16, 16, 32>}, {transform_indices = @transform_2, window_bounds = array<i64: 1, 16, 16, 32>}, {transform_indices = @transform_3, window_bounds = array<i64: 1, 16, 16, 3>}, {pipeline_mode = #tpu.pipeline_mode<synchronous>, transform_indices = @transform_4, window_bounds = array<i64: 288, 3>}, {pipeline_mode = #tpu.pipeline_mode<synchronous>, transform_indices = @transform_5, window_bounds = array<i64: 1, 3>}, {transform_indices = @transform_6, window_bounds = array<i64: 1, 16, 16, 3>}]} {
    %c0 = arith.constant 0 : index
    %c0_0 = arith.constant 0 : index
    %c0_1 = arith.constant 0 : index
    %c0_2 = arith.constant 0 : index
    %0 = vector.load %arg1[%c0, %c0_0, %c0_1, %c0_2] : memref<1x16x16x32xf32, #tpu.memory_space<vmem>>, vector<1x16x16x32xf32>
    %1 = vector.shape_cast %0 : vector<1x16x16x32xf32> to vector<16x16x32xf32>
    %c0_3 = arith.constant 0 : index
    %c0_4 = arith.constant 0 : index
    %c0_5 = arith.constant 0 : index
    %c0_6 = arith.constant 0 : index
    %2 = vector.load %arg2[%c0_3, %c0_4, %c0_5, %c0_6] : memref<1x16x16x32xf32, #tpu.memory_space<vmem>>, vector<1x16x16x32xf32>
    %3 = vector.shape_cast %2 : vector<1x16x16x32xf32> to vector<16x16x32xf32>
    %4 = arith.addf %1, %3 : vector<16x16x32xf32>
    %c0_7 = arith.constant 0 : index
    %c0_8 = arith.constant 0 : index
    %c0_9 = arith.constant 0 : index
    %c0_10 = arith.constant 0 : index
    %5 = vector.load %arg3[%c0_7, %c0_8, %c0_9, %c0_10] : memref<1x16x16x32xf32, #tpu.memory_space<vmem>>, vector<1x16x16x32xf32>
    %6 = vector.shape_cast %5 : vector<1x16x16x32xf32> to vector<16x16x32xf32>
    %7 = arith.addf %4, %6 : vector<16x16x32xf32>
    %cst = arith.constant 0.000000e+00 : f32
    %8 = vector.broadcast %cst : f32 to vector<16x16x32xf32>
    %9 = arith.maximumf %7, %8 : vector<16x16x32xf32>
    %c0_11 = arith.constant 0 : index
    %c0_12 = arith.constant 0 : index
    %10 = vector.load %arg5[%c0_11, %c0_12] : memref<288x3xbf16, #tpu.memory_space<vmem>>, vector<288x3xbf16>
    %c0_13 = arith.constant 0 : index
    %c0_14 = arith.constant 0 : index
    %11 = vector.load %arg6[%c0_13, %c0_14] : memref<1x3xf32, #tpu.memory_space<vmem>>, vector<1x3xf32>
    %cst_15 = arith.constant 0.000000e+00 : f32
    %12 = vector.broadcast %cst_15 : f32 to vector<1x16x32xf32>
    %13 = tpu.concatenate %12, %9, %12 in 0 : vector<1x16x32xf32>, vector<16x16x32xf32>, vector<1x16x32xf32> -> vector<18x16x32xf32>
    %cst_16 = arith.constant 0.000000e+00 : f32
    %14 = vector.broadcast %cst_16 : f32 to vector<18x1x32xf32>
    %15 = tpu.concatenate %14, %13, %14 in 1 : vector<18x1x32xf32>, vector<18x16x32xf32>, vector<18x1x32xf32> -> vector<18x18x32xf32>
    %16 = vector.extract_strided_slice %15 {offsets = [0, 0, 0], sizes = [16, 16, 32], strides = [1, 1, 1]} : vector<18x18x32xf32> to vector<16x16x32xf32>
    %17 = vector.extract_strided_slice %15 {offsets = [0, 1, 0], sizes = [16, 16, 32], strides = [1, 1, 1]} : vector<18x18x32xf32> to vector<16x16x32xf32>
    %18 = vector.extract_strided_slice %15 {offsets = [0, 2, 0], sizes = [16, 16, 32], strides = [1, 1, 1]} : vector<18x18x32xf32> to vector<16x16x32xf32>
    %19 = vector.extract_strided_slice %15 {offsets = [1, 0, 0], sizes = [16, 16, 32], strides = [1, 1, 1]} : vector<18x18x32xf32> to vector<16x16x32xf32>
    %20 = vector.extract_strided_slice %15 {offsets = [1, 1, 0], sizes = [16, 16, 32], strides = [1, 1, 1]} : vector<18x18x32xf32> to vector<16x16x32xf32>
    %21 = vector.extract_strided_slice %15 {offsets = [1, 2, 0], sizes = [16, 16, 32], strides = [1, 1, 1]} : vector<18x18x32xf32> to vector<16x16x32xf32>
    %22 = vector.extract_strided_slice %15 {offsets = [2, 0, 0], sizes = [16, 16, 32], strides = [1, 1, 1]} : vector<18x18x32xf32> to vector<16x16x32xf32>
    %23 = vector.extract_strided_slice %15 {offsets = [2, 1, 0], sizes = [16, 16, 32], strides = [1, 1, 1]} : vector<18x18x32xf32> to vector<16x16x32xf32>
    %24 = vector.extract_strided_slice %15 {offsets = [2, 2, 0], sizes = [16, 16, 32], strides = [1, 1, 1]} : vector<18x18x32xf32> to vector<16x16x32xf32>
    %25 = tpu.concatenate %16, %17, %18, %19, %20, %21, %22, %23, %24 in 2 : vector<16x16x32xf32>, vector<16x16x32xf32>, vector<16x16x32xf32>, vector<16x16x32xf32>, vector<16x16x32xf32>, vector<16x16x32xf32>, vector<16x16x32xf32>, vector<16x16x32xf32>, vector<16x16x32xf32> -> vector<16x16x288xf32>
    %26 = arith.truncf %25 : vector<16x16x288xf32> to vector<16x16x288xbf16>
    %cst_17 = arith.constant dense<0.000000e+00> : vector<16x16x3xf32>
    %27 = tpu.matmul %26, %10, %cst_17 {dimension_numbers = #tpu.dot_dimension_numbers<[2], [0], [0, 1], [1], [0, 0, 0, 1, 1, 1], [], []>} : vector<16x16x288xbf16>, vector<288x3xbf16>, vector<16x16x3xf32> -> vector<16x16x3xf32>
    %28 = vector.shape_cast %11 : vector<1x3xf32> to vector<1x1x3xf32>
    %29 = vector.broadcast %28 : vector<1x1x3xf32> to vector<16x16x3xf32>
    %30 = arith.addf %27, %29 : vector<16x16x3xf32>
    %c0_18 = arith.constant 0 : index
    %c0_19 = arith.constant 0 : index
    %c0_20 = arith.constant 0 : index
    %c0_21 = arith.constant 0 : index
    %31 = vector.load %arg4[%c0_18, %c0_19, %c0_20, %c0_21] : memref<1x16x16x3xf32, #tpu.memory_space<vmem>>, vector<1x16x16x3xf32>
    %32 = vector.shape_cast %31 : vector<1x16x16x3xf32> to vector<16x16x3xf32>
    %33 = arith.addf %30, %32 : vector<16x16x3xf32>
    %c0_22 = arith.constant 0 : index
    %c0_23 = arith.constant 0 : index
    %c0_24 = arith.constant 0 : index
    %c0_25 = arith.constant 0 : index
    %34 = vector.load %arg7[%c0_22, %c0_23, %c0_24, %c0_25] : memref<1x16x16x3xf32, #tpu.memory_space<vmem>>, vector<1x16x16x3xf32>
    %35 = vector.shape_cast %34 : vector<1x16x16x3xf32> to vector<16x16x3xf32>
    %36 = vector.shape_cast %33 : vector<16x16x3xf32> to vector<1x16x16x3xf32>
    tpu.vector_store %arg7[%c0_22, %c0_23, %c0_24, %c0_25], %36 {strides = array<i32>} : memref<1x16x16x3xf32, #tpu.memory_space<vmem>>, vector<1x16x16x3xf32>,
    return
  }
  func.func @transform_0(%arg0: i32) -> (i32, i32, i32, i32) {
    %c0_i32 = arith.constant 0 : i32
    %c0_i32_0 = arith.constant 0 : i32
    %c0_i32_1 = arith.constant 0 : i32
    %c0_i32_2 = arith.constant 0 : i32
    return %arg0, %c0_i32, %c0_i32_0, %c0_i32_1 : i32, i32, i32, i32
  }
  func.func @transform_1(%arg0: i32) -> (i32, i32, i32, i32) {
    %c0_i32 = arith.constant 0 : i32
    %c0_i32_0 = arith.constant 0 : i32
    %c0_i32_1 = arith.constant 0 : i32
    %c0_i32_2 = arith.constant 0 : i32
    return %arg0, %c0_i32, %c0_i32_0, %c0_i32_1 : i32, i32, i32, i32
  }
  func.func @transform_2(%arg0: i32) -> (i32, i32, i32, i32) {
    %c0_i32 = arith.constant 0 : i32
    %c0_i32_0 = arith.constant 0 : i32
    %c0_i32_1 = arith.constant 0 : i32
    %c0_i32_2 = arith.constant 0 : i32
    return %arg0, %c0_i32, %c0_i32_0, %c0_i32_1 : i32, i32, i32, i32
  }
  func.func @transform_3(%arg0: i32) -> (i32, i32, i32, i32) {
    %c0_i32 = arith.constant 0 : i32
    %c0_i32_0 = arith.constant 0 : i32
    %c0_i32_1 = arith.constant 0 : i32
    %c0_i32_2 = arith.constant 0 : i32
    return %arg0, %c0_i32, %c0_i32_0, %c0_i32_1 : i32, i32, i32, i32
  }
  func.func @transform_4(%arg0: i32) -> (i32, i32) {
    %c0_i32 = arith.constant 0 : i32
    %c0_i32_0 = arith.constant 0 : i32
    %c0_i32_1 = arith.constant 0 : i32
    return %c0_i32, %c0_i32_0 : i32, i32
  }
  func.func @transform_5(%arg0: i32) -> (i32, i32) {
    %c0_i32 = arith.constant 0 : i32
    %c0_i32_0 = arith.constant 0 : i32
    %c0_i32_1 = arith.constant 0 : i32
    return %c0_i32, %c0_i32_0 : i32, i32
  }
  func.func @transform_6(%arg0: i32) -> (i32, i32, i32, i32) {
    %c0_i32 = arith.constant 0 : i32
    %c0_i32_0 = arith.constant 0 : i32
    %c0_i32_1 = arith.constant 0 : i32
    %c0_i32_2 = arith.constant 0 : i32
    return %arg0, %c0_i32, %c0_i32_0, %c0_i32_1 : i32, i32, i32, i32
  }
}

</mosaic_0001>

<bundles_post_ra>
// kernel: optce_deblur_forward.4
= control target key start
LH: loop header
LB: loop body
LE: loop exit
PB: predicated region body
PF: predicated region fallthrough
CT: control target
= control target key end

     0   :  { %s618_s9 = smov 0   ;;  %s620_s10 = smov 0   ;;  %s658_s0 = inlined_call_operand.vmem [shape: f32[1,8], index: 0, kind: input, shape index: {}]   ;;  %s659_s1 = inlined_call_operand.vmem [shape: f32[2,8,768], index: 1, kind: input, shape index: {}]   ;;  %s660_s2 = inlined_call_operand.vmem [shape: f32[2,1,768], index: 2, kind: output, shape index: {}]  }
   0x1   :  { %s622_s11 = smov 0  }
   0x2 LB: > { %s24_s12 = sadd.s32 1, %s595_s10  ;;  %p542_p0 = scmp.ge.s32.totalorder %s599_s11, 1  ;;  %s599_s11 = sphi %s622_s11, %s12_s11   ;;  %s595_s10 = sphi %s620_s10, %s662_s10   ;;  %s591_s9 = sphi %s618_s9, %s661_s9  }
   0x3   : > { %p26_p1 = scmp.ge.s32.totalorder %s24_s12, 2  ;;  %p133_p2 = scmp.lt.s32.totalorder %s599_s11, 3 }
   0x5   : > { %s664_s12 = smov (%p26_p1, %s24_s12), 0  ;;  %p134_p3 = pnand %p542_p0, %p133_p2 }
   0x6   : > { %p163_p4 = scmp.lt.s32.totalorder (!%p134_p3), %s591_s9, 1 }
   0x7   : > { %137 = sbr.rel (%p134_p3) target bundleno = 227 (0xe3), region = 28 }
   0xc   : > { %v601_v0 = vmov 0.0   ;;  %s666_s9 = smov (!%p163_p4, %s591_s9), 1  ;;  %v187_v1 = vld [vmem:[%s658_s0] sm:$0x1]  ;;  %vm188_vm0 = vcmask 64512   ;;  %v417_v10 = vlaneseq }
   0xd   : > { %256 = vmatprep.mubr.f32.mxu0 %v601_v0  ;;  %327 = vmatprep.mubr.f32.mxu1 %v601_v0  ;;  %s549_s13 = smul.u32 48, %s666_s9  ;;  %v602_v8 = vmov 1966171168  }
   0xe   : > { %v415_v9 = vunpack.c.l.s4 %v602_v8  ;;  %v418_v12 = vshrl.u32 %v417_v10, 7  ;;  %s550_s19 = smul.u32 6, %s666_s9  ;;  %vm454_vm1 = vcmp.lt.s32.totalorder %v417_v10, 768 }
   0xf   : > { %s170_s16 = scalar_lea.vmem %s659_s1, %s549_s13 }
  0x10   : > { %v182_v2 = vld [vmem:[%s170_s16 + $0x8] sm:$0xff]  ;;  %v184_v3 = vld [vmem:[%s170_s16 + $0x18] sm:$0xff]  ;;  %v181_v4 = vld [vmem:[%s170_s16] sm:$0xff]  ;;  %v416_v11 = vunpack.c.0.s8 %v415_v9  ;;  %s179_s22 = scalar_lea.vmem %s660_s2, %s550_s19 }
  0x11   : > { %222 = vmatprep.subr.mxu0 %v182_v2  ;;  %293 = vmatprep.subr.mxu1 %v184_v3  ;;  %v183_v5 = vld [vmem:[%s170_s16 + $0x10] sm:$0xff]  ;;  %v186_v6 = vld [vmem:[%s170_s16 + $0x28] sm:$0xff]  ;;  %v185_v7 = vld [vmem:[%s170_s16 + $0x20] sm:$0xff] }
  0x12   : > { %223 = vmatpush1.msra.mxu0 %v181_v4  ;;  %294 = vmatpush1.msra.mxu1 %v183_v5  ;;  %v419_v15 = vsub.s32 %v416_v11, %v418_v12 }
  0x13   : > { %544 = vmatmul.mubr.msk.f32.vlgmr.msra.gmra.mxu0 %vm188_vm0, %v187_v1  ;;  %545 = vmatmul.mubr.msk.f32.vlgmr.msra.gmra.mxu1 %vm188_vm0, %v187_v1 }
  0x14   : > { %364 = vmatprep.subr.mxu0 %v186_v6  ;;  %398 = vmatprep.mubr.f32.mxu0 %v601_v0 }
  0x15   : > { %365 = vmatpush1.msra.mxu0 %v185_v7 }
  0x17   : > { %546 = vmatmul.mubr.msk.f32.vlgmr.msra.gmra.mxu0 %vm188_vm0, %v187_v1 }
  0xd3   : > { %v258_v13 = vpop.f32.mrf.mxu0  ;;  %v329_v14 = vpop.f32.mrf.mxu1 }
  0xd5   : > { %v260_v16 = vpop.f32.mrf.mxu0  ;;  %v331_v17 = vpop.f32.mrf.mxu1 }
  0xd6   : > { %v411_v18 = vcombine.low %v258_v13, %v260_v16  ;;  %v412_v19 = vcombine.low %v329_v14, %v331_v17 }
  0xd7   : > { %v400_v20 = vpop.f32.mrf.mxu0 }
  0xd8   : > { %v420_v21 = vrot.slane %v411_v18, %v419_v15  ;;  %v427_v22 = vrot.slane %v412_v19, %v419_v15 }
  0xd9   : > { %v402_v23 = vpop.f32.mrf.mxu0 }
  0xda   : > { %v435_v24 = vcombine.low %v420_v21, %v427_v22  ;;  %v413_v25 = vcombine.low %v400_v20, %v402_v23 }
  0xdc   : > { %v434_v26 = vrot.slane %v413_v25, %v419_v15  ;;  %v442_v27 = vrot.slane %v435_v24, %v419_v15 }
  0xde   : > { %v449_v28 = vrot.slane %v434_v26, %v419_v15 }
  0xe0   : > { %v450_v29 = vcombine.low %v442_v27, %v449_v28 }
  0xe2   : > { %456 = vst.msk [vmem:[%s179_s22] sm:$0x3f] %vm454_vm1, %v450_v29 }
  0xe3 PF: > { %s12_s11 = sadd.s32 1, %s599_s11   ;;  %s661_s9 = smov %s595_s10 }
  0xe4   : > { %p9_p5 = scmp.ge.s32.totalorder %s12_s11, 4   ;;  %s662_s10 = smov %s664_s12 }
  0xe6   :  { %11 = sbr.rel (!%p9_p5) target bundleno = 2 (0x2), region = 58 }

// kernel: optce_deblur_forward.5
= control target key start
LH: loop header
LB: loop body
LE: loop exit
PB: predicated region body
PF: predicated region fallthrough
CT: control target
= control target key end

     0   :  { %s5419_s21 = smov 0   ;;  %s8240_s0 = inlined_call_operand.vmem [shape: f32[2,16,16,3], index: 0, kind: input, shape index: {}]   ;;  %s8241_s1 = inlined_call_operand.vmem [shape: bf16[27,32], index: 1, kind: input, shape index: {}]   ;;  %s8242_s2 = inlined_call_operand.vmem [shape: f32[1,32], index: 2, kind: input, shape index: {}]   ;;  %s8243_s3 = inlined_call_operand.vmem [shape: bf16[288,32], index: 3, kind: input, shape index: {}]   ;;  %s8244_s4 = inlined_call_operand.vmem [shape: f32[1,32], index: 4, kind: input, shape index: {}]   ;;  %s8245_s5 = inlined_call_operand.vmem [shape: f32[2,16,16,32], index: 5, kind: output, shape index: {0}]   ;;  %s8246_s6 = inlined_call_operand.vmem [shape: f32[2,16,16,32], index: 6, kind: output, shape index: {1}]  }
   0x1 LB: > { %s3896_s22 = sadd.s32 4294967295, %s5369_s21   ;;  %p3900_p0 = scmp.ge.s32.totalorder %s5369_s21, 1  ;;  %s5369_s21 = sphi %s5419_s21, %s17_s21  }
   0x2   : > { %p215_p1 = scmp.lt.s32.totalorder %s5369_s21, 3 }
   0x4   : > { %p216_p2 = pnand %p3900_p0, %p215_p1 }
   0x6   : > { %219 = sbr.rel (%p216_p2) target bundleno = 1005 (0x3ed), region = 40 }
   0xb   : > { %vm336_vm0 = vcmask 1040384   ;;  %p250_p3 = scmp.lt.s32.totalorder %s3896_s22, 1  ;;  %v5371_v0 = vmov 0.0   ;;  %vm502_vm1 = vcmask 1046528   ;;  %vm679_vm2 = vcmask 1045504   ;;  %s5372_s27 = smov 3  }
   0xc   : > { %v5427_v1 = vrot.slane %v5371_v0, 7  ;;  %s5373_s28 = smov 6   ;;  %s5374_s29 = smov 9   ;;  %vm1790_vm3 = vcmask 1044480   ;;  %vm1444_vm4 = vcmask 23552   ;;  %vm1477_vm5 = vcmask 48128  }
   0xd   : > { %s8619_s22 = smov (!%p250_p3, %s3896_s22), 1  ;;  %s5375_s30 = smov 12   ;;  %vm1510_vm6 = vcmask 72704   ;;  %vm1543_vm7 = vcmask 97280   ;;  %vm1576_vm8 = vcmask 121856   ;;  %vm1609_vm9 = vcmask 146432  }
   0xe   : > { %8379 = vst [vmem:[#allocation2_spill] sm:$0xff] %v5427_v1  ;;  %v5431_v2 = vsel %vm336_vm0, 0.0, %v5427_v1  ;;  %v453_v3 = vsel %vm336_vm0, %v5427_v1, 0.0  ;;  %v504_v4 = vrot.slane %v5427_v1, 1  ;;  %v681_v5 = vrot.slane %v5427_v1, 2  ;;  %s5438_s23 = sshll.u32 %s8619_s22, 8 }
   0xf   : > { %8380 = vst [vmem:[#allocation3_spill] sm:$0xff] %v5431_v2  ;;  %v503_v6 = vrot.slane %v5431_v2, 1  ;;  %v506_v7 = vrot.slane %v453_v3, 1  ;;  %v683_v8 = vrot.slane %v453_v3, 2  ;;  %v680_v9 = vrot.slane %v5431_v2, 2  ;;  %s5445_s26 = scalar_lea.vmem %s8240_s0, %s5438_s23  ;;  %s5377_s9 = smov 15  }
  0x10   : > { %v268_v12 = vld [vmem:[%s5445_s26 + $0x10] sm:$0xff]  ;;  %v269_v13 = vld [vmem:[%s5445_s26 + $0x18] sm:$0xff]  ;;  %v266_v14 = vld [vmem:[%s5445_s26] sm:$0xff]  ;;  %s5378_s12 = smov 18   ;;  %s5379_s13 = smov 21   ;;  %vm1642_vm10 = vcmask 171008  }
  0x11   : > { %v505_v10 = vsel %vm502_vm1, %v503_v6, %v504_v4  ;;  %v507_v11 = vsel %vm502_vm1, %v504_v4, %v506_v7  ;;  %v5453_v15 = vsel %vm679_vm2, %v680_v9, %v681_v5  ;;  %v342_v17 = vrot.slane %v268_v12, 7  ;;  %v267_v19 = vld [vmem:[%s5445_s26 + $0x8] sm:$0xff]  ;;  %v270_v21 = vld [vmem:[%s5445_s26 + $0x20] sm:$0xff]  ;;  %v272_v43 = vld [vmem:[%s5445_s26 + $0x30] sm:$0xff]  ;;  %s5380_s14 = smov 24   ;;  %s5381_s15 = smov 32  }
  0x12   : > { %8381 = vst [vmem:[#allocation4_spill] sm:$0xff] %v5453_v15  ;;  %v5455_v16 = vpack.i.bf16 %v507_v11, %v505_v10  ;;  %v343_v18 = vrot.slane %v269_v13, 7  ;;  %v339_v20 = vrot.slane %v266_v14, 7  ;;  %v271_v22 = vld [vmem:[%s5445_s26 + $0x28] sm:$0xff]  ;;  %v340_v23 = vrot.slane %v267_v19, 7  ;;  %v273_v44 = vld [vmem:[%s5445_s26 + $0x38] sm:$0xff]  ;;  %s8140_s22 = scalar_lea.vmem %s8246_s6, %s5438_s23 }
  0x13   : > { %v345_v24 = vrot.slane %v270_v21, 7  ;;  %v346_v25 = vrot.slane %v271_v22, 7  ;;  %v5461_v26 = vsel %vm679_vm2, %v681_v5, %v683_v8  ;;  %v5469_v28 = vsel %vm336_vm0, 0.0, %v342_v17  ;;  %v274_v45 = vld [vmem:[%s5445_s26 + $0x40] sm:$0xff]  ;;  %v275_v50 = vld [vmem:[%s5445_s26 + $0x48] sm:$0xff]  ;;  %v276_v51 = vld [vmem:[%s5445_s26 + $0x50] sm:$0xff] }
  0x14   : > { %8382 = vst [vmem:[#allocation5_spill] sm:$0xff] %v5455_v16  ;;  %8383 = vst [vmem:[#allocation6_spill] sm:$0xff] %v5461_v26  ;;  %4224 = vrot.lane.b32.xlu0 %v5455_v16, %s5372_s27  ;;  %v5466_v27 = vsel %vm336_vm0, %v342_v17, %v343_v18  ;;  %v5472_v29 = vsel %vm336_vm0, %v343_v18, 0.0  ;;  %v5475_v30 = vsel %vm336_vm0, 0.0, %v339_v20  ;;  %v513_v31 = vrot.slane %v5469_v28, 1  ;;  %v277_v63 = vld [vmem:[%s5445_s26 + $0x58] sm:$0xff] }
  0x15   : > { %8384 = vst [vmem:[#allocation7_spill] sm:$0xff] %v5466_v27  ;;  %8385 = vst [vmem:[#allocation8_spill] sm:$0xff] %v5469_v28  ;;  %v514_v32 = vrot.slane %v5466_v27, 1  ;;  %v516_v33 = vrot.slane %v5472_v29, 1  ;;  %v5482_v35 = vsel %vm336_vm0, %v339_v20, %v340_v23  ;;  %v5485_v36 = vsel %vm336_vm0, %v340_v23, 0.0  ;;  %v278_v11 = vld [vmem:[%s5445_s26 + $0x60] sm:$0xff] }
  0x16   : > { %8386 = vst [vmem:[#allocation9_spill] sm:$0xff] %v5475_v30  ;;  %8387 = vst [vmem:[#allocation10_spill] sm:$0xff] %v5482_v35  ;;  %v508_v37 = vrot.slane %v5475_v30, 1  ;;  %v5489_v38 = vsel %vm336_vm0, %v345_v24, %v346_v25  ;;  %v509_v41 = vrot.slane %v5482_v35, 1  ;;  %v511_v42 = vrot.slane %v5485_v36, 1  ;;  %v279_v12 = vld [vmem:[%s5445_s26 + $0x68] sm:$0xff] }
  0x17   : > { %8388 = vst [vmem:[#allocation11_spill] sm:$0xff] %v5489_v38  ;;  %v515_v39 = vsel %vm502_vm1, %v513_v31, %v514_v32  ;;  %v517_v40 = vsel %vm502_vm1, %v514_v32, %v516_v33  ;;  %v5501_v47 = vsel %vm336_vm0, 0.0, %v345_v24  ;;  %v5504_v48 = vsel %vm336_vm0, %v346_v25, 0.0  ;;  %v280_v19 = vld [vmem:[%s5445_s26 + $0x70] sm:$0xff]  ;;  %v281_v20 = vld [vmem:[%s5445_s26 + $0x78] sm:$0xff]  ;;  %v282_v21 = vld [vmem:[%s5445_s26 + $0x80] sm:$0xff] }
  0x18   : > { %v5498_v46 = vpack.i.bf16 %v517_v40, %v515_v39  ;;  %8390 = vst [vmem:[#allocation13_spill] sm:$0xff] %v5501_v47  ;;  %v519_v49 = vrot.slane %v5489_v38, 1  ;;  %v510_v52 = vsel %vm502_vm1, %v508_v37, %v509_v41  ;;  %v512_v53 = vsel %vm502_vm1, %v509_v41, %v511_v42  ;;  %v293_v1 = vld [vmem:[%s5445_s26 + $0xd8] sm:$0xff]  ;;  %s5382_s16 = smov 64  }
  0x19   : > { %v518_v54 = vrot.slane %v5501_v47, 1  ;;  %v521_v55 = vrot.slane %v5504_v48, 1  ;;  %v5515_v56 = vpack.i.bf16 %v512_v53, %v510_v52  ;;  %v348_v57 = vrot.slane %v272_v43, 7  ;;  %v283_v53 = vld [vmem:[%s5445_s26 + $0x88] sm:$0xff] }
  0x1a   : > { %8389 = vst [vmem:[#allocation12_spill] sm:$0xff] %v5498_v46  ;;  %4234 = vrot.lane.b32.xlu1 %v5498_v46, %s5372_s27  ;;  %v349_v58 = vrot.slane %v273_v44, 7  ;;  %v351_v59 = vrot.slane %v274_v45, 7  ;;  %v352_v62 = vrot.slane %v275_v50, 7  ;;  %v354_v0 = vrot.slane %v276_v51, 7 }
  0x1b   : > { %v520_v60 = vsel %vm502_vm1, %v518_v54, %v519_v49  ;;  %v522_v61 = vsel %vm502_vm1, %v519_v49, %v521_v55  ;;  %4229 = vrot.lane.b32.xlu0 %v5515_v56, %s5372_s27  ;;  %v5528_v5 = vsel %vm336_vm0, 0.0, %v348_v57  ;;  %v355_v18 = vrot.slane %v277_v63, 7 }
  0x1c   : > { %v5522_v3 = vpack.i.bf16 %v522_v61, %v520_v60  ;;  %v5525_v4 = vsel %vm336_vm0, %v348_v57, %v349_v58  ;;  %8393 = vst [vmem:[#allocation16_spill] sm:$0xff] %v5528_v5  ;;  %v5531_v6 = vsel %vm336_vm0, %v349_v58, 0.0  ;;  %v523_v7 = vrot.slane %v5528_v5, 1 }
  0x1d   : > { %8392 = vst [vmem:[#allocation15_spill] sm:$0xff] %v5525_v4  ;;  %v524_v8 = vrot.slane %v5525_v4, 1  ;;  %v526_v9 = vrot.slane %v5531_v6, 1  ;;  %v5537_v10 = vsel %vm336_vm0, %v351_v59, %v352_v62  ;;  %v5544_v13 = vsel %vm336_vm0, 0.0, %v351_v59 }
  0x1e   : > { %8391 = vst [vmem:[#allocation14_spill] sm:$0xff] %v5522_v3  ;;  %8394 = vst [vmem:[#allocation17_spill] sm:$0xff] %v5537_v10  ;;  %4239 = vrot.lane.b32.xlu1 %v5522_v3, %s5372_s27  ;;  %v5547_v14 = vsel %vm336_vm0, %v352_v62, 0.0  ;;  %v529_v17 = vrot.slane %v5537_v10, 1  ;;  %v528_v24 = vrot.slane %v5544_v13, 1  ;;  %v5560_v32 = vsel %vm336_vm0, %v354_v0, %v355_v18 }
  0x1f   : > { %8395 = vst [vmem:[#allocation18_spill] sm:$0xff] %v5544_v13  ;;  %v525_v22 = vsel %vm502_vm1, %v523_v7, %v524_v8  ;;  %v527_v23 = vsel %vm502_vm1, %v524_v8, %v526_v9  ;;  %v531_v25 = vrot.slane %v5547_v14, 1  ;;  %8397 = vst [vmem:[#allocation20_spill] sm:$0xff] %v5560_v32  ;;  %v5563_v33 = vsel %vm336_vm0, 0.0, %v354_v0  ;;  %v284_v0 = vld [vmem:[%s5445_s26 + $0x90] sm:$0xff]  ;;  %v285_v7 = vld [vmem:[%s5445_s26 + $0x98] sm:$0xff] }
  0x20   : > { %v5557_v31 = vpack.i.bf16 %v527_v23, %v525_v22  ;;  %8398 = vst [vmem:[#allocation21_spill] sm:$0xff] %v5563_v33  ;;  %v5566_v37 = vsel %vm336_vm0, %v355_v18, 0.0  ;;  %v530_v39 = vsel %vm502_vm1, %v528_v24, %v529_v17  ;;  %v533_v41 = vrot.slane %v5563_v33, 1  ;;  %v287_v18 = vld [vmem:[%s5445_s26 + $0xa8] sm:$0xff] }
  0x21   : > { %v532_v40 = vsel %vm502_vm1, %v529_v17, %v531_v25  ;;  %v534_v42 = vrot.slane %v5560_v32, 1  ;;  %v536_v44 = vrot.slane %v5566_v37, 1  ;;  %v357_v45 = vrot.slane %v278_v11, 7  ;;  %v286_v17 = vld [vmem:[%s5445_s26 + $0xa0] sm:$0xff] }
  0x22   : > { %8396 = vst [vmem:[#allocation19_spill] sm:$0xff] %v5557_v31  ;;  %4244 = vrot.lane.b32.xlu0 %v5557_v31, %s5372_s27  ;;  %v5574_v43 = vpack.i.bf16 %v532_v40, %v530_v39  ;;  %v358_v49 = vrot.slane %v279_v12, 7  ;;  %v360_v51 = vrot.slane %v280_v19, 7  ;;  %v361_v52 = vrot.slane %v281_v20, 7 }
  0x23   : > { %v535_v50 = vsel %vm502_vm1, %v533_v41, %v534_v42  ;;  %v363_v54 = vrot.slane %v282_v21, 7  ;;  %v537_v55 = vsel %vm502_vm1, %v534_v42, %v536_v44  ;;  %v5586_v58 = vsel %vm336_vm0, 0.0, %v357_v45 }
  0x24   : > { %8399 = vst [vmem:[#allocation22_spill] sm:$0xff] %v5574_v43  ;;  %4249 = vrot.lane.b32.xlu1 %v5574_v43, %s5372_s27  ;;  %v5583_v57 = vsel %vm336_vm0, %v357_v45, %v358_v49  ;;  %8401 = vst [vmem:[#allocation24_spill] sm:$0xff] %v5586_v58  ;;  %v5589_v59 = vsel %vm336_vm0, %v358_v49, 0.0  ;;  %v5591_v60 = vpack.i.bf16 %v537_v55, %v535_v50  ;;  %v538_v61 = vrot.slane %v5586_v58, 1 }
  0x25   : > { %8400 = vst [vmem:[#allocation23_spill] sm:$0xff] %v5583_v57  ;;  %v539_v62 = vrot.slane %v5583_v57, 1  ;;  %v541_v63 = vrot.slane %v5589_v59, 1  ;;  %v5599_v8 = vsel %vm336_vm0, %v360_v51, %v361_v52  ;;  %v5602_v9 = vsel %vm336_vm0, 0.0, %v360_v51 }
  0x26   : > { %8402 = vst [vmem:[#allocation25_spill] sm:$0xff] %v5591_v60  ;;  %v5605_v11 = vsel %vm336_vm0, %v361_v52, 0.0  ;;  %v364_v12 = vrot.slane %v283_v53, 7  ;;  %4254 = vrot.lane.b32.xlu0 %v5591_v60, %s5372_s27  ;;  %v543_v21 = vrot.slane %v5602_v9, 1  ;;  %v544_v22 = vrot.slane %v5599_v8, 1  ;;  %v288_v52 = vld [vmem:[%s5445_s26 + $0xb0] sm:$0xff] }
  0x27   : > { %v540_v19 = vsel %vm502_vm1, %v538_v61, %v539_v62  ;;  %v542_v20 = vsel %vm502_vm1, %v539_v62, %v541_v63  ;;  %v546_v24 = vrot.slane %v5605_v11, 1  ;;  %v5622_v39 = vsel %vm336_vm0, 0.0, %v363_v54  ;;  %v289_v62 = vld [vmem:[%s5445_s26 + $0xb8] sm:$0xff] }
  0x28   : > { %v5615_v23 = vpack.i.bf16 %v542_v20, %v540_v19  ;;  %v5619_v25 = vsel %vm336_vm0, %v363_v54, %v364_v12  ;;  %v545_v40 = vsel %vm502_vm1, %v543_v21, %v544_v22  ;;  %v5626_v41 = vsel %vm336_vm0, %v364_v12, 0.0 }
  0x29   : > { %v548_v42 = vrot.slane %v5622_v39, 1  ;;  %v549_v44 = vrot.slane %v5619_v25, 1  ;;  %v547_v45 = vsel %vm502_vm1, %v544_v22, %v546_v24  ;;  %v551_v49 = vrot.slane %v5626_v41, 1  ;;  %v291_v22 = vld [vmem:[%s5445_s26 + $0xc8] sm:$0xff] }
  0x2a   : > { %8403 = vst [vmem:[#allocation26_spill] sm:$0xff] %v5615_v23  ;;  %4259 = vrot.lane.b32.xlu1 %v5615_v23, %s5372_s27  ;;  %v366_v50 = vrot.slane %v284_v0, 7  ;;  %v367_v51 = vrot.slane %v285_v7, 7  ;;  %v5635_v53 = vpack.i.bf16 %v547_v45, %v545_v40  ;;  %v369_v55 = vrot.slane %v286_v17, 7  ;;  %v290_v7 = vld [vmem:[%s5445_s26 + $0xc0] sm:$0xff]  ;;  %v292_v45 = vld [vmem:[%s5445_s26 + $0xd0] sm:$0xff] }
  0x2b   : > { %v550_v54 = vsel %vm502_vm1, %v548_v42, %v549_v44  ;;  %v370_v61 = vrot.slane %v287_v18, 7  ;;  %v552_v63 = vsel %vm502_vm1, %v549_v44, %v551_v49  ;;  %v372_v44 = vrot.slane %v288_v52, 7 }
  0x2c   : > { %8404 = vst [vmem:[#allocation27_spill] sm:$0xff] %v5635_v53  ;;  %v5641_v12 = vsel %vm336_vm0, %v366_v50, %v367_v51  ;;  %v5644_v19 = vsel %vm336_vm0, 0.0, %v366_v50  ;;  %v5647_v0 = vsel %vm336_vm0, %v367_v51, 0.0  ;;  %4264 = vrot.lane.b32.xlu0 %v5635_v53, %s5372_s27  ;;  %v5652_v20 = vpack.i.bf16 %v552_v63, %v550_v54 }
  0x2d   : > { %v553_v17 = vrot.slane %v5644_v19, 1  ;;  %v554_v18 = vrot.slane %v5641_v12, 1  ;;  %v556_v21 = vrot.slane %v5647_v0, 1  ;;  %v5659_v24 = vsel %vm336_vm0, %v369_v55, %v370_v61 }
  0x2e   : > { %8405 = vst [vmem:[#allocation28_spill] sm:$0xff] %v5652_v20  ;;  %v5662_v40 = vsel %vm336_vm0, 0.0, %v369_v55  ;;  %v5665_v42 = vsel %vm336_vm0, %v370_v61, 0.0  ;;  %4269 = vrot.lane.b32.xlu1 %v5652_v20, %s5372_s27  ;;  %v559_v54 = vrot.slane %v5659_v24, 1  ;;  %v373_v61 = vrot.slane %v289_v62, 7  ;;  %v294_v20 = vld [vmem:[%s5445_s26 + $0xe0] sm:$0xff] }
  0x2f   : > { %v555_v49 = vsel %vm502_vm1, %v553_v17, %v554_v18  ;;  %v557_v50 = vsel %vm502_vm1, %v554_v18, %v556_v21  ;;  %v558_v51 = vrot.slane %v5662_v40, 1  ;;  %v561_v55 = vrot.slane %v5665_v42, 1 }
  0x30   : > { %v5674_v63 = vpack.i.bf16 %v557_v50, %v555_v49  ;;  %v5678_v34 = vsel %vm336_vm0, 0.0, %v372_v44  ;;  %v375_v2 = vrot.slane %v290_v7, 7  ;;  %v376_v17 = vrot.slane %v291_v22, 7 }
  0x31   : > { %v560_v52 = vsel %vm502_vm1, %v558_v51, %v559_v54  ;;  %v563_v16 = vrot.slane %v5678_v34, 1  ;;  %v562_v18 = vsel %vm502_vm1, %v559_v54, %v561_v55  ;;  %v5687_v21 = vsel %vm336_vm0, %v372_v44, %v373_v61 }
  0x32   : > { %8406 = vst [vmem:[#allocation29_spill] sm:$0xff] %v5674_v63  ;;  %4274 = vrot.lane.b32.xlu0 %v5674_v63, %s5372_s27  ;;  %v5690_v62 = vsel %vm336_vm0, %v373_v61, 0.0  ;;  %v378_v49 = vrot.slane %v292_v45, 7  ;;  %v5692_v50 = vpack.i.bf16 %v562_v18, %v560_v52  ;;  %v564_v7 = vrot.slane %v5687_v21, 1 }
  0x33   : > { %v566_v22 = vrot.slane %v5690_v62, 1  ;;  %v5697_v51 = vsel %vm336_vm0, %v375_v2, %v376_v17  ;;  %v5700_v54 = vsel %vm336_vm0, 0.0, %v375_v2  ;;  %v5703_v44 = vsel %vm336_vm0, %v376_v17, 0.0  ;;  %v295_v2 = vld [vmem:[%s5445_s26 + $0xe8] sm:$0xff] }
  0x34   : > { %8407 = vst [vmem:[#allocation30_spill] sm:$0xff] %v5692_v50  ;;  %v569_v55 = vrot.slane %v5697_v51, 1  ;;  %v379_v61 = vrot.slane %v293_v1, 7  ;;  %4279 = vrot.lane.b32.xlu1 %v5692_v50, %s5372_s27  ;;  %v565_v45 = vsel %vm502_vm1, %v563_v16, %v564_v7  ;;  %v568_v18 = vrot.slane %v5700_v54, 1 }
  0x35   : > { %v567_v52 = vsel %vm502_vm1, %v564_v7, %v566_v22  ;;  %v571_v63 = vrot.slane %v5703_v44, 1  ;;  %v5720_v1 = vsel %vm336_vm0, 0.0, %v378_v49  ;;  %v382_v60 = vrot.slane %v295_v2, 7 }
  0x36   : > { %v5714_v53 = vpack.i.bf16 %v567_v52, %v565_v45  ;;  %v5717_v17 = vsel %vm336_vm0, %v378_v49, %v379_v61  ;;  %v5723_v50 = vsel %vm336_vm0, %v379_v61, 0.0  ;;  %v570_v16 = vsel %vm502_vm1, %v568_v18, %v569_v55 }
  0x37   : > { %v572_v7 = vsel %vm502_vm1, %v569_v55, %v571_v63  ;;  %v573_v22 = vrot.slane %v5720_v1, 1  ;;  %v574_v23 = vrot.slane %v5717_v17, 1  ;;  %v576_v52 = vrot.slane %v5723_v50, 1 }
  0x38   : > { %8408 = vst [vmem:[#allocation31_spill] sm:$0xff] %v5714_v53  ;;  %4284 = vrot.lane.b32.xlu0 %v5714_v53, %s5372_s27  ;;  %v5731_v45 = vpack.i.bf16 %v572_v7, %v570_v16  ;;  %v381_v49 = vrot.slane %v294_v20, 7  ;;  %v685_v43 = vrot.slane %v5475_v30, 2  ;;  %v686_v18 = vrot.slane %v5482_v35, 2 }
  0x39   : > { %v575_v61 = vsel %vm502_vm1, %v573_v22, %v574_v23  ;;  %v688_v63 = vrot.slane %v5485_v36, 2  ;;  %v577_v55 = vsel %vm502_vm1, %v574_v23, %v576_v52  ;;  %v5748_v20 = vsel %vm336_vm0, %v382_v60, 0.0 }
  0x3a   : > { %8409 = vst [vmem:[#allocation32_spill] sm:$0xff] %v5731_v45  ;;  %4289 = vrot.lane.b32.xlu1 %v5731_v45, %s5372_s27  ;;  %v5742_v16 = vsel %vm336_vm0, %v381_v49, %v382_v60  ;;  %v5745_v7 = vsel %vm336_vm0, 0.0, %v381_v49  ;;  %v5750_v2 = vpack.i.bf16 %v577_v55, %v575_v61  ;;  %v581_v53 = vrot.slane %v5748_v20, 1 }
  0x3b   : > { %v578_v22 = vrot.slane %v5745_v7, 1  ;;  %v579_v36 = vrot.slane %v5742_v16, 1  ;;  %v5757_v23 = vpack.i.bf16 %v5461_v26, %v5453_v15  ;;  %v687_v52 = vsel %vm679_vm2, %v685_v43, %v686_v18 }
  0x3c   : > { %8410 = vst [vmem:[#allocation33_spill] sm:$0xff] %v5750_v2  ;;  %v690_v49 = vrot.slane %v5469_v28, 2  ;;  %v691_v45 = vrot.slane %v5466_v27, 2  ;;  %4294 = vrot.lane.b32.xlu0 %v5750_v2, %s5372_s27  ;;  %v689_v55 = vsel %vm679_vm2, %v686_v18, %v688_v63  ;;  %v695_v31 = vrot.slane %v5501_v47, 2 }
  0x3d   : > { %8411 = vst [vmem:[#allocation34_spill] sm:$0xff] %v5757_v23  ;;  %v580_v60 = vsel %vm502_vm1, %v578_v22, %v579_v36  ;;  %v582_v61 = vsel %vm502_vm1, %v579_v36, %v581_v53  ;;  %v8413_v43 = vrot.slane %v5472_v29, 2  ;;  %v696_v46 = vrot.slane %v5489_v38, 2 }
  0x3e   : > { %v5768_v3 = vpack.i.bf16 %v582_v61, %v580_v60  ;;  %v692_v26 = vsel %vm679_vm2, %v690_v49, %v691_v45  ;;  %v698_v2 = vrot.slane %v5504_v48, 2  ;;  %v700_v22 = vrot.slane %v5528_v5, 2 }
  0x3f   : > { %v694_v15 = vsel %vm679_vm2, %v691_v45, %v8413_v43  ;;  %v701_v53 = vrot.slane %v5525_v4, 2  ;;  %v5780_v18 = vpack.i.bf16 %v689_v55, %v687_v52  ;;  %v703_v63 = vrot.slane %v5531_v6, 2 }
  0x40   : > { %8412 = vst [vmem:[#allocation35_spill] sm:$0xff] %v5768_v3  ;;  %4299 = vrot.lane.b32.xlu1 %v5768_v3, %s5372_s27  ;;  %v705_v36 = vrot.slane %v5544_v13, 2  ;;  %v706_v29 = vrot.slane %v5537_v10, 2  ;;  %4304 = vrot.lane.b32.xlu0 %v5757_v23, %s5373_s28  ;;  %v5787_v48 = vpack.i.bf16 %v694_v15, %v692_v26  ;;  %v697_v45 = vsel %vm679_vm2, %v695_v31, %v696_v46 }
  0x41   : > { %v699_v49 = vsel %vm679_vm2, %v696_v46, %v698_v2  ;;  %v708_v60 = vrot.slane %v5547_v14, 2  ;;  %v702_v52 = vsel %vm679_vm2, %v700_v22, %v701_v53  ;;  %v704_v6 = vsel %vm679_vm2, %v701_v53, %v703_v63 }
  0x42   : > { %v710_v61 = vrot.slane %v5563_v33, 2  ;;  %v711_v55 = vrot.slane %v5560_v32, 2  ;;  %v707_v43 = vsel %vm679_vm2, %v705_v36, %v706_v29  ;;  %v713_v15 = vrot.slane %v5566_v37, 2 }
  0x43   : > { %v709_v23 = vsel %vm679_vm2, %v706_v29, %v708_v60  ;;  %v715_v26 = vrot.slane %v5586_v58, 2  ;;  %v5802_v46 = vpack.i.bf16 %v699_v49, %v697_v45  ;;  %v716_v14 = vrot.slane %v5583_v57, 2 }
  0x44   : > { %4309 = vrot.lane.b32.xlu1 %v5780_v18, %s5373_s28  ;;  %v718_v31 = vrot.slane %v5589_v59, 2  ;;  %4314 = vrot.lane.b32.xlu0 %v5787_v48, %s5373_s28  ;;  %v5808_v2 = vpack.i.bf16 %v704_v6, %v702_v52  ;;  %v720_v22 = vrot.slane %v5602_v9, 2  ;;  %v721_v37 = vrot.slane %v5599_v8, 2 }
  0x45   : > { %v723_v53 = vrot.slane %v5605_v11, 2  ;;  %v5813_v63 = vpack.i.bf16 %v709_v23, %v707_v43  ;;  %v712_v36 = vsel %vm679_vm2, %v710_v61, %v711_v55  ;;  %v714_v29 = vsel %vm679_vm2, %v711_v55, %v713_v15 }
  0x46   : > { %v717_v45 = vsel %vm679_vm2, %v715_v26, %v716_v14  ;;  %v719_v59 = vsel %vm679_vm2, %v716_v14, %v718_v31  ;;  %v722_v49 = vsel %vm679_vm2, %v720_v22, %v721_v37  ;;  %v725_v60 = vrot.slane %v5622_v39, 2 }
  0x47   : > { %v726_v52 = vrot.slane %v5619_v25, 2  ;;  %v724_v11 = vsel %vm679_vm2, %v721_v37, %v723_v53  ;;  %v728_v23 = vrot.slane %v5626_v41, 2  ;;  %v730_v6 = vrot.slane %v5644_v19, 2 }
  0x48   : > { %4319 = vrot.lane.b32.xlu1 %v5802_v46, %s5373_s28  ;;  %v731_v61 = vrot.slane %v5641_v12, 2  ;;  %4324 = vrot.lane.b32.xlu0 %v5808_v2, %s5373_s28  ;;  %v5830_v55 = vpack.i.bf16 %v714_v29, %v712_v36  ;;  %v733_v43 = vrot.slane %v5647_v0, 2  ;;  %v5833_v15 = vpack.i.bf16 %v719_v59, %v717_v45 }
  0x49   : > { %v5835_v26 = vpack.i.bf16 %v724_v11, %v722_v49  ;;  %v727_v14 = vsel %vm679_vm2, %v725_v60, %v726_v52  ;;  %v735_v31 = vrot.slane %v5662_v40, 2  ;;  %v729_v41 = vsel %vm679_vm2, %v726_v52, %v728_v23 }
  0x4a   : > { %v732_v22 = vsel %vm679_vm2, %v730_v6, %v731_v61  ;;  %v736_v37 = vrot.slane %v5659_v24, 2  ;;  %v738_v53 = vrot.slane %v5665_v42, 2  ;;  %v734_v0 = vsel %vm679_vm2, %v731_v61, %v733_v43 }
  0x4b   : > { %v740_v36 = vrot.slane %v5678_v34, 2  ;;  %v741_v29 = vrot.slane %v5687_v21, 2  ;;  %v743_v45 = vrot.slane %v5690_v62, 2  ;;  %v5851_v59 = vpack.i.bf16 %v729_v41, %v727_v14 }
  0x4c   : > { %4329 = vrot.lane.b32.xlu1 %v5813_v63, %s5373_s28  ;;  %4334 = vrot.lane.b32.xlu0 %v5830_v55, %s5373_s28  ;;  %v5855_v49 = vpack.i.bf16 %v734_v0, %v732_v22  ;;  %v737_v42 = vsel %vm679_vm2, %v735_v31, %v736_v37  ;;  %v745_v60 = vrot.slane %v5700_v54, 2  ;;  %v746_v52 = vrot.slane %v5697_v51, 2 }
  0x4d   : > { %v739_v11 = vsel %vm679_vm2, %v736_v37, %v738_v53  ;;  %v742_v62 = vsel %vm679_vm2, %v740_v36, %v741_v29  ;;  %v744_v23 = vsel %vm679_vm2, %v741_v29, %v743_v45  ;;  %v748_v6 = vrot.slane %v5703_v44, 2 }
  0x4e   : > { %v750_v61 = vrot.slane %v5720_v1, 2  ;;  %v751_v43 = vrot.slane %v5717_v17, 2  ;;  %v753_v14 = vrot.slane %v5723_v50, 2  ;;  %v5871_v31 = vpack.i.bf16 %v739_v11, %v737_v42 }
  0x4f   : > { %v5873_v41 = vpack.i.bf16 %v744_v23, %v742_v62  ;;  %v747_v22 = vsel %vm679_vm2, %v745_v60, %v746_v52  ;;  %v749_v44 = vsel %vm679_vm2, %v746_v52, %v748_v6  ;;  %v755_v37 = vrot.slane %v5745_v7, 2 }
  0x50   : > { %4339 = vrot.lane.b32.xlu1 %v5833_v15, %s5373_s28  ;;  %4344 = vrot.lane.b32.xlu0 %v5835_v26, %s5373_s28  ;;  %v756_v53 = vrot.slane %v5742_v16, 2  ;;  %v758_v50 = vrot.slane %v5748_v20, 2  ;;  %v752_v0 = vsel %vm679_vm2, %v750_v61, %v751_v43  ;;  %v754_v36 = vsel %vm679_vm2, %v751_v43, %v753_v14 }
  0x51   : > { %v5886_v29 = vpack.i.bf16 %v749_v44, %v747_v22  ;;  %v5890_v45 = vpack.i.bf16 %v754_v36, %v752_v0  ;;  %v4383_v52 = vpack.i.bf16 %v5482_v35, %v5475_v30  ;;  %v5906_v11 = vpack.i.bf16 %v5466_v27, %v5469_v28 }
  0x52   : > { %v757_v42 = vsel %vm679_vm2, %v755_v37, %v756_v53  ;;  %v759_v60 = vsel %vm679_vm2, %v756_v53, %v758_v50  ;;  %v5910_v62 = vpack.i.bf16 %v5489_v38, %v5501_v47  ;;  %v5917_v23 = vpack.i.bf16 %v5525_v4, %v5528_v5  ;;  %v296_v53 = vld [vmem:[%s5445_s26 + $0xf0] sm:$0xff]  ;;  %v297_v50 = vld [vmem:[%s5445_s26 + $0xf8] sm:$0xff]  ;;  %v8425_v38 = vld [vmem:[#allocation26_spill] sm:$0xff] }
  0x53   : > { %v5896_v20 = vpack.i.bf16 %v759_v60, %v757_v42  ;;  %v5923_v6 = vpack.i.bf16 %v5537_v10, %v5544_v13  ;;  %v5929_v61 = vpack.i.bf16 %v5560_v32, %v5563_v33  ;;  %v5935_v43 = vpack.i.bf16 %v5583_v57, %v5586_v58  ;;  %v8420_v32 = vld [vmem:[#allocation19_spill] sm:$0xff]  ;;  %v8422_v10 = vld [vmem:[#allocation22_spill] sm:$0xff] }
  0x54   : > { %4349 = vrot.lane.b32.xlu1 %v5851_v59, %s5373_s28  ;;  %4354 = vrot.lane.b32.xlu0 %v5855_v49, %s5373_s28  ;;  %v5941_v14 = vpack.i.bf16 %v5599_v8, %v5602_v9  ;;  %v5947_v22 = vpack.i.bf16 %v5619_v25, %v5622_v39  ;;  %v5953_v44 = vpack.i.bf16 %v5641_v12, %v5644_v19  ;;  %v384_v42 = vrot.slane %v296_v53, 7 }
  0x55   : > { %8414 = vst [vmem:[#allocation36_spill] sm:$0xff] %v5896_v20  ;;  %v5959_v37 = vpack.i.bf16 %v5659_v24, %v5662_v40  ;;  %v5967_v0 = vpack.i.bf16 %v5687_v21, %v5678_v34  ;;  %v5973_v36 = vpack.i.bf16 %v5697_v51, %v5700_v54  ;;  %v385_v60 = vrot.slane %v297_v50, 7  ;;  %v8418_v50 = vld [vmem:[#allocation12_spill] sm:$0xff] }
  0x56   : > { %v5985_v58 = vpack.i.bf16 %v5742_v16, %v5745_v7  ;;  %v452_v33 = vsel %vm336_vm0, 0.0, %v384_v42  ;;  %vm1675_vm11 = vcmask 195584   ;;  %vm1741_vm12 = vcmask 220160  }
  0x57   : > { %v386_v57 = vsel %vm336_vm0, %v384_v42, %v385_v60  ;;  %v8419_v42 = vld [vmem:[#allocation14_spill] sm:$0xff]  ;;  %v954_v5 = vrot.slane %v452_v33, 1  ;;  %v469_v47 = vsel %vm336_vm0, %v385_v60, 0.0  ;;  %v1055_v30 = vrot.slane %v452_v33, 2 }
  0x58   : > { %4359 = vrot.lane.b32.xlu1 %v5871_v31, %s5373_s28  ;;  %4364 = vrot.lane.b32.xlu0 %v5873_v41, %s5373_s28  ;;  %8416 = vst [vmem:[#allocation38_spill] sm:$0xff] %v5985_v58  ;;  %v5991_v53 = vpack.i.bf16 %v386_v57, %v452_v33  ;;  %v955_v4 = vrot.slane %v386_v57, 1  ;;  %v1056_v35 = vrot.slane %v386_v57, 2  ;;  %vm1989_vm13 = vcmask 261120  }
  0x59   : > { %vm3082_vm14 = vcmask 523264   ;;  %vm3115_vm15 = vcmask 785408  }
  0x5a   : > { %8417 = vst [vmem:[#allocation39_spill] sm:$0xff] %v5991_v53  ;;  %v956_v27 = vsel %vm502_vm1, %v954_v5, %v955_v4  ;;  %v1057_v33 = vsel %vm679_vm2, %v1055_v30, %v1056_v35  ;;  %v5343_v5 = vld [vmem:[%s8241_s1 + $0x8] sm:$0x3f]  }
  0x5c   : > { %4369 = vrot.lane.b32.xlu1 %v5886_v29, %s5373_s28  ;;  %4374 = vrot.lane.b32.xlu0 %v5890_v45, %s5373_s28 }
  0x60   : > { %4379 = vrot.lane.b32.xlu1 %v5896_v20, %s5373_s28  ;;  %4384 = vrot.lane.b32.xlu0 %v4383_v52, %s5374_s29  ;;  %v5979_v52 = vpack.i.bf16 %v5717_v17, %v5720_v1  ;;  %v957_v20 = vrot.slane %v469_v47, 1  ;;  %s5383_s28 = smov 96  }
  0x62   : > { %8415 = vst [vmem:[#allocation37_spill] sm:$0xff] %v5979_v52  ;;  %v958_v3 = vsel %vm502_vm1, %v955_v4, %v957_v20  ;;  %v8429_v20 = vld [vmem:[#allocation29_spill] sm:$0xff] }
  0x64   : > { %4389 = vrot.lane.b32.xlu1 %v5906_v11, %s5374_s29  ;;  %4394 = vrot.lane.b32.xlu0 %v5910_v62, %s5374_s29 }
  0x68   : > { %4399 = vrot.lane.b32.xlu1 %v5917_v23, %s5374_s29  ;;  %4404 = vrot.lane.b32.xlu0 %v5923_v6, %s5374_s29 }
  0x6c   : > { %4409 = vrot.lane.b32.xlu1 %v5929_v61, %s5374_s29  ;;  %4414 = vrot.lane.b32.xlu0 %v5935_v43, %s5374_s29 }
  0x70   : > { %4419 = vrot.lane.b32.xlu1 %v5941_v14, %s5374_s29  ;;  %4424 = vrot.lane.b32.xlu0 %v5947_v22, %s5374_s29 }
  0x74   : > { %4429 = vrot.lane.b32.xlu1 %v5953_v44, %s5374_s29  ;;  %4434 = vrot.lane.b32.xlu0 %v5959_v37, %s5374_s29 }
  0x78   : > { %4439 = vrot.lane.b32.xlu1 %v5967_v0, %s5374_s29  ;;  %4444 = vrot.lane.b32.xlu0 %v5973_v36, %s5374_s29 }
  0x7c   : > { %4449 = vrot.lane.b32.xlu1 %v5979_v52, %s5374_s29  ;;  %4454 = vrot.lane.b32.xlu0 %v5985_v58, %s5374_s29  ;;  %v6024_v58 = vpack.i.bf16 %v958_v3, %v956_v27  ;;  %v8428_v52 = vld [vmem:[#allocation28_spill] sm:$0xff] }
  0x7e   : > { %8427 = vst [vmem:[#allocation19_spill] sm:$0xff] %v6024_v58  ;;  %v8430_v58 = vld [vmem:[#allocation30_spill] sm:$0xff] }
  0x80   : > { %4459 = vrot.lane.b32.xlu1 %v5991_v53, %s5374_s29  ;;  %4464 = vrot.lane.b32.xlu0 %v5515_v56, %s5375_s30  ;;  %v8423_v56 = vld [vmem:[#allocation25_spill] sm:$0xff] }
  0x84   : > { %4469 = vrot.lane.b32.xlu1 %v8418_v50, %s5375_s30  ;;  %4474 = vrot.lane.b32.xlu0 %v8419_v42, %s5375_s30 }
  0x86   : > { %v6005_v13 = vpop.permute.xlu0 %4224 }
  0x87   : > { %8421 = vst [vmem:[#allocation12_spill] sm:$0xff] %v6005_v13  ;;  %v8426_v13 = vld [vmem:[#allocation27_spill] sm:$0xff] }
  0x88   : > { %4479 = vrot.lane.b32.xlu1 %v8420_v32, %s5375_s30  ;;  %4484 = vrot.lane.b32.xlu0 %v8422_v10, %s5375_s30 }
  0x8c   : > { %4489 = vrot.lane.b32.xlu1 %v8423_v56, %s5375_s30  ;;  %v6012_v53 = vpop.permute.xlu1 %4234  ;;  %4494 = vrot.lane.b32.xlu0 %v8425_v38, %s5375_s30 }
  0x8d   : > { %8424 = vst [vmem:[#allocation14_spill] sm:$0xff] %v6012_v53  ;;  %v6016_v28 = vpop.permute.xlu0 %4229  ;;  %v1058_v53 = vrot.slane %v469_v47, 2  ;;  %v5376_v47 = vmov 65535  }
  0x8e   : > { %v1791_v3 = vsel %vm1790_vm3, 4294967295, %v5376_v47 }
  0x8f   : > { %v1059_v57 = vsel %vm679_vm2, %v1056_v35, %v1058_v53  ;;  %v1792_v30 = vsel %vm679_vm2, %v1791_v3, 0 }
  0x90   : > { %4499 = vrot.lane.b32.xlu1 %v8426_v13, %s5375_s30  ;;  %v6022_v60 = vpop.permute.xlu1 %4239  ;;  %4504 = vrot.lane.b32.xlu0 %v8428_v52, %s5375_s30  ;;  %v6033_v4 = vpack.i.bf16 %v1059_v57, %v1057_v33  ;;  %v1794_v53 = vand.u32 %v5343_v5, %v1792_v30  ;;  %v5344_v33 = vld [vmem:[%s8241_s1] sm:$0xff]  }
  0x92   : > { %4114 = vmatprep.subr.bf16.mxu0 %v1794_v53 }
  0x93   : > { %4115 = vmatpush3.bf16.msra.mxu0 %v1794_v53 }
  0x94   : > { %4509 = vrot.lane.b32.xlu1 %v8429_v20, %s5375_s30  ;;  %v6037_v27 = vpop.permute.xlu0 %4244  ;;  %4514 = vrot.lane.b32.xlu0 %v8430_v58, %s5375_s30 }
  0x95   : > { %4116 = vmatprep.subr.bf16.mxu0 %v5344_v33 }
  0x96   : > { %v6042_v35 = vpop.permute.xlu1 %4249 }
  0x97   : > { %8431 = vst [vmem:[#allocation22_spill] sm:$0xff] %v6042_v35  ;;  %4117 = vmatpush3.bf16.msra.mxu0 %v5344_v33 }
  0x98   : > { %4519 = vrot.lane.b32.xlu1 %v5780_v18, %s5377_s9  ;;  %4524 = vrot.lane.b32.xlu0 %v5787_v48, %s5377_s9  ;;  %v6051_v57 = vpop.permute.xlu0 %4254 }
  0x99   : > { %8432 = vst [vmem:[#allocation25_spill] sm:$0xff] %v6051_v57 }
  0x9c   : > { %4529 = vrot.lane.b32.xlu1 %v5906_v11, %s5378_s12  ;;  %v6055_v5 = vpop.permute.xlu1 %4259  ;;  %4534 = vrot.lane.b32.xlu0 %v5910_v62, %s5378_s12 }
  0x9d   : > { %8433 = vst [vmem:[#allocation26_spill] sm:$0xff] %v6055_v5 }
  0x9e   : > { %v4265_v18 = vpop.permute.xlu0 %4264 }
  0x9f   : > { %v4266_v53 = vunpack.i.l.bf16 %v4265_v18 }
  0xa0   : > { %4539 = vrot.lane.b32.xlu1 %v8418_v50, %s5379_s13  ;;  %4544 = vrot.lane.b32.xlu0 %v8419_v42, %s5379_s13  ;;  %v4270_v47 = vpop.permute.xlu1 %4269 }
  0xa1   : > { %v4272_v5 = vunpack.i.h.bf16 %v4270_v47 }
  0xa4   : > { %4549 = vrot.lane.b32.xlu1 %v5787_v48, %s5380_s14  ;;  %v4275_v11 = vpop.permute.xlu0 %4274  ;;  %4554 = vrot.lane.b32.xlu0 %v5802_v46, %s5380_s14 }
  0xa6   : > { %v6067_v3 = vpop.permute.xlu1 %4279 }
  0xa8   : > { %4559 = vrot.lane.b32.xlu1 %v5802_v46, %s5377_s9  ;;  %4564 = vrot.lane.b32.xlu0 %v5808_v2, %s5377_s9 }
  0xaa   : > { %v6073_v62 = vpop.permute.xlu0 %4284 }
  0xab   : > { %v4287_v35 = vunpack.i.h.bf16 %v6073_v62 }
  0xac   : > { %4569 = vrot.lane.b32.xlu1 %v5917_v23, %s5378_s12  ;;  %v6077_v50 = vpop.permute.xlu1 %4289  ;;  %4574 = vrot.lane.b32.xlu0 %v5923_v6, %s5378_s12 }
  0xae   : > { %v6081_v48 = vpop.permute.xlu0 %4294 }
  0xb0   : > { %4579 = vrot.lane.b32.xlu1 %v8420_v32, %s5379_s13  ;;  %4584 = vrot.lane.b32.xlu0 %v8422_v10, %s5379_s13 }
  0xb2   : > { %v6087_v46 = vpop.permute.xlu1 %4299  ;;  %v6089_v42 = vpop.permute.xlu0 %4304 }
  0xb4   : > { %4589 = vrot.lane.b32.xlu1 %v5808_v2, %s5380_s14  ;;  %4594 = vrot.lane.b32.xlu0 %v5813_v63, %s5380_s14 }
  0xb6   : > { %v6095_v23 = vpop.permute.xlu1 %4309  ;;  %v6097_v6 = vpop.permute.xlu0 %4314 }
  0xb8   : > { %4599 = vrot.lane.b32.xlu1 %v5813_v63, %s5377_s9  ;;  %4604 = vrot.lane.b32.xlu0 %v5830_v55, %s5377_s9  ;;  %v4267_v63 = vunpack.i.h.bf16 %v4265_v18  ;;  %v1461_v18 = vsel %vm1444_vm4, %v5602_v9, %v4266_v53 }
  0xba   : > { %v6103_v10 = vpop.permute.xlu1 %4319  ;;  %v6105_v32 = vpop.permute.xlu0 %4324 }
  0xbb   : > { %8434 = vst [vmem:[#allocation27_spill] sm:$0xff] %v6103_v10  ;;  %8435 = vst [vmem:[#allocation28_spill] sm:$0xff] %v6105_v32 }
  0xbc   : > { %4609 = vrot.lane.b32.xlu1 %v5929_v61, %s5378_s12  ;;  %4614 = vrot.lane.b32.xlu0 %v5935_v43, %s5378_s12  ;;  %v4271_v61 = vunpack.i.l.bf16 %v4270_v47  ;;  %v4282_v47 = vunpack.i.h.bf16 %v6067_v3 }
  0xbe   : > { %v6111_v2 = vpop.permute.xlu1 %4329  ;;  %v6113_v30 = vpop.permute.xlu0 %4334  ;;  %v1463_v9 = vsel %vm1444_vm4, %v5622_v39, %v4271_v61  ;;  %v4291_v61 = vunpack.i.l.bf16 %v6077_v50 }
  0xbf   : > { %8436 = vst [vmem:[#allocation29_spill] sm:$0xff] %v6111_v2  ;;  %8437 = vst [vmem:[#allocation30_spill] sm:$0xff] %v6113_v30  ;;  %v4277_v30 = vunpack.i.h.bf16 %v4275_v11 }
  0xc0   : > { %4619 = vrot.lane.b32.xlu1 %v8423_v56, %s5379_s13  ;;  %4624 = vrot.lane.b32.xlu0 %v8425_v38, %s5379_s13  ;;  %v1462_v56 = vsel %vm1444_vm4, %v5599_v8, %v4267_v63  ;;  %v4276_v38 = vunpack.i.l.bf16 %v4275_v11  ;;  %v1464_v8 = vsel %vm1444_vm4, %v5619_v25, %v4272_v5 }
  0xc2   : > { %v6119_v33 = vpop.permute.xlu1 %4339  ;;  %v4345_v57 = vpop.permute.xlu0 %4344  ;;  %v1465_v25 = vsel %vm1444_vm4, %v5644_v19, %v4276_v38 }
  0xc3   : > { %8438 = vst [vmem:[#allocation40_spill] sm:$0xff] %v6119_v33  ;;  %v4347_v43 = vunpack.i.h.bf16 %v4345_v57  ;;  %v4346_v32 = vunpack.i.l.bf16 %v4345_v57  ;;  %v4281_v33 = vunpack.i.l.bf16 %v6067_v3  ;;  %v4286_v3 = vunpack.i.l.bf16 %v6073_v62 }
  0xc4   : > { %4629 = vrot.lane.b32.xlu1 %v5830_v55, %s5380_s14  ;;  %4634 = vrot.lane.b32.xlu0 %v5833_v15, %s5380_s14  ;;  %v1468_v62 = vsel %vm1444_vm4, %v5659_v24, %v4282_v47  ;;  %v1470_v24 = vsel %vm1444_vm4, %v5687_v21, %v4287_v35 }
  0xc5   : > { %v6132_v57 = vsel %vm1477_vm5, %v1461_v18, %v4346_v32  ;;  %v6135_v55 = vsel %vm1477_vm5, %v1462_v56, %v4347_v43  ;;  %v1466_v43 = vsel %vm1444_vm4, %v5641_v12, %v4277_v30  ;;  %v4292_v30 = vunpack.i.h.bf16 %v6077_v50 }
  0xc6   : > { %v4350_v2 = vpop.permute.xlu1 %4349  ;;  %v4355_v53 = vpop.permute.xlu0 %4354 }
  0xc7   : > { %v4352_v11 = vunpack.i.h.bf16 %v4350_v2  ;;  %v4351_v63 = vunpack.i.l.bf16 %v4350_v2  ;;  %v4357_v10 = vunpack.i.h.bf16 %v4355_v53  ;;  %v4356_v32 = vunpack.i.l.bf16 %v4355_v53 }
  0xc8   : > { %4639 = vrot.lane.b32.xlu1 %v5833_v15, %s5377_s9  ;;  %4644 = vrot.lane.b32.xlu0 %v5835_v26, %s5377_s9  ;;  %v1467_v15 = vsel %vm1444_vm4, %v5662_v40, %v4281_v33  ;;  %v1469_v40 = vsel %vm1444_vm4, %v5678_v34, %v4286_v3  ;;  %v1472_v35 = vsel %vm1444_vm4, %v5697_v51, %v4292_v30  ;;  %v4302_v3 = vunpack.i.h.bf16 %v6087_v46 }
  0xc9   : > { %v6150_v39 = vsel %vm1477_vm5, %v1464_v8, %v4352_v11  ;;  %v6153_v5 = vsel %vm1477_vm5, %v1463_v9, %v4351_v63  ;;  %v6162_v12 = vsel %vm1477_vm5, %v1465_v25, %v4356_v32  ;;  %v6165_v19 = vsel %vm1477_vm5, %v1466_v43, %v4357_v10 }
  0xca   : > { %v4360_v2 = vpop.permute.xlu1 %4359  ;;  %v4365_v38 = vpop.permute.xlu0 %4364  ;;  %v4297_v10 = vunpack.i.h.bf16 %v6081_v48  ;;  %v4296_v8 = vunpack.i.l.bf16 %v6081_v48  ;;  %v1471_v48 = vsel %vm1444_vm4, %v5700_v54, %v4291_v61 }
  0xcb   : > { %v4362_v56 = vunpack.i.h.bf16 %v4360_v2  ;;  %v4361_v18 = vunpack.i.l.bf16 %v4360_v2  ;;  %v4367_v33 = vunpack.i.h.bf16 %v4365_v38  ;;  %v4366_v47 = vunpack.i.l.bf16 %v4365_v38 }
  0xcc   : > { %4649 = vrot.lane.b32.xlu1 %v5941_v14, %s5378_s12  ;;  %4654 = vrot.lane.b32.xlu0 %v5947_v22, %s5378_s12  ;;  %v4301_v22 = vunpack.i.l.bf16 %v6087_v46  ;;  %v1474_v25 = vsel %vm1444_vm4, %v5717_v17, %v4297_v10  ;;  %v1473_v51 = vsel %vm1444_vm4, %v5720_v1, %v4296_v8  ;;  %v1476_v1 = vsel %vm1444_vm4, %v5742_v16, %v4302_v3 }
  0xcd   : > { %v6178_v50 = vsel %vm1477_vm5, %v1468_v62, %v4362_v56  ;;  %v6181_v9 = vsel %vm1477_vm5, %v1467_v15, %v4361_v18  ;;  %v6186_v34 = vsel %vm1477_vm5, %v1469_v40, %v4366_v47  ;;  %v6189_v21 = vsel %vm1477_vm5, %v1470_v24, %v4367_v33 }
  0xce   : > { %v4370_v14 = vpop.permute.xlu1 %4369  ;;  %v4375_v53 = vpop.permute.xlu0 %4374  ;;  %v1475_v61 = vsel %vm1444_vm4, %v5745_v7, %v4301_v22 }
  0xcf   : > { %v4372_v11 = vunpack.i.h.bf16 %v4370_v14  ;;  %v4371_v63 = vunpack.i.l.bf16 %v4370_v14  ;;  %v4377_v32 = vunpack.i.h.bf16 %v4375_v53  ;;  %v4376_v43 = vunpack.i.l.bf16 %v4375_v53 }
  0xd0   : > { %4659 = vrot.lane.b32.xlu1 %v8426_v13, %s5379_s13  ;;  %4664 = vrot.lane.b32.xlu0 %v8428_v52, %s5379_s13 }
  0xd1   : > { %v6204_v54 = vsel %vm1477_vm5, %v1472_v35, %v4372_v11  ;;  %v6207_v62 = vsel %vm1477_vm5, %v1471_v48, %v4371_v63  ;;  %v6212_v46 = vsel %vm1477_vm5, %v1473_v51, %v4376_v43  ;;  %v6215_v13 = vsel %vm1477_vm5, %v1474_v25, %v4377_v32 }
  0xd2   : > { %v4380_v15 = vpop.permute.xlu1 %4379  ;;  %v6217_v30 = vpop.permute.xlu0 %4384 }
  0xd3   : > { %v4382_v17 = vunpack.i.h.bf16 %v4380_v15  ;;  %v4381_v2 = vunpack.i.l.bf16 %v4380_v15 }
  0xd4   : > { %4669 = vrot.lane.b32.xlu1 %v5835_v26, %s5380_s14  ;;  %4674 = vrot.lane.b32.xlu0 %v5851_v59, %s5380_s14 }
  0xd5   : > { %v6226_v52 = vsel %vm1477_vm5, %v1476_v1, %v4382_v17  ;;  %v6229_v56 = vsel %vm1477_vm5, %v1475_v61, %v4381_v2  ;;  %v8442_v61 = vld [vmem:[#allocation32_spill] sm:$0xff] }
  0xd6   : > { %v6233_v18 = vpop.permute.xlu1 %4389  ;;  %v6235_v38 = vpop.permute.xlu0 %4394 }
  0xd8   : > { %4679 = vrot.lane.b32.xlu1 %v5851_v59, %s5377_s9  ;;  %4684 = vrot.lane.b32.xlu0 %v5855_v49, %s5377_s9 }
  0xda   : > { %v6241_v16 = vpop.permute.xlu1 %4399  ;;  %v6243_v7 = vpop.permute.xlu0 %4404 }
  0xdc   : > { %4689 = vrot.lane.b32.xlu1 %v5953_v44, %s5378_s12  ;;  %4694 = vrot.lane.b32.xlu0 %v5959_v37, %s5378_s12 }
  0xde   : > { %v6249_v26 = vpop.permute.xlu1 %4409  ;;  %v6251_v24 = vpop.permute.xlu0 %4414 }
  0xe0   : > { %4699 = vrot.lane.b32.xlu1 %v8429_v20, %s5379_s13  ;;  %4704 = vrot.lane.b32.xlu0 %v8430_v58, %s5379_s13 }
  0xe2   : > { %v6257_v59 = vpop.permute.xlu1 %4419  ;;  %v4425_v40 = vpop.permute.xlu0 %4424 }
  0xe3   : > { %v4427_v33 = vunpack.i.h.bf16 %v4425_v40  ;;  %v4426_v47 = vunpack.i.l.bf16 %v4425_v40 }
  0xe4   : > { %4709 = vrot.lane.b32.xlu1 %v5855_v49, %s5380_s14  ;;  %4714 = vrot.lane.b32.xlu0 %v5871_v31, %s5380_s14  ;;  %v8439_v49 = vld [vmem:[#allocation31_spill] sm:$0xff] }
  0xe5   : > { %v6265_v44 = vsel %vm1510_vm6, %v6132_v57, %v4426_v47  ;;  %v6269_v37 = vsel %vm1510_vm6, %v6135_v55, %v4427_v33 }
  0xe6   : > { %v4430_v58 = vpop.permute.xlu1 %4429  ;;  %v4435_v8 = vpop.permute.xlu0 %4434 }
  0xe7   : > { %v4432_v20 = vunpack.i.h.bf16 %v4430_v58  ;;  %v4431_v10 = vunpack.i.l.bf16 %v4430_v58  ;;  %v4437_v14 = vunpack.i.h.bf16 %v4435_v8  ;;  %v4436_v35 = vunpack.i.l.bf16 %v4435_v8  ;;  %v8446_v58 = vld [vmem:[#allocation37_spill] sm:$0xff]  ;;  %v8447_v8 = vld [vmem:[#allocation38_spill] sm:$0xff] }
  0xe8   : > { %4719 = vrot.lane.b32.xlu1 %v8439_v49, %s5375_s30  ;;  %4724 = vrot.lane.b32.xlu0 %v5871_v31, %s5377_s9 }
  0xe9   : > { %v6275_v48 = vsel %vm1510_vm6, %v6153_v5, %v4431_v10  ;;  %v6279_v57 = vsel %vm1510_vm6, %v6150_v39, %v4432_v20  ;;  %v6285_v55 = vsel %vm1510_vm6, %v6162_v12, %v4436_v35  ;;  %v6289_v11 = vsel %vm1510_vm6, %v6165_v19, %v4437_v14  ;;  %v8448_v14 = vld [vmem:[#allocation12_spill] sm:$0xff] }
  0xea   : > { %v4440_v63 = vpop.permute.xlu1 %4439  ;;  %v4445_v5 = vpop.permute.xlu0 %4444  ;;  %v4227_v35 = vunpack.i.h.bf16 %v8448_v14 }
  0xeb   : > { %v4442_v53 = vunpack.i.h.bf16 %v4440_v63  ;;  %v4441_v3 = vunpack.i.l.bf16 %v4440_v63  ;;  %v4447_v22 = vunpack.i.h.bf16 %v4445_v5  ;;  %v4446_v32 = vunpack.i.l.bf16 %v4445_v5 }
  0xec   : > { %4729 = vrot.lane.b32.xlu1 %v5873_v41, %s5377_s9  ;;  %4734 = vrot.lane.b32.xlu0 %v5967_v0, %s5378_s12 }
  0xed   : > { %v6295_v31 = vsel %vm1510_vm6, %v6181_v9, %v4441_v3  ;;  %v6299_v39 = vsel %vm1510_vm6, %v6178_v50, %v4442_v53  ;;  %v6305_v12 = vsel %vm1510_vm6, %v6186_v34, %v4446_v32  ;;  %v6309_v19 = vsel %vm1510_vm6, %v6189_v21, %v4447_v22 }
  0xee   : > { %v4450_v43 = vpop.permute.xlu1 %4449  ;;  %v4455_v9 = vpop.permute.xlu0 %4454  ;;  %v4232_v3 = vunpack.i.h.bf16 %v6016_v28  ;;  %v4231_v22 = vunpack.i.l.bf16 %v6016_v28  ;;  %v8454_v28 = vld [vmem:[#allocation8_spill] sm:$0xff] }
  0xef   : > { %v4452_v25 = vunpack.i.h.bf16 %v4450_v43  ;;  %v4451_v51 = vunpack.i.l.bf16 %v4450_v43  ;;  %v4457_v15 = vunpack.i.h.bf16 %v4455_v9  ;;  %v4456_v17 = vunpack.i.l.bf16 %v4455_v9 }
  0xf0   : > { %4739 = vrot.lane.b32.xlu1 %v5973_v36, %s5378_s12  ;;  %4744 = vrot.lane.b32.xlu0 %v8439_v49, %s5379_s13  ;;  %v8449_v49 = vld [vmem:[#allocation14_spill] sm:$0xff]  ;;  %v4242_v43 = vunpack.i.h.bf16 %v6022_v60 }
  0xf1   : > { %v6315_v0 = vsel %vm1510_vm6, %v6207_v62, %v4451_v51  ;;  %v6319_v50 = vsel %vm1510_vm6, %v6204_v54, %v4452_v25  ;;  %v6325_v34 = vsel %vm1510_vm6, %v6212_v46, %v4456_v17  ;;  %v6329_v21 = vsel %vm1510_vm6, %v6215_v13, %v4457_v15  ;;  %v8450_v25 = vld [vmem:[#allocation35_spill] sm:$0xff]  ;;  %v8451_v51 = vld [vmem:[#allocation2_spill] sm:$0xff] }
  0xf2   : > { %8440 = vst [vmem:[#allocation31_spill] sm:$0xff] %v6325_v34  ;;  %8441 = vst [vmem:[#allocation41_spill] sm:$0xff] %v6329_v21  ;;  %v4460_v36 = vpop.permute.xlu1 %4459  ;;  %v6331_v62 = vpop.permute.xlu0 %4464  ;;  %v4237_v63 = vunpack.i.h.bf16 %v8449_v49  ;;  %v4236_v53 = vunpack.i.l.bf16 %v8449_v49  ;;  %v1446_v9 = vsel %vm1444_vm4, %v8451_v51, %v4227_v35  ;;  %v8452_v15 = vld [vmem:[#allocation3_spill] sm:$0xff]  ;;  %v8456_v35 = vld [vmem:[#allocation9_spill] sm:$0xff]  ;;  %v4392_v49 = vunpack.i.h.bf16 %v6233_v18 }
  0xf3   : > { %v4462_v2 = vunpack.i.h.bf16 %v4460_v36  ;;  %v4461_v1 = vunpack.i.l.bf16 %v4460_v36  ;;  %v8453_v36 = vld [vmem:[#allocation7_spill] sm:$0xff] }
  0xf4   : > { %4749 = vrot.lane.b32.xlu1 %v8442_v61, %s5379_s13  ;;  %4754 = vrot.lane.b32.xlu0 %v5873_v41, %s5380_s14 }
  0xf5   : > { %v6337_v54 = vsel %vm1510_vm6, %v6229_v56, %v4461_v1  ;;  %v6341_v46 = vsel %vm1510_vm6, %v6226_v52, %v4462_v2  ;;  %v8445_v52 = vld [vmem:[#allocation33_spill] sm:$0xff]  ;;  %v6396_v2 = vsel %vm1444_vm4, %v8453_v36, %v4237_v63  ;;  %v6402_v1 = vsel %vm1444_vm4, %v8454_v28, %v4236_v53  ;;  %v8457_v36 = vld [vmem:[#allocation11_spill] sm:$0xff] }
  0xf6   : > { %8443 = vst [vmem:[#allocation32_spill] sm:$0xff] %v6337_v54  ;;  %8444 = vst [vmem:[#allocation42_spill] sm:$0xff] %v6341_v46  ;;  %v6345_v13 = vpop.permute.xlu1 %4469  ;;  %v6347_v40 = vpop.permute.xlu0 %4474  ;;  %v4311_v63 = vunpack.i.l.bf16 %v6095_v23  ;;  %v4467_v54 = vunpack.i.h.bf16 %v6331_v62 }
  0xf8   : > { %4759 = vrot.lane.b32.xlu1 %v5886_v29, %s5380_s14  ;;  %4764 = vrot.lane.b32.xlu0 %v8442_v61, %s5375_s30  ;;  %v8455_v61 = vld [vmem:[#allocation10_spill] sm:$0xff] }
  0xfa   : > { %v6353_v33 = vpop.permute.xlu1 %4479  ;;  %v6355_v56 = vpop.permute.xlu0 %4484 }
  0xfc   : > { %4769 = vrot.lane.b32.xlu1 %v8445_v52, %s5375_s30  ;;  %4774 = vrot.lane.b32.xlu0 %v5886_v29, %s5377_s9  ;;  %v4226_v29 = vunpack.i.l.bf16 %v8448_v14 }
  0xfe   : > { %v6361_v41 = vpop.permute.xlu1 %4489  ;;  %v6363_v47 = vpop.permute.xlu0 %4494  ;;  %v1445_v17 = vsel %vm1444_vm4, %v8452_v15, %v4226_v29  ;;  %v1447_v29 = vsel %vm1444_vm4, %v8456_v35, %v4231_v22  ;;  %v8458_v22 = vld [vmem:[#allocation36_spill] sm:$0xff] }
  0xff   : > { %v1480_v35 = vsel %vm1477_vm5, %v1447_v29, %v4311_v63 }
 0x100   : > { %4779 = vrot.lane.b32.xlu1 %v5890_v45, %s5377_s9  ;;  %4784 = vrot.lane.b32.xlu0 %v8446_v58, %s5378_s12  ;;  %v4307_v58 = vunpack.i.h.bf16 %v6089_v42 }
 0x102   : > { %v6369_v20 = vpop.permute.xlu1 %4499  ;;  %v6371_v10 = vpop.permute.xlu0 %4504 }
 0x104   : > { %4789 = vrot.lane.b32.xlu1 %v8447_v8, %s5378_s12  ;;  %4794 = vrot.lane.b32.xlu0 %v8445_v52, %s5379_s13  ;;  %v1448_v52 = vsel %vm1444_vm4, %v8455_v61, %v4232_v3  ;;  %v4306_v8 = vunpack.i.l.bf16 %v6089_v42  ;;  %v6415_v3 = vsel %vm1444_vm4, %v8457_v36, %v4242_v43  ;;  %v4387_v42 = vunpack.i.h.bf16 %v6217_v30 }
 0x105   : > { %v4386_v61 = vunpack.i.l.bf16 %v6217_v30  ;;  %v6429_v43 = vpack.i.bf16 %v8451_v51, %v8452_v15  ;;  %v1479_v36 = vsel %vm1477_vm5, %v1446_v9, %v4307_v58  ;;  %v4472_v9 = vunpack.i.h.bf16 %v6345_v13  ;;  %v8460_v58 = vld [vmem:[#allocation19_spill] sm:$0xff] }
 0x106   : > { %v6382_v5 = vpop.permute.xlu1 %4509  ;;  %v6385_v32 = vpop.permute.xlu0 %4514  ;;  %v1478_v30 = vsel %vm1477_vm5, %v1445_v17, %v4306_v8  ;;  %v1512_v15 = vsel %vm1510_vm6, %v1479_v36, %v4387_v42  ;;  %v4471_v17 = vunpack.i.l.bf16 %v6345_v13 }
 0x107   : > { %8459 = vst [vmem:[#allocation33_spill] sm:$0xff] %v6429_v43  ;;  %v1511_v51 = vsel %vm1510_vm6, %v1478_v30, %v4386_v61  ;;  %v1545_v30 = vsel %vm1543_vm7, %v1512_v15, %v4467_v54  ;;  %v8461_v54 = vld [vmem:[#allocation39_spill] sm:$0xff] }
 0x108   : > { %4799 = vrot.lane.b32.xlu1 %v8450_v25, %s5379_s13  ;;  %4804 = vrot.lane.b32.xlu0 %v5890_v45, %s5380_s14  ;;  %v4312_v45 = vunpack.i.h.bf16 %v6095_v23  ;;  %v4391_v23 = vunpack.i.l.bf16 %v6233_v18 }
 0x10a   : > { %v4520_v14 = vpop.permute.xlu1 %4519  ;;  %v4525_v53 = vpop.permute.xlu0 %4524  ;;  %v1481_v18 = vsel %vm1477_vm5, %v1448_v52, %v4312_v45  ;;  %v1513_v8 = vsel %vm1510_vm6, %v1480_v35, %v4391_v23 }
 0x10b   : > { %v1514_v52 = vsel %vm1510_vm6, %v1481_v18, %v4392_v49  ;;  %v4522_v29 = vunpack.i.h.bf16 %v4520_v14  ;;  %v4521_v45 = vunpack.i.l.bf16 %v4520_v14  ;;  %v4526_v63 = vunpack.i.l.bf16 %v4525_v53 }
 0x10c   : > { %4809 = vrot.lane.b32.xlu1 %v8458_v22, %s5380_s14  ;;  %4814 = vrot.lane.b32.xlu0 %v8450_v25, %s5375_s30  ;;  %v4466_v25 = vunpack.i.l.bf16 %v6331_v62  ;;  %v4527_v62 = vunpack.i.h.bf16 %v4525_v53  ;;  %v1546_v49 = vsel %vm1543_vm7, %v1513_v8, %v4471_v17  ;;  %v1547_v14 = vsel %vm1543_vm7, %v1514_v52, %v4472_v9 }
 0x10e   : > { %v4530_v46 = vpop.permute.xlu1 %4529  ;;  %v4535_v21 = vpop.permute.xlu0 %4534  ;;  %v1544_v13 = vsel %vm1543_vm7, %v1511_v51, %v4466_v25  ;;  %v1580_v15 = vsel %vm1576_vm8, %v1547_v14, %v4527_v62 }
 0x10f   : > { %v4532_v42 = vunpack.i.h.bf16 %v4530_v46  ;;  %v4531_v61 = vunpack.i.l.bf16 %v4530_v46  ;;  %v4537_v28 = vunpack.i.h.bf16 %v4535_v21  ;;  %v4536_v34 = vunpack.i.l.bf16 %v4535_v21 }
 0x110   : > { %4819 = vrot.lane.b32.xlu1 %v8460_v58, %s5375_s30  ;;  %4824 = vrot.lane.b32.xlu0 %v8458_v22, %s5377_s9  ;;  %v1577_v53 = vsel %vm1576_vm8, %v1544_v13, %v4521_v45  ;;  %v1578_v46 = vsel %vm1576_vm8, %v1545_v30, %v4522_v29  ;;  %v1579_v21 = vsel %vm1576_vm8, %v1546_v49, %v4526_v63 }
 0x111   : > { %v1610_v9 = vsel %vm1609_vm9, %v1577_v53, %v4531_v61  ;;  %v1611_v17 = vsel %vm1609_vm9, %v1578_v46, %v4532_v42  ;;  %v1612_v8 = vsel %vm1609_vm9, %v1579_v21, %v4536_v34  ;;  %v1613_v52 = vsel %vm1609_vm9, %v1580_v15, %v4537_v28  ;;  %v8463_v46 = vld [vmem:[#allocation13_spill] sm:$0xff] }
 0x112   : > { %v4540_v36 = vpop.permute.xlu1 %4539  ;;  %v4545_v35 = vpop.permute.xlu0 %4544 }
 0x113   : > { %v4542_v23 = vunpack.i.h.bf16 %v4540_v36  ;;  %v4541_v18 = vunpack.i.l.bf16 %v4540_v36  ;;  %v4547_v22 = vunpack.i.h.bf16 %v4545_v35  ;;  %v4546_v51 = vunpack.i.l.bf16 %v4545_v35 }
 0x114   : > { %4829 = vrot.lane.b32.xlu1 %v6033_v4, %s5377_s9  ;;  %4834 = vrot.lane.b32.xlu0 %v8461_v54, %s5378_s12  ;;  %v4316_v35 = vunpack.i.l.bf16 %v6097_v6  ;;  %s6805_s9 = scalar_lea.vmem %s8245_s5, %s5438_s23 }
 0x115   : > { %v1643_v63 = vsel %vm1642_vm10, %v1610_v9, %v4541_v18  ;;  %v1644_v62 = vsel %vm1642_vm10, %v1611_v17, %v4542_v23  ;;  %v1645_v61 = vsel %vm1642_vm10, %v1612_v8, %v4546_v51  ;;  %v1646_v42 = vsel %vm1642_vm10, %v1613_v52, %v4547_v22  ;;  %v8464_v51 = vld [vmem:[#allocation27_spill] sm:$0xff] }
 0x116   : > { %v4550_v25 = vpop.permute.xlu1 %4549  ;;  %v4555_v36 = vpop.permute.xlu0 %4554  ;;  %v8462_v23 = vunpack.i.l.bf16 %v6022_v60  ;;  %v4322_v54 = vunpack.i.h.bf16 %v8464_v51  ;;  %v8466_v9 = vld [vmem:[#allocation15_spill] sm:$0xff]  ;;  %v4397_v8 = vunpack.i.h.bf16 %v6235_v38  ;;  %v4396_v52 = vunpack.i.l.bf16 %v6235_v38  ;;  %v8467_v60 = vld [vmem:[#allocation5_spill] sm:$0xff] }
 0x117   : > { %v4552_v45 = vunpack.i.h.bf16 %v4550_v25  ;;  %v4551_v29 = vunpack.i.l.bf16 %v4550_v25  ;;  %v4557_v13 = vunpack.i.h.bf16 %v4555_v36  ;;  %v4556_v30 = vunpack.i.l.bf16 %v4555_v36 }
 0x118   : > { %4839 = vrot.lane.b32.xlu1 %v6429_v43, %s5378_s12  ;;  %4844 = vrot.lane.b32.xlu0 %v8460_v58, %s5379_s13  ;;  %v1451_v22 = vsel %vm1444_vm4, %v8463_v46, %v8462_v23  ;;  %v4321_v58 = vunpack.i.l.bf16 %v8464_v51  ;;  %v8465_v25 = vunpack.i.h.bf16 %v6037_v27  ;;  %v4482_v46 = vunpack.i.h.bf16 %v6353_v33 }
 0x119   : > { %v1676_v34 = vsel %vm1675_vm11, %v1643_v63, %v4551_v29  ;;  %v1677_v28 = vsel %vm1675_vm11, %v1644_v62, %v4552_v45  ;;  %v1678_v49 = vsel %vm1675_vm11, %v1645_v61, %v4556_v30  ;;  %v1679_v14 = vsel %vm1675_vm11, %v1646_v42, %v4557_v13  ;;  %v8469_v29 = vld [vmem:[#allocation16_spill] sm:$0xff]  ;;  %v8470_v13 = vld [vmem:[#allocation22_spill] sm:$0xff] }
 0x11a   : > { %v4560_v18 = vpop.permute.xlu1 %4559  ;;  %v1708_v53 = vpack.c.bf16 %v1677_v28, %v1676_v34  ;;  %v4565_v21 = vpop.permute.xlu0 %4564  ;;  %v1709_v15 = vpack.c.bf16 %v1679_v14, %v1678_v49  ;;  %v6487_v17 = vsel %vm1444_vm4, %v8466_v9, %v8465_v25  ;;  %v8468_v45 = vunpack.i.l.bf16 %v6037_v27  ;;  %v8472_v34 = vld [vmem:[#allocation28_spill] sm:$0xff] }
 0x11b   : > { %v4252_v30 = vunpack.i.h.bf16 %v8470_v13  ;;  %v4402_v63 = vunpack.i.h.bf16 %v6241_v16  ;;  %v4401_v62 = vunpack.i.l.bf16 %v6241_v16  ;;  %v4251_v38 = vunpack.i.l.bf16 %v8470_v13 }
 0x11c   : > { %4849 = vrot.lane.b32.xlu1 %v8467_v60, %s5379_s13  ;;  %4118 = vmatprep.mubr.msk.bf16.mxu0 %vm1741_vm12, %v1708_v53  ;;  %v6498_v36 = vsel %vm1444_vm4, %v8469_v29, %v8468_v45  ;;  %v8471_v61 = vunpack.i.h.bf16 %v6097_v6  ;;  %v1482_v42 = vsel %vm1477_vm5, %v6402_v1, %v4316_v35  ;;  %v4327_v28 = vunpack.i.h.bf16 %v8472_v34  ;;  %v8473_v35 = vld [vmem:[#allocation34_spill] sm:$0xff] }
 0x11d   : > { %4854 = vrot.lane.b32.xlu0 %v6033_v4, %s5380_s14  ;;  %4119 = vmatmul.mubr.msk.bf16.vlgmr.msra.gmra.mxu0 %vm1741_vm12, %v1709_v15  ;;  %v1485_v16 = vsel %vm1477_vm5, %v6415_v3, %v4322_v54  ;;  %v1484_v4 = vsel %vm1477_vm5, %v1451_v22, %v4321_v58  ;;  %v4477_v14 = vunpack.i.h.bf16 %v6347_v40  ;;  %v4476_v53 = vunpack.i.l.bf16 %v6347_v40 }
 0x11e   : > { %v1483_v27 = vsel %vm1477_vm5, %v6396_v2, %v8471_v61  ;;  %v4570_v49 = vpop.permute.xlu1 %4569  ;;  %v4575_v23 = vpop.permute.xlu0 %4574  ;;  %v1515_v6 = vsel %vm1510_vm6, %v1482_v42, %v4396_v52  ;;  %v4481_v1 = vunpack.i.l.bf16 %v6353_v33  ;;  %v1517_v3 = vsel %vm1510_vm6, %v1484_v4, %v4401_v62 }
 0x11f   : > { %v1516_v2 = vsel %vm1510_vm6, %v1483_v27, %v4397_v8  ;;  %v1518_v22 = vsel %vm1510_vm6, %v1485_v16, %v4402_v63  ;;  %v4562_v51 = vunpack.i.h.bf16 %v4560_v18  ;;  %v4561_v54 = vunpack.i.l.bf16 %v4560_v18 }
 0x120   : > { %4859 = vrot.lane.b32.xlu1 %v8473_v35, %s5380_s14  ;;  %v4567_v58 = vunpack.i.h.bf16 %v4565_v21  ;;  %v4566_v40 = vunpack.i.l.bf16 %v4565_v21  ;;  %v4572_v15 = vunpack.i.h.bf16 %v4570_v49  ;;  %v4571_v25 = vunpack.i.l.bf16 %v4570_v49 }
 0x121   : > { %v1548_v8 = vsel %vm1543_vm7, %v1515_v6, %v4476_v53  ;;  %v1549_v52 = vsel %vm1543_vm7, %v1516_v2, %v4477_v14  ;;  %v4577_v45 = vunpack.i.h.bf16 %v4575_v23  ;;  %v4576_v33 = vunpack.i.l.bf16 %v4575_v23  ;;  %4864 = vrot.lane.b32.xlu0 %v8467_v60, %s5381_s15 }
 0x122   : > { %v4580_v9 = vpop.permute.xlu1 %4579  ;;  %v4585_v29 = vpop.permute.xlu0 %4584  ;;  %v1550_v61 = vsel %vm1543_vm7, %v1517_v3, %v4481_v1  ;;  %v1551_v62 = vsel %vm1543_vm7, %v1518_v22, %v4482_v46  ;;  %v1581_v18 = vsel %vm1576_vm8, %v1548_v8, %v4561_v54  ;;  %v1582_v21 = vsel %vm1576_vm8, %v1549_v52, %v4562_v51 }
 0x123   : > { %v4582_v27 = vunpack.i.h.bf16 %v4580_v9  ;;  %v4581_v63 = vunpack.i.l.bf16 %v4580_v9  ;;  %v4587_v42 = vunpack.i.h.bf16 %v4585_v29  ;;  %v4586_v49 = vunpack.i.l.bf16 %v4585_v29 }
 0x124   : > { %v1584_v16 = vsel %vm1576_vm8, %v1551_v62, %v4567_v58  ;;  %v1583_v4 = vsel %vm1576_vm8, %v1550_v61, %v4566_v40  ;;  %v1614_v14 = vsel %vm1609_vm9, %v1581_v18, %v4571_v25  ;;  %v1615_v53 = vsel %vm1609_vm9, %v1582_v21, %v4572_v15  ;;  %v8474_v61 = vld [vmem:[#allocation17_spill] sm:$0xff]  ;;  %4869 = vrot.lane.b32.xlu1 %v8473_v35, %s5382_s16 }
 0x125   : > { %v1616_v6 = vsel %vm1609_vm9, %v1583_v4, %v4576_v33  ;;  %v1617_v2 = vsel %vm1609_vm9, %v1584_v16, %v4577_v45  ;;  %v1647_v22 = vsel %vm1642_vm10, %v1614_v14, %v4581_v63  ;;  %v1648_v51 = vsel %vm1642_vm10, %v1615_v53, %v4582_v27  ;;  %v8475_v27 = vld [vmem:[#allocation29_spill] sm:$0xff] }
 0x126   : > { %v4590_v23 = vpop.permute.xlu1 %4589  ;;  %v4595_v3 = vpop.permute.xlu0 %4594  ;;  %v1649_v40 = vsel %vm1642_vm10, %v1616_v6, %v4586_v49  ;;  %v1650_v25 = vsel %vm1642_vm10, %v1617_v2, %v4587_v42  ;;  %v4326_v8 = vunpack.i.l.bf16 %v8472_v34  ;;  %v1456_v62 = vsel %vm1444_vm4, %v8474_v61, %v4252_v30  ;;  %v8476_v49 = vld [vmem:[#allocation18_spill] sm:$0xff]  ;;  %v8477_v4 = vld [vmem:[#allocation25_spill] sm:$0xff] }
 0x127   : > { %v4592_v46 = vunpack.i.h.bf16 %v4590_v23  ;;  %v4591_v1 = vunpack.i.l.bf16 %v4590_v23  ;;  %v4597_v54 = vunpack.i.h.bf16 %v4595_v3  ;;  %v4596_v58 = vunpack.i.l.bf16 %v4595_v3  ;;  %v8478_v6 = vld [vmem:[#allocation26_spill] sm:$0xff] }
 0x128   : > { %v4332_v63 = vunpack.i.h.bf16 %v8475_v27  ;;  %v4331_v18 = vunpack.i.l.bf16 %v8475_v27  ;;  %v1455_v16 = vsel %vm1444_vm4, %v8476_v49, %v4251_v38  ;;  %v4257_v14 = vunpack.i.h.bf16 %v8477_v4  ;;  %v8479_v3 = vld [vmem:[#allocation30_spill] sm:$0xff] }
 0x129   : > { %v1680_v15 = vsel %vm1675_vm11, %v1647_v22, %v4591_v1  ;;  %v1681_v9 = vsel %vm1675_vm11, %v1648_v51, %v4592_v46  ;;  %v1682_v52 = vsel %vm1675_vm11, %v1649_v40, %v4596_v58  ;;  %v1683_v45 = vsel %vm1675_vm11, %v1650_v25, %v4597_v54 }
 0x12a   : > { %v4600_v33 = vpop.permute.xlu1 %4599  ;;  %v1710_v29 = vpack.c.bf16 %v1681_v9, %v1680_v15  ;;  %v4605_v21 = vpop.permute.xlu0 %4604  ;;  %v1711_v42 = vpack.c.bf16 %v1683_v45, %v1682_v52  ;;  %v4407_v53 = vunpack.i.h.bf16 %v6243_v7  ;;  %v4406_v23 = vunpack.i.l.bf16 %v6243_v7 }
 0x12b   : > { %v4256_v30 = vunpack.i.l.bf16 %v8477_v4  ;;  %v4262_v2 = vunpack.i.h.bf16 %v8478_v6  ;;  %v4412_v46 = vunpack.i.h.bf16 %v6249_v26  ;;  %v4411_v1 = vunpack.i.l.bf16 %v6249_v26 }
 0x12c   : > { %4122 = vmatprep.mubr.msk.bf16.mxu0 %vm1741_vm12, %v1710_v29  ;;  %v4261_v13 = vunpack.i.l.bf16 %v8478_v6  ;;  %v1486_v38 = vsel %vm1477_vm5, %v6498_v36, %v4326_v8  ;;  %v1487_v7 = vsel %vm1477_vm5, %v6487_v17, %v4327_v28  ;;  %v4337_v22 = vunpack.i.h.bf16 %v8479_v3 }
 0x12d   : > { %4123 = vmatmul.mubr.msk.bf16.gmra.mxu0 %vm1741_vm12, %v1711_v42  ;;  %v1489_v54 = vsel %vm1477_vm5, %v1456_v62, %v4332_v63  ;;  %v1488_v58 = vsel %vm1477_vm5, %v1455_v16, %v4331_v18  ;;  %v4487_v26 = vunpack.i.h.bf16 %v6355_v56  ;;  %v4486_v40 = vunpack.i.l.bf16 %v6355_v56 }
 0x12e   : > { %v4610_v51 = vpop.permute.xlu1 %4609  ;;  %v4615_v25 = vpop.permute.xlu0 %4614  ;;  %v1519_v15 = vsel %vm1510_vm6, %v1486_v38, %v4406_v23  ;;  %v1520_v36 = vsel %vm1510_vm6, %v1487_v7, %v4407_v53  ;;  %v4492_v34 = vunpack.i.h.bf16 %v6361_v41  ;;  %v4491_v17 = vunpack.i.l.bf16 %v6361_v41 }
 0x12f   : > { %v1521_v28 = vsel %vm1510_vm6, %v1488_v58, %v4411_v1  ;;  %v1522_v9 = vsel %vm1510_vm6, %v1489_v54, %v4412_v46  ;;  %v4602_v8 = vunpack.i.h.bf16 %v4600_v33  ;;  %v4601_v52 = vunpack.i.l.bf16 %v4600_v33 }
 0x130   : > { %v4607_v45 = vunpack.i.h.bf16 %v4605_v21  ;;  %v4606_v29 = vunpack.i.l.bf16 %v4605_v21  ;;  %v4612_v61 = vunpack.i.h.bf16 %v4610_v51  ;;  %v4611_v62 = vunpack.i.l.bf16 %v4610_v51 }
 0x131   : > { %v1552_v27 = vsel %vm1543_vm7, %v1519_v15, %v4486_v40  ;;  %v1553_v63 = vsel %vm1543_vm7, %v1520_v36, %v4487_v26  ;;  %v4617_v18 = vunpack.i.h.bf16 %v4615_v25  ;;  %v4616_v42 = vunpack.i.l.bf16 %v4615_v25 }
 0x132   : > { %v4620_v56 = vpop.permute.xlu1 %4619  ;;  %v4625_v49 = vpop.permute.xlu0 %4624  ;;  %v1554_v41 = vsel %vm1543_vm7, %v1521_v28, %v4491_v17  ;;  %v1555_v16 = vsel %vm1543_vm7, %v1522_v9, %v4492_v34  ;;  %v1585_v33 = vsel %vm1576_vm8, %v1552_v27, %v4601_v52  ;;  %v1586_v21 = vsel %vm1576_vm8, %v1553_v63, %v4602_v8 }
 0x133   : > { %v4622_v53 = vunpack.i.h.bf16 %v4620_v56  ;;  %v4621_v23 = vunpack.i.l.bf16 %v4620_v56  ;;  %v4627_v46 = vunpack.i.h.bf16 %v4625_v49  ;;  %v4626_v1 = vunpack.i.l.bf16 %v4625_v49 }
 0x134   : > { %v1588_v38 = vsel %vm1576_vm8, %v1555_v16, %v4607_v45  ;;  %v1587_v7 = vsel %vm1576_vm8, %v1554_v41, %v4606_v29  ;;  %v1618_v51 = vsel %vm1609_vm9, %v1585_v33, %v4611_v62  ;;  %v1619_v54 = vsel %vm1609_vm9, %v1586_v21, %v4612_v61  ;;  %v8481_v33 = vld [vmem:[#allocation20_spill] sm:$0xff] }
 0x135   : > { %v1620_v26 = vsel %vm1609_vm9, %v1587_v7, %v4616_v42  ;;  %v1621_v40 = vsel %vm1609_vm9, %v1588_v38, %v4617_v18  ;;  %v1651_v34 = vsel %vm1642_vm10, %v1618_v51, %v4621_v23  ;;  %v1652_v17 = vsel %vm1642_vm10, %v1619_v54, %v4622_v53  ;;  %v8480_v18 = vld [vmem:[#allocation40_spill] sm:$0xff] }
 0x136   : > { %v4630_v58 = vpop.permute.xlu1 %4629  ;;  %v4635_v36 = vpop.permute.xlu0 %4634  ;;  %v1653_v8 = vsel %vm1642_vm10, %v1620_v26, %v4626_v1  ;;  %v1654_v52 = vsel %vm1642_vm10, %v1621_v40, %v4627_v46  ;;  %v4336_v61 = vunpack.i.l.bf16 %v8479_v3  ;;  %v4342_v42 = vunpack.i.h.bf16 %v8480_v18  ;;  %v8482_v46 = vld [vmem:[#allocation21_spill] sm:$0xff]  ;;  %v8484_v54 = vld [vmem:[#allocation24_spill] sm:$0xff] }
 0x137   : > { %v4632_v25 = vunpack.i.h.bf16 %v4630_v58  ;;  %v4631_v15 = vunpack.i.l.bf16 %v4630_v58  ;;  %v4637_v28 = vunpack.i.h.bf16 %v4635_v36  ;;  %v4636_v9 = vunpack.i.l.bf16 %v4635_v36 }
 0x138   : > { %v4341_v49 = vunpack.i.l.bf16 %v8480_v18  ;;  %v4417_v53 = vunpack.i.h.bf16 %v6251_v24  ;;  %v4416_v23 = vunpack.i.l.bf16 %v6251_v24  ;;  %v1458_v21 = vsel %vm1444_vm4, %v8481_v33, %v4257_v14  ;;  %v8483_v24 = vld [vmem:[#allocation23_spill] sm:$0xff] }
 0x139   : > { %v1684_v45 = vsel %vm1675_vm11, %v1651_v34, %v4631_v15  ;;  %v1685_v29 = vsel %vm1675_vm11, %v1652_v17, %v4632_v25  ;;  %v1686_v62 = vsel %vm1675_vm11, %v1653_v8, %v4636_v9  ;;  %v1687_v56 = vsel %vm1675_vm11, %v1654_v52, %v4637_v28 }
 0x13a   : > { %v4640_v27 = vpop.permute.xlu1 %4639  ;;  %v1712_v63 = vpack.c.bf16 %v1685_v29, %v1684_v45  ;;  %v4645_v41 = vpop.permute.xlu0 %4644  ;;  %v1713_v16 = vpack.c.bf16 %v1687_v56, %v1686_v62  ;;  %v1457_v1 = vsel %vm1444_vm4, %v8482_v46, %v4256_v30  ;;  %v4422_v38 = vunpack.i.h.bf16 %v6257_v59 }
 0x13b   : > { %v4421_v7 = vunpack.i.l.bf16 %v6257_v59  ;;  %v1460_v51 = vsel %vm1444_vm4, %v8483_v24, %v4262_v2  ;;  %v1459_v14 = vsel %vm1444_vm4, %v8484_v54, %v4261_v13  ;;  %v1490_v4 = vsel %vm1477_vm5, %v1457_v1, %v4336_v61 }
 0x13c   : > { %4126 = vmatprep.mubr.msk.bf16.mxu0 %vm1741_vm12, %v1712_v63  ;;  %v1491_v30 = vsel %vm1477_vm5, %v1458_v21, %v4337_v22  ;;  %v1493_v59 = vsel %vm1477_vm5, %v1460_v51, %v4342_v42  ;;  %v1492_v26 = vsel %vm1477_vm5, %v1459_v14, %v4341_v49  ;;  %v4497_v40 = vunpack.i.h.bf16 %v6363_v47 }
 0x13d   : > { %4127 = vmatmul.mubr.msk.bf16.gmra.mxu0 %vm1741_vm12, %v1713_v16  ;;  %v4496_v2 = vunpack.i.l.bf16 %v6363_v47  ;;  %v1523_v6 = vsel %vm1510_vm6, %v1490_v4, %v4416_v23  ;;  %v1524_v13 = vsel %vm1510_vm6, %v1491_v30, %v4417_v53  ;;  %v4502_v15 = vunpack.i.h.bf16 %v6369_v20 }
 0x13e   : > { %v4650_v58 = vpop.permute.xlu1 %4649  ;;  %v4655_v25 = vpop.permute.xlu0 %4654  ;;  %v4501_v3 = vunpack.i.l.bf16 %v6369_v20  ;;  %v1525_v22 = vsel %vm1510_vm6, %v1492_v26, %v4421_v7  ;;  %v1526_v36 = vsel %vm1510_vm6, %v1493_v59, %v4422_v38  ;;  %v4642_v34 = vunpack.i.h.bf16 %v4640_v27 }
 0x13f   : > { %v4641_v17 = vunpack.i.l.bf16 %v4640_v27  ;;  %v4647_v28 = vunpack.i.h.bf16 %v4645_v41  ;;  %v4646_v9 = vunpack.i.l.bf16 %v4645_v41  ;;  %v4652_v8 = vunpack.i.h.bf16 %v4650_v58 }
 0x140   : > { %v4651_v52 = vunpack.i.l.bf16 %v4650_v58  ;;  %v1556_v45 = vsel %vm1543_vm7, %v1523_v6, %v4496_v2  ;;  %v1557_v29 = vsel %vm1543_vm7, %v1524_v13, %v4497_v40  ;;  %v4657_v61 = vunpack.i.h.bf16 %v4655_v25 }
 0x141   : > { %v4656_v62 = vunpack.i.l.bf16 %v4655_v25  ;;  %v1558_v20 = vsel %vm1543_vm7, %v1525_v22, %v4501_v3  ;;  %v1559_v63 = vsel %vm1543_vm7, %v1526_v36, %v4502_v15  ;;  %v1589_v27 = vsel %vm1576_vm8, %v1556_v45, %v4641_v17 }
 0x142   : > { %v4660_v47 = vpop.permute.xlu1 %4659  ;;  %v4665_v56 = vpop.permute.xlu0 %4664  ;;  %v1590_v49 = vsel %vm1576_vm8, %v1557_v29, %v4642_v34  ;;  %v1592_v53 = vsel %vm1576_vm8, %v1559_v63, %v4647_v28  ;;  %v1591_v23 = vsel %vm1576_vm8, %v1558_v20, %v4646_v9  ;;  %v1622_v33 = vsel %vm1609_vm9, %v1589_v27, %v4651_v52 }
 0x143   : > { %v4662_v18 = vunpack.i.h.bf16 %v4660_v47  ;;  %v4661_v42 = vunpack.i.l.bf16 %v4660_v47  ;;  %v4667_v41 = vunpack.i.h.bf16 %v4665_v56  ;;  %v4666_v16 = vunpack.i.l.bf16 %v4665_v56 }
 0x144   : > { %v1623_v21 = vsel %vm1609_vm9, %v1590_v49, %v4652_v8  ;;  %v1624_v1 = vsel %vm1609_vm9, %v1591_v23, %v4656_v62  ;;  %v1625_v38 = vsel %vm1609_vm9, %v1592_v53, %v4657_v61  ;;  %v4507_v36 = vunpack.i.h.bf16 %v6371_v10 }
 0x145   : > { %v1655_v54 = vsel %vm1642_vm10, %v1622_v33, %v4661_v42  ;;  %v1656_v14 = vsel %vm1642_vm10, %v1623_v21, %v4662_v18  ;;  %v1657_v58 = vsel %vm1642_vm10, %v1624_v1, %v4666_v16  ;;  %v1658_v59 = vsel %vm1642_vm10, %v1625_v38, %v4667_v41 }
 0x146   : > { %v4670_v46 = vpop.permute.xlu1 %4669  ;;  %v4675_v51 = vpop.permute.xlu0 %4674  ;;  %v4506_v34 = vunpack.i.l.bf16 %v6371_v10  ;;  %v4512_v28 = vunpack.i.h.bf16 %v6382_v5  ;;  %v4511_v9 = vunpack.i.l.bf16 %v6382_v5  ;;  %v1561_v20 = vsel %vm1543_vm7, %v6269_v37, %v4507_v36 }
 0x147   : > { %v4672_v7 = vunpack.i.h.bf16 %v4670_v46  ;;  %v4671_v24 = vunpack.i.l.bf16 %v4670_v46  ;;  %v4677_v4 = vunpack.i.h.bf16 %v4675_v51  ;;  %v4676_v30 = vunpack.i.l.bf16 %v4675_v51 }
 0x148   : > { %v1560_v56 = vsel %vm1543_vm7, %v6265_v44, %v4506_v34  ;;  %v1562_v42 = vsel %vm1543_vm7, %v6275_v48, %v4511_v9  ;;  %v1563_v5 = vsel %vm1543_vm7, %v6279_v57, %v4512_v28  ;;  %v4516_v36 = vunpack.i.l.bf16 %v6385_v32 }
 0x149   : > { %v1688_v26 = vsel %vm1675_vm11, %v1655_v54, %v4671_v24  ;;  %v1689_v40 = vsel %vm1675_vm11, %v1656_v14, %v4672_v7  ;;  %v1690_v2 = vsel %vm1675_vm11, %v1657_v58, %v4676_v30  ;;  %v1691_v25 = vsel %vm1675_vm11, %v1658_v59, %v4677_v4 }
 0x14a   : > { %v4680_v6 = vpop.permute.xlu1 %4679  ;;  %v1714_v13 = vpack.c.bf16 %v1689_v40, %v1688_v26  ;;  %v4685_v15 = vpop.permute.xlu0 %4684  ;;  %v1715_v3 = vpack.c.bf16 %v1691_v25, %v1690_v2 }
 0x14b   : > { %v4682_v8 = vunpack.i.h.bf16 %v4680_v6  ;;  %v4681_v52 = vunpack.i.l.bf16 %v4680_v6  ;;  %v4687_v47 = vunpack.i.h.bf16 %v4685_v15  ;;  %v4686_v45 = vunpack.i.l.bf16 %v4685_v15 }
 0x14c   : > { %4130 = vmatprep.mubr.msk.bf16.mxu0 %vm1741_vm12, %v1714_v13 }
 0x14d   : > { %4131 = vmatmul.mubr.msk.bf16.gmra.mxu0 %vm1741_vm12, %v1715_v3  ;;  %v1593_v41 = vsel %vm1576_vm8, %v1560_v56, %v4681_v52  ;;  %v1594_v16 = vsel %vm1576_vm8, %v1561_v20, %v4682_v8  ;;  %v1596_v23 = vsel %vm1576_vm8, %v1563_v5, %v4687_v47  ;;  %v1595_v37 = vsel %vm1576_vm8, %v1562_v42, %v4686_v45 }
 0x14e   : > { %v4690_v22 = vpop.permute.xlu1 %4689  ;;  %v4695_v17 = vpop.permute.xlu0 %4694  ;;  %v1564_v45 = vsel %vm1543_vm7, %v6285_v55, %v4516_v36 }
 0x14f   : > { %v4692_v29 = vunpack.i.h.bf16 %v4690_v22  ;;  %v4691_v61 = vunpack.i.l.bf16 %v4690_v22  ;;  %v4697_v63 = vunpack.i.h.bf16 %v4695_v17  ;;  %v4696_v10 = vunpack.i.l.bf16 %v4695_v17 }
 0x150   : > { %v4517_v22 = vunpack.i.h.bf16 %v6385_v32 }
 0x151   : > { %v1626_v33 = vsel %vm1609_vm9, %v1593_v41, %v4691_v61  ;;  %v1627_v21 = vsel %vm1609_vm9, %v1594_v16, %v4692_v29  ;;  %v1628_v46 = vsel %vm1609_vm9, %v1595_v37, %v4696_v10  ;;  %v1629_v57 = vsel %vm1609_vm9, %v1596_v23, %v4697_v63 }
 0x152   : > { %v4700_v62 = vpop.permute.xlu1 %4699  ;;  %v4705_v18 = vpop.permute.xlu0 %4704  ;;  %v1565_v29 = vsel %vm1543_vm7, %v6289_v11, %v4517_v22 }
 0x153   : > { %v4702_v27 = vunpack.i.h.bf16 %v4700_v62  ;;  %v4701_v49 = vunpack.i.l.bf16 %v4700_v62  ;;  %v4707_v53 = vunpack.i.h.bf16 %v4705_v18  ;;  %v4706_v44 = vunpack.i.l.bf16 %v4705_v18 }
 0x155   : > { %v1659_v24 = vsel %vm1642_vm10, %v1626_v33, %v4701_v49  ;;  %v1660_v51 = vsel %vm1642_vm10, %v1627_v21, %v4702_v27  ;;  %v1661_v4 = vsel %vm1642_vm10, %v1628_v46, %v4706_v44  ;;  %v1662_v30 = vsel %vm1642_vm10, %v1629_v57, %v4707_v53 }
 0x156   : > { %v4710_v48 = vpop.permute.xlu1 %4709  ;;  %v4715_v7 = vpop.permute.xlu0 %4714 }
 0x157   : > { %v4712_v1 = vunpack.i.h.bf16 %v4710_v48  ;;  %v4711_v38 = vunpack.i.l.bf16 %v4710_v48  ;;  %v4717_v54 = vunpack.i.h.bf16 %v4715_v7  ;;  %v4716_v14 = vunpack.i.l.bf16 %v4715_v7 }
 0x159   : > { %v1692_v58 = vsel %vm1675_vm11, %v1659_v24, %v4711_v38  ;;  %v1693_v59 = vsel %vm1675_vm11, %v1660_v51, %v4712_v1  ;;  %v1694_v26 = vsel %vm1675_vm11, %v1661_v4, %v4716_v14  ;;  %v1695_v40 = vsel %vm1675_vm11, %v1662_v30, %v4717_v54 }
 0x15a   : > { %v4720_v2 = vpop.permute.xlu1 %4719  ;;  %v1716_v25 = vpack.c.bf16 %v1693_v59, %v1692_v58  ;;  %v4725_v6 = vpop.permute.xlu0 %4724  ;;  %v1717_v13 = vpack.c.bf16 %v1695_v40, %v1694_v26 }
 0x15b   : > { %v4721_v34 = vunpack.i.l.bf16 %v4720_v2  ;;  %v4726_v17 = vunpack.i.l.bf16 %v4725_v6  ;;  %v4727_v28 = vunpack.i.h.bf16 %v4725_v6  ;;  %v4722_v61 = vunpack.i.h.bf16 %v4720_v2 }
 0x15c   : > { %4134 = vmatprep.mubr.msk.bf16.mxu0 %vm1741_vm12, %v1716_v25 }
 0x15d   : > { %4135 = vmatmul.mubr.msk.bf16.gmra.mxu0 %vm1741_vm12, %v1717_v13  ;;  %v1566_v62 = vsel %vm1543_vm7, %v6295_v31, %v4721_v34  ;;  %v1597_v56 = vsel %vm1576_vm8, %v1564_v45, %v4726_v17  ;;  %v1598_v10 = vsel %vm1576_vm8, %v1565_v29, %v4727_v28  ;;  %v1567_v44 = vsel %vm1543_vm7, %v6299_v39, %v4722_v61 }
 0x15e   : > { %v4730_v15 = vpop.permute.xlu1 %4729  ;;  %v4735_v3 = vpop.permute.xlu0 %4734 }
 0x15f   : > { %v4737_v8 = vunpack.i.h.bf16 %v4735_v3  ;;  %v4736_v52 = vunpack.i.l.bf16 %v4735_v3  ;;  %v4731_v32 = vunpack.i.l.bf16 %v4730_v15  ;;  %v4732_v18 = vunpack.i.h.bf16 %v4730_v15 }
 0x161   : > { %v1630_v27 = vsel %vm1609_vm9, %v1597_v56, %v4736_v52  ;;  %v1631_v55 = vsel %vm1609_vm9, %v1598_v10, %v4737_v8  ;;  %v1599_v23 = vsel %vm1576_vm8, %v1566_v62, %v4731_v32  ;;  %v1600_v21 = vsel %vm1576_vm8, %v1567_v44, %v4732_v18 }
 0x162   : > { %v4740_v9 = vpop.permute.xlu1 %4739  ;;  %v4745_v47 = vpop.permute.xlu0 %4744 }
 0x163   : > { %v4747_v20 = vunpack.i.h.bf16 %v4745_v47  ;;  %v4746_v63 = vunpack.i.l.bf16 %v4745_v47  ;;  %v4741_v42 = vunpack.i.l.bf16 %v4740_v9  ;;  %v4742_v49 = vunpack.i.h.bf16 %v4740_v9 }
 0x165   : > { %v1663_v37 = vsel %vm1642_vm10, %v1630_v27, %v4746_v63  ;;  %v1664_v33 = vsel %vm1642_vm10, %v1631_v55, %v4747_v20  ;;  %v1632_v48 = vsel %vm1609_vm9, %v1599_v23, %v4741_v42  ;;  %v1633_v39 = vsel %vm1609_vm9, %v1600_v21, %v4742_v49 }
 0x166   : > { %v4750_v5 = vpop.permute.xlu1 %4749  ;;  %v4755_v41 = vpop.permute.xlu0 %4754 }
 0x167   : > { %v4752_v11 = vunpack.i.h.bf16 %v4750_v5  ;;  %v4751_v16 = vunpack.i.l.bf16 %v4750_v5  ;;  %v4757_v53 = vunpack.i.h.bf16 %v4755_v41  ;;  %v4756_v31 = vunpack.i.l.bf16 %v4755_v41 }
 0x169   : > { %v1696_v46 = vsel %vm1675_vm11, %v1663_v37, %v4756_v31  ;;  %v1697_v57 = vsel %vm1675_vm11, %v1664_v33, %v4757_v53  ;;  %v1665_v54 = vsel %vm1642_vm10, %v1632_v48, %v4751_v16  ;;  %v1666_v14 = vsel %vm1642_vm10, %v1633_v39, %v4752_v11 }
 0x16a   : > { %v4760_v1 = vpop.permute.xlu1 %4759  ;;  %v4765_v24 = vpop.permute.xlu0 %4764  ;;  %v1718_v51 = vpack.c.bf16 %v1697_v57, %v1696_v46 }
 0x16b   : > { %v4762_v38 = vunpack.i.h.bf16 %v4760_v1  ;;  %v4761_v7 = vunpack.i.l.bf16 %v4760_v1  ;;  %v4767_v2 = vunpack.i.h.bf16 %v4765_v24  ;;  %v4766_v25 = vunpack.i.l.bf16 %v4765_v24 }
 0x16c   : > { %4138 = vmatprep.mubr.msk.bf16.mxu0 %vm1741_vm12, %v1718_v51 }
 0x16d   : > { %v1698_v4 = vsel %vm1675_vm11, %v1665_v54, %v4761_v7  ;;  %v1699_v30 = vsel %vm1675_vm11, %v1666_v14, %v4762_v38  ;;  %v1568_v17 = vsel %vm1543_vm7, %v6305_v12, %v4766_v25  ;;  %v1569_v28 = vsel %vm1543_vm7, %v6309_v19, %v4767_v2  ;;  %v8486_v25 = vld [vmem:[#allocation41_spill] sm:$0xff] }
 0x16e   : > { %v4770_v58 = vpop.permute.xlu1 %4769  ;;  %v1719_v59 = vpack.c.bf16 %v1699_v30, %v1698_v4  ;;  %v4775_v26 = vpop.permute.xlu0 %4774 }
 0x16f   : > { %v4777_v6 = vunpack.i.h.bf16 %v4775_v26  ;;  %v4776_v13 = vunpack.i.l.bf16 %v4775_v26  ;;  %v4771_v3 = vunpack.i.l.bf16 %v4770_v58  ;;  %v4772_v9 = vunpack.i.h.bf16 %v4770_v58 }
 0x170   : > { %4139 = vmatmul.mubr.msk.bf16.gmra.mxu0 %vm1741_vm12, %v1719_v59 }
 0x171   : > { %v1601_v45 = vsel %vm1576_vm8, %v1568_v17, %v4776_v13  ;;  %v1602_v29 = vsel %vm1576_vm8, %v1569_v28, %v4777_v6  ;;  %v1570_v32 = vsel %vm1543_vm7, %v6315_v0, %v4771_v3  ;;  %v1571_v27 = vsel %vm1543_vm7, %v6319_v50, %v4772_v9 }
 0x172   : > { %v4780_v35 = vpop.permute.xlu1 %4779  ;;  %v4785_v40 = vpop.permute.xlu0 %4784 }
 0x173   : > { %v4787_v22 = vunpack.i.h.bf16 %v4785_v40  ;;  %v4786_v36 = vunpack.i.l.bf16 %v4785_v40  ;;  %v4781_v8 = vunpack.i.l.bf16 %v4780_v35  ;;  %v4782_v61 = vunpack.i.h.bf16 %v4780_v35  ;;  %v8485_v40 = vld [vmem:[#allocation31_spill] sm:$0xff] }
 0x175   : > { %v1634_v20 = vsel %vm1609_vm9, %v1601_v45, %v4786_v36  ;;  %v1635_v12 = vsel %vm1609_vm9, %v1602_v29, %v4787_v22  ;;  %v1603_v55 = vsel %vm1576_vm8, %v1570_v32, %v4781_v8  ;;  %v1604_v0 = vsel %vm1576_vm8, %v1571_v27, %v4782_v61  ;;  %v8487_v8 = vld [vmem:[#allocation32_spill] sm:$0xff] }
 0x176   : > { %v4790_v15 = vpop.permute.xlu1 %4789  ;;  %v4795_v34 = vpop.permute.xlu0 %4794 }
 0x177   : > { %v4797_v52 = vunpack.i.h.bf16 %v4795_v34  ;;  %v4796_v47 = vunpack.i.l.bf16 %v4795_v34  ;;  %v4791_v62 = vunpack.i.l.bf16 %v4790_v15  ;;  %v4792_v63 = vunpack.i.h.bf16 %v4790_v15 }
 0x179   : > { %v1667_v49 = vsel %vm1642_vm10, %v1634_v20, %v4796_v47  ;;  %v1668_v11 = vsel %vm1642_vm10, %v1635_v12, %v4797_v52  ;;  %v1636_v41 = vsel %vm1609_vm9, %v1603_v55, %v4791_v62  ;;  %v1637_v44 = vsel %vm1609_vm9, %v1604_v0, %v4792_v63  ;;  %v8488_v12 = vld [vmem:[#allocation42_spill] sm:$0xff] }
 0x17a   : > { %v4800_v56 = vpop.permute.xlu1 %4799  ;;  %v4805_v19 = vpop.permute.xlu0 %4804 }
 0x17b   : > { %v4802_v10 = vunpack.i.h.bf16 %v4800_v56  ;;  %v4801_v18 = vunpack.i.l.bf16 %v4800_v56  ;;  %v4807_v42 = vunpack.i.h.bf16 %v4805_v19  ;;  %v4806_v5 = vunpack.i.l.bf16 %v4805_v19 }
 0x17d   : > { %v1700_v16 = vsel %vm1675_vm11, %v1667_v49, %v4806_v5  ;;  %v1701_v53 = vsel %vm1675_vm11, %v1668_v11, %v4807_v42  ;;  %v1669_v21 = vsel %vm1642_vm10, %v1636_v41, %v4801_v18  ;;  %v1670_v48 = vsel %vm1642_vm10, %v1637_v44, %v4802_v10 }
 0x17e   : > { %v4810_v31 = vpop.permute.xlu1 %4809  ;;  %v4815_v50 = vpop.permute.xlu0 %4814  ;;  %v1720_v33 = vpack.c.bf16 %v1701_v53, %v1700_v16 }
 0x17f   : > { %v4812_v23 = vunpack.i.h.bf16 %v4810_v31  ;;  %v4811_v37 = vunpack.i.l.bf16 %v4810_v31  ;;  %v4817_v51 = vunpack.i.h.bf16 %v4815_v50  ;;  %v4816_v54 = vunpack.i.l.bf16 %v4815_v50  ;;  %v5345_v50 = vld [vmem:[%s8243_s3 + $0x78] sm:$0xff]  }
 0x180   : > { %4142 = vmatprep.mubr.msk.bf16.mxu0 %vm1741_vm12, %v1720_v33  ;;  %v5346_v33 = vld [vmem:[%s8243_s3 + $0x38] sm:$0xff]   ;;  %3984 = vmatprep.subr.bf16.mxu0 %v5345_v50 }
 0x181   : > { %v1702_v46 = vsel %vm1675_vm11, %v1669_v21, %v4811_v37  ;;  %v1703_v57 = vsel %vm1675_vm11, %v1670_v48, %v4812_v23  ;;  %v1572_v2 = vsel %vm1543_vm7, %v8485_v40, %v4816_v54  ;;  %v1573_v6 = vsel %vm1543_vm7, %v8486_v25, %v4817_v51  ;;  %4186 = vmatprep.subr.bf16.mxu1 %v5345_v50  ;;  %v5347_v21 = vld [vmem:[%s8243_s3 + $0x70] sm:$0xff]   ;;  %v6792_v48 = vld [vmem:[%s8242_s2] ss:$0 sm:$0xff] }
 0x182   : > { %v4820_v1 = vpop.permute.xlu1 %4819  ;;  %v1721_v39 = vpack.c.bf16 %v1703_v57, %v1702_v46  ;;  %v4825_v38 = vpop.permute.xlu0 %4824  ;;  %3985 = vmatpush3.bf16.msra.mxu0 %v5346_v33  ;;  %4194 = vmatpush3.bf16.msra.mxu1 %v5346_v33  ;;  %v5348_v46 = vld [vmem:[%s8243_s3 + $0x30] sm:$0xff]  }
 0x183   : > { %v4827_v14 = vunpack.i.h.bf16 %v4825_v38  ;;  %v4826_v4 = vunpack.i.l.bf16 %v4825_v38  ;;  %v4821_v58 = vunpack.i.l.bf16 %v4820_v1  ;;  %v4822_v13 = vunpack.i.h.bf16 %v4820_v1  ;;  %3986 = vmatprep.subr.bf16.mxu0 %v5347_v21  ;;  %4187 = vmatprep.subr.bf16.mxu1 %v5347_v21 }
 0x184   : > { %4143 = vmatmul.mubr.msk.bf16.gmra.mxu0 %vm1741_vm12, %v1721_v39  ;;  %v5349_v39 = vld [vmem:[%s8243_s3 + $0x68] sm:$0xff]  }
 0x185   : > { %v1605_v36 = vsel %vm1576_vm8, %v1572_v2, %v4826_v4  ;;  %v1606_v34 = vsel %vm1576_vm8, %v1573_v6, %v4827_v14  ;;  %v1574_v52 = vsel %vm1543_vm7, %v8487_v8, %v4821_v58  ;;  %v1575_v63 = vsel %vm1543_vm7, %v8488_v12, %v4822_v13  ;;  %v5353_v6 = vld [vmem:[%s8243_s3 + $0x58] sm:$0xff]  }
 0x186   : > { %v4830_v7 = vpop.permute.xlu1 %4829  ;;  %v4835_v24 = vpop.permute.xlu0 %4834  ;;  %3987 = vmatpush3.bf16.msra.mxu0 %v5348_v46  ;;  %4195 = vmatpush3.bf16.msra.mxu1 %v5348_v46 }
 0x187   : > { %v4837_v59 = vunpack.i.h.bf16 %v4835_v24  ;;  %v4836_v26 = vunpack.i.l.bf16 %v4835_v24  ;;  %v4831_v15 = vunpack.i.l.bf16 %v4830_v7  ;;  %v4832_v17 = vunpack.i.h.bf16 %v4830_v7  ;;  %v5350_v7 = vld [vmem:[%s8243_s3 + $0x28] sm:$0xff]   ;;  %3988 = vmatprep.subr.bf16.mxu0 %v5349_v39  ;;  %4188 = vmatprep.subr.bf16.mxu1 %v5349_v39 }
 0x189   : > { %v1638_v47 = vsel %vm1609_vm9, %v1605_v36, %v4836_v26  ;;  %v1639_v45 = vsel %vm1609_vm9, %v1606_v34, %v4837_v59  ;;  %v1607_v19 = vsel %vm1576_vm8, %v1574_v52, %v4831_v15  ;;  %v1608_v42 = vsel %vm1576_vm8, %v1575_v63, %v4832_v17  ;;  %v5352_v59 = vld [vmem:[%s8243_s3 + $0x20] sm:$0xff]   ;;  %v5354_v15 = vld [vmem:[%s8243_s3 + $0x18] sm:$0xff]  }
 0x18a   : > { %v4840_v30 = vpop.permute.xlu1 %4839  ;;  %v4845_v35 = vpop.permute.xlu0 %4844  ;;  %3989 = vmatpush3.bf16.msra.mxu0 %v5350_v7  ;;  %4196 = vmatpush3.bf16.msra.mxu1 %v5350_v7 }
 0x18b   : > { %v4847_v3 = vunpack.i.h.bf16 %v4845_v35  ;;  %v4846_v22 = vunpack.i.l.bf16 %v4845_v35  ;;  %v4841_v28 = vunpack.i.l.bf16 %v4840_v30  ;;  %v4842_v29 = vunpack.i.h.bf16 %v4840_v30  ;;  %v5351_v30 = vld [vmem:[%s8243_s3 + $0x60] sm:$0xff]  }
 0x18c   : > { %3990 = vmatprep.subr.bf16.mxu0 %v5351_v30  ;;  %4189 = vmatprep.subr.bf16.mxu1 %v5351_v30 }
 0x18d   : > { %v1671_v10 = vsel %vm1642_vm10, %v1638_v47, %v4846_v22  ;;  %v1672_v18 = vsel %vm1642_vm10, %v1639_v45, %v4847_v3  ;;  %v1640_v5 = vsel %vm1609_vm9, %v1607_v19, %v4841_v28  ;;  %v1641_v11 = vsel %vm1609_vm9, %v1608_v42, %v4842_v29  ;;  %v5355_v47 = vld [vmem:[%s8243_s3 + $0x50] sm:$0xff]   ;;  %v5357_v42 = vld [vmem:[%s8243_s3 + $0x48] sm:$0xff]  }
 0x18e   : > { %v4850_v9 = vpop.permute.xlu1 %4849  ;;  %3991 = vmatpush3.bf16.msra.mxu0 %v5352_v59  ;;  %4197 = vmatpush3.bf16.msra.mxu1 %v5352_v59  ;;  %v6923_v59 = vld [vmem:[%s8243_s3 + $0x88] sm:$0xff]  }
 0x18f   : > { %v4855_v61 = vpop.permute.xlu0 %4854  ;;  %v4852_v62 = vunpack.i.h.bf16 %v4850_v9  ;;  %v4851_v56 = vunpack.i.l.bf16 %v4850_v9  ;;  %3992 = vmatprep.subr.bf16.mxu0 %v5353_v6  ;;  %4190 = vmatprep.subr.bf16.mxu1 %v5353_v6 }
 0x190   : > { %v4857_v32 = vunpack.i.h.bf16 %v4855_v61  ;;  %v4856_v20 = vunpack.i.l.bf16 %v4855_v61 }
 0x191   : > { %v1673_v53 = vsel %vm1642_vm10, %v1640_v5, %v4851_v56  ;;  %v1674_v31 = vsel %vm1642_vm10, %v1641_v11, %v4852_v62  ;;  %v5356_v56 = vld [vmem:[%s8243_s3 + $0x10] sm:$0xff]  }
 0x192   : > { %v1704_v27 = vsel %vm1675_vm11, %v1671_v10, %v4856_v20  ;;  %v1705_v55 = vsel %vm1675_vm11, %v1672_v18, %v4857_v32  ;;  %v4860_v49 = vpop.permute.xlu1 %4859  ;;  %3993 = vmatpush3.bf16.msra.mxu0 %v5354_v15  ;;  %4198 = vmatpush3.bf16.msra.mxu1 %v5354_v15 }
 0x193   : > { %v1722_v0 = vpack.c.bf16 %v1705_v55, %v1704_v27  ;;  %v4862_v41 = vunpack.i.h.bf16 %v4860_v49  ;;  %v4861_v16 = vunpack.i.l.bf16 %v4860_v49  ;;  %3994 = vmatprep.subr.bf16.mxu0 %v5355_v47  ;;  %4191 = vmatprep.subr.bf16.mxu1 %v5355_v47 }
 0x195   : > { %v1706_v44 = vsel %vm1675_vm11, %v1673_v53, %v4861_v16  ;;  %v1707_v23 = vsel %vm1675_vm11, %v1674_v31, %v4862_v41  ;;  %4146 = vmatprep.mubr.msk.bf16.mxu0 %vm1741_vm12, %v1722_v0  ;;  %v5358_v0 = vld [vmem:[%s8243_s3 + $0x8] sm:$0xff]   ;;  %v5359_v31 = vld [vmem:[%s8243_s3 + $0x40] sm:$0xff]  }
 0x196   : > { %v1723_v37 = vpack.c.bf16 %v1707_v23, %v1706_v44  ;;  %3995 = vmatpush3.bf16.msra.mxu0 %v5356_v56  ;;  %4199 = vmatpush3.bf16.msra.mxu1 %v5356_v56 }
 0x197   : > { %3996 = vmatprep.subr.bf16.mxu0 %v5357_v42  ;;  %4192 = vmatprep.subr.bf16.mxu1 %v5357_v42 }
 0x198   : > { %4147 = vmatmul.mubr.msk.bf16.gmra.mxu0 %vm1741_vm12, %v1723_v37 }
 0x19a   : > { %3997 = vmatpush3.bf16.msra.mxu0 %v5358_v0  ;;  %4200 = vmatpush3.bf16.msra.mxu1 %v5358_v0 }
 0x19b   : > { %3998 = vmatprep.subr.bf16.mxu0 %v5359_v31  ;;  %4193 = vmatprep.subr.bf16.mxu1 %v5359_v31 }
 0x1dd   : > { %v4120_v57 = vpop.f32.mrf.mxu0 }
 0x1de   : > { %v1839_v1 = vadd.f32 %v4120_v57, %v6792_v48 }
 0x1df   : > { %v1830_v38 = vpop.f32.mrf.mxu0 }
 0x1e0   : > { %v1959_v24 = vmax.f32 %v1839_v1, 0.0  ;;  %v1831_v51 = vadd.f32 %v6792_v48, %v1830_v38  ;;  %v5360_v1 = vld [vmem:[%s8243_s3] sm:$0xff]  }
 0x1e1   : > { %v4121_v54 = vpop.f32.mrf.mxu0  ;;  %3999 = vmatpush3.bf16.msra.mxu0 %v5360_v1  ;;  %4201 = vmatpush3.bf16.msra.mxu1 %v5360_v1 }
 0x1e2   : > { %1992 = vst.msk [vmem:[%s6805_s9 + $0x10] sm:$0xff] %vm1989_vm13, %v1959_v24  ;;  %v1957_v14 = vmax.f32 %v1831_v51, 0.0  ;;  %v1842_v4 = vadd.f32 %v4121_v54, %v6792_v48  ;;  %v2094_v26 = vrot.slane %v1959_v24, 7  ;;  %4150 = vmatprep.subr.bf16.mxu0 %v6923_v59 }
 0x1e3   : > { %v1833_v58 = vpop.f32.mrf.mxu0 }
 0x1e4   : > { %1990 = vst.msk [vmem:[%s6805_s9] sm:$0xff] %vm1989_vm13, %v1957_v14  ;;  %v1960_v35 = vmax.f32 %v1842_v4, 0.0  ;;  %v1834_v40 = vadd.f32 %v6792_v48, %v1833_v58  ;;  %v2091_v13 = vrot.slane %v1957_v14, 7  ;;  %v6832_v3 = vsel %vm336_vm0, 0.0, %v2094_v26 }
 0x1e5   : > { %v2424_v45 = vrot.slane %v6832_v3, 2  ;;  %v2253_v32 = vrot.slane %v6832_v3, 1 }
 0x1e6   : > { %1993 = vst.msk [vmem:[%s6805_s9 + $0x18] sm:$0xff] %vm1989_vm13, %v1960_v35  ;;  %v2095_v2 = vrot.slane %v1960_v35, 7  ;;  %v1958_v25 = vmax.f32 %v1834_v40, 0.0  ;;  %v6854_v29 = vsel %vm336_vm0, 0.0, %v2091_v13 }
 0x1e7   : > { %v2419_v27 = vrot.slane %v6854_v29, 2  ;;  %v2248_v4 = vrot.slane %v6854_v29, 1 }
 0x1e8   : > { %v6835_v22 = vsel %vm336_vm0, %v2094_v26, %v2095_v2  ;;  %v2203_v36 = vsel %vm336_vm0, %v2095_v2, 0.0  ;;  %1991 = vst.msk [vmem:[%s6805_s9 + $0x8] sm:$0xff] %vm1989_vm13, %v1958_v25  ;;  %v2092_v34 = vrot.slane %v1958_v25, 7 }
 0x1e9   : > { %v2425_v17 = vrot.slane %v6835_v22, 2  ;;  %v2427_v28 = vrot.slane %v2203_v36, 2  ;;  %v4873_v52 = vpack.i.bf16 %v6835_v22, %v6832_v3  ;;  %v2254_v61 = vrot.slane %v6835_v22, 1 }
 0x1ea   : > { %v6842_v9 = vsel %vm336_vm0, %v2091_v13, %v2092_v34  ;;  %v6845_v8 = vsel %vm336_vm0, %v2092_v34, 0.0  ;;  %v2256_v62 = vrot.slane %v2203_v36, 1 }
 0x1eb   : > { %4874 = vrot.lane.b32.xlu0 %v4873_v52, %s5383_s28  ;;  %v4883_v20 = vpack.i.bf16 %v6842_v9, %v6854_v29  ;;  %v2420_v12 = vrot.slane %v6842_v9, 2  ;;  %v2422_v63 = vrot.slane %v6845_v8, 2  ;;  %v6867_v10 = vsel %vm679_vm2, %v2424_v45, %v2425_v17 }
 0x1ec   : > { %v6870_v18 = vsel %vm679_vm2, %v2425_v17, %v2427_v28  ;;  %v6879_v49 = vsel %vm502_vm1, %v2253_v32, %v2254_v61  ;;  %v6882_v11 = vsel %vm502_vm1, %v2254_v61, %v2256_v62  ;;  %v2249_v39 = vrot.slane %v6842_v9, 1 }
 0x1ed   : > { %v4124_v19 = vpop.f32.mrf.mxu0  ;;  %4884 = vrot.lane.b32.xlu1 %v4883_v20, %s5383_s28  ;;  %v4888_v53 = vpack.i.bf16 %v6870_v18, %v6867_v10  ;;  %v2421_v37 = vsel %vm679_vm2, %v2419_v27, %v2420_v12  ;;  %v2423_v50 = vsel %vm679_vm2, %v2420_v12, %v2422_v63  ;;  %v4893_v46 = vpack.i.bf16 %v6882_v11, %v6879_v49 }
 0x1ee   : > { %v1855_v5 = vadd.f32 %v4124_v19, %v6792_v48  ;;  %v6912_v24 = vpack.i.bf16 %v2423_v50, %v2421_v37  ;;  %v2251_v51 = vrot.slane %v6845_v8, 1  ;;  %v6933_v2 = vsel %vm502_vm1, %v2248_v4, %v2249_v39 }
 0x1ef   : > { %v1846_v55 = vpop.f32.mrf.mxu0  ;;  %4879 = vrot.lane.b32.xlu0 %v4873_v52, %s5382_s16 }
 0x1f0   : > { %v1963_v41 = vmax.f32 %v1855_v5, 0.0  ;;  %v1847_v16 = vadd.f32 %v6792_v48, %v1846_v55  ;;  %v6944_v15 = vsel %vm502_vm1, %v2249_v39, %v2251_v51 }
 0x1f1   : > { %v4125_v23 = vpop.f32.mrf.mxu0  ;;  %4889 = vrot.lane.b32.xlu1 %v4888_v53, %s5381_s15  ;;  %v4908_v20 = vpack.i.bf16 %v6944_v15, %v6933_v2 }
 0x1f2   : > { %1996 = vst.msk [vmem:[%s6805_s9 + $0x30] sm:$0xff] %vm1989_vm13, %v1963_v41  ;;  %v1961_v33 = vmax.f32 %v1847_v16, 0.0  ;;  %v1858_v21 = vadd.f32 %v4125_v23, %v6792_v48  ;;  %v2100_v54 = vrot.slane %v1963_v41, 7 }
 0x1f3   : > { %v1849_v57 = vpop.f32.mrf.mxu0  ;;  %4894 = vrot.lane.b32.xlu0 %v4893_v46, %s5381_s15 }
 0x1f4   : > { %1994 = vst.msk [vmem:[%s6805_s9 + $0x20] sm:$0xff] %vm1989_vm13, %v1961_v33  ;;  %v1964_v38 = vmax.f32 %v1858_v21, 0.0  ;;  %v1850_v7 = vadd.f32 %v6792_v48, %v1849_v57  ;;  %v2097_v14 = vrot.slane %v1961_v33, 7  ;;  %v6937_v25 = vsel %vm336_vm0, 0.0, %v2100_v54 }
 0x1f5   : > { %4919 = vrot.lane.b32.xlu1 %v6912_v24, %s5381_s15  ;;  %8490 = vst [vmem:[#allocation38_spill] sm:$0xff] %v6937_v25  ;;  %v2434_v61 = vrot.slane %v6937_v25, 2  ;;  %v2263_v62 = vrot.slane %v6937_v25, 1 }
 0x1f6   : > { %1997 = vst.msk [vmem:[%s6805_s9 + $0x38] sm:$0xff] %vm1989_vm13, %v1964_v38  ;;  %v2101_v30 = vrot.slane %v1964_v38, 7  ;;  %v1962_v58 = vmax.f32 %v1850_v7, 0.0  ;;  %v6940_v6 = vsel %vm336_vm0, 0.0, %v2097_v14 }
 0x1f7   : > { %4899 = vrot.lane.b32.xlu0 %v4888_v53, %s5382_s16  ;;  %8491 = vst [vmem:[#allocation12_spill] sm:$0xff] %v6940_v6  ;;  %v2429_v56 = vrot.slane %v6940_v6, 2  ;;  %v2258_v1 = vrot.slane %v6940_v6, 1 }
 0x1f8   : > { %v6926_v26 = vsel %vm336_vm0, %v2100_v54, %v2101_v30  ;;  %v2205_v35 = vsel %vm336_vm0, %v2101_v30, 0.0  ;;  %1995 = vst.msk [vmem:[%s6805_s9 + $0x28] sm:$0xff] %vm1989_vm13, %v1962_v58  ;;  %v2098_v40 = vrot.slane %v1962_v58, 7 }
 0x1f9   : > { %8489 = vst [vmem:[#allocation37_spill] sm:$0xff] %v6926_v26  ;;  %v2435_v13 = vrot.slane %v6926_v26, 2  ;;  %v2437_v36 = vrot.slane %v2205_v35, 2  ;;  %v4923_v28 = vpack.i.bf16 %v6926_v26, %v6937_v25  ;;  %v2264_v8 = vrot.slane %v6926_v26, 1  ;;  %v7376_v25 = vpop.permute.xlu1 %4869 }
 0x1fa   : > { %v6947_v34 = vsel %vm336_vm0, %v2097_v14, %v2098_v40  ;;  %v2204_v17 = vsel %vm336_vm0, %v2098_v40, 0.0  ;;  %v2266_v52 = vrot.slane %v2205_v35, 1 }
 0x1fb   : > { %8492 = vst [vmem:[#allocation14_spill] sm:$0xff] %v6947_v34  ;;  %v2430_v47 = vrot.slane %v6947_v34, 2  ;;  %v2432_v45 = vrot.slane %v2204_v17, 2  ;;  %4904 = vrot.lane.b32.xlu0 %v4893_v46, %s5383_s28  ;;  %4924 = vrot.lane.b32.xlu1 %v4923_v28, %s5382_s16  ;;  %v4933_v63 = vpack.i.bf16 %v6947_v34, %v6940_v6  ;;  %v6965_v19 = vsel %vm679_vm2, %v2434_v61, %v2435_v13 }
 0x1fc   : > { %v6968_v42 = vsel %vm679_vm2, %v2435_v13, %v2437_v36  ;;  %v6971_v27 = vsel %vm502_vm1, %v2263_v62, %v2264_v8  ;;  %v6974_v55 = vsel %vm502_vm1, %v2264_v8, %v2266_v52  ;;  %v2259_v31 = vrot.slane %v6947_v34, 1 }
 0x1fd   : > { %v4128_v32 = vpop.f32.mrf.mxu0  ;;  %8493 = vst [vmem:[#allocation35_spill] sm:$0xff] %v6971_v27  ;;  %8494 = vst [vmem:[#allocation7_spill] sm:$0xff] %v6974_v55  ;;  %v6977_v0 = vsel %vm679_vm2, %v2429_v56, %v2430_v47  ;;  %v6980_v41 = vsel %vm679_vm2, %v2430_v47, %v2432_v45  ;;  %v2261_v33 = vrot.slane %v2204_v17, 1  ;;  %v4943_v57 = vpack.i.bf16 %v6974_v55, %v6971_v27 }
 0x1fe   : > { %v1871_v12 = vadd.f32 %v4128_v32, %v6792_v48  ;;  %v7003_v14 = vsel %vm502_vm1, %v2258_v1, %v2259_v31  ;;  %v4948_v58 = vpack.i.bf16 %v6968_v42, %v6965_v19 }
 0x1ff   : > { %v1862_v5 = vpop.f32.mrf.mxu0  ;;  %4934 = vrot.lane.b32.xlu1 %v4933_v63, %s5382_s16  ;;  %4909 = vrot.lane.b32.xlu0 %v4908_v20, %s5381_s15  ;;  %v7010_v35 = vsel %vm502_vm1, %v2259_v31, %v2261_v33 }
 0x200   : > { %v1967_v16 = vmax.f32 %v1871_v12, 0.0  ;;  %v1863_v53 = vadd.f32 %v6792_v48, %v1862_v5  ;;  %v4963_v8 = vpack.i.bf16 %v7010_v35, %v7003_v14  ;;  %v4968_v5 = vpack.i.bf16 %v6980_v41, %v6977_v0 }
 0x201   : > { %v4129_v23 = vpop.f32.mrf.mxu0 }
 0x202   : > { %2000 = vst.msk [vmem:[%s6805_s9 + $0x50] sm:$0xff] %vm1989_vm13, %v1967_v16  ;;  %v1965_v21 = vmax.f32 %v1863_v53, 0.0  ;;  %v1874_v46 = vadd.f32 %v4129_v23, %v6792_v48  ;;  %v2106_v51 = vrot.slane %v1967_v16, 7 }
 0x203   : > { %v1865_v39 = vpop.f32.mrf.mxu0  ;;  %4944 = vrot.lane.b32.xlu1 %v4943_v57, %s5383_s28  ;;  %4914 = vrot.lane.b32.xlu0 %v6912_v24, %s5382_s16 }
 0x204   : > { %1998 = vst.msk [vmem:[%s6805_s9 + $0x40] sm:$0xff] %vm1989_vm13, %v1965_v21  ;;  %v1968_v38 = vmax.f32 %v1874_v46, 0.0  ;;  %v1866_v7 = vadd.f32 %v6792_v48, %v1865_v39  ;;  %v2103_v54 = vrot.slane %v1965_v21, 7  ;;  %v7021_v36 = vsel %vm336_vm0, 0.0, %v2106_v51 }
 0x205   : > { %8496 = vst [vmem:[#allocation10_spill] sm:$0xff] %v7021_v36  ;;  %v2444_v56 = vrot.slane %v7021_v36, 2 }
 0x206   : > { %2001 = vst.msk [vmem:[%s6805_s9 + $0x58] sm:$0xff] %vm1989_vm13, %v1968_v38  ;;  %v2107_v4 = vrot.slane %v1968_v38, 7  ;;  %v1966_v30 = vmax.f32 %v1866_v7, 0.0  ;;  %v7024_v17 = vsel %vm336_vm0, 0.0, %v2103_v54 }
 0x207   : > { %4949 = vrot.lane.b32.xlu1 %v4948_v58, %s5381_s15  ;;  %4929 = vrot.lane.b32.xlu0 %v4923_v28, %s5383_s28  ;;  %8497 = vst [vmem:[#allocation9_spill] sm:$0xff] %v7024_v17  ;;  %v2439_v32 = vrot.slane %v7024_v17, 2 }
 0x208   : > { %v7013_v40 = vsel %vm336_vm0, %v2106_v51, %v2107_v4  ;;  %v2207_v24 = vsel %vm336_vm0, %v2107_v4, 0.0  ;;  %1999 = vst.msk [vmem:[%s6805_s9 + $0x48] sm:$0xff] %vm1989_vm13, %v1966_v30  ;;  %v2104_v13 = vrot.slane %v1966_v30, 7  ;;  %v2273_v30 = vrot.slane %v7021_v36, 1 }
 0x209   : > { %8495 = vst [vmem:[#allocation8_spill] sm:$0xff] %v7013_v40  ;;  %v2445_v52 = vrot.slane %v7013_v40, 2  ;;  %v2447_v47 = vrot.slane %v2207_v24, 2  ;;  %v2274_v46 = vrot.slane %v7013_v40, 1  ;;  %v2276_v7 = vrot.slane %v2207_v24, 1 }
 0x20a   : > { %v7030_v45 = vsel %vm336_vm0, %v2103_v54, %v2104_v13  ;;  %v7033_v61 = vsel %vm336_vm0, %v2104_v13, 0.0  ;;  %v4983_v4 = vpack.i.bf16 %v7013_v40, %v7021_v36 }
 0x20b   : > { %8498 = vst [vmem:[#allocation11_spill] sm:$0xff] %v7030_v45  ;;  %v2440_v28 = vrot.slane %v7030_v45, 2  ;;  %v2442_v62 = vrot.slane %v7033_v61, 2  ;;  %4964 = vrot.lane.b32.xlu1 %v4963_v8, %s5383_s28  ;;  %4939 = vrot.lane.b32.xlu0 %v4933_v63, %s5383_s28  ;;  %v7045_v16 = vsel %vm679_vm2, %v2444_v56, %v2445_v52  ;;  %v7048_v53 = vsel %vm679_vm2, %v2445_v52, %v2447_v47 }
 0x20d   : > { %v4132_v20 = vpop.f32.mrf.mxu0  ;;  %v7051_v23 = vsel %vm679_vm2, %v2439_v32, %v2440_v28  ;;  %v7054_v63 = vsel %vm679_vm2, %v2440_v28, %v2442_v62  ;;  %v4993_v28 = vpack.i.bf16 %v7030_v45, %v7024_v17  ;;  %v7080_v32 = vsel %vm502_vm1, %v2273_v30, %v2274_v46 }
 0x20e   : > { %v1887_v12 = vadd.f32 %v4132_v20, %v6792_v48  ;;  %8499 = vst [vmem:[#allocation36_spill] sm:$0xff] %v7080_v32  ;;  %v7083_v20 = vsel %vm502_vm1, %v2274_v46, %v2276_v7 }
 0x20f   : > { %v1878_v31 = vpop.f32.mrf.mxu0  ;;  %4969 = vrot.lane.b32.xlu1 %v4968_v5, %s5381_s15  ;;  %4954 = vrot.lane.b32.xlu0 %v4943_v57, %s5381_s15  ;;  %8500 = vst [vmem:[#allocation19_spill] sm:$0xff] %v7083_v20  ;;  %v5003_v46 = vpack.i.bf16 %v7083_v20, %v7080_v32 }
 0x210   : > { %v1971_v33 = vmax.f32 %v1887_v12, 0.0  ;;  %v1879_v21 = vadd.f32 %v6792_v48, %v1878_v31 }
 0x211   : > { %v4133_v1 = vpop.f32.mrf.mxu0 }
 0x212   : > { %2004 = vst.msk [vmem:[%s6805_s9 + $0x70] sm:$0xff] %vm1989_vm13, %v1971_v33  ;;  %v1969_v51 = vmax.f32 %v1879_v21, 0.0  ;;  %v1890_v54 = vadd.f32 %v4133_v1, %v6792_v48  ;;  %v2112_v24 = vrot.slane %v1971_v33, 7 }
 0x213   : > { %v1881_v57 = vpop.f32.mrf.mxu0  ;;  %4984 = vrot.lane.b32.xlu1 %v4983_v4, %s5382_s16  ;;  %4959 = vrot.lane.b32.xlu0 %v4948_v58, %s5382_s16 }
 0x214   : > { %2002 = vst.msk [vmem:[%s6805_s9 + $0x60] sm:$0xff] %vm1989_vm13, %v1969_v51  ;;  %v1972_v13 = vmax.f32 %v1890_v54, 0.0  ;;  %v1882_v52 = vadd.f32 %v6792_v48, %v1881_v57  ;;  %v2109_v47 = vrot.slane %v1969_v51, 7  ;;  %v7096_v33 = vsel %vm336_vm0, 0.0, %v2112_v24 }
 0x215   : > { %8502 = vst [vmem:[#allocation13_spill] sm:$0xff] %v7096_v33  ;;  %v2271_v57 = vrot.slane %v7033_v61, 1  ;;  %v5008_v61 = vpack.i.bf16 %v7048_v53, %v7045_v16 }
 0x216   : > { %2005 = vst.msk [vmem:[%s6805_s9 + $0x78] sm:$0xff] %vm1989_vm13, %v1972_v13  ;;  %v2113_v62 = vrot.slane %v1972_v13, 7  ;;  %v1970_v56 = vmax.f32 %v1882_v52, 0.0  ;;  %v7099_v21 = vsel %vm336_vm0, 0.0, %v2109_v47  ;;  %v2454_v52 = vrot.slane %v7096_v33, 2 }
 0x217   : > { %4994 = vrot.lane.b32.xlu1 %v4993_v28, %s5382_s16  ;;  %4974 = vrot.lane.b32.xlu0 %v4963_v8, %s5381_s15  ;;  %8503 = vst [vmem:[#allocation27_spill] sm:$0xff] %v7099_v21  ;;  %v2269_v8 = vrot.slane %v7030_v45, 1 }
 0x218   : > { %v7086_v12 = vsel %vm336_vm0, %v2112_v24, %v2113_v62  ;;  %v7089_v58 = vsel %vm336_vm0, %v2113_v62, 0.0  ;;  %2003 = vst.msk [vmem:[%s6805_s9 + $0x68] sm:$0xff] %vm1989_vm13, %v1970_v56  ;;  %v2110_v31 = vrot.slane %v1970_v56, 7  ;;  %v2268_v24 = vrot.slane %v7024_v17, 1 }
 0x219   : > { %8501 = vst [vmem:[#allocation39_spill] sm:$0xff] %v7086_v12  ;;  %v2455_v1 = vrot.slane %v7086_v12, 2  ;;  %v2457_v7 = vrot.slane %v7089_v58, 2  ;;  %v7133_v50 = vsel %vm502_vm1, %v2269_v8, %v2271_v57 }
 0x21a   : > { %v7106_v51 = vsel %vm336_vm0, %v2109_v47, %v2110_v31  ;;  %v7109_v54 = vsel %vm336_vm0, %v2110_v31, 0.0  ;;  %v2449_v47 = vrot.slane %v7099_v21, 2  ;;  %8508 = vst [vmem:[#allocation34_spill] sm:$0xff] %v7133_v50 }
 0x21b   : > { %8504 = vst [vmem:[#allocation15_spill] sm:$0xff] %v7106_v51  ;;  %v2450_v30 = vrot.slane %v7106_v51, 2  ;;  %v2452_v13 = vrot.slane %v7109_v54, 2  ;;  %5004 = vrot.lane.b32.xlu1 %v5003_v46, %s5383_s28  ;;  %4979 = vrot.lane.b32.xlu0 %v4968_v5, %s5382_s16  ;;  %v7124_v31 = vsel %vm679_vm2, %v2454_v52, %v2455_v1  ;;  %v7127_v38 = vsel %vm679_vm2, %v2455_v1, %v2457_v7 }
 0x21c   : > { %8505 = vst [vmem:[#allocation16_spill] sm:$0xff] %v7124_v31  ;;  %8506 = vst [vmem:[#allocation22_spill] sm:$0xff] %v7127_v38  ;;  %v7130_v5 = vsel %vm502_vm1, %v2268_v24, %v2269_v8  ;;  %v5028_v8 = vpack.i.bf16 %v7054_v63, %v7051_v23 }
 0x21d   : > { %v4136_v62 = vpop.f32.mrf.mxu0  ;;  %8507 = vst [vmem:[#allocation28_spill] sm:$0xff] %v7130_v5  ;;  %v7139_v37 = vsel %vm679_vm2, %v2450_v30, %v2452_v13 }
 0x21e   : > { %v1903_v56 = vadd.f32 %v4136_v62, %v6792_v48  ;;  %v7136_v62 = vsel %vm679_vm2, %v2449_v47, %v2450_v30 }
 0x21f   : > { %v1894_v39 = vpop.f32.mrf.mxu0  ;;  %5009 = vrot.lane.b32.xlu1 %v5008_v61, %s5381_s15  ;;  %4989 = vrot.lane.b32.xlu0 %v4983_v4, %s5383_s28 }
 0x220   : > { %v1975_v44 = vmax.f32 %v1903_v56, 0.0  ;;  %v1895_v52 = vadd.f32 %v6792_v48, %v1894_v39  ;;  %v5023_v39 = vpack.i.bf16 %v7133_v50, %v7130_v5 }
 0x221   : > { %v4137_v1 = vpop.f32.mrf.mxu0 }
 0x222   : > { %2008 = vst.msk [vmem:[%s6805_s9 + $0x90] sm:$0xff] %vm1989_vm13, %v1975_v44  ;;  %v1973_v57 = vmax.f32 %v1895_v52, 0.0  ;;  %v1906_v30 = vadd.f32 %v4137_v1, %v6792_v48  ;;  %v2118_v47 = vrot.slane %v1975_v44, 7 }
 0x223   : > { %v1897_v13 = vpop.f32.mrf.mxu0  ;;  %5024 = vrot.lane.b32.xlu1 %v5023_v39, %s5383_s28  ;;  %4999 = vrot.lane.b32.xlu0 %v4993_v28, %s5383_s28 }
 0x224   : > { %2006 = vst.msk [vmem:[%s6805_s9 + $0x80] sm:$0xff] %vm1989_vm13, %v1973_v57  ;;  %v1976_v4 = vmax.f32 %v1906_v30, 0.0  ;;  %v1898_v24 = vadd.f32 %v6792_v48, %v1897_v13  ;;  %v2115_v56 = vrot.slane %v1973_v57, 7  ;;  %v7173_v44 = vsel %vm336_vm0, 0.0, %v2118_v47 }
 0x225   : > { %8510 = vst [vmem:[#allocation29_spill] sm:$0xff] %v7173_v44  ;;  %v5043_v57 = vpack.i.bf16 %v7086_v12, %v7096_v33  ;;  %v2464_v32 = vrot.slane %v7173_v44, 2 }
 0x226   : > { %2009 = vst.msk [vmem:[%s6805_s9 + $0x98] sm:$0xff] %vm1989_vm13, %v1976_v4  ;;  %v2119_v52 = vrot.slane %v1976_v4, 7  ;;  %v1974_v1 = vmax.f32 %v1898_v24, 0.0  ;;  %v7176_v28 = vsel %vm336_vm0, 0.0, %v2115_v56 }
 0x227   : > { %5029 = vrot.lane.b32.xlu1 %v5028_v8, %s5381_s15  ;;  %5014 = vrot.lane.b32.xlu0 %v5003_v46, %s5381_s15  ;;  %8511 = vst [vmem:[#allocation18_spill] sm:$0xff] %v7176_v28  ;;  %v2284_v46 = vrot.slane %v7086_v12, 1  ;;  %v2459_v20 = vrot.slane %v7176_v28, 2 }
 0x228   : > { %v7163_v7 = vsel %vm336_vm0, %v2118_v47, %v2119_v52  ;;  %v7166_v30 = vsel %vm336_vm0, %v2119_v52, 0.0  ;;  %2007 = vst.msk [vmem:[%s6805_s9 + $0x88] sm:$0xff] %vm1989_vm13, %v1974_v1  ;;  %v2116_v13 = vrot.slane %v1974_v1, 7  ;;  %v2286_v47 = vrot.slane %v7089_v58, 1 }
 0x229   : > { %8509 = vst [vmem:[#allocation17_spill] sm:$0xff] %v7163_v7  ;;  %v2465_v4 = vrot.slane %v7163_v7, 2  ;;  %v2467_v24 = vrot.slane %v7166_v30, 2 }
 0x22a   : > { %v7183_v52 = vsel %vm336_vm0, %v2115_v56, %v2116_v13  ;;  %v7186_v1 = vsel %vm336_vm0, %v2116_v13, 0.0  ;;  %v2283_v56 = vrot.slane %v7096_v33, 1  ;;  %v5053_v13 = vpack.i.bf16 %v7106_v51, %v7099_v21 }
 0x22b   : > { %8512 = vst [vmem:[#allocation25_spill] sm:$0xff] %v7183_v52  ;;  %v2460_v36 = vrot.slane %v7183_v52, 2  ;;  %v2462_v40 = vrot.slane %v7186_v1, 2  ;;  %5044 = vrot.lane.b32.xlu1 %v5043_v57, %s5382_s16  ;;  %5019 = vrot.lane.b32.xlu0 %v5008_v61, %s5382_s16  ;;  %v7200_v12 = vsel %vm679_vm2, %v2464_v32, %v2465_v4  ;;  %v7203_v58 = vsel %vm679_vm2, %v2465_v4, %v2467_v24 }
 0x22c   : > { %8513 = vst [vmem:[#allocation26_spill] sm:$0xff] %v7200_v12  ;;  %8514 = vst [vmem:[#allocation30_spill] sm:$0xff] %v7203_v58  ;;  %v7212_v61 = vsel %vm502_vm1, %v2283_v56, %v2284_v46  ;;  %v7215_v33 = vsel %vm502_vm1, %v2284_v46, %v2286_v47 }
 0x22d   : > { %v7206_v17 = vsel %vm679_vm2, %v2459_v20, %v2460_v36  ;;  %v7209_v45 = vsel %vm679_vm2, %v2460_v36, %v2462_v40  ;;  %8517 = vst [vmem:[#allocation21_spill] sm:$0xff] %v7212_v61  ;;  %8518 = vst [vmem:[#allocation23_spill] sm:$0xff] %v7215_v33  ;;  %v5063_v24 = vpack.i.bf16 %v7215_v33, %v7212_v61  ;;  %v2281_v20 = vrot.slane %v7109_v54, 1 }
 0x22e   : > { %8515 = vst [vmem:[#allocation40_spill] sm:$0xff] %v7206_v17  ;;  %8516 = vst [vmem:[#allocation20_spill] sm:$0xff] %v7209_v45 }
 0x22f   : > { %5054 = vrot.lane.b32.xlu1 %v5053_v13, %s5382_s16  ;;  %5034 = vrot.lane.b32.xlu0 %v5023_v39, %s5381_s15 }
 0x230   : > { %v4140_v32 = vpop.f32.mrf.mxu0 }
 0x231   : > { %v7220_v4 = vadd.f32 %v4140_v32, %v6792_v48 }
 0x232   : > { %v1910_v36 = vpop.f32.mrf.mxu0 }
 0x233   : > { %v1979_v46 = vmax.f32 %v7220_v4, 0.0  ;;  %v7230_v47 = vadd.f32 %v6792_v48, %v1910_v36  ;;  %5064 = vrot.lane.b32.xlu1 %v5063_v24, %s5383_s28  ;;  %5039 = vrot.lane.b32.xlu0 %v5028_v8, %s5382_s16  ;;  %v5068_v4 = vpack.i.bf16 %v7127_v38, %v7124_v31  ;;  %v2279_v36 = vrot.slane %v7106_v51, 1 }
 0x234   : > { %v4141_v39 = vpop.f32.mrf.mxu0 }
 0x235   : > { %2012 = vst.msk [vmem:[%s6805_s9 + $0xb0] sm:$0xff] %vm1989_vm13, %v1979_v46  ;;  %v8328_v56 = vmax.f32 %v7230_v47, 0.0  ;;  %v1922_v32 = vadd.f32 %v4141_v39, %v6792_v48  ;;  %v2278_v39 = vrot.slane %v7099_v21, 1  ;;  %v7258_v51 = vsel %vm502_vm1, %v2279_v36, %v2281_v20 }
 0x236   : > { %v1913_v40 = vpop.f32.mrf.mxu0  ;;  %8520 = vst [vmem:[#allocation31_spill] sm:$0xff] %v7258_v51  ;;  %v2296_v20 = vrot.slane %v7166_v30, 1 }
 0x237   : > { %2010 = vst.msk [vmem:[%s6805_s9 + $0xa0] sm:$0xff] %vm1989_vm13, %v8328_v56  ;;  %v1980_v8 = vmax.f32 %v1922_v32, 0.0  ;;  %v1914_v61 = vadd.f32 %v6792_v48, %v1913_v40  ;;  %5069 = vrot.lane.b32.xlu1 %v5068_v4, %s5381_s15  ;;  %5049 = vrot.lane.b32.xlu0 %v5043_v57, %s5383_s28  ;;  %v7255_v54 = vsel %vm502_vm1, %v2278_v39, %v2279_v36  ;;  %v2294_v40 = vrot.slane %v7163_v7, 1 }
 0x238   : > { %8519 = vst [vmem:[#allocation24_spill] sm:$0xff] %v7255_v54  ;;  %v5093_v57 = vpack.i.bf16 %v7258_v51, %v7255_v54  ;;  %v5103_v36 = vpack.i.bf16 %v7163_v7, %v7173_v44 }
 0x239   : > { %2013 = vst.msk [vmem:[%s6805_s9 + $0xb8] sm:$0xff] %vm1989_vm13, %v1980_v8  ;;  %v1978_v33 = vmax.f32 %v1914_v61, 0.0  ;;  %v5098_v61 = vpack.i.bf16 %v7139_v37, %v7136_v62  ;;  %v2125_v7 = vrot.slane %v1980_v8, 7 }
 0x23b   : > { %2011 = vst.msk [vmem:[%s6805_s9 + $0xa8] sm:$0xff] %vm1989_vm13, %v1978_v33  ;;  %5074 = vrot.lane.b32.xlu1 %v5063_v24, %s5381_s15  ;;  %5059 = vrot.lane.b32.xlu0 %v5053_v13, %s5383_s28  ;;  %v2293_v24 = vrot.slane %v7173_v44, 1  ;;  %v7339_v21 = vsel %vm336_vm0, %v2125_v7, 0.0 }
 0x23d   : > { %v7283_v30 = vsel %vm502_vm1, %v2293_v24, %v2294_v40 }
 0x23e   : > { %8521 = vst [vmem:[#allocation41_spill] sm:$0xff] %v7283_v30 }
 0x23f   : > { %5079 = vrot.lane.b32.xlu1 %v5068_v4, %s5382_s16  ;;  %5094 = vrot.lane.b32.xlu0 %v5093_v57, %s5381_s15 }
 0x243   : > { %5084 = vrot.lane.b32.xlu1 %v5093_v57, %s5383_s28  ;;  %5099 = vrot.lane.b32.xlu0 %v5098_v61, %s5382_s16  ;;  %v7286_v57 = vsel %vm502_vm1, %v2294_v40, %v2296_v20 }
 0x244   : > { %v4144_v13 = vpop.f32.mrf.mxu0  ;;  %8522 = vst [vmem:[#allocation32_spill] sm:$0xff] %v7286_v57  ;;  %v5123_v40 = vpack.i.bf16 %v7286_v57, %v7283_v30  ;;  %v7332_v30 = vpack.i.bf16 %v7209_v45, %v7206_v17  ;;  %v2122_v57 = vrot.slane %v1978_v33, 7 }
 0x245   : > { %v7274_v32 = vadd.f32 %v4144_v13, %v6792_v48 }
 0x246   : > { %v1926_v4 = vpop.f32.mrf.mxu0 }
 0x247   : > { %v8330_v39 = vmax.f32 %v7274_v32, 0.0  ;;  %v7280_v56 = vadd.f32 %v6792_v48, %v1926_v4  ;;  %5089 = vrot.lane.b32.xlu1 %v5098_v61, %s5381_s15  ;;  %5104 = vrot.lane.b32.xlu0 %v5103_v36, %s5382_s16 }
 0x248   : > { %v4145_v13 = vpop.f32.mrf.mxu0 }
 0x249   : > { %2016 = vst.msk [vmem:[%s6805_s9 + $0xd0] sm:$0xff] %vm1989_vm13, %v8330_v39  ;;  %v8331_v4 = vmax.f32 %v7280_v56, 0.0  ;;  %v7296_v44 = vadd.f32 %v4145_v13, %v6792_v48  ;;  %v5113_v39 = vpack.i.bf16 %v7183_v52, %v7176_v28 }
 0x24a   : > { %v1929_v24 = vpop.f32.mrf.mxu0 }
 0x24b   : > { %2014 = vst.msk [vmem:[%s6805_s9 + $0xc0] sm:$0xff] %vm1989_vm13, %v8331_v4  ;;  %v8333_v61 = vmax.f32 %v7296_v44, 0.0  ;;  %v7306_v20 = vadd.f32 %v6792_v48, %v1929_v24  ;;  %5109 = vrot.lane.b32.xlu1 %v5103_v36, %s5383_s28  ;;  %5124 = vrot.lane.b32.xlu0 %v5123_v40, %s5383_s28  ;;  %v7319_v4 = vpack.i.bf16 %v7203_v58, %v7200_v12  ;;  %v2124_v36 = vrot.slane %v1979_v46, 7 }
 0x24c   : > { %v2289_v24 = vrot.slane %v7183_v52, 1  ;;  %v8525_v46 = vmax.f32 %v7230_v47, 0.0  ;;  %v2212_v47 = vsel %vm336_vm0, %v2122_v57, 0.0 }
 0x24d   : > { %2017 = vst.msk [vmem:[%s6805_s9 + $0xd8] sm:$0xff] %vm1989_vm13, %v8333_v61  ;;  %v8336_v13 = vmax.f32 %v7306_v20, 0.0  ;;  %v2291_v61 = vrot.slane %v7186_v1, 1  ;;  %v7335_v8 = vsel %vm336_vm0, %v2124_v36, %v2125_v7  ;;  %v7345_v1 = vsel %vm336_vm0, 0.0, %v2124_v36 }
 0x24e   : > { %8523 = vst [vmem:[#allocation42_spill] sm:$0xff] %v7335_v8  ;;  %8524 = vst [vmem:[#allocation43_spill] sm:$0xff] %v7345_v1  ;;  %v2121_v52 = vrot.slane %v8525_v46, 7  ;;  %v7351_v54 = vpack.i.bf16 %v7335_v8, %v7345_v1  ;;  %v2303_v51 = vrot.slane %v7345_v1, 1  ;;  %v2301_v43 = vrot.slane %v2212_v47, 1 }
 0x24f   : > { %2015 = vst.msk [vmem:[%s6805_s9 + $0xc8] sm:$0xff] %vm1989_vm13, %v8336_v13  ;;  %5114 = vrot.lane.b32.xlu1 %v5113_v39, %s5382_s16  ;;  %5129 = vrot.lane.b32.xlu0 %v7319_v4, %s5381_s15  ;;  %v2288_v13 = vrot.slane %v7176_v28, 1  ;;  %v7357_v7 = vsel %vm502_vm1, %v2289_v24, %v2291_v61  ;;  %v2306_v28 = vrot.slane %v7339_v21, 1  ;;  %v2472_v27 = vrot.slane %v2212_v47, 2 }
 0x250   : > { %8527 = vst [vmem:[#allocation45_spill] sm:$0xff] %v7357_v7  ;;  %v7362_v36 = vsel %vm336_vm0, %v2121_v52, %v2122_v57  ;;  %v7370_v61 = vsel %vm336_vm0, 0.0, %v2121_v52 }
 0x251   : > { %v7354_v33 = vsel %vm502_vm1, %v2288_v13, %v2289_v24  ;;  %8528 = vst [vmem:[#allocation46_spill] sm:$0xff] %v7362_v36  ;;  %v4865_v13 = vpop.permute.xlu0 %4864  ;;  %8529 = vst [vmem:[#allocation47_spill] sm:$0xff] %v7370_v61  ;;  %v2299_v60 = vrot.slane %v7362_v36, 1  ;;  %v7382_v26 = vpack.i.bf16 %v7362_v36, %v7370_v61  ;;  %v2469_v47 = vrot.slane %v7370_v61, 2 }
 0x252   : > { %8526 = vst [vmem:[#allocation44_spill] sm:$0xff] %v7354_v33 }
 0x253   : > { %5119 = vrot.lane.b32.xlu1 %v5113_v39, %s5383_s28  ;;  %5144 = vrot.lane.b32.xlu0 %v7332_v30, %s5381_s15  ;;  %v2304_v39 = vrot.slane %v7335_v8, 1  ;;  %v7422_v55 = vsel %vm502_vm1, %v2299_v60, %v2301_v43  ;;  %v4867_v43 = vunpack.i.h.bf16 %v4865_v13 }
 0x254   : > { %8533 = vst [vmem:[#allocation51_spill] sm:$0xff] %v7422_v55 }
 0x255   : > { %v7392_v50 = vsel %vm502_vm1, %v2304_v39, %v2306_v28  ;;  %v2470_v28 = vrot.slane %v7362_v36, 2  ;;  %v4866_v36 = vunpack.i.l.bf16 %v4865_v13 }
 0x256   : > { %8531 = vst [vmem:[#allocation49_spill] sm:$0xff] %v7392_v50 }
 0x257   : > { %5134 = vrot.lane.b32.xlu1 %v5123_v40, %s5381_s15  ;;  %5164 = vrot.lane.b32.xlu0 %v7351_v54, %s5382_s16  ;;  %v5138_v40 = vpack.i.bf16 %v7357_v7, %v7354_v33  ;;  %v2298_v7 = vrot.slane %v7370_v61, 1  ;;  %v7448_v61 = vsel %vm679_vm2, %v2470_v28, %v2472_v27  ;;  %v2474_v27 = vrot.slane %v7345_v1, 2 }
 0x258   : > { %v4148_v46 = vpop.f32.mrf.mxu0  ;;  %8535 = vst [vmem:[#allocation53_spill] sm:$0xff] %v7448_v61 }
 0x259   : > { %v7373_v24 = vadd.f32 %v4148_v46, %v6792_v48  ;;  %v7389_v46 = vsel %vm502_vm1, %v2303_v51, %v2304_v39 }
 0x25a   : > { %v1942_v57 = vpop.f32.mrf.mxu0  ;;  %8530 = vst [vmem:[#allocation48_spill] sm:$0xff] %v7389_v46  ;;  %v7411_v58 = vpack.i.bf16 %v7392_v50, %v7389_v46  ;;  %v8537_v46 = vld [vmem:[#allocation3_spill] sm:$0xff]  ;;  %v4871_v50 = vunpack.i.l.bf16 %v7376_v25 }
 0x25b   : > { %v8353_v52 = vmax.f32 %v7373_v24, 0.0  ;;  %v7386_v5 = vadd.f32 %v6792_v48, %v1942_v57  ;;  %5139 = vrot.lane.b32.xlu1 %v5138_v40, %s5383_s28  ;;  %5169 = vrot.lane.b32.xlu0 %v7382_v26, %s5382_s16 }
 0x25c   : > { %v4149_v33 = vpop.f32.mrf.mxu0 }
 0x25d   : > { %2020 = vst.msk [vmem:[%s6805_s9 + $0xf0] sm:$0xff] %vm1989_vm13, %v8353_v52  ;;  %v8358_v57 = vmax.f32 %v7386_v5, 0.0  ;;  %v7404_v51 = vadd.f32 %v4149_v33, %v6792_v48  ;;  %v7407_v39 = vpop.permute.xlu0 %4874  ;;  %v7419_v33 = vsel %vm502_vm1, %v2298_v7, %v2299_v60  ;;  %v3050_v60 = vsel %vm1989_vm13, %v8537_v46, %v4866_v36 }
 0x25e   : > { %v1945_v12 = vpop.f32.mrf.mxu0  ;;  %8532 = vst [vmem:[#allocation50_spill] sm:$0xff] %v7419_v33  ;;  %v4872_v36 = vunpack.i.h.bf16 %v7376_v25 }
 0x25f   : > { %2018 = vst.msk [vmem:[%s6805_s9 + $0xe0] sm:$0xff] %vm1989_vm13, %v8358_v57  ;;  %v8360_v52 = vmax.f32 %v7404_v51, 0.0  ;;  %v7425_v17 = vadd.f32 %v6792_v48, %v1945_v12  ;;  %v7427_v45 = vpop.permute.xlu1 %4884  ;;  %5149 = vrot.lane.b32.xlu1 %v5138_v40, %s5381_s15  ;;  %5179 = vrot.lane.b32.xlu0 %v7411_v58, %s5383_s28  ;;  %v5183_v48 = vpack.i.bf16 %v7422_v55, %v7419_v33  ;;  %v2475_v12 = vrot.slane %v7335_v8, 2 }
 0x260   : > { %v2477_v40 = vrot.slane %v7339_v21, 2  ;;  %v7445_v57 = vsel %vm679_vm2, %v2469_v47, %v2470_v28  ;;  %v8539_v21 = vmax.f32 %v7280_v56, 0.0  ;;  %v8543_v56 = vmax.f32 %v7296_v44, 0.0 }
 0x261   : > { %2021 = vst.msk [vmem:[%s6805_s9 + $0xf8] sm:$0xff] %vm1989_vm13, %v8360_v52  ;;  %v7438_v7 = vpop.permute.xlu0 %4879  ;;  %8534 = vst [vmem:[#allocation52_spill] sm:$0xff] %v7445_v57  ;;  %v8536_v52 = vmax.f32 %v7306_v20, 0.0  ;;  %v8538_v33 = vmax.f32 %v7425_v17, 0.0 }
 0x262   : > { %v2127_v20 = vrot.slane %v8539_v21, 7  ;;  %v7478_v47 = vsel %vm679_vm2, %v2475_v12, %v2477_v40  ;;  %v2131_v21 = vrot.slane %v8543_v56, 7  ;;  %v8546_v56 = vmax.f32 %v7274_v32, 0.0 }
 0x263   : > { %v2128_v13 = vrot.slane %v8536_v52, 7  ;;  %2019 = vst.msk [vmem:[%s6805_s9 + $0xe8] sm:$0xff] %vm1989_vm13, %v8538_v33  ;;  %v7459_v8 = vpop.permute.xlu1 %4889  ;;  %5154 = vrot.lane.b32.xlu1 %v7332_v30, %s5382_s16  ;;  %5184 = vrot.lane.b32.xlu0 %v5183_v48, %s5383_s28  ;;  %v8540_v52 = vld [vmem:[#allocation2_spill] sm:$0xff]  ;;  %v5188_v33 = vpack.i.bf16 %v7448_v61, %v7445_v57  ;;  %v7475_v30 = vsel %vm679_vm2, %v2474_v27, %v2475_v12  ;;  %v4881_v34 = vunpack.i.l.bf16 %v7438_v7 }
 0x264   : > { %v3051_v46 = vsel %vm1989_vm13, %v8540_v52, %v4867_v43  ;;  %8541 = vst [vmem:[#allocation3_spill] sm:$0xff] %v7475_v30  ;;  %8542 = vst [vmem:[#allocation2_spill] sm:$0xff] %v7478_v47  ;;  %v3083_v43 = vsel %vm3082_vm14, %v3050_v60, %v4871_v50  ;;  %v7491_v27 = vsel %vm336_vm0, 0.0, %v2127_v20  ;;  %v2130_v55 = vrot.slane %v8546_v56, 7 }
 0x265   : > { %v7470_v28 = vpop.permute.xlu0 %4894  ;;  %v7483_v1 = vsel %vm336_vm0, %v2127_v20, %v2128_v13  ;;  %v2214_v25 = vsel %vm336_vm0, %v2128_v13, 0.0  ;;  %8545 = vst [vmem:[#allocation55_spill] sm:$0xff] %v7491_v27  ;;  %v3084_v12 = vsel %vm3082_vm14, %v3051_v46, %v4872_v36  ;;  %v7500_v50 = vpack.i.bf16 %v7478_v47, %v7475_v30 }
 0x266   : > { %8544 = vst [vmem:[#allocation54_spill] sm:$0xff] %v7483_v1  ;;  %v2311_v60 = vrot.slane %v2214_v25, 1  ;;  %v2308_v20 = vrot.slane %v7491_v27, 1  ;;  %v7505_v6 = vsel %vm336_vm0, %v2130_v55, %v2131_v21  ;;  %v2215_v36 = vsel %vm336_vm0, %v2131_v21, 0.0 }
 0x267   : > { %5159 = vrot.lane.b32.xlu1 %v7319_v4, %s5382_s16  ;;  %v4920_v52 = vpop.permute.xlu1 %4919  ;;  %5189 = vrot.lane.b32.xlu0 %v5188_v33, %s5381_s15  ;;  %v2309_v4 = vrot.slane %v7483_v1, 1  ;;  %8547 = vst [vmem:[#allocation56_spill] sm:$0xff] %v7505_v6  ;;  %v2480_v32 = vrot.slane %v7483_v1, 2  ;;  %v4887_v46 = vunpack.i.h.bf16 %v7427_v45  ;;  %v2482_v30 = vrot.slane %v2214_v25, 2 }
 0x268   : > { %v4922_v44 = vunpack.i.h.bf16 %v4920_v52  ;;  %v4921_v40 = vunpack.i.l.bf16 %v4920_v52  ;;  %v4886_v52 = vunpack.i.l.bf16 %v7427_v45  ;;  %v4882_v21 = vunpack.i.h.bf16 %v7438_v7 }
 0x269   : > { %v7496_v13 = vpop.permute.xlu0 %4899  ;;  %v7525_v57 = vpack.i.bf16 %v7483_v1, %v7491_v27  ;;  %v7528_v38 = vsel %vm502_vm1, %v2308_v20, %v2309_v4  ;;  %v2479_v7 = vrot.slane %v7491_v27, 2  ;;  %v2316_v20 = vrot.slane %v2215_v36, 1 }
 0x26a   : > { %v3148_v56 = vsel %vm1989_vm13, %v6933_v2, %v4921_v40  ;;  %v3149_v47 = vsel %vm1989_vm13, %v6944_v15, %v4922_v44  ;;  %v7531_v2 = vsel %vm502_vm1, %v2309_v4, %v2311_v60  ;;  %v7534_v15 = vsel %vm336_vm0, 0.0, %v2130_v55 }
 0x26b   : > { %5174 = vrot.lane.b32.xlu1 %v7382_v26, %s5383_s28  ;;  %5194 = vrot.lane.b32.xlu0 %v7500_v50, %s5381_s15  ;;  %8548 = vst [vmem:[#allocation57_spill] sm:$0xff] %v7534_v15  ;;  %v3180_v25 = vsel %vm3082_vm14, %v3148_v56, %v4881_v34  ;;  %v3117_v44 = vsel %vm3115_vm15, %v3084_v12, %v4887_v46  ;;  %v2314_v60 = vrot.slane %v7505_v6, 1  ;;  %v2313_v12 = vrot.slane %v7534_v15, 1 }
 0x26c   : > { %v3116_v40 = vsel %vm3115_vm15, %v3083_v43, %v4886_v52  ;;  %v7551_v1 = vpack.i.bf16 %v7531_v2, %v7528_v38  ;;  %v7557_v43 = vsel %vm679_vm2, %v2480_v32, %v2482_v30  ;;  %v2487_v46 = vrot.slane %v2215_v36, 2 }
 0x26d   : > { %v4905_v61 = vpop.permute.xlu0 %4904  ;;  %v7521_v26 = vpop.permute.xlu1 %4924  ;;  %v3244_v52 = vpack.c.bf16 %v3117_v44, %v3116_v40  ;;  %v2484_v56 = vrot.slane %v7534_v15, 2  ;;  %v8549_v30 = vmax.f32 %v7386_v5, 0.0  ;;  %v8550_v5 = vpack.c.bf16 %v6870_v18, %v6867_v10 }
 0x26e   : > { %v4907_v31 = vunpack.i.h.bf16 %v4905_v61  ;;  %v4906_v45 = vunpack.i.l.bf16 %v4905_v61  ;;  %v3181_v61 = vsel %vm3082_vm14, %v3149_v47, %v4882_v21  ;;  %v7554_v47 = vsel %vm679_vm2, %v2479_v7, %v2480_v32  ;;  %v5362_v21 = vld [vmem:[%s8243_s3 + $0x80] sm:$0xff]  }
 0x26f   : > { %5199 = vrot.lane.b32.xlu1 %v5183_v48, %s5381_s15  ;;  %5209 = vrot.lane.b32.xlu0 %v7525_v57, %s5382_s16  ;;  %v2133_v32 = vrot.slane %v8549_v30, 7  ;;  %v7577_v7 = vsel %vm502_vm1, %v2313_v12, %v2314_v60  ;;  %v8551_v10 = vmax.f32 %v7425_v17, 0.0  ;;  %v4892_v17 = vunpack.i.h.bf16 %v7459_v8 }
 0x270   : > { %v3212_v4 = vsel %vm3115_vm15, %v3180_v25, %v4906_v45  ;;  %v3213_v55 = vsel %vm3115_vm15, %v3181_v61, %v4907_v31  ;;  %v2485_v31 = vrot.slane %v7505_v6, 2  ;;  %v7580_v25 = vsel %vm502_vm1, %v2314_v60, %v2316_v20 }
 0x271   : > { %v7547_v27 = vpop.permute.xlu1 %4934  ;;  %v4910_v48 = vpop.permute.xlu0 %4909  ;;  %v3245_v34 = vpack.c.bf16 %v3213_v55, %v3212_v4  ;;  %v7589_v61 = vpack.i.bf16 %v7505_v6, %v7534_v15  ;;  %v2134_v18 = vrot.slane %v8551_v10, 7  ;;  %v7605_v55 = vpack.i.bf16 %v7580_v25, %v7577_v7 }
 0x272   : > { %v7596_v44 = vsel %vm679_vm2, %v2484_v56, %v2485_v31  ;;  %v4912_v40 = vunpack.i.h.bf16 %v4910_v48  ;;  %v4911_v4 = vunpack.i.l.bf16 %v4910_v48  ;;  %v4891_v48 = vunpack.i.l.bf16 %v7459_v8 }
 0x273   : > { %5204 = vrot.lane.b32.xlu1 %v5188_v33, %s5382_s16  ;;  %5214 = vrot.lane.b32.xlu0 %v7551_v1, %s5383_s28  ;;  %v7574_v33 = vpack.i.bf16 %v7557_v43, %v7554_v47  ;;  %v4876_v30 = vunpack.i.l.bf16 %v7407_v39  ;;  %v7641_v10 = vsel %vm336_vm0, %v2134_v18, 0.0  ;;  %v8553_v15 = vpack.c.bf16 %v6980_v41, %v6977_v0 }
 0x274   : > { %3486 = vmatprep.mubr.bf16.mxu0 %v3245_v34  ;;  %v4896_v0 = vunpack.i.l.bf16 %v7470_v28 }
 0x275   : > { %3487 = vmatmul.mubr.bf16.vlgmr.msra.gmra.mxu0 %v3244_v52  ;;  %v7570_v45 = vpop.permute.xlu1 %4944  ;;  %v4915_v36 = vpop.permute.xlu0 %4914  ;;  %v8552_v52 = vmax.f32 %v7404_v51, 0.0  ;;  %v3053_v51 = vsel %vm1989_vm13, %v6842_v9, %v4912_v40 }
 0x276   : > { %4151 = vmatpush3.bf16.msra.mxu0 %v6923_v59  ;;  %4154 = vmatprep.mubr.msk.bf16.mxu0 %vm1989_vm13, %v8550_v5  ;;  %v7599_v59 = vsel %vm679_vm2, %v2485_v31, %v2487_v46  ;;  %v4917_v60 = vunpack.i.h.bf16 %v4915_v36  ;;  %v4916_v20 = vunpack.i.l.bf16 %v4915_v36  ;;  %v4877_v31 = vunpack.i.h.bf16 %v7407_v39 }
 0x277   : > { %5219 = vrot.lane.b32.xlu1 %v7351_v54, %s5383_s28  ;;  %5224 = vrot.lane.b32.xlu0 %v7574_v33, %s5381_s15  ;;  %v7608_v54 = vsel %vm336_vm0, 0.0, %v2133_v32  ;;  %v7619_v46 = vpack.i.bf16 %v7599_v59, %v7596_v44  ;;  %v7623_v56 = vrot.slane %v8552_v52, 7  ;;  %v4937_v36 = vunpack.i.h.bf16 %v7547_v27 }
 0x278   : > { %4152 = vmatprep.subr.bf16.mxu0 %v5362_v21  ;;  %v4936_v5 = vunpack.i.l.bf16 %v7547_v27  ;;  %v2318_v8 = vrot.slane %v7608_v54, 1  ;;  %v3052_v39 = vsel %vm1989_vm13, %v6854_v29, %v4911_v4  ;;  %v4897_v27 = vunpack.i.h.bf16 %v7470_v28 }
 0x279   : > { %v7610_v34 = vpop.permute.xlu1 %4949  ;;  %v7612_v12 = vpop.permute.xlu0 %4929  ;;  %v3086_v52 = vsel %vm3082_vm14, %v3053_v51, %v4917_v60  ;;  %v8554_v29 = vpack.c.bf16 %v6968_v42, %v6965_v19  ;;  %v3151_v4 = vsel %vm1989_vm13, %v6882_v11, %v4892_v17  ;;  %v2321_v28 = vrot.slane %v7641_v10, 1 }
 0x27a   : > { %4153 = vmatpush3.bf16.msra.mxu0 %v5362_v21  ;;  %v7634_v21 = vsel %vm336_vm0, %v2133_v32, %v2134_v18  ;;  %v3150_v18 = vsel %vm1989_vm13, %v6879_v49, %v4891_v48  ;;  %v3183_v42 = vsel %vm3082_vm14, %v3151_v4, %v4937_v36  ;;  %v3055_v36 = vsel %vm1989_vm13, %v6835_v22, %v4897_v27 }
 0x27b   : > { %5229 = vrot.lane.b32.xlu1 %v7411_v58, %s5381_s15  ;;  %5234 = vrot.lane.b32.xlu0 %v7589_v61, %s5382_s16  ;;  %v3085_v58 = vsel %vm3082_vm14, %v3052_v39, %v4916_v20  ;;  %v2319_v60 = vrot.slane %v7634_v21, 1  ;;  %v3182_v19 = vsel %vm3082_vm14, %v3150_v18, %v4936_v5  ;;  %v2490_v20 = vrot.slane %v7634_v21, 2 }
 0x27c   : > { %v3118_v11 = vsel %vm3115_vm15, %v3085_v58, %v4876_v30  ;;  %v4902_v51 = vunpack.i.h.bf16 %v7496_v13  ;;  %v4901_v30 = vunpack.i.l.bf16 %v7496_v13  ;;  %v4926_v58 = vunpack.i.l.bf16 %v7521_v26 }
 0x27d   : > { %4155 = vmatmul.mubr.msk.bf16.vlgmr.msra.gmra.mxu0 %vm1989_vm13, %v8553_v15  ;;  %v4965_v32 = vpop.permute.xlu1 %4964  ;;  %v4940_v6 = vpop.permute.xlu0 %4939  ;;  %v3119_v15 = vsel %vm3115_vm15, %v3086_v52, %v4877_v31  ;;  %v4927_v31 = vunpack.i.h.bf16 %v7521_v26  ;;  %v4947_v13 = vunpack.i.h.bf16 %v7570_v45  ;;  %v4946_v26 = vunpack.i.l.bf16 %v7570_v45 }
 0x27e   : > { %v4967_v9 = vunpack.i.h.bf16 %v4965_v32  ;;  %v4966_v40 = vunpack.i.l.bf16 %v4965_v32  ;;  %4158 = vmatprep.mubr.msk.bf16.mxu0 %vm1989_vm13, %v8554_v29  ;;  %v4942_v52 = vunpack.i.h.bf16 %v4940_v6  ;;  %v3054_v29 = vsel %vm1989_vm13, %v6832_v3, %v4896_v0 }
 0x27f   : > { %5239 = vrot.lane.b32.xlu1 %v7500_v50, %s5382_s16  ;;  %5244 = vrot.lane.b32.xlu0 %v7605_v55, %s5383_s28  ;;  %v2492_v50 = vrot.slane %v7641_v10, 2  ;;  %v3247_v10 = vpack.c.bf16 %v3119_v15, %v3118_v11  ;;  %v8556_v45 = vpack.c.bf16 %v7048_v53, %v7045_v16  ;;  %v7715_v18 = vsel %vm502_vm1, %v2319_v60, %v2321_v28 }
 0x280   : > { %v3214_v41 = vsel %vm3115_vm15, %v3182_v19, %v4966_v40  ;;  %v3215_v49 = vsel %vm3115_vm15, %v3183_v42, %v4967_v9  ;;  %v4941_v9 = vunpack.i.l.bf16 %v4940_v6  ;;  %v3087_v4 = vsel %vm3082_vm14, %v3054_v29, %v4901_v30  ;;  %v8559_v30 = vld [vmem:[#allocation22_spill] sm:$0xff] }
 0x281   : > { %v4970_v17 = vpop.permute.xlu1 %4969  ;;  %v7673_v48 = vpop.permute.xlu0 %4954  ;;  %v3248_v5 = vpack.c.bf16 %v3215_v49, %v3214_v41  ;;  %v3088_v19 = vsel %vm3082_vm14, %v3055_v36, %v4902_v51  ;;  %v8557_v53 = vmax.f32 %v7373_v24, 0.0  ;;  %v2489_v41 = vrot.slane %v7608_v54, 2 }
 0x282   : > { %v4972_v39 = vunpack.i.h.bf16 %v4970_v17  ;;  %v4971_v32 = vunpack.i.l.bf16 %v4970_v17  ;;  %v3121_v42 = vsel %vm3115_vm15, %v3088_v19, %v4942_v52  ;;  %v2217_v15 = vsel %vm336_vm0, %v7623_v56, 0.0 }
 0x283   : > { %5249 = vrot.lane.b32.xlu1 %v7525_v57, %s5383_s28  ;;  %3494 = vmatprep.mubr.bf16.mxu1 %v3248_v5  ;;  %v8555_v57 = vpack.c.bf16 %v7054_v63, %v7051_v23  ;;  %v7709_v23 = vpack.i.bf16 %v7634_v21, %v7608_v54  ;;  %v7712_v63 = vsel %vm502_vm1, %v2318_v8, %v2319_v60  ;;  %v2136_v0 = vrot.slane %v8557_v53, 7 }
 0x284   : > { %v3153_v22 = vsel %vm1989_vm13, %v7010_v35, %v4972_v39  ;;  %v3152_v27 = vsel %vm1989_vm13, %v7003_v14, %v4971_v32  ;;  %5254 = vrot.lane.b32.xlu0 %v7619_v46, %s5381_s15  ;;  %3495 = vmatmul.mubr.bf16.vlgmr.msra.gmra.mxu1 %v3247_v10  ;;  %v3120_v60 = vsel %vm3115_vm15, %v3087_v4, %v4941_v9  ;;  %v2691_v51 = vrot.slane %v2217_v15, 1  ;;  %v8563_v4 = vld [vmem:[#allocation53_spill] sm:$0xff] }
 0x285   : > { %4159 = vmatmul.mubr.msk.bf16.gmra.mxu0 %vm1989_vm13, %v8555_v57  ;;  %v7695_v6 = vpop.permute.xlu1 %4984  ;;  %v7697_v40 = vpop.permute.xlu0 %4959  ;;  %v3184_v35 = vsel %vm3082_vm14, %v3152_v27, %v4926_v58  ;;  %v3185_v14 = vsel %vm3082_vm14, %v3153_v22, %v4927_v31  ;;  %v7736_v24 = vpack.i.bf16 %v7715_v18, %v7712_v63  ;;  %v3250_v28 = vpack.c.bf16 %v3121_v42, %v3120_v60  ;;  %v8560_v31 = vld [vmem:[#allocation16_spill] sm:$0xff] }
 0x286   : > { %4162 = vmatprep.mubr.msk.bf16.mxu0 %vm1989_vm13, %v8556_v45  ;;  %v3216_v3 = vsel %vm3115_vm15, %v3184_v35, %v4946_v26  ;;  %v3217_v16 = vsel %vm3115_vm15, %v3185_v14, %v4947_v13  ;;  %v7741_v17 = vsel %vm679_vm2, %v2489_v41, %v2490_v20  ;;  %v7744_v5 = vsel %vm679_vm2, %v2490_v20, %v2492_v50  ;;  %v8562_v45 = vld [vmem:[#allocation52_spill] sm:$0xff] }
 0x287   : > { %5259 = vrot.lane.b32.xlu1 %v7551_v1, %s5381_s15  ;;  %v3251_v8 = vpack.c.bf16 %v3217_v16, %v3216_v3  ;;  %v2138_v1 = vsel %vm336_vm0, %v2136_v0, %v7623_v56  ;;  %v2201_v36 = vsel %vm336_vm0, 0.0, %v2136_v0  ;;  %v8558_v39 = vpack.c.bf16 %v7139_v37, %v7136_v62  ;;  %v8564_v0 = vld [vmem:[#allocation14_spill] sm:$0xff]  ;;  %v8565_v60 = vld [vmem:[#allocation12_spill] sm:$0xff] }
 0x288   : > { %5264 = vrot.lane.b32.xlu0 %v7709_v23, %s5382_s16  ;;  %v2689_v56 = vrot.slane %v2138_v1, 1  ;;  %v8561_v20 = vpack.c.bf16 %v8559_v30, %v8560_v31  ;;  %v7761_v50 = vpack.i.bf16 %v7744_v5, %v7741_v17  ;;  %v2688_v58 = vrot.slane %v2201_v36, 1  ;;  %v8570_v30 = vld [vmem:[#allocation35_spill] sm:$0xff] }
 0x289   : > { %v4995_v49 = vpop.permute.xlu1 %4994  ;;  %v4975_v11 = vpop.permute.xlu0 %4974  ;;  %3502 = vmatprep.mubr.bf16.mxu1 %v3251_v8  ;;  %v2726_v10 = vrot.slane %v2138_v1, 2  ;;  %v2725_v37 = vrot.slane %v2201_v36, 2  ;;  %v2728_v62 = vrot.slane %v2217_v15, 2  ;;  %v4951_v14 = vunpack.i.l.bf16 %v7610_v34  ;;  %v8566_v15 = vld [vmem:[#allocation20_spill] sm:$0xff] }
 0x28a   : > { %v4977_v52 = vunpack.i.h.bf16 %v4975_v11  ;;  %v4976_v9 = vunpack.i.l.bf16 %v4975_v11  ;;  %v7772_v57 = vsel %vm502_vm1, %v2688_v58, %v2689_v56  ;;  %v7775_v35 = vsel %vm502_vm1, %v2689_v56, %v2691_v51 }
 0x28b   : > { %5269 = vrot.lane.b32.xlu1 %v7574_v33, %s5382_s16  ;;  %v7779_v29 = vpack.i.bf16 %v2138_v1, %v2201_v36  ;;  %v3273_v19 = vpack.c.bf16 %v8563_v4, %v8562_v45  ;;  %v4997_v3 = vunpack.i.h.bf16 %v4995_v49  ;;  %v4996_v16 = vunpack.i.l.bf16 %v4995_v49 }
 0x28c   : > { %5274 = vrot.lane.b32.xlu0 %v7736_v24, %s5383_s28  ;;  %3503 = vmatmul.mubr.bf16.gmra.mxu1 %v3250_v28  ;;  %v7786_v53 = vsel %vm679_vm2, %v2725_v37, %v2726_v10  ;;  %v3057_v8 = vsel %vm1989_vm13, %v8564_v0, %v4977_v52  ;;  %v3056_v42 = vsel %vm1989_vm13, %v8565_v60, %v4976_v9  ;;  %v4931_v49 = vunpack.i.l.bf16 %v7612_v12  ;;  %v8567_v28 = vld [vmem:[#allocation40_spill] sm:$0xff]  ;;  %v8574_v9 = vld [vmem:[#allocation3_spill] sm:$0xff] }
 0x28d   : > { %4163 = vmatmul.mubr.msk.bf16.gmra.mxu0 %vm1989_vm13, %v8558_v39  ;;  %v7753_v33 = vpop.permute.xlu1 %5004  ;;  %v4980_v32 = vpop.permute.xlu0 %4979  ;;  %v7797_v41 = vsel %vm679_vm2, %v2726_v10, %v2728_v62  ;;  %v8568_v36 = vpack.c.bf16 %v8566_v15, %v8567_v28  ;;  %v8569_v39 = vld [vmem:[#allocation7_spill] sm:$0xff]  ;;  %v3154_v31 = vsel %vm1989_vm13, %v8570_v30, %v4951_v14  ;;  %v8572_v10 = vld [vmem:[#allocation26_spill] sm:$0xff]  ;;  %v4956_v60 = vunpack.i.l.bf16 %v7673_v48 }
 0x28e   : > { %4166 = vmatprep.mubr.msk.bf16.mxu0 %vm1989_vm13, %v8561_v20  ;;  %v4982_v22 = vunpack.i.h.bf16 %v4980_v32  ;;  %v4981_v27 = vunpack.i.l.bf16 %v4980_v32  ;;  %v3186_v62 = vsel %vm3082_vm14, %v3154_v31, %v4996_v16  ;;  %v4957_v16 = vunpack.i.h.bf16 %v7673_v48 }
 0x28f   : > { %5279 = vrot.lane.b32.xlu1 %v7589_v61, %s5383_s28  ;;  %v4952_v61 = vunpack.i.h.bf16 %v7610_v34  ;;  %v5303_v34 = vpack.i.bf16 %v7775_v35, %v7772_v57  ;;  %v4986_v28 = vunpack.i.l.bf16 %v7695_v6  ;;  %v5006_v30 = vunpack.i.l.bf16 %v7753_v33 }
 0x290   : > { %5284 = vrot.lane.b32.xlu0 %v7761_v50, %s5381_s15  ;;  %v3089_v11 = vsel %vm3082_vm14, %v3056_v42, %v4981_v27  ;;  %v3090_v1 = vsel %vm3082_vm14, %v3057_v8, %v4982_v22  ;;  %v8575_v22 = vld [vmem:[#allocation2_spill] sm:$0xff]  ;;  %v4987_v42 = vunpack.i.h.bf16 %v7695_v6  ;;  %v5007_v6 = vunpack.i.h.bf16 %v7753_v33 }
 0x291   : > { %v7767_v13 = vpop.permute.xlu1 %5009  ;;  %v7769_v26 = vpop.permute.xlu0 %4989  ;;  %v3155_v32 = vsel %vm1989_vm13, %v8569_v39, %v4952_v61  ;;  %v3276_v27 = vpack.c.bf16 %v8575_v22, %v8574_v9  ;;  %v3122_v45 = vsel %vm3115_vm15, %v3089_v11, %v4931_v49  ;;  %v4962_v49 = vunpack.i.h.bf16 %v7697_v40  ;;  %v8577_v39 = vld [vmem:[#allocation28_spill] sm:$0xff] }
 0x292   : > { %v3187_v52 = vsel %vm3082_vm14, %v3155_v32, %v4997_v3 }
 0x293   : > { %5289 = vrot.lane.b32.xlu1 %v7605_v55, %s5381_s15  ;;  %v4932_v55 = vunpack.i.h.bf16 %v7612_v12  ;;  %v8571_v12 = vld [vmem:[#allocation30_spill] sm:$0xff] }
 0x294   : > { %5294 = vrot.lane.b32.xlu0 %v7779_v29, %s5382_s16  ;;  %v8573_v37 = vpack.c.bf16 %v8571_v12, %v8572_v10  ;;  %v8579_v12 = vld [vmem:[#allocation38_spill] sm:$0xff] }
 0x295   : > { %4167 = vmatmul.mubr.msk.bf16.gmra.mxu0 %vm1989_vm13, %v8568_v36  ;;  %v5025_v56 = vpop.permute.xlu1 %5024  ;;  %v5000_v51 = vpop.permute.xlu0 %4999  ;;  %v3123_v4 = vsel %vm3115_vm15, %v3090_v1, %v4932_v55  ;;  %v4961_v55 = vunpack.i.l.bf16 %v7697_v40  ;;  %v3058_v10 = vsel %vm1989_vm13, %v8579_v12, %v4956_v60 }
 0x296   : > { %v5027_v20 = vunpack.i.h.bf16 %v5025_v56  ;;  %v5026_v58 = vunpack.i.l.bf16 %v5025_v56  ;;  %4170 = vmatprep.mubr.msk.bf16.mxu0 %vm1989_vm13, %v8573_v37  ;;  %v3253_v11 = vpack.c.bf16 %v3123_v4, %v3122_v45  ;;  %v5002_v1 = vunpack.i.h.bf16 %v5000_v51  ;;  %v8576_v56 = vld [vmem:[#allocation34_spill] sm:$0xff]  ;;  %v8581_v4 = vld [vmem:[#allocation5_spill] sm:$0xff] }
 0x297   : > { %5299 = vrot.lane.b32.xlu1 %v7619_v46, %s5382_s16  ;;  %v5313_v46 = vpack.i.bf16 %v7797_v41, %v7786_v53  ;;  %v5001_v36 = vunpack.i.l.bf16 %v5000_v51  ;;  %v3091_v33 = vsel %vm3082_vm14, %v3058_v10, %v4961_v55 }
 0x298   : > { %5304 = vrot.lane.b32.xlu0 %v5303_v34, %s5383_s28  ;;  %v3218_v61 = vsel %vm3115_vm15, %v3186_v62, %v5026_v58  ;;  %v3219_v14 = vsel %vm3115_vm15, %v3187_v52, %v5027_v20  ;;  %v8578_v20 = vld [vmem:[#allocation37_spill] sm:$0xff] }
 0x299   : > { %v5030_v0 = vpop.permute.xlu1 %5029  ;;  %v7827_v3 = vpop.permute.xlu0 %5014  ;;  %v3254_v8 = vpack.c.bf16 %v3219_v14, %v3218_v61  ;;  %v3059_v58 = vsel %vm1989_vm13, %v8578_v20, %v4957_v16  ;;  %v8580_v52 = vld [vmem:[#allocation33_spill] sm:$0xff]  ;;  %v3124_v22 = vsel %vm3115_vm15, %v3091_v33, %v5001_v36  ;;  %v3282_v16 = vpack.c.bf16 %v7599_v59, %v7596_v44 }
 0x29a   : > { %v5032_v34 = vunpack.i.h.bf16 %v5030_v0  ;;  %v5031_v15 = vunpack.i.l.bf16 %v5030_v0  ;;  %v3288_v44 = vpack.c.bf16 %v7797_v41, %v7786_v53  ;;  %v5012_v53 = vunpack.i.h.bf16 %v7767_v13 }
 0x29b   : > { %5309 = vrot.lane.b32.xlu1 %v7709_v23, %s5383_s28  ;;  %3510 = vmatprep.mubr.bf16.mxu1 %v3254_v8  ;;  %v5011_v41 = vunpack.i.l.bf16 %v7767_v13  ;;  %v8586_v13 = vld [vmem:[#allocation19_spill] sm:$0xff] }
 0x29c   : > { %v3157_v48 = vsel %vm1989_vm13, %v8576_v56, %v5032_v34  ;;  %v3156_v32 = vsel %vm1989_vm13, %v8577_v39, %v5031_v15  ;;  %5314 = vrot.lane.b32.xlu0 %v5313_v46, %s5381_s15  ;;  %3511 = vmatmul.mubr.bf16.gmra.mxu1 %v3253_v11  ;;  %v8585_v56 = vld [vmem:[#allocation9_spill] sm:$0xff]  ;;  %v3159_v20 = vsel %vm1989_vm13, %v8586_v13, %v5012_v53  ;;  %v8591_v53 = vld [vmem:[#allocation24_spill] sm:$0xff] }
 0x29d   : > { %4171 = vmatmul.mubr.msk.bf16.gmra.mxu0 %vm1989_vm13, %v3273_v19  ;;  %v7846_v40 = vpop.permute.xlu1 %5044  ;;  %v7848_v23 = vpop.permute.xlu0 %5019  ;;  %v3188_v51 = vsel %vm3082_vm14, %v3156_v32, %v4986_v28  ;;  %v3189_v31 = vsel %vm3082_vm14, %v3157_v48, %v4987_v42  ;;  %v3092_v19 = vsel %vm3082_vm14, %v3059_v58, %v4962_v49  ;;  %v8587_v58 = vld [vmem:[#allocation36_spill] sm:$0xff] }
 0x29e   : > { %4174 = vmatprep.mubr.msk.bf16.mxu0 %vm1989_vm13, %v3276_v27  ;;  %v3220_v37 = vsel %vm3115_vm15, %v3188_v51, %v5006_v30  ;;  %v3221_v62 = vsel %vm3115_vm15, %v3189_v31, %v5007_v6  ;;  %v3125_v61 = vsel %vm3115_vm15, %v3092_v19, %v5002_v1  ;;  %v8584_v1 = vld [vmem:[#allocation11_spill] sm:$0xff]  ;;  %v4992_v6 = vunpack.i.h.bf16 %v7769_v26 }
 0x29f   : > { %5319 = vrot.lane.b32.xlu1 %v7736_v24, %s5381_s15  ;;  %v3257_v9 = vpack.c.bf16 %v3221_v62, %v3220_v37  ;;  %v3256_v45 = vpack.c.bf16 %v3125_v61, %v3124_v22  ;;  %v3279_v24 = vpack.c.bf16 %v7557_v43, %v7554_v47  ;;  %v3285_v43 = vpack.c.bf16 %v7744_v5, %v7741_v17  ;;  %v8582_v17 = vld [vmem:[#allocation4_spill] sm:$0xff]  ;;  %v8583_v5 = vld [vmem:[#allocation6_spill] sm:$0xff] }
 0x2a0   : > { %5324 = vrot.lane.b32.xlu0 %v8580_v52, %s5382_s16  ;;  %v3291_v49 = vpack.c.bf16 %v8583_v5, %v8582_v17  ;;  %v4991_v30 = vunpack.i.l.bf16 %v7769_v26  ;;  %v3158_v12 = vsel %vm1989_vm13, %v8587_v58, %v5011_v41  ;;  %v5017_v52 = vunpack.i.h.bf16 %v7827_v3  ;;  %v8589_v17 = vld [vmem:[#allocation10_spill] sm:$0xff] }
 0x2a1   : > { %v5055_v27 = vpop.permute.xlu1 %5054  ;;  %v5035_v14 = vpop.permute.xlu0 %5034  ;;  %3518 = vmatprep.mubr.bf16.mxu1 %v3257_v9  ;;  %v5016_v9 = vunpack.i.l.bf16 %v7827_v3 }
 0x2a2   : > { %v5037_v60 = vunpack.i.h.bf16 %v5035_v14  ;;  %v5057_v55 = vunpack.i.h.bf16 %v5055_v27  ;;  %v5056_v11 = vunpack.i.l.bf16 %v5055_v27  ;;  %v5022_v27 = vunpack.i.h.bf16 %v7848_v23 }
 0x2a3   : > { %5329 = vrot.lane.b32.xlu1 %v7761_v50, %s5382_s16  ;;  %v3062_v5 = vsel %vm1989_vm13, %v8589_v17, %v5016_v9 }
 0x2a4   : > { %5334 = vrot.lane.b32.xlu0 %v8581_v4, %s5383_s28  ;;  %3519 = vmatmul.mubr.bf16.gmra.mxu1 %v3256_v45  ;;  %v3061_v36 = vsel %vm1989_vm13, %v8584_v1, %v5037_v60  ;;  %v3190_v19 = vsel %vm3082_vm14, %v3158_v12, %v5056_v11  ;;  %v3191_v37 = vsel %vm3082_vm14, %v3159_v20, %v5057_v55  ;;  %v5021_v4 = vunpack.i.l.bf16 %v7848_v23 }
 0x2a5   : > { %4175 = vmatmul.mubr.msk.bf16.gmra.mxu0 %vm1989_vm13, %v3279_v24  ;;  %v7876_v0 = vpop.permute.xlu1 %5064  ;;  %v5040_v46 = vpop.permute.xlu0 %5039  ;;  %v5046_v60 = vunpack.i.l.bf16 %v7846_v40 }
 0x2a6   : > { %4178 = vmatprep.mubr.msk.bf16.mxu0 %vm1989_vm13, %v3282_v16  ;;  %v5042_v42 = vunpack.i.h.bf16 %v5040_v46  ;;  %v5041_v34 = vunpack.i.l.bf16 %v5040_v46  ;;  %v5066_v55 = vunpack.i.l.bf16 %v7876_v0 }
 0x2a7   : > { %5339 = vrot.lane.b32.xlu1 %v7779_v29, %s5383_s28  ;;  %v5036_v29 = vunpack.i.l.bf16 %v5035_v14 }
 0x2a8   : > { %v3094_v32 = vsel %vm3082_vm14, %v3061_v36, %v5042_v42  ;;  %v8588_v42 = vld [vmem:[#allocation8_spill] sm:$0xff] }
 0x2a9   : > { %v7881_v50 = vpop.permute.xlu1 %5069  ;;  %v7883_v47 = vpop.permute.xlu0 %5049  ;;  %v3060_v48 = vsel %vm1989_vm13, %v8585_v56, %v5036_v29  ;;  %v3127_v26 = vsel %vm3115_vm15, %v3094_v32, %v4992_v6  ;;  %v3095_v56 = vsel %vm3082_vm14, %v3062_v5, %v5021_v4 }
 0x2aa   : > { %v3093_v39 = vsel %vm3082_vm14, %v3060_v48, %v5041_v34  ;;  %v3063_v34 = vsel %vm1989_vm13, %v8588_v42, %v5017_v52  ;;  %v5072_v58 = vunpack.i.h.bf16 %v7881_v50 }
 0x2ab   : > { %v3126_v62 = vsel %vm3115_vm15, %v3093_v39, %v4991_v30  ;;  %v3096_v48 = vsel %vm3082_vm14, %v3063_v34, %v5022_v27  ;;  %v5052_v27 = vunpack.i.h.bf16 %v7883_v47  ;;  %v8597_v34 = vld [vmem:[#allocation21_spill] sm:$0xff] }
 0x2ad   : > { %4179 = vmatmul.mubr.msk.bf16.gmra.mxu0 %vm1989_vm13, %v3285_v43  ;;  %v7890_v59 = vpop.permute.xlu1 %5074  ;;  %v7892_v8 = vpop.permute.xlu0 %5059  ;;  %v3259_v43 = vpack.c.bf16 %v3127_v26, %v3126_v62  ;;  %v5071_v26 = vunpack.i.l.bf16 %v7881_v50 }
 0x2ae   : > { %4182 = vmatprep.mubr.msk.bf16.mxu0 %vm1989_vm13, %v3288_v44  ;;  %v5047_v44 = vunpack.i.h.bf16 %v7846_v40  ;;  %v5062_v3 = vunpack.i.h.bf16 %v7892_v8  ;;  %v5061_v29 = vunpack.i.l.bf16 %v7892_v8  ;;  %v5067_v40 = vunpack.i.h.bf16 %v7876_v0 }
 0x2af   : > { %v3162_v17 = vsel %vm1989_vm13, %v8597_v34, %v5071_v26  ;;  %v5077_v5 = vunpack.i.h.bf16 %v7890_v59 }
 0x2b0   : > { %v3128_v6 = vsel %vm3115_vm15, %v3095_v56, %v5061_v29  ;;  %v3129_v30 = vsel %vm3115_vm15, %v3096_v48, %v5062_v3 }
 0x2b1   : > { %v7895_v15 = vpop.permute.xlu1 %5079  ;;  %v7897_v28 = vpop.permute.xlu0 %5094  ;;  %v3262_v20 = vpack.c.bf16 %v3129_v30, %v3128_v6 }
 0x2b5   : > { %v5085_v51 = vpop.permute.xlu1 %5084  ;;  %v7911_v31 = vpop.permute.xlu0 %5099  ;;  %4183 = vmatmul.mubr.msk.bf16.gmra.mxu0 %vm1989_vm13, %v3291_v49  ;;  %v8590_v49 = vld [vmem:[#allocation31_spill] sm:$0xff] }
 0x2b6   : > { %v5087_v10 = vunpack.i.h.bf16 %v5085_v51  ;;  %v5086_v33 = vunpack.i.l.bf16 %v5085_v51  ;;  %v5102_v52 = vunpack.i.h.bf16 %v7911_v31  ;;  %v5101_v9 = vunpack.i.l.bf16 %v7911_v31 }
 0x2b8   : > { %v3222_v22 = vsel %vm3115_vm15, %v3190_v19, %v5086_v33  ;;  %v3223_v61 = vsel %vm3115_vm15, %v3191_v37, %v5087_v10  ;;  %v5097_v33 = vunpack.i.h.bf16 %v7897_v28  ;;  %v5096_v19 = vunpack.i.l.bf16 %v7897_v28  ;;  %v8593_v28 = vld [vmem:[#allocation15_spill] sm:$0xff] }
 0x2b9   : > { %v5090_v14 = vpop.permute.xlu1 %5089  ;;  %v7927_v45 = vpop.permute.xlu0 %5104  ;;  %v3260_v24 = vpack.c.bf16 %v3223_v61, %v3222_v22  ;;  %v8592_v22 = vld [vmem:[#allocation23_spill] sm:$0xff] }
 0x2ba   : > { %v5092_v16 = vunpack.i.h.bf16 %v5090_v14  ;;  %v5091_v46 = vunpack.i.l.bf16 %v5090_v14  ;;  %v3163_v61 = vsel %vm1989_vm13, %v8592_v22, %v5072_v58  ;;  %v5051_v14 = vunpack.i.l.bf16 %v7883_v47 }
 0x2bb   : > { %3526 = vmatprep.mubr.bf16.mxu1 %v3260_v24  ;;  %v5107_v3 = vunpack.i.h.bf16 %v7927_v45  ;;  %v5106_v47 = vunpack.i.l.bf16 %v7927_v45 }
 0x2bc   : > { %v3161_v23 = vsel %vm1989_vm13, %v8590_v49, %v5092_v16  ;;  %v3160_v41 = vsel %vm1989_vm13, %v8591_v53, %v5091_v46  ;;  %3527 = vmatmul.mubr.bf16.gmra.mxu1 %v3259_v43  ;;  %v3065_v16 = vsel %vm1989_vm13, %v8593_v28, %v5097_v33  ;;  %v8594_v46 = vld [vmem:[#allocation27_spill] sm:$0xff]  ;;  %v8595_v43 = vld [vmem:[#allocation45_spill] sm:$0xff]  ;;  %v5076_v53 = vunpack.i.l.bf16 %v7890_v59 }
 0x2bd   : > { %v7944_v11 = vpop.permute.xlu1 %5109  ;;  %v5125_v8 = vpop.permute.xlu0 %5124  ;;  %v3192_v1 = vsel %vm3082_vm14, %v3160_v41, %v5046_v60  ;;  %v3193_v36 = vsel %vm3082_vm14, %v3161_v23, %v5047_v44  ;;  %v3064_v50 = vsel %vm1989_vm13, %v8594_v46, %v5096_v19  ;;  %v8596_v44 = vld [vmem:[#allocation44_spill] sm:$0xff]  ;;  %v3098_v23 = vsel %vm3082_vm14, %v3065_v16, %v5102_v52 }
 0x2be   : > { %v3224_v39 = vsel %vm3115_vm15, %v3192_v1, %v5066_v55  ;;  %v3225_v32 = vsel %vm3115_vm15, %v3193_v36, %v5067_v40  ;;  %v3097_v49 = vsel %vm3082_vm14, %v3064_v50, %v5101_v9  ;;  %v5082_v41 = vunpack.i.h.bf16 %v7895_v15  ;;  %v8600_v50 = vld [vmem:[#allocation32_spill] sm:$0xff] }
 0x2bf   : > { %v3263_v0 = vpack.c.bf16 %v3225_v32, %v3224_v39  ;;  %v5127_v36 = vunpack.i.h.bf16 %v5125_v8  ;;  %v5126_v56 = vunpack.i.l.bf16 %v5125_v8  ;;  %v3130_v30 = vsel %vm3115_vm15, %v3097_v49, %v5051_v14  ;;  %v8598_v14 = vld [vmem:[#allocation39_spill] sm:$0xff] }
 0x2c0   : > { %v3131_v59 = vsel %vm3115_vm15, %v3098_v23, %v5052_v27  ;;  %v5081_v8 = vunpack.i.l.bf16 %v7895_v15  ;;  %v3067_v28 = vsel %vm1989_vm13, %v8598_v14, %v5077_v5  ;;  %v8599_v15 = vld [vmem:[#allocation13_spill] sm:$0xff] }
 0x2c1   : > { %v5115_v51 = vpop.permute.xlu1 %5114  ;;  %v7954_v13 = vpop.permute.xlu0 %5129  ;;  %3534 = vmatprep.mubr.bf16.mxu1 %v3263_v0  ;;  %v3265_v9 = vpack.c.bf16 %v3131_v59, %v3130_v30  ;;  %v3066_v16 = vsel %vm1989_vm13, %v8599_v15, %v5076_v53  ;;  %v3100_v46 = vsel %vm3082_vm14, %v3067_v28, %v5082_v41  ;;  %v8603_v30 = vld [vmem:[#allocation18_spill] sm:$0xff] }
 0x2c2   : > { %v5117_v29 = vunpack.i.h.bf16 %v5115_v51  ;;  %v5116_v42 = vunpack.i.l.bf16 %v5115_v51  ;;  %v5131_v33 = vunpack.i.l.bf16 %v7954_v13 }
 0x2c4   : > { %3535 = vmatmul.mubr.bf16.gmra.mxu1 %v3262_v20  ;;  %v3194_v32 = vsel %vm3082_vm14, %v3162_v17, %v5116_v42  ;;  %v3195_v6 = vsel %vm3082_vm14, %v3163_v61, %v5117_v29 }
 0x2c5   : > { %v7957_v12 = vpop.permute.xlu1 %5119  ;;  %v5145_v10 = vpop.permute.xlu0 %5144 }
 0x2c6   : > { %v5147_v37 = vunpack.i.h.bf16 %v5145_v10  ;;  %v5146_v62 = vunpack.i.l.bf16 %v5145_v10  ;;  %v5132_v10 = vunpack.i.h.bf16 %v7954_v13  ;;  %v5122_v26 = vunpack.i.h.bf16 %v7957_v12 }
 0x2c7   : > { %v5121_v52 = vunpack.i.l.bf16 %v7957_v12  ;;  %v3099_v13 = vsel %vm3082_vm14, %v3066_v16, %v5081_v8  ;;  %v8601_v12 = vld [vmem:[#allocation41_spill] sm:$0xff] }
 0x2c8   : > { %v3165_v31 = vsel %vm1989_vm13, %v8595_v43, %v5147_v37  ;;  %v3164_v60 = vsel %vm1989_vm13, %v8596_v44, %v5146_v62  ;;  %v3167_v43 = vsel %vm1989_vm13, %v8600_v50, %v5132_v10  ;;  %v3133_v42 = vsel %vm3115_vm15, %v3100_v46, %v5122_v26  ;;  %v8605_v10 = vld [vmem:[#allocation50_spill] sm:$0xff] }
 0x2c9   : > { %v7968_v24 = vpop.permute.xlu1 %5134  ;;  %v7970_v4 = vpop.permute.xlu0 %5164  ;;  %v3196_v1 = vsel %vm3082_vm14, %v3164_v60, %v5106_v47  ;;  %v3197_v45 = vsel %vm3082_vm14, %v3165_v31, %v5107_v3  ;;  %v3166_v31 = vsel %vm1989_vm13, %v8601_v12, %v5131_v33  ;;  %v3132_v29 = vsel %vm3115_vm15, %v3099_v13, %v5121_v52 }
 0x2ca   : > { %v3228_v20 = vsel %vm3115_vm15, %v3196_v1, %v5126_v56  ;;  %v3229_v58 = vsel %vm3115_vm15, %v3197_v45, %v5127_v36  ;;  %v5167_v45 = vunpack.i.h.bf16 %v7970_v4  ;;  %v5137_v28 = vunpack.i.h.bf16 %v7968_v24 }
 0x2cb   : > { %v3269_v27 = vpack.c.bf16 %v3229_v58, %v3228_v20  ;;  %v8604_v58 = vld [vmem:[#allocation51_spill] sm:$0xff]  ;;  %v5136_v15 = vunpack.i.l.bf16 %v7968_v24  ;;  %v8607_v24 = vld [vmem:[#allocation29_spill] sm:$0xff] }
 0x2cd   : > { %v5140_v40 = vpop.permute.xlu1 %5139  ;;  %v5170_v55 = vpop.permute.xlu0 %5169 }
 0x2ce   : > { %v5142_v48 = vunpack.i.h.bf16 %v5140_v40  ;;  %v5141_v39 = vunpack.i.l.bf16 %v5140_v40  ;;  %v5172_v22 = vunpack.i.h.bf16 %v5170_v55  ;;  %v5171_v61 = vunpack.i.l.bf16 %v5170_v55 }
 0x2d0   : > { %v3226_v0 = vsel %vm3115_vm15, %v3194_v32, %v5141_v39  ;;  %v3227_v51 = vsel %vm3115_vm15, %v3195_v6, %v5142_v48  ;;  %v3198_v34 = vsel %vm3082_vm14, %v3166_v31, %v5171_v61  ;;  %v3199_v17 = vsel %vm3082_vm14, %v3167_v43, %v5172_v22  ;;  %v8602_v32 = vld [vmem:[#allocation25_spill] sm:$0xff] }
 0x2d1   : > { %v5150_v19 = vpop.permute.xlu1 %5149  ;;  %v5180_v37 = vpop.permute.xlu0 %5179  ;;  %v3266_v62 = vpack.c.bf16 %v3227_v51, %v3226_v0  ;;  %v3268_v48 = vpack.c.bf16 %v3133_v42, %v3132_v29  ;;  %v5166_v39 = vunpack.i.l.bf16 %v7970_v4  ;;  %v5112_v4 = vunpack.i.h.bf16 %v7944_v11  ;;  %v8606_v42 = vld [vmem:[#allocation17_spill] sm:$0xff] }
 0x2d2   : > { %v5152_v5 = vunpack.i.h.bf16 %v5150_v19  ;;  %v5151_v49 = vunpack.i.l.bf16 %v5150_v19  ;;  %v5111_v19 = vunpack.i.l.bf16 %v7944_v11  ;;  %v5182_v22 = vunpack.i.h.bf16 %v5180_v37 }
 0x2d3   : > { %3542 = vmatprep.mubr.bf16.mxu1 %v3266_v62  ;;  %v5181_v61 = vunpack.i.l.bf16 %v5180_v37 }
 0x2d4   : > { %3543 = vmatmul.mubr.bf16.gmra.mxu1 %v3265_v9  ;;  %v3069_v6 = vsel %vm1989_vm13, %v8602_v32, %v5152_v5  ;;  %v3068_v59 = vsel %vm1989_vm13, %v8603_v30, %v5151_v49 }
 0x2d5   : > { %v5155_v44 = vpop.permute.xlu1 %5154  ;;  %v5185_v60 = vpop.permute.xlu0 %5184  ;;  %3550 = vmatprep.mubr.bf16.mxu1 %v3269_v27 }
 0x2d6   : > { %v5187_v3 = vunpack.i.h.bf16 %v5185_v60  ;;  %v5186_v47 = vunpack.i.l.bf16 %v5185_v60  ;;  %v5157_v23 = vunpack.i.h.bf16 %v5155_v44  ;;  %v5156_v53 = vunpack.i.l.bf16 %v5155_v44 }
 0x2d8   : > { %v3230_v41 = vsel %vm3115_vm15, %v3198_v34, %v5186_v47  ;;  %v3231_v40 = vsel %vm3115_vm15, %v3199_v17, %v5187_v3  ;;  %v3101_v51 = vsel %vm3082_vm14, %v3068_v59, %v5156_v53  ;;  %v3102_v20 = vsel %vm3082_vm14, %v3069_v6, %v5157_v23 }
 0x2d9   : > { %v5160_v55 = vpop.permute.xlu1 %5159  ;;  %v5190_v1 = vpop.permute.xlu0 %5189  ;;  %v3272_v0 = vpack.c.bf16 %v3231_v40, %v3230_v41  ;;  %v3134_v27 = vsel %vm3115_vm15, %v3101_v51, %v5111_v19  ;;  %v3135_v14 = vsel %vm3115_vm15, %v3102_v20, %v5112_v4  ;;  %v3071_v34 = vsel %vm1989_vm13, %v8606_v42, %v5137_v28  ;;  %v8608_v41 = vld [vmem:[#allocation49_spill] sm:$0xff] }
 0x2da   : > { %v5192_v36 = vunpack.i.h.bf16 %v5190_v1  ;;  %v5191_v56 = vunpack.i.l.bf16 %v5190_v1  ;;  %v5162_v13 = vunpack.i.h.bf16 %v5160_v55  ;;  %v5161_v46 = vunpack.i.l.bf16 %v5160_v55  ;;  %v8609_v55 = vld [vmem:[#allocation48_spill] sm:$0xff] }
 0x2db   : > { %v3271_v37 = vpack.c.bf16 %v3135_v14, %v3134_v27  ;;  %v3070_v17 = vsel %vm1989_vm13, %v8607_v24, %v5136_v15 }
 0x2dc   : > { %v3169_v8 = vsel %vm1989_vm13, %v8604_v58, %v5192_v36  ;;  %v3168_v33 = vsel %vm1989_vm13, %v8605_v10, %v5191_v56  ;;  %3551 = vmatmul.mubr.bf16.gmra.mxu1 %v3268_v48  ;;  %v3103_v5 = vsel %vm3082_vm14, %v3070_v17, %v5161_v46  ;;  %v3104_v49 = vsel %vm3082_vm14, %v3071_v34, %v5162_v13 }
 0x2dd   : > { %v5175_v62 = vpop.permute.xlu1 %5174  ;;  %v5195_v26 = vpop.permute.xlu0 %5194  ;;  %3558 = vmatprep.mubr.bf16.mxu1 %v3272_v0  ;;  %v3200_v52 = vsel %vm3082_vm14, %v3168_v33, %v5166_v39  ;;  %v3201_v9 = vsel %vm3082_vm14, %v3169_v8, %v5167_v45 }
 0x2de   : > { %v3232_v16 = vsel %vm3115_vm15, %v3200_v52, %v5181_v61  ;;  %v3233_v11 = vsel %vm3115_vm15, %v3201_v9, %v5182_v22  ;;  %v5177_v12 = vunpack.i.h.bf16 %v5175_v62  ;;  %v5197_v31 = vunpack.i.h.bf16 %v5195_v26  ;;  %v8611_v52 = vld [vmem:[#allocation47_spill] sm:$0xff] }
 0x2df   : > { %v5196_v44 = vunpack.i.l.bf16 %v5195_v26  ;;  %v5176_v60 = vunpack.i.l.bf16 %v5175_v62  ;;  %v3275_v29 = vpack.c.bf16 %v3233_v11, %v3232_v16  ;;  %v8610_v62 = vld [vmem:[#allocation46_spill] sm:$0xff] }
 0x2e0   : > { %v3171_v40 = vsel %vm1989_vm13, %v8608_v41, %v5197_v31  ;;  %v3137_v32 = vsel %vm3115_vm15, %v3104_v49, %v5177_v12  ;;  %v8612_v49 = vld [vmem:[#allocation42_spill] sm:$0xff] }
 0x2e1   : > { %v5200_v50 = vpop.permute.xlu1 %5199  ;;  %v5210_v43 = vpop.permute.xlu0 %5209  ;;  %v3170_v1 = vsel %vm1989_vm13, %v8609_v55, %v5196_v44  ;;  %v3136_v39 = vsel %vm3115_vm15, %v3103_v5, %v5176_v60 }
 0x2e2   : > { %v5212_v3 = vunpack.i.h.bf16 %v5210_v43  ;;  %v5211_v47 = vunpack.i.l.bf16 %v5210_v43  ;;  %v5202_v6 = vunpack.i.h.bf16 %v5200_v50  ;;  %v5201_v30 = vunpack.i.l.bf16 %v5200_v50 }
 0x2e3   : > { %v3274_v4 = vpack.c.bf16 %v3137_v32, %v3136_v39 }
 0x2e4   : > { %3559 = vmatmul.mubr.bf16.gmra.mxu1 %v3271_v37  ;;  %v3202_v56 = vsel %vm3082_vm14, %v3170_v1, %v5211_v47  ;;  %v3203_v48 = vsel %vm3082_vm14, %v3171_v40, %v5212_v3  ;;  %v3073_v26 = vsel %vm1989_vm13, %v8610_v62, %v5202_v6  ;;  %v3072_v9 = vsel %vm1989_vm13, %v8611_v52, %v5201_v30 }
 0x2e5   : > { %v5205_v23 = vpop.permute.xlu1 %5204  ;;  %v5215_v53 = vpop.permute.xlu0 %5214  ;;  %3566 = vmatprep.mubr.bf16.mxu1 %v3275_v29 }
 0x2e6   : > { %v5217_v45 = vunpack.i.h.bf16 %v5215_v53  ;;  %v5216_v36 = vunpack.i.l.bf16 %v5215_v53  ;;  %v5207_v51 = vunpack.i.h.bf16 %v5205_v23  ;;  %v5206_v20 = vunpack.i.l.bf16 %v5205_v23  ;;  %v8613_v53 = vld [vmem:[#allocation43_spill] sm:$0xff] }
 0x2e8   : > { %v3234_v59 = vsel %vm3115_vm15, %v3202_v56, %v5216_v36  ;;  %v3235_v0 = vsel %vm3115_vm15, %v3203_v48, %v5217_v45  ;;  %v3105_v22 = vsel %vm3082_vm14, %v3072_v9, %v5206_v20  ;;  %v3106_v61 = vsel %vm3082_vm14, %v3073_v26, %v5207_v51 }
 0x2e9   : > { %v5220_v58 = vpop.permute.xlu1 %5219  ;;  %v5225_v8 = vpop.permute.xlu0 %5224  ;;  %v3278_v19 = vpack.c.bf16 %v3235_v0, %v3234_v59 }
 0x2ea   : > { %v5222_v10 = vunpack.i.h.bf16 %v5220_v58  ;;  %v5221_v33 = vunpack.i.l.bf16 %v5220_v58  ;;  %v5227_v27 = vunpack.i.h.bf16 %v5225_v8  ;;  %v5226_v14 = vunpack.i.l.bf16 %v5225_v8 }
 0x2ec   : > { %3567 = vmatmul.mubr.bf16.gmra.mxu1 %v3274_v4  ;;  %v3138_v16 = vsel %vm3115_vm15, %v3105_v22, %v5221_v33  ;;  %v3139_v11 = vsel %vm3115_vm15, %v3106_v61, %v5222_v10  ;;  %v3173_v50 = vsel %vm1989_vm13, %v7531_v2, %v5227_v27  ;;  %v3172_v43 = vsel %vm1989_vm13, %v7528_v38, %v5226_v14  ;;  %v8614_v61 = vld [vmem:[#allocation54_spill] sm:$0xff] }
 0x2ed   : > { %v5230_v28 = vpop.permute.xlu1 %5229  ;;  %v5235_v15 = vpop.permute.xlu0 %5234  ;;  %3574 = vmatprep.mubr.bf16.mxu1 %v3278_v19  ;;  %v3277_v44 = vpack.c.bf16 %v3139_v11, %v3138_v16 }
 0x2ee   : > { %v5237_v13 = vunpack.i.h.bf16 %v5235_v15  ;;  %v5236_v46 = vunpack.i.l.bf16 %v5235_v15  ;;  %v5232_v37 = vunpack.i.h.bf16 %v5230_v28  ;;  %v5231_v60 = vunpack.i.l.bf16 %v5230_v28  ;;  %v8615_v15 = vld [vmem:[#allocation55_spill] sm:$0xff] }
 0x2f0   : > { %v3204_v29 = vsel %vm3082_vm14, %v3172_v43, %v5236_v46  ;;  %v3205_v42 = vsel %vm3082_vm14, %v3173_v50, %v5237_v13  ;;  %v3075_v23 = vsel %vm1989_vm13, %v8612_v49, %v5232_v37  ;;  %v3074_v41 = vsel %vm1989_vm13, %v8613_v53, %v5231_v60 }
 0x2f1   : > { %v5240_v12 = vpop.permute.xlu1 %5239  ;;  %v5245_v31 = vpop.permute.xlu0 %5244 }
 0x2f2   : > { %v5247_v3 = vunpack.i.h.bf16 %v5245_v31  ;;  %v5246_v47 = vunpack.i.l.bf16 %v5245_v31  ;;  %v5242_v34 = vunpack.i.h.bf16 %v5240_v12  ;;  %v5241_v24 = vunpack.i.l.bf16 %v5240_v12 }
 0x2f4   : > { %3575 = vmatmul.mubr.bf16.gmra.mxu1 %v3277_v44  ;;  %v3236_v17 = vsel %vm3115_vm15, %v3204_v29, %v5246_v47  ;;  %v3237_v2 = vsel %vm3115_vm15, %v3205_v42, %v5247_v3  ;;  %v3107_v45 = vsel %vm3082_vm14, %v3074_v41, %v5241_v24  ;;  %v3108_v36 = vsel %vm3082_vm14, %v3075_v23, %v5242_v34 }
 0x2f5   : > { %v5250_v5 = vpop.permute.xlu1 %5249  ;;  %v3281_v38 = vpack.c.bf16 %v3237_v2, %v3236_v17 }
 0x2f6   : > { %v5252_v40 = vunpack.i.h.bf16 %v5250_v5  ;;  %v5251_v55 = vunpack.i.l.bf16 %v5250_v5  ;;  %v5255_v1 = vpop.permute.xlu0 %5254 }
 0x2f7   : > { %3582 = vmatprep.mubr.bf16.mxu1 %v3281_v38  ;;  %v5257_v6 = vunpack.i.h.bf16 %v5255_v1  ;;  %v5256_v30 = vunpack.i.l.bf16 %v5255_v1  ;;  %v8616_v1 = vld [vmem:[#allocation56_spill] sm:$0xff] }
 0x2f8   : > { %v3140_v56 = vsel %vm3115_vm15, %v3107_v45, %v5251_v55  ;;  %v3141_v48 = vsel %vm3115_vm15, %v3108_v36, %v5252_v40 }
 0x2f9   : > { %v5260_v39 = vpop.permute.xlu1 %5259  ;;  %v3280_v32 = vpack.c.bf16 %v3141_v48, %v3140_v56  ;;  %v3175_v8 = vsel %vm1989_vm13, %v7580_v25, %v5257_v6  ;;  %v3174_v10 = vsel %vm1989_vm13, %v7577_v7, %v5256_v30  ;;  %v8617_v48 = vld [vmem:[#allocation57_spill] sm:$0xff] }
 0x2fa   : > { %v5265_v59 = vpop.permute.xlu0 %5264  ;;  %v5262_v20 = vunpack.i.h.bf16 %v5260_v39  ;;  %v5261_v33 = vunpack.i.l.bf16 %v5260_v39 }
 0x2fb   : > { %v5267_v0 = vunpack.i.h.bf16 %v5265_v59  ;;  %v5266_v51 = vunpack.i.l.bf16 %v5265_v59 }
 0x2fc   : > { %3583 = vmatmul.mubr.bf16.gmra.mxu1 %v3280_v32  ;;  %v3077_v27 = vsel %vm1989_vm13, %v8614_v61, %v5262_v20  ;;  %v3076_v7 = vsel %vm1989_vm13, %v8615_v15, %v5261_v33 }
 0x2fd   : > { %v5270_v58 = vpop.permute.xlu1 %5269  ;;  %v3206_v9 = vsel %vm3082_vm14, %v3174_v10, %v5266_v51  ;;  %v3207_v22 = vsel %vm3082_vm14, %v3175_v8, %v5267_v0 }
 0x2fe   : > { %v5275_v4 = vpop.permute.xlu0 %5274  ;;  %v5272_v19 = vunpack.i.h.bf16 %v5270_v58  ;;  %v5271_v62 = vunpack.i.l.bf16 %v5270_v58 }
 0x2ff   : > { %v5277_v26 = vunpack.i.h.bf16 %v5275_v4  ;;  %v5276_v52 = vunpack.i.l.bf16 %v5275_v4 }
 0x300   : > { %v3109_v50 = vsel %vm3082_vm14, %v3076_v7, %v5271_v62  ;;  %v3110_v43 = vsel %vm3082_vm14, %v3077_v27, %v5272_v19 }
 0x301   : > { %v5280_v14 = vpop.permute.xlu1 %5279  ;;  %v3238_v28 = vsel %vm3115_vm15, %v3206_v9, %v5276_v52  ;;  %v3239_v25 = vsel %vm3115_vm15, %v3207_v22, %v5277_v26 }
 0x302   : > { %v5282_v16 = vunpack.i.h.bf16 %v5280_v14  ;;  %v5281_v11 = vunpack.i.l.bf16 %v5280_v14  ;;  %v5285_v13 = vpop.permute.xlu0 %5284  ;;  %v3284_v46 = vpack.c.bf16 %v3239_v25, %v3238_v28 }
 0x303   : > { %v5287_v60 = vunpack.i.h.bf16 %v5285_v13  ;;  %v5286_v3 = vunpack.i.l.bf16 %v5285_v13 }
 0x304   : > { %3590 = vmatprep.mubr.bf16.mxu1 %v3284_v46  ;;  %v3142_v12 = vsel %vm3115_vm15, %v3109_v50, %v5281_v11  ;;  %v3143_v31 = vsel %vm3115_vm15, %v3110_v43, %v5282_v16 }
 0x305   : > { %v5290_v44 = vpop.permute.xlu1 %5289  ;;  %v3283_v37 = vpack.c.bf16 %v3143_v31, %v3142_v12  ;;  %v3177_v17 = vsel %vm1989_vm13, %v7715_v18, %v5287_v60  ;;  %v3176_v2 = vsel %vm1989_vm13, %v7712_v63, %v5286_v3 }
 0x306   : > { %v5295_v47 = vpop.permute.xlu0 %5294  ;;  %v5292_v34 = vunpack.i.h.bf16 %v5290_v44  ;;  %v5291_v5 = vunpack.i.l.bf16 %v5290_v44 }
 0x307   : > { %3591 = vmatmul.mubr.bf16.gmra.mxu1 %v3283_v37  ;;  %v5297_v29 = vunpack.i.h.bf16 %v5295_v47  ;;  %v5296_v42 = vunpack.i.l.bf16 %v5295_v47 }
 0x308   : > { %v3079_v45 = vsel %vm1989_vm13, %v8616_v1, %v5292_v34  ;;  %v3078_v63 = vsel %vm1989_vm13, %v8617_v48, %v5291_v5  ;;  %v8133_v34 = vld [vmem:[%s8244_s4] ss:$0 sm:$0xff] }
 0x309   : > { %v5300_v24 = vpop.permute.xlu1 %5299  ;;  %v3208_v40 = vsel %vm3082_vm14, %v3176_v2, %v5296_v42  ;;  %v3209_v55 = vsel %vm3082_vm14, %v3177_v17, %v5297_v29 }
 0x30a   : > { %v5305_v38 = vpop.permute.xlu0 %5304  ;;  %v5302_v49 = vunpack.i.h.bf16 %v5300_v24  ;;  %v5301_v23 = vunpack.i.l.bf16 %v5300_v24 }
 0x30b   : > { %v5307_v53 = vunpack.i.h.bf16 %v5305_v38  ;;  %v5306_v41 = vunpack.i.l.bf16 %v5305_v38 }
 0x30c   : > { %v3111_v59 = vsel %vm3082_vm14, %v3078_v63, %v5301_v23  ;;  %v3112_v0 = vsel %vm3082_vm14, %v3079_v45, %v5302_v49 }
 0x30d   : > { %v5310_v36 = vpop.permute.xlu1 %5309  ;;  %v3240_v56 = vsel %vm3115_vm15, %v3208_v40, %v5306_v41  ;;  %v3241_v18 = vsel %vm3115_vm15, %v3209_v55, %v5307_v53 }
 0x30e   : > { %v5312_v39 = vunpack.i.h.bf16 %v5310_v36  ;;  %v5311_v32 = vunpack.i.l.bf16 %v5310_v36  ;;  %v5315_v6 = vpop.permute.xlu0 %5314  ;;  %v3287_v30 = vpack.c.bf16 %v3241_v18, %v3240_v56 }
 0x30f   : > { %v5317_v10 = vunpack.i.h.bf16 %v5315_v6  ;;  %v5316_v33 = vunpack.i.l.bf16 %v5315_v6 }
 0x310   : > { %3598 = vmatprep.mubr.bf16.mxu1 %v3287_v30  ;;  %v3144_v51 = vsel %vm3115_vm15, %v3111_v59, %v5311_v32  ;;  %v3145_v20 = vsel %vm3115_vm15, %v3112_v0, %v5312_v39 }
 0x311   : > { %v5320_v58 = vpop.permute.xlu1 %5319  ;;  %v3286_v8 = vpack.c.bf16 %v3145_v20, %v3144_v51  ;;  %v3179_v9 = vsel %vm1989_vm13, %v7775_v35, %v5317_v10  ;;  %v3178_v22 = vsel %vm1989_vm13, %v7772_v57, %v5316_v33 }
 0x312   : > { %v5325_v4 = vpop.permute.xlu0 %5324  ;;  %v5322_v26 = vunpack.i.h.bf16 %v5320_v58  ;;  %v5321_v61 = vunpack.i.l.bf16 %v5320_v58 }
 0x313   : > { %3599 = vmatmul.mubr.bf16.gmra.mxu1 %v3286_v8  ;;  %v5327_v19 = vunpack.i.h.bf16 %v5325_v4  ;;  %v5326_v62 = vunpack.i.l.bf16 %v5325_v4 }
 0x314   : > { %v3081_v11 = vsel %vm1989_vm13, %v7634_v21, %v5322_v26  ;;  %v3080_v57 = vsel %vm1989_vm13, %v7608_v54, %v5321_v61 }
 0x315   : > { %v5330_v52 = vpop.permute.xlu1 %5329  ;;  %v3210_v7 = vsel %vm3082_vm14, %v3178_v22, %v5326_v62  ;;  %v3211_v16 = vsel %vm3082_vm14, %v3179_v9, %v5327_v19 }
 0x316   : > { %v5335_v27 = vpop.permute.xlu0 %5334  ;;  %v5332_v14 = vunpack.i.h.bf16 %v5330_v52  ;;  %v5331_v28 = vunpack.i.l.bf16 %v5330_v52 }
 0x317   : > { %v5337_v25 = vunpack.i.h.bf16 %v5335_v27  ;;  %v5336_v15 = vunpack.i.l.bf16 %v5335_v27 }
 0x318   : > { %v3113_v31 = vsel %vm3082_vm14, %v3080_v57, %v5331_v28  ;;  %v3114_v44 = vsel %vm3082_vm14, %v3081_v11, %v5332_v14 }
 0x319   : > { %v5340_v13 = vpop.permute.xlu1 %5339  ;;  %v3242_v46 = vsel %vm3115_vm15, %v3210_v7, %v5336_v15  ;;  %v3243_v35 = vsel %vm3115_vm15, %v3211_v16, %v5337_v25 }
 0x31a   : > { %v5342_v50 = vunpack.i.h.bf16 %v5340_v13  ;;  %v5341_v43 = vunpack.i.l.bf16 %v5340_v13  ;;  %v3290_v12 = vpack.c.bf16 %v3243_v35, %v3242_v46 }
 0x31c   : > { %3606 = vmatprep.mubr.bf16.mxu1 %v3290_v12  ;;  %v3146_v37 = vsel %vm3115_vm15, %v3113_v31, %v5341_v43  ;;  %v3147_v21 = vsel %vm3115_vm15, %v3114_v44, %v5342_v50 }
 0x31d   : > { %v3289_v60 = vpack.c.bf16 %v3147_v21, %v3146_v37 }
 0x31f   : > { %3607 = vmatmul.mubr.bf16.gmra.mxu1 %v3289_v60 }
 0x335   : > { %v4000_v3 = vpop.f32.mrf.mxu0 }
 0x337   : > { %v4001_v47 = vpop.f32.mrf.mxu0 }
 0x338   : > { %v4002_v42 = vadd.f32 %v4001_v47, %v4000_v3 }
 0x339   : > { %v4003_v29 = vpop.f32.mrf.mxu0 }
 0x33a   : > { %v3489_v2 = vadd.f32 %v4002_v42, %v8133_v34 }
 0x33b   : > { %v4004_v54 = vpop.f32.mrf.mxu0 }
 0x33c   : > { %v4005_v17 = vadd.f32 %v4004_v54, %v4003_v29 }
 0x33d   : > { %v4156_v24 = vpop.f32.mrf.mxu0 }
 0x33e   : > { %v3492_v23 = vadd.f32 %v4005_v17, %v8133_v34 }
 0x33f   : > { %v3649_v5 = vpop.f32.mrf.mxu0 }
 0x340   : > { %v3650_v38 = vadd.f32 %v3649_v5, %v3489_v2 }
 0x341   : > { %v4157_v49 = vpop.f32.mrf.mxu0 }
 0x342   : > { %3776 = vst.msk [vmem:[%s8140_s22] sm:$0xff] %vm1989_vm13, %v3650_v38 }
 0x343   : > { %v3652_v53 = vpop.f32.mrf.mxu0 }
 0x344   : > { %v3653_v41 = vadd.f32 %v3652_v53, %v3492_v23  ;;  %v4006_v40 = vpop.f32.mrf.mxu1 }
 0x345   : > { %v4160_v56 = vpop.f32.mrf.mxu0 }
 0x346   : > { %3777 = vst.msk [vmem:[%s8140_s22 + $0x8] sm:$0xff] %vm1989_vm13, %v3653_v41  ;;  %v4007_v55 = vpop.f32.mrf.mxu1 }
 0x347   : > { %v4008_v1 = vadd.f32 %v4007_v55, %v4006_v40  ;;  %v3665_v6 = vpop.f32.mrf.mxu0 }
 0x348   : > { %v4009_v45 = vpop.f32.mrf.mxu1 }
 0x349   : > { %v3497_v36 = vadd.f32 %v4008_v1, %v8133_v34  ;;  %v4161_v58 = vpop.f32.mrf.mxu0 }
 0x34a   : > { %v4010_v18 = vpop.f32.mrf.mxu1 }
 0x34b   : > { %v3658_v48 = vadd.f32 %v4156_v24, %v3497_v36  ;;  %v4011_v63 = vadd.f32 %v4010_v18, %v4009_v45  ;;  %v3668_v19 = vpop.f32.mrf.mxu0 }
 0x34c   : > { %v4012_v39 = vpop.f32.mrf.mxu1 }
 0x34d   : > { %3778 = vst.msk [vmem:[%s8140_s22 + $0x10] sm:$0xff] %vm1989_vm13, %v3658_v48  ;;  %v3500_v32 = vadd.f32 %v4011_v63, %v8133_v34  ;;  %v4164_v27 = vpop.f32.mrf.mxu0 }
 0x34e   : > { %v4013_v30 = vpop.f32.mrf.mxu1 }
 0x34f   : > { %v3661_v59 = vadd.f32 %v4157_v49, %v3500_v32  ;;  %v4014_v0 = vadd.f32 %v4013_v30, %v4012_v39  ;;  %v3681_v16 = vpop.f32.mrf.mxu0 }
 0x350   : > { %v4015_v51 = vpop.f32.mrf.mxu1 }
 0x351   : > { %3779 = vst.msk [vmem:[%s8140_s22 + $0x18] sm:$0xff] %vm1989_vm13, %v3661_v59  ;;  %v3505_v20 = vadd.f32 %v4014_v0, %v8133_v34  ;;  %v4165_v50 = vpop.f32.mrf.mxu0 }
 0x352   : > { %v4016_v8 = vpop.f32.mrf.mxu1 }
 0x353   : > { %v3666_v10 = vadd.f32 %v3665_v6, %v3505_v20  ;;  %v4017_v33 = vadd.f32 %v4016_v8, %v4015_v51  ;;  %v3684_v37 = vpop.f32.mrf.mxu0 }
 0x355   : > { %3780 = vst.msk [vmem:[%s8140_s22 + $0x20] sm:$0xff] %vm1989_vm13, %v3666_v10  ;;  %v3508_v4 = vadd.f32 %v4017_v33, %v8133_v34  ;;  %v4168_v54 = vpop.f32.mrf.mxu0 }
 0x357   : > { %v3669_v62 = vadd.f32 %v3668_v19, %v3508_v4  ;;  %v3697_v49 = vpop.f32.mrf.mxu0 }
 0x359   : > { %3781 = vst.msk [vmem:[%s8140_s22 + $0x28] sm:$0xff] %vm1989_vm13, %v3669_v62  ;;  %v4169_v1 = vpop.f32.mrf.mxu0 }
 0x35b   : > { %v3700_v48 = vpop.f32.mrf.mxu0 }
 0x35c   : > { %v4018_v26 = vpop.f32.mrf.mxu1 }
 0x35d   : > { %v4172_v0 = vpop.f32.mrf.mxu0 }
 0x35e   : > { %v4019_v52 = vpop.f32.mrf.mxu1 }
 0x35f   : > { %v4020_v9 = vadd.f32 %v4019_v52, %v4018_v26  ;;  %v3713_v33 = vpop.f32.mrf.mxu0 }
 0x360   : > { %v4021_v22 = vpop.f32.mrf.mxu1 }
 0x361   : > { %v3513_v61 = vadd.f32 %v4020_v9, %v8133_v34  ;;  %v4173_v9 = vpop.f32.mrf.mxu0 }
 0x362   : > { %v4022_v14 = vpop.f32.mrf.mxu1 }
 0x363   : > { %v3674_v28 = vadd.f32 %v4160_v56, %v3513_v61  ;;  %v4023_v25 = vadd.f32 %v4022_v14, %v4021_v22 }
 0x364   : > { %v4024_v15 = vpop.f32.mrf.mxu1 }
 0x365   : > { %3782 = vst.msk [vmem:[%s8140_s22 + $0x30] sm:$0xff] %vm1989_vm13, %v3674_v28  ;;  %v3516_v7 = vadd.f32 %v4023_v25, %v8133_v34  ;;  %v3716_v25 = vpop.f32.mrf.mxu0 }
 0x366   : > { %v4025_v11 = vpop.f32.mrf.mxu1 }
 0x367   : > { %v3677_v13 = vadd.f32 %v4161_v58, %v3516_v7  ;;  %v4026_v46 = vadd.f32 %v4025_v11, %v4024_v15 }
 0x368   : > { %v4027_v35 = vpop.f32.mrf.mxu1 }
 0x369   : > { %3783 = vst.msk [vmem:[%s8140_s22 + $0x38] sm:$0xff] %vm1989_vm13, %v3677_v13  ;;  %v3521_v57 = vadd.f32 %v4026_v46, %v8133_v34  ;;  %v4176_v46 = vpop.f32.mrf.mxu0 }
 0x36a   : > { %v4028_v43 = vpop.f32.mrf.mxu1 }
 0x36b   : > { %v3682_v12 = vadd.f32 %v3681_v16, %v3521_v57  ;;  %v4029_v31 = vadd.f32 %v4028_v43, %v4027_v35 }
 0x36d   : > { %3784 = vst.msk [vmem:[%s8140_s22 + $0x40] sm:$0xff] %vm1989_vm13, %v3682_v12  ;;  %v3524_v44 = vadd.f32 %v4029_v31, %v8133_v34  ;;  %v3729_v31 = vpop.f32.mrf.mxu0 }
 0x36f   : > { %v3685_v21 = vadd.f32 %v3684_v37, %v3524_v44 }
 0x371   : > { %3785 = vst.msk [vmem:[%s8140_s22 + $0x48] sm:$0xff] %vm1989_vm13, %v3685_v21 }
 0x37c   : > { %v4030_v60 = vpop.f32.mrf.mxu1 }
 0x37e   : > { %v4031_v3 = vpop.f32.mrf.mxu1 }
 0x37f   : > { %v4032_v47 = vadd.f32 %v4031_v3, %v4030_v60 }
 0x380   : > { %v4033_v29 = vpop.f32.mrf.mxu1 }
 0x381   : > { %v3529_v42 = vadd.f32 %v4032_v47, %v8133_v34  ;;  %v4177_v47 = vpop.f32.mrf.mxu0 }
 0x382   : > { %v4034_v24 = vpop.f32.mrf.mxu1 }
 0x383   : > { %v3690_v17 = vadd.f32 %v4164_v27, %v3529_v42  ;;  %v4035_v2 = vadd.f32 %v4034_v24, %v4033_v29 }
 0x384   : > { %v4036_v5 = vpop.f32.mrf.mxu1 }
 0x385   : > { %3786 = vst.msk [vmem:[%s8140_s22 + $0x50] sm:$0xff] %vm1989_vm13, %v3690_v17  ;;  %v3532_v38 = vadd.f32 %v4035_v2, %v8133_v34  ;;  %v3732_v2 = vpop.f32.mrf.mxu0 }
 0x386   : > { %v4037_v23 = vpop.f32.mrf.mxu1 }
 0x387   : > { %v3693_v53 = vadd.f32 %v4165_v50, %v3532_v38  ;;  %v4038_v41 = vadd.f32 %v4037_v23, %v4036_v5 }
 0x388   : > { %v4039_v40 = vpop.f32.mrf.mxu1 }
 0x389   : > { %3787 = vst.msk [vmem:[%s8140_s22 + $0x58] sm:$0xff] %vm1989_vm13, %v3693_v53  ;;  %v3537_v55 = vadd.f32 %v4038_v41, %v8133_v34  ;;  %v4180_v41 = vpop.f32.mrf.mxu0 }
 0x38a   : > { %v4040_v45 = vpop.f32.mrf.mxu1 }
 0x38b   : > { %v3698_v36 = vadd.f32 %v3697_v49, %v3537_v55  ;;  %v4041_v56 = vadd.f32 %v4040_v45, %v4039_v40 }
 0x38d   : > { %3788 = vst.msk [vmem:[%s8140_s22 + $0x60] sm:$0xff] %vm1989_vm13, %v3698_v36  ;;  %v3540_v18 = vadd.f32 %v4041_v56, %v8133_v34  ;;  %v3745_v56 = vpop.f32.mrf.mxu0 }
 0x38f   : > { %v3701_v63 = vadd.f32 %v3700_v48, %v3540_v18 }
 0x391   : > { %3789 = vst.msk [vmem:[%s8140_s22 + $0x68] sm:$0xff] %vm1989_vm13, %v3701_v63 }
 0x394   : > { %v4042_v39 = vpop.f32.mrf.mxu1 }
 0x396   : > { %v4043_v32 = vpop.f32.mrf.mxu1 }
 0x397   : > { %v4044_v6 = vadd.f32 %v4043_v32, %v4042_v39 }
 0x398   : > { %v4045_v30 = vpop.f32.mrf.mxu1 }
 0x399   : > { %v3545_v59 = vadd.f32 %v4044_v6, %v8133_v34  ;;  %v4181_v6 = vpop.f32.mrf.mxu0 }
 0x39a   : > { %v4046_v51 = vpop.f32.mrf.mxu1 }
 0x39b   : > { %v3706_v20 = vadd.f32 %v4168_v54, %v3545_v59  ;;  %v4047_v58 = vadd.f32 %v4046_v51, %v4045_v30 }
 0x39c   : > { %v4048_v8 = vpop.f32.mrf.mxu1 }
 0x39d   : > { %3790 = vst.msk [vmem:[%s8140_s22 + $0x70] sm:$0xff] %vm1989_vm13, %v3706_v20  ;;  %v3548_v10 = vadd.f32 %v4047_v58, %v8133_v34  ;;  %v3748_v20 = vpop.f32.mrf.mxu0 }
 0x39e   : > { %v4049_v4 = vpop.f32.mrf.mxu1 }
 0x39f   : > { %v3709_v19 = vadd.f32 %v4169_v1, %v3548_v10  ;;  %v4050_v62 = vadd.f32 %v4049_v4, %v4048_v8 }
 0x3a0   : > { %v4051_v26 = vpop.f32.mrf.mxu1 }
 0x3a1   : > { %3791 = vst.msk [vmem:[%s8140_s22 + $0x78] sm:$0xff] %vm1989_vm13, %v3709_v19  ;;  %v3553_v52 = vadd.f32 %v4050_v62, %v8133_v34 }
 0x3a2   : > { %v4052_v22 = vpop.f32.mrf.mxu1 }
 0x3a3   : > { %v3714_v61 = vadd.f32 %v3713_v33, %v3553_v52  ;;  %v4053_v27 = vadd.f32 %v4052_v22, %v4051_v26 }
 0x3a4   : > { %v4054_v14 = vpop.f32.mrf.mxu1 }
 0x3a5   : > { %3792 = vst.msk [vmem:[%s8140_s22 + $0x80] sm:$0xff] %vm1989_vm13, %v3714_v61  ;;  %v3556_v28 = vadd.f32 %v4053_v27, %v8133_v34 }
 0x3a6   : > { %v4055_v15 = vpop.f32.mrf.mxu1 }
 0x3a7   : > { %v3717_v7 = vadd.f32 %v3716_v25, %v3556_v28  ;;  %v4056_v16 = vadd.f32 %v4055_v15, %v4054_v14 }
 0x3a8   : > { %v4057_v11 = vpop.f32.mrf.mxu1 }
 0x3a9   : > { %3793 = vst.msk [vmem:[%s8140_s22 + $0x88] sm:$0xff] %vm1989_vm13, %v3717_v7  ;;  %v3561_v13 = vadd.f32 %v4056_v16, %v8133_v34 }
 0x3aa   : > { %v4058_v35 = vpop.f32.mrf.mxu1 }
 0x3ab   : > { %v3722_v57 = vadd.f32 %v4172_v0, %v3561_v13  ;;  %v4059_v50 = vadd.f32 %v4058_v35, %v4057_v11 }
 0x3ac   : > { %v4060_v43 = vpop.f32.mrf.mxu1 }
 0x3ad   : > { %3794 = vst.msk [vmem:[%s8140_s22 + $0x90] sm:$0xff] %vm1989_vm13, %v3722_v57  ;;  %v3564_v12 = vadd.f32 %v4059_v50, %v8133_v34 }
 0x3ae   : > { %v4061_v44 = vpop.f32.mrf.mxu1 }
 0x3af   : > { %v3725_v37 = vadd.f32 %v4173_v9, %v3564_v12  ;;  %v4062_v21 = vadd.f32 %v4061_v44, %v4060_v43  ;;  %v4184_v9 = vpop.f32.mrf.mxu0 }
 0x3b0   : > { %v4063_v60 = vpop.f32.mrf.mxu1 }
 0x3b1   : > { %3795 = vst.msk [vmem:[%s8140_s22 + $0x98] sm:$0xff] %vm1989_vm13, %v3725_v37  ;;  %v3569_v3 = vadd.f32 %v4062_v21, %v8133_v34  ;;  %v3761_v14 = vpop.f32.mrf.mxu0 }
 0x3b2   : > { %v4064_v29 = vpop.f32.mrf.mxu1 }
 0x3b3   : > { %v3730_v42 = vadd.f32 %v3729_v31, %v3569_v3  ;;  %v4065_v54 = vadd.f32 %v4064_v29, %v4063_v60  ;;  %v4185_v7 = vpop.f32.mrf.mxu0 }
 0x3b4   : > { %v4066_v24 = vpop.f32.mrf.mxu1 }
 0x3b5   : > { %3796 = vst.msk [vmem:[%s8140_s22 + $0xa0] sm:$0xff] %vm1989_vm13, %v3730_v42  ;;  %v3572_v17 = vadd.f32 %v4065_v54, %v8133_v34  ;;  %v3764_v35 = vpop.f32.mrf.mxu0 }
 0x3b6   : > { %v4067_v5 = vpop.f32.mrf.mxu1 }
 0x3b7   : > { %v3733_v38 = vadd.f32 %v3732_v2, %v3572_v17  ;;  %v4068_v49 = vadd.f32 %v4067_v5, %v4066_v24 }
 0x3b8   : > { %v4069_v23 = vpop.f32.mrf.mxu1 }
 0x3b9   : > { %3797 = vst.msk [vmem:[%s8140_s22 + $0xa8] sm:$0xff] %vm1989_vm13, %v3733_v38  ;;  %v3577_v53 = vadd.f32 %v4068_v49, %v8133_v34 }
 0x3ba   : > { %v4070_v40 = vpop.f32.mrf.mxu1 }
 0x3bb   : > { %v3738_v55 = vadd.f32 %v4176_v46, %v3577_v53  ;;  %v4071_v1 = vadd.f32 %v4070_v40, %v4069_v23 }
 0x3bc   : > { %v4072_v45 = vpop.f32.mrf.mxu1 }
 0x3bd   : > { %3798 = vst.msk [vmem:[%s8140_s22 + $0xb0] sm:$0xff] %vm1989_vm13, %v3738_v55  ;;  %v3580_v36 = vadd.f32 %v4071_v1, %v8133_v34 }
 0x3be   : > { %v4073_v18 = vpop.f32.mrf.mxu1 }
 0x3bf   : > { %v3741_v48 = vadd.f32 %v4177_v47, %v3580_v36  ;;  %v4074_v63 = vadd.f32 %v4073_v18, %v4072_v45 }
 0x3c0   : > { %v4075_v39 = vpop.f32.mrf.mxu1 }
 0x3c1   : > { %3799 = vst.msk [vmem:[%s8140_s22 + $0xb8] sm:$0xff] %vm1989_vm13, %v3741_v48  ;;  %v3585_v32 = vadd.f32 %v4074_v63, %v8133_v34 }
 0x3c2   : > { %v4076_v30 = vpop.f32.mrf.mxu1 }
 0x3c3   : > { %v3746_v59 = vadd.f32 %v3745_v56, %v3585_v32  ;;  %v4077_v0 = vadd.f32 %v4076_v30, %v4075_v39 }
 0x3c5   : > { %3800 = vst.msk [vmem:[%s8140_s22 + $0xc0] sm:$0xff] %vm1989_vm13, %v3746_v59  ;;  %v3588_v51 = vadd.f32 %v4077_v0, %v8133_v34 }
 0x3c7   : > { %v3749_v58 = vadd.f32 %v3748_v20, %v3588_v51  ;;  %v4078_v8 = vpop.f32.mrf.mxu1 }
 0x3c9   : > { %3801 = vst.msk [vmem:[%s8140_s22 + $0xc8] sm:$0xff] %vm1989_vm13, %v3749_v58  ;;  %v4079_v10 = vpop.f32.mrf.mxu1 }
 0x3ca   : > { %v4080_v33 = vadd.f32 %v4079_v10, %v4078_v8 }
 0x3cb   : > { %v4081_v4 = vpop.f32.mrf.mxu1 }
 0x3cc   : > { %v3593_v19 = vadd.f32 %v4080_v33, %v8133_v34 }
 0x3cd   : > { %v4082_v62 = vpop.f32.mrf.mxu1 }
 0x3ce   : > { %v3754_v26 = vadd.f32 %v4180_v41, %v3593_v19  ;;  %v4083_v52 = vadd.f32 %v4082_v62, %v4081_v4 }
 0x3d0   : > { %3802 = vst.msk [vmem:[%s8140_s22 + $0xd0] sm:$0xff] %vm1989_vm13, %v3754_v26  ;;  %v3596_v22 = vadd.f32 %v4083_v52, %v8133_v34 }
 0x3d2   : > { %v3757_v61 = vadd.f32 %v4181_v6, %v3596_v22 }
 0x3d3   : > { %v4084_v27 = vpop.f32.mrf.mxu1 }
 0x3d4   : > { %3803 = vst.msk [vmem:[%s8140_s22 + $0xd8] sm:$0xff] %vm1989_vm13, %v3757_v61 }
 0x3d5   : > { %v4085_v28 = vpop.f32.mrf.mxu1 }
 0x3d6   : > { %v4086_v25 = vadd.f32 %v4085_v28, %v4084_v27 }
 0x3d7   : > { %v4087_v15 = vpop.f32.mrf.mxu1 }
 0x3d8   : > { %v3601_v16 = vadd.f32 %v4086_v25, %v8133_v34 }
 0x3d9   : > { %v4088_v11 = vpop.f32.mrf.mxu1 }
 0x3da   : > { %v4089_v13 = vadd.f32 %v4088_v11, %v4087_v15  ;;  %v3762_v46 = vadd.f32 %v3761_v14, %v3601_v16 }
 0x3dc   : > { %3804 = vst.msk [vmem:[%s8140_s22 + $0xe0] sm:$0xff] %vm1989_vm13, %v3762_v46  ;;  %v3604_v57 = vadd.f32 %v4089_v13, %v8133_v34 }
 0x3de   : > { %v3765_v50 = vadd.f32 %v3764_v35, %v3604_v57 }
 0x3df   : > { %v4090_v43 = vpop.f32.mrf.mxu1 }
 0x3e0   : > { %3805 = vst.msk [vmem:[%s8140_s22 + $0xe8] sm:$0xff] %vm1989_vm13, %v3765_v50 }
 0x3e1   : > { %v4091_v12 = vpop.f32.mrf.mxu1 }
 0x3e2   : > { %v4092_v31 = vadd.f32 %v4091_v12, %v4090_v43 }
 0x3e3   : > { %v4093_v44 = vpop.f32.mrf.mxu1 }
 0x3e4   : > { %v3609_v37 = vadd.f32 %v4092_v31, %v8133_v34 }
 0x3e5   : > { %v4094_v21 = vpop.f32.mrf.mxu1 }
 0x3e6   : > { %v3770_v60 = vadd.f32 %v4184_v9, %v3609_v37  ;;  %v4095_v3 = vadd.f32 %v4094_v21, %v4093_v44 }
 0x3e8   : > { %3806 = vst.msk [vmem:[%s8140_s22 + $0xf0] sm:$0xff] %vm1989_vm13, %v3770_v60  ;;  %v3612_v47 = vadd.f32 %v4095_v3, %v8133_v34 }
 0x3ea   : > { %v3773_v29 = vadd.f32 %v4185_v7, %v3612_v47 }
 0x3ec   : > { %3807 = vst.msk [vmem:[%s8140_s22 + $0xf8] sm:$0xff] %vm1989_vm13, %v3773_v29 }
 0x3ed PF: > { %s17_s21 = sadd.s32 1, %s5369_s21  }
 0x3ee   : > { %p14_p4 = scmp.ge.s32.totalorder %s17_s21, 4  }
 0x3f0   :  { %16 = sbr.rel (!%p14_p4) target bundleno = 1 (0x1), region = 82 }

// kernel: reverse.1
= control target key start
LH: loop header
LB: loop body
LE: loop exit
PB: predicated region body
PF: predicated region fallthrough
CT: control target
= control target key end

     0   :  { %s344_s0 = inlined_call_operand.vmem [shape: f32[2,32,16,7], index: 0, kind: input, shape index: {}]   ;;  %s345_s1 = inlined_call_operand.vmem [shape: f32[2,32,16,7], index: 1, kind: output, shape index: {}]  }
   0x1   :  { %v112_v0 = vld [vmem:[%s344_s0 + $0x60] sm:$0xff]  ;;  %v113_v1 = vld [vmem:[%s344_s0 + $0xd0] sm:$0xff]  ;;  %v138_v14 = vld [vmem:[%s344_s0 + $0x68] sm:$0xff] }
   0x2   :  { %v115_v2 = vld [vmem:[%s344_s0 + $0x50] sm:$0xff]  ;;  %4 = vst [vmem:[%s345_s1] sm:$0xff] %v112_v0  ;;  %114 = vst [vmem:[%s345_s1 + $0x70] sm:$0xff] %v113_v1  ;;  %v117_v3 = vld [vmem:[%s344_s0 + $0xc0] sm:$0xff] }
   0x3   :  { %116 = vst [vmem:[%s345_s1 + $0x10] sm:$0xff] %v115_v2  ;;  %v119_v4 = vld [vmem:[%s344_s0 + $0x40] sm:$0xff]  ;;  %v121_v5 = vld [vmem:[%s344_s0 + $0xb0] sm:$0xff]  ;;  %118 = vst [vmem:[%s345_s1 + $0x80] sm:$0xff] %v117_v3 }
   0x4   :  { %120 = vst [vmem:[%s345_s1 + $0x20] sm:$0xff] %v119_v4  ;;  %122 = vst [vmem:[%s345_s1 + $0x90] sm:$0xff] %v121_v5  ;;  %v123_v6 = vld [vmem:[%s344_s0 + $0x30] sm:$0xff]  ;;  %v125_v7 = vld [vmem:[%s344_s0 + $0xa0] sm:$0xff] }
   0x5   :  { %v127_v8 = vld [vmem:[%s344_s0 + $0x20] sm:$0xff]  ;;  %124 = vst [vmem:[%s345_s1 + $0x30] sm:$0xff] %v123_v6  ;;  %126 = vst [vmem:[%s345_s1 + $0xa0] sm:$0xff] %v125_v7  ;;  %v129_v9 = vld [vmem:[%s344_s0 + $0x90] sm:$0xff] }
   0x6   :  { %128 = vst [vmem:[%s345_s1 + $0x40] sm:$0xff] %v127_v8  ;;  %v131_v10 = vld [vmem:[%s344_s0 + $0x10] sm:$0xff]  ;;  %v133_v11 = vld [vmem:[%s344_s0 + $0x80] sm:$0xff]  ;;  %130 = vst [vmem:[%s345_s1 + $0xb0] sm:$0xff] %v129_v9 }
   0x7   :  { %132 = vst [vmem:[%s345_s1 + $0x50] sm:$0xff] %v131_v10  ;;  %134 = vst [vmem:[%s345_s1 + $0xc0] sm:$0xff] %v133_v11  ;;  %v49_v12 = vld [vmem:[%s344_s0] sm:$0xff]  ;;  %v136_v13 = vld [vmem:[%s344_s0 + $0x70] sm:$0xff] }
   0x8   :  { %135 = vst [vmem:[%s345_s1 + $0x60] sm:$0xff] %v49_v12  ;;  %137 = vst [vmem:[%s345_s1 + $0xd0] sm:$0xff] %v136_v13  ;;  %v140_v15 = vld [vmem:[%s344_s0 + $0xd8] sm:$0xff]  ;;  %v144_v17 = vld [vmem:[%s344_s0 + $0xc8] sm:$0xff] }
   0x9   :  { %139 = vst [vmem:[%s345_s1 + $0x8] sm:$0xff] %v138_v14  ;;  %v142_v16 = vld [vmem:[%s344_s0 + $0x58] sm:$0xff]  ;;  %141 = vst [vmem:[%s345_s1 + $0x78] sm:$0xff] %v140_v15  ;;  %v146_v18 = vld [vmem:[%s344_s0 + $0x48] sm:$0xff] }
   0xa   :  { %143 = vst [vmem:[%s345_s1 + $0x18] sm:$0xff] %v142_v16  ;;  %145 = vst [vmem:[%s345_s1 + $0x88] sm:$0xff] %v144_v17  ;;  %v148_v19 = vld [vmem:[%s344_s0 + $0xb8] sm:$0xff]  ;;  %v152_v21 = vld [vmem:[%s344_s0 + $0xa8] sm:$0xff] }
   0xb   :  { %v150_v20 = vld [vmem:[%s344_s0 + $0x38] sm:$0xff]  ;;  %147 = vst [vmem:[%s345_s1 + $0x28] sm:$0xff] %v146_v18  ;;  %149 = vst [vmem:[%s345_s1 + $0x98] sm:$0xff] %v148_v19  ;;  %v154_v22 = vld [vmem:[%s344_s0 + $0x28] sm:$0xff] }
   0xc   :  { %151 = vst [vmem:[%s345_s1 + $0x38] sm:$0xff] %v150_v20  ;;  %v156_v23 = vld [vmem:[%s344_s0 + $0x98] sm:$0xff]  ;;  %153 = vst [vmem:[%s345_s1 + $0xa8] sm:$0xff] %v152_v21  ;;  %v160_v25 = vld [vmem:[%s344_s0 + $0x88] sm:$0xff] }
   0xd   :  { %155 = vst [vmem:[%s345_s1 + $0x48] sm:$0xff] %v154_v22  ;;  %157 = vst [vmem:[%s345_s1 + $0xb8] sm:$0xff] %v156_v23  ;;  %v158_v24 = vld [vmem:[%s344_s0 + $0x18] sm:$0xff]  ;;  %v162_v26 = vld [vmem:[%s344_s0 + $0x8] sm:$0xff] }
   0xe   :  { %159 = vst [vmem:[%s345_s1 + $0x58] sm:$0xff] %v158_v24  ;;  %161 = vst [vmem:[%s345_s1 + $0xc8] sm:$0xff] %v160_v25  ;;  %v164_v27 = vld [vmem:[%s344_s0 + $0x78] sm:$0xff] }
   0xf   :  { %163 = vst [vmem:[%s345_s1 + $0x68] sm:$0xff] %v162_v26  ;;  %165 = vst [vmem:[%s345_s1 + $0xd8] sm:$0xff] %v164_v27 }

// kernel: optce_deblur_forward.6
= control target key start
LH: loop header
LB: loop body
LE: loop exit
PB: predicated region body
PF: predicated region fallthrough
CT: control target
= control target key end

     0   :  { %s8015_s12 = smov 0   ;;  %s8017_s13 = smov 0   ;;  %s9363_s0 = inlined_call_operand.vmem [shape: bf16[2,16,9,64], index: 0, kind: input, shape index: {}]   ;;  %s9364_s1 = inlined_call_operand.vmem [shape: bf16[64,64], index: 1, kind: input, shape index: {}]   ;;  %s9365_s2 = inlined_call_operand.vmem [shape: bf16[64,64], index: 2, kind: input, shape index: {}]   ;;  %s9366_s3 = inlined_call_operand.vmem [shape: f32[2,16,9,64], index: 3, kind: output, shape index: {}]  }
   0x1   :  { %s8019_s14 = smov 0  }
   0x2 LB: > { %s25_s15 = sadd.s32 1, %s7986_s13  ;;  %p7632_p0 = scmp.ge.s32.totalorder %s7990_s14, 1  ;;  %s7990_s14 = sphi %s8019_s14, %s13_s14   ;;  %s7986_s13 = sphi %s8017_s13, %s9377_s13   ;;  %s7982_s12 = sphi %s8015_s12, %s9376_s12  }
   0x3   : > { %p27_p1 = scmp.ge.s32.totalorder %s25_s15, 2  ;;  %p159_p2 = scmp.lt.s32.totalorder %s7990_s14, 3 }
   0x5   : > { %s9379_s15 = smov (%p27_p1, %s25_s15), 0  ;;  %p160_p3 = pnand %p7632_p0, %p159_p2 }
   0x6   : > { %p194_p4 = scmp.lt.s32.totalorder (!%p160_p3), %s7982_s12, 1 }
   0x7   : > { %163 = sbr.rel (%p160_p3) target bundleno = 724 (0x2d4), region = 32 }
   0xc   : > { %v7960_v0 = vld [vmem:[%s9364_s1 + $0x18] sm:$0xff]   ;;  %v299_v1 = vlaneseq  ;;  %v7992_v2 = vmov 0.0   ;;  %v7961_v3 = vld [vmem:[%s9364_s1 + $0x10] sm:$0xff]   ;;  %vm7993_vm0 = vmmov 0   ;;  %s9381_s12 = smov (!%p194_p4, %s7982_s12), 1  ;;  %v7962_v7 = vld [vmem:[%s9364_s1 + $0x8] sm:$0xff]  }
   0xd   : > { %7845 = vmatprep.subr.bf16.mxu0 %v7992_v2  ;;  %7889 = vmatprep.subr.bf16.mxu1 %v7992_v2  ;;  %v7994_v5 = vmov 1966171168   ;;  %s7817_s22 = sshll.u32 %s9381_s12, 7  ;;  %v7963_v13 = vld [vmem:[%s9364_s1] sm:$0xff]   ;;  %vm1577_vm1 = vcmask 523264   ;;  %s7818_s9 = sshll.u32 %s9381_s12, 8 }
   0xe   : > { %7846 = vmatpush3.bf16.msra.mxu0 %v7960_v0  ;;  %7853 = vmatprep.mubr.msk.bf16.mxu0 %vm7993_vm0, %v7992_v2  ;;  %v300_v4 = vshrl.u32 %v299_v1, 7  ;;  %v297_v6 = vunpack.c.l.s4 %v7994_v5  ;;  %s8056_s25 = scalar_lea.vmem %s9363_s0, %s7817_s22  ;;  %s9035_s16 = scalar_lea.vmem %s9366_s3, %s7818_s9  ;;  %vm7500_vm2 = vcmask 516096  }
   0xf   : > { %7847 = vmatprep.subr.bf16.mxu0 %v7992_v2  ;;  %7897 = vmatprep.mubr.msk.bf16.mxu1 %vm7993_vm0, %v7992_v2  ;;  %v7637_v9 = vld.sshfl [vmem:[%s8056_s25] sm:$0x33 pattern:$0x75316420] }
  0x10   : > { %v298_v8 = vunpack.c.0.s8 %v297_v6  ;;  %v7638_v10 = vld.sshfl [vmem:[%s8056_s25 + $0x4] sm:$0x1 pattern:$0x75316420]  ;;  %v295_v11 = vcombine.high %v7637_v9, %v7637_v9 }
  0x11   : > { %v7639_v14 = vld.sshfl [vmem:[%s8056_s25 + $0x8] sm:$0x33 pattern:$0x75316420] }
  0x12   : > { %7848 = vmatpush3.bf16.msra.mxu0 %v7961_v3  ;;  %v8060_v12 = vsub.s32 %v298_v8, %v300_v4  ;;  %v333_v18 = vcombine.high %v7639_v14, %v7639_v14  ;;  %v7640_v19 = vld.sshfl [vmem:[%s8056_s25 + $0xc] sm:$0x1 pattern:$0x75316420] }
  0x13   : > { %7849 = vmatprep.subr.bf16.mxu0 %v7992_v2  ;;  %v7641_v21 = vld.sshfl [vmem:[%s8056_s25 + $0x10] sm:$0x33 pattern:$0x75316420] }
  0x14   : > { %v302_v15 = vrot.slane %v7637_v9, %v8060_v12  ;;  %v309_v16 = vrot.slane %v295_v11, %v8060_v12  ;;  %v325_v17 = vrot.slane %v7638_v10, %v8060_v12  ;;  %v340_v20 = vrot.slane %v7639_v14, %v8060_v12  ;;  %v7642_v26 = vld.sshfl [vmem:[%s8056_s25 + $0x14] sm:$0x1 pattern:$0x75316420] }
  0x15   : > { %v363_v22 = vrot.slane %v7640_v19, %v8060_v12  ;;  %v347_v23 = vrot.slane %v333_v18, %v8060_v12  ;;  %v371_v27 = vcombine.high %v7641_v21, %v7641_v21  ;;  %v7643_v31 = vld.sshfl [vmem:[%s8056_s25 + $0x18] sm:$0x33 pattern:$0x75316420]  ;;  %v378_v32 = vrot.slane %v7641_v21, %v8060_v12 }
  0x16   : > { %7850 = vmatpush3.bf16.msra.mxu0 %v7962_v7  ;;  %v1112_v24 = vcombine.low %v302_v15, %v309_v16  ;;  %v7709_v25 = vcombine.high %v302_v15, %v309_v16  ;;  %v348_v28 = vcombine.high %v340_v20, %v340_v20  ;;  %v906_v29 = vunpack.i.h.s16 %v340_v20  ;;  %v7644_v49 = vld.sshfl [vmem:[%s8056_s25 + $0x1c] sm:$0x1 pattern:$0x75316420] }
  0x17   : > { %7851 = vmatprep.subr.bf16.mxu0 %v7992_v2  ;;  %v7669_v30 = vpack.i.b16 %v340_v20, %v325_v17  ;;  %v349_v33 = vcombine.high %v347_v23, %v347_v23  ;;  %v908_v34 = vunpack.i.h.s16 %v347_v23  ;;  %v385_v39 = vrot.slane %v371_v27, %v8060_v12  ;;  %v7645_v54 = vld.sshfl [vmem:[%s8056_s25 + $0x20] sm:$0x33 pattern:$0x75316420] }
  0x18   : > { %v1122_v35 = vrot.slane %v1112_v24, %v8060_v12  ;;  %v1129_v36 = vrot.slane %v7709_v25, %v8060_v12  ;;  %v910_v37 = vunpack.i.h.s16 %v348_v28  ;;  %v7670_v38 = vpack.i.b16 %v347_v23, %v906_v29  ;;  %v7646_v59 = vld.sshfl [vmem:[%s8056_s25 + $0x24] sm:$0x1 pattern:$0x75316420] }
  0x19   : > { %v386_v40 = vcombine.high %v378_v32, %v378_v32  ;;  %v7671_v41 = vpack.i.b16 %v348_v28, %v908_v34  ;;  %v401_v43 = vrot.slane %v7642_v26, %v8060_v12  ;;  %v409_v44 = vcombine.high %v7643_v31, %v7643_v31  ;;  %v7647_v0 = vld.sshfl [vmem:[%s8056_s25 + $0x28] sm:$0x33 pattern:$0x75316420] }
  0x1a   : > { %7852 = vmatpush3.bf16.msra.mxu0 %v7963_v13  ;;  %v1144_v42 = vcombine.low %v1122_v35, %v1129_v36  ;;  %v7672_v45 = vpack.i.b16 %v349_v33, %v910_v37  ;;  %v1114_v46 = vcombine.low %v7669_v30, %v7670_v38  ;;  %v387_v47 = vcombine.high %v385_v39, %v385_v39  ;;  %v7648_v27 = vld.sshfl [vmem:[%s8056_s25 + $0x2c] sm:$0x1 pattern:$0x75316420] }
  0x1b   : > { %v416_v48 = vrot.slane %v7643_v31, %v8060_v12  ;;  %v423_v51 = vrot.slane %v409_v44, %v8060_v12  ;;  %v912_v52 = vunpack.i.h.s16 %v349_v33  ;;  %v1162_v53 = vcombine.low %v385_v39, %v386_v40  ;;  %v7650_v37 = vld.sshfl [vmem:[%s8056_s25 + $0x34] sm:$0x1 pattern:$0x75316420] }
  0x1c   : > { %v1152_v50 = vrot.slane %v1144_v42, %v8060_v12  ;;  %v1115_v55 = vcombine.low %v7671_v41, %v7672_v45  ;;  %v1136_v56 = vrot.slane %v1114_v46, %v8060_v12  ;;  %v439_v5 = vrot.slane %v7644_v49, %v8060_v12  ;;  %v7651_v40 = vld.sshfl [vmem:[%s8056_s25 + $0x38] sm:$0x33 pattern:$0x75316420] }
  0x1d   : > { %v424_v57 = vcombine.high %v416_v48, %v416_v48  ;;  %v924_v58 = vunpack.i.h.s16 %v416_v48  ;;  %v926_v60 = vunpack.i.h.s16 %v423_v51  ;;  %v7673_v61 = vpack.i.b16 %v363_v22, %v912_v52 }
  0x1e   : > { %v7674_v62 = vpack.i.b16 %v416_v48, %v401_v43  ;;  %v1178_v63 = vrot.slane %v1162_v53, %v8060_v12  ;;  %v1143_v1 = vrot.slane %v1115_v55, %v8060_v12  ;;  %v425_v4 = vcombine.high %v423_v51, %v423_v51 }
  0x1f   : > { %v7675_v3 = vpack.i.b16 %v423_v51, %v924_v58  ;;  %v7676_v6 = vpack.i.b16 %v424_v57, %v926_v60  ;;  %v1161_v7 = vcombine.low %v7673_v61, %v378_v32  ;;  %v447_v9 = vcombine.high %v7645_v54, %v7645_v54  ;;  %v7649_v32 = vld.sshfl [vmem:[%s8056_s25 + $0x30] sm:$0x33 pattern:$0x75316420] }
  0x20   : > { %v1163_v8 = vcombine.low %v387_v47, %v7674_v62  ;;  %v1145_v10 = vcombine.low %v1136_v56, %v1143_v1  ;;  %v454_v11 = vrot.slane %v7645_v54, %v8060_v12  ;;  %v477_v13 = vrot.slane %v7646_v59, %v8060_v12 }
  0x21   : > { %v485_v14 = vcombine.high %v7647_v0, %v7647_v0  ;;  %v1164_v15 = vcombine.low %v7675_v3, %v7676_v6  ;;  %v1171_v16 = vrot.slane %v1161_v7, %v8060_v12  ;;  %v461_v18 = vrot.slane %v447_v9, %v8060_v12 }
  0x22   : > { %v1185_v17 = vrot.slane %v1163_v8, %v8060_v12  ;;  %v1159_v19 = vrot.slane %v1145_v10, %v8060_v12  ;;  %v492_v20 = vrot.slane %v7647_v0, %v8060_v12  ;;  %v928_v22 = vunpack.i.h.s16 %v424_v57 }
  0x23   : > { %v499_v21 = vrot.slane %v485_v14, %v8060_v12  ;;  %v1192_v23 = vrot.slane %v1164_v15, %v8060_v12  ;;  %v1193_v24 = vcombine.low %v1171_v16, %v1178_v63  ;;  %v930_v25 = vunpack.i.h.s16 %v425_v4  ;;  %v7652_v63 = vld.sshfl [vmem:[%s8056_s25 + $0x3c] sm:$0x1 pattern:$0x75316420] }
  0x24   : > { %v1211_v26 = vcombine.low %v454_v11, %v461_v18  ;;  %v1160_v28 = vcombine.low %v1152_v50, %v1159_v19  ;;  %v942_v29 = vunpack.i.h.s16 %v492_v20  ;;  %v7677_v30 = vpack.i.b16 %v425_v4, %v928_v22  ;;  %v7654_v19 = vld.sshfl [vmem:[%s8056_s25 + $0x44] sm:$0x1 pattern:$0x75316420] }
  0x25   : > { %v7679_v31 = vpack.i.b16 %v492_v20, %v477_v13  ;;  %v1194_v33 = vcombine.low %v1185_v17, %v1192_v23  ;;  %v1201_v34 = vrot.slane %v1193_v24, %v8060_v12  ;;  %v7678_v35 = vpack.i.b16 %v439_v5, %v930_v25  ;;  %v7653_v5 = vld.sshfl [vmem:[%s8056_s25 + $0x40] sm:$0x33 pattern:$0x75316420] }
  0x26   : > { %v7710_v36 = vcombine.high %v454_v11, %v461_v18  ;;  %7854 = vmatmul.mubr.msk.bf16.vlgmr.msra.gmra.mxu0 %vm1577_vm1, %v1160_v28  ;;  %v7680_v38 = vpack.i.b16 %v499_v21, %v942_v29  ;;  %v1227_v39 = vrot.slane %v1211_v26, %v8060_v12  ;;  %v500_v41 = vcombine.high %v492_v20, %v492_v20 }
  0x27   : > { %v501_v42 = vcombine.high %v499_v21, %v499_v21  ;;  %7857 = vmatprep.mubr.msk.bf16.mxu0 %vm7993_vm0, %v7992_v2  ;;  %v1208_v43 = vrot.slane %v1194_v33, %v8060_v12  ;;  %v1210_v44 = vcombine.low %v7677_v30, %v7678_v35  ;;  %v515_v46 = vrot.slane %v7648_v27, %v8060_v12 }
  0x28   : > { %v1234_v45 = vrot.slane %v7710_v36, %v8060_v12  ;;  %v1213_v47 = vcombine.low %v7679_v31, %v7680_v38  ;;  %v523_v48 = vcombine.high %v7649_v32, %v7649_v32  ;;  %v530_v49 = vrot.slane %v7649_v32, %v8060_v12  ;;  %v7655_v31 = vld.sshfl [vmem:[%s8056_s25 + $0x48] sm:$0x33 pattern:$0x75316420] }
  0x29   : > { %v553_v50 = vrot.slane %v7650_v37, %v8060_v12  ;;  %v1209_v51 = vcombine.low %v1201_v34, %v1208_v43  ;;  %v1220_v52 = vrot.slane %v1210_v44, %v8060_v12  ;;  %v568_v53 = vrot.slane %v7651_v40, %v8060_v12  ;;  %v7656_v37 = vld.sshfl [vmem:[%s8056_s25 + $0x4c] sm:$0x1 pattern:$0x75316420] }
  0x2a   : > { %v944_v54 = vunpack.i.h.s16 %v499_v21  ;;  %v1241_v55 = vrot.slane %v1213_v47, %v8060_v12  ;;  %v537_v56 = vrot.slane %v523_v48, %v8060_v12  ;;  %v538_v57 = vcombine.high %v530_v49, %v530_v49 }
  0x2b   : > { %v946_v58 = vunpack.i.h.s16 %v500_v41  ;;  %v1242_v59 = vcombine.low %v1220_v52, %v1227_v39  ;;  %v948_v60 = vunpack.i.h.s16 %v501_v42  ;;  %v7684_v62 = vpack.i.b16 %v568_v53, %v553_v50 }
  0x2c   : > { %v7681_v61 = vpack.i.b16 %v500_v41, %v944_v54  ;;  %v1243_v0 = vcombine.low %v1234_v45, %v1241_v55  ;;  %v539_v1 = vcombine.high %v537_v56, %v537_v56  ;;  %v1261_v4 = vcombine.low %v537_v56, %v538_v57 }
  0x2d   : > { %v7682_v3 = vpack.i.b16 %v501_v42, %v946_v58  ;;  %v1250_v6 = vrot.slane %v1242_v59, %v8060_v12  ;;  %v7683_v7 = vpack.i.b16 %v515_v46, %v948_v60  ;;  %v561_v8 = vcombine.high %v7651_v40, %v7651_v40  ;;  %v7657_v42 = vld.sshfl [vmem:[%s8056_s25 + $0x50] sm:$0x33 pattern:$0x75316420] }
  0x2e   : > { %v576_v9 = vcombine.high %v568_v53, %v568_v53  ;;  %7858 = vmatmul.mubr.msk.bf16.gmra.mxu0 %vm1577_vm1, %v1209_v51  ;;  %v1257_v10 = vrot.slane %v1243_v0, %v8060_v12  ;;  %v1262_v13 = vcombine.low %v539_v1, %v7684_v62  ;;  %v1283_v14 = vrot.slane %v1261_v4, %v8060_v12  ;;  %v7658_v4 = vld.sshfl [vmem:[%s8056_s25 + $0x54] sm:$0x1 pattern:$0x75316420] }
  0x2f   : > { %v1259_v11 = vcombine.low %v7681_v61, %v7682_v3  ;;  %7861 = vmatprep.mubr.msk.bf16.mxu0 %vm7993_vm0, %v7992_v2  ;;  %v1260_v15 = vcombine.low %v7683_v7, %v530_v49  ;;  %v575_v16 = vrot.slane %v561_v8, %v8060_v12  ;;  %v591_v17 = vrot.slane %v7652_v63, %v8060_v12 }
  0x30   : > { %v599_v18 = vcombine.high %v7653_v5, %v7653_v5  ;;  %v1258_v20 = vcombine.low %v1250_v6, %v1257_v10  ;;  %v1290_v22 = vrot.slane %v1262_v13, %v8060_v12  ;;  %v606_v23 = vrot.slane %v7653_v5, %v8060_v12 }
  0x31   : > { %v1269_v21 = vrot.slane %v1259_v11, %v8060_v12  ;;  %v1276_v24 = vrot.slane %v1260_v15, %v8060_v12  ;;  %v577_v25 = vcombine.high %v575_v16, %v575_v16  ;;  %v960_v27 = vunpack.i.h.s16 %v568_v53 }
  0x32   : > { %v613_v26 = vrot.slane %v599_v18, %v8060_v12  ;;  %v1292_v28 = vcombine.low %v1283_v14, %v1290_v22  ;;  %v962_v29 = vunpack.i.h.s16 %v575_v16  ;;  %v964_v30 = vunpack.i.h.s16 %v576_v9  ;;  %v7660_v14 = vld.sshfl [vmem:[%s8056_s25 + $0x5c] sm:$0x1 pattern:$0x75316420] }
  0x33   : > { %v629_v32 = vrot.slane %v7654_v19, %v8060_v12  ;;  %v1291_v33 = vcombine.low %v1269_v21, %v1276_v24  ;;  %v966_v34 = vunpack.i.h.s16 %v577_v25  ;;  %v7685_v35 = vpack.i.b16 %v575_v16, %v960_v27  ;;  %v7661_v19 = vld.sshfl [vmem:[%s8056_s25 + $0x60] sm:$0x33 pattern:$0x75316420] }
  0x34   : > { %v1310_v36 = vcombine.low %v606_v23, %v613_v26  ;;  %v1306_v38 = vrot.slane %v1292_v28, %v8060_v12  ;;  %v7686_v39 = vpack.i.b16 %v576_v9, %v962_v29  ;;  %v7687_v40 = vpack.i.b16 %v577_v25, %v964_v30  ;;  %v7659_v9 = vld.sshfl [vmem:[%s8056_s25 + $0x58] sm:$0x33 pattern:$0x75316420] }
  0x35   : > { %v7711_v41 = vcombine.high %v606_v23, %v613_v26  ;;  %v1299_v43 = vrot.slane %v1291_v33, %v8060_v12  ;;  %v7688_v44 = vpack.i.b16 %v591_v17, %v966_v34  ;;  %v637_v46 = vcombine.high %v7655_v31, %v7655_v31 }
  0x36   : > { %v1332_v45 = vrot.slane %v1310_v36, %v8060_v12  ;;  %7862 = vmatmul.mubr.msk.bf16.gmra.mxu0 %vm1577_vm1, %v1258_v20  ;;  %v1308_v47 = vcombine.low %v7685_v35, %v7686_v39  ;;  %v644_v49 = vrot.slane %v7655_v31, %v8060_v12  ;;  %v667_v50 = vrot.slane %v7656_v37, %v8060_v12  ;;  %v7662_v37 = vld.sshfl [vmem:[%s8056_s25 + $0x64] sm:$0x1 pattern:$0x75316420] }
  0x37   : > { %v1339_v48 = vrot.slane %v7711_v41, %v8060_v12  ;;  %7865 = vmatprep.mubr.msk.bf16.mxu0 %vm7993_vm0, %v7992_v2  ;;  %v1307_v51 = vcombine.low %v1299_v43, %v1306_v38  ;;  %v1309_v52 = vcombine.low %v7687_v40, %v7688_v44  ;;  %v651_v53 = vrot.slane %v637_v46, %v8060_v12 }
  0x38   : > { %v675_v54 = vcombine.high %v7657_v42, %v7657_v42  ;;  %v1318_v55 = vrot.slane %v1308_v47, %v8060_v12  ;;  %v652_v57 = vcombine.high %v644_v49, %v644_v49  ;;  %v682_v58 = vrot.slane %v7657_v42, %v8060_v12  ;;  %v7663_v42 = vld.sshfl [vmem:[%s8056_s25 + $0x68] sm:$0x33 pattern:$0x75316420] }
  0x39   : > { %v1341_v56 = vcombine.low %v1332_v45, %v1339_v48  ;;  %v1325_v59 = vrot.slane %v1309_v52, %v8060_v12  ;;  %v653_v60 = vcombine.high %v651_v53, %v651_v53  ;;  %v978_v62 = vunpack.i.h.s16 %v644_v49  ;;  %v7664_v47 = vld.sshfl [vmem:[%s8056_s25 + $0x6c] sm:$0x1 pattern:$0x75316420] }
  0x3a   : > { %v689_v61 = vrot.slane %v675_v54, %v8060_v12  ;;  %v690_v0 = vcombine.high %v682_v58, %v682_v58  ;;  %v980_v1 = vunpack.i.h.s16 %v651_v53  ;;  %v982_v3 = vunpack.i.h.s16 %v652_v57  ;;  %v7665_v52 = vld.sshfl [vmem:[%s8056_s25 + $0x70] sm:$0x33 pattern:$0x75316420] }
  0x3b   : > { %v1355_v63 = vrot.slane %v1341_v56, %v8060_v12  ;;  %v1340_v5 = vcombine.low %v1318_v55, %v1325_v59  ;;  %v984_v6 = vunpack.i.h.s16 %v653_v60  ;;  %v7689_v7 = vpack.i.b16 %v644_v49, %v629_v32 }
  0x3c   : > { %v7690_v8 = vpack.i.b16 %v651_v53, %v978_v62  ;;  %v7691_v10 = vpack.i.b16 %v652_v57, %v980_v1  ;;  %v7692_v11 = vpack.i.b16 %v653_v60, %v982_v3  ;;  %v1360_v13 = vcombine.low %v689_v61, %v690_v0 }
  0x3d   : > { %v691_v15 = vcombine.high %v689_v61, %v689_v61  ;;  %v1348_v16 = vrot.slane %v1340_v5, %v8060_v12  ;;  %v7693_v17 = vpack.i.b16 %v667_v50, %v984_v6  ;;  %v705_v20 = vrot.slane %v7658_v4, %v8060_v12 }
  0x3e   : > { %v1357_v18 = vcombine.low %v7689_v7, %v7690_v8  ;;  %7866 = vmatmul.mubr.msk.bf16.gmra.mxu0 %vm1577_vm1, %v1307_v51  ;;  %v1358_v21 = vcombine.low %v7691_v10, %v7692_v11  ;;  %v1388_v22 = vrot.slane %v1360_v13, %v8060_v12  ;;  %v713_v23 = vcombine.high %v7659_v9, %v7659_v9 }
  0x3f   : > { %v720_v24 = vrot.slane %v7659_v9, %v8060_v12  ;;  %7869 = vmatprep.mubr.msk.bf16.mxu0 %vm7993_vm0, %v7992_v2  ;;  %v1356_v25 = vcombine.low %v1348_v16, %v1355_v63  ;;  %v1359_v26 = vcombine.low %v7693_v17, %v682_v58  ;;  %v743_v28 = vrot.slane %v7660_v14, %v8060_v12 }
  0x40   : > { %v1367_v27 = vrot.slane %v1357_v18, %v8060_v12  ;;  %v1374_v29 = vrot.slane %v1358_v21, %v8060_v12  ;;  %v727_v30 = vrot.slane %v713_v23, %v8060_v12  ;;  %v751_v32 = vcombine.high %v7661_v19, %v7661_v19 }
  0x41   : > { %v728_v31 = vcombine.high %v720_v24, %v720_v24  ;;  %v1381_v33 = vrot.slane %v1359_v26, %v8060_v12  ;;  %v758_v34 = vrot.slane %v7661_v19, %v8060_v12  ;;  %v996_v35 = vunpack.i.h.s16 %v720_v24  ;;  %v7667_v19 = vld.sshfl [vmem:[%s8056_s25 + $0x78] sm:$0x33 pattern:$0x75316420] }
  0x42   : > { %v7694_v36 = vpack.i.b16 %v720_v24, %v705_v20  ;;  %v1389_v38 = vcombine.low %v1367_v27, %v1374_v29  ;;  %v729_v39 = vcombine.high %v727_v30, %v727_v30  ;;  %v765_v40 = vrot.slane %v751_v32, %v8060_v12 }
  0x43   : > { %v998_v41 = vunpack.i.h.s16 %v727_v30  ;;  %v1390_v43 = vcombine.low %v1381_v33, %v1388_v22  ;;  %v1000_v44 = vunpack.i.h.s16 %v728_v31  ;;  %v7695_v45 = vpack.i.b16 %v727_v30, %v996_v35 }
  0x44   : > { %v1406_v46 = vcombine.low %v691_v15, %v7694_v36  ;;  %v1397_v48 = vrot.slane %v1389_v38, %v8060_v12  ;;  %v1002_v49 = vunpack.i.h.s16 %v729_v39  ;;  %v1409_v51 = vcombine.low %v758_v34, %v765_v40  ;;  %v7666_v15 = vld.sshfl [vmem:[%s8056_s25 + $0x74] sm:$0x1 pattern:$0x75316420] }
  0x45   : > { %v7696_v50 = vpack.i.b16 %v728_v31, %v998_v41  ;;  %v1404_v53 = vrot.slane %v1390_v43, %v8060_v12  ;;  %v7697_v54 = vpack.i.b16 %v729_v39, %v1000_v44  ;;  %v781_v56 = vrot.slane %v7662_v37, %v8060_v12 }
  0x46   : > { %v1416_v55 = vrot.slane %v1406_v46, %v8060_v12  ;;  %7870 = vmatmul.mubr.msk.bf16.gmra.mxu0 %vm1577_vm1, %v1356_v25  ;;  %v7698_v57 = vpack.i.b16 %v743_v28, %v1002_v49  ;;  %v1437_v59 = vrot.slane %v1409_v51, %v8060_v12  ;;  %v789_v60 = vcombine.high %v7663_v42, %v7663_v42  ;;  %v7668_v25 = vld.sshfl [vmem:[%s8056_s25 + $0x7c] sm:$0x1 pattern:$0x75316420] }
  0x47   : > { %v1407_v58 = vcombine.low %v7695_v45, %v7696_v50  ;;  %7873 = vmatprep.mubr.msk.bf16.mxu0 %vm7993_vm0, %v7992_v2  ;;  %v1405_v61 = vcombine.low %v1397_v48, %v1404_v53  ;;  %v796_v62 = vrot.slane %v7663_v42, %v8060_v12  ;;  %v819_v63 = vrot.slane %v7664_v47, %v8060_v12 }
  0x48   : > { %v834_v0 = vrot.slane %v7665_v52, %v8060_v12  ;;  %v1408_v1 = vcombine.low %v7697_v54, %v7698_v57  ;;  %v803_v4 = vrot.slane %v789_v60, %v8060_v12  ;;  %v7712_v5 = vcombine.high %v758_v34, %v765_v40 }
  0x49   : > { %v1423_v3 = vrot.slane %v1407_v58, %v8060_v12  ;;  %v804_v6 = vcombine.high %v796_v62, %v796_v62  ;;  %v1014_v7 = vunpack.i.h.s16 %v796_v62  ;;  %v7699_v8 = vpack.i.b16 %v796_v62, %v781_v56 }
  0x4a   : > { %v827_v9 = vcombine.high %v7665_v52, %v7665_v52  ;;  %v1430_v10 = vrot.slane %v1408_v1, %v8060_v12  ;;  %v805_v13 = vcombine.high %v803_v4, %v803_v4  ;;  %v1016_v14 = vunpack.i.h.s16 %v803_v4 }
  0x4b   : > { %v1438_v11 = vcombine.low %v1416_v55, %v1423_v3  ;;  %v1018_v16 = vunpack.i.h.s16 %v804_v6  ;;  %v7700_v17 = vpack.i.b16 %v803_v4, %v1014_v7  ;;  %v1465_v18 = vrot.slane %v7712_v5, %v8060_v12 }
  0x4c   : > { %v841_v20 = vrot.slane %v827_v9, %v8060_v12  ;;  %v1439_v21 = vcombine.low %v1430_v10, %v1437_v59  ;;  %v1020_v23 = vunpack.i.h.s16 %v805_v13  ;;  %v7701_v24 = vpack.i.b16 %v804_v6, %v1016_v14  ;;  %v7964_v9 = vld [vmem:[%s9365_s2 + $0x18] sm:$0xff]   ;;  %v7965_v10 = vld [vmem:[%s9365_s2 + $0x10] sm:$0xff]  }
  0x4d   : > { %v1446_v22 = vrot.slane %v1438_v11, %v8060_v12  ;;  %v7702_v26 = vpack.i.b16 %v805_v13, %v1018_v16  ;;  %v1456_v27 = vcombine.low %v7699_v8, %v7700_v17  ;;  %v842_v28 = vcombine.high %v834_v0, %v834_v0  ;;  %7890 = vmatpush3.bf16.msra.mxu1 %v7964_v9  ;;  %v7966_v11 = vld [vmem:[%s9365_s2 + $0x8] sm:$0xff]   ;;  %v7967_v13 = vld [vmem:[%s9365_s2] sm:$0xff]  }
  0x4e   : > { %v843_v29 = vcombine.high %v841_v20, %v841_v20  ;;  %7874 = vmatmul.mubr.msk.bf16.gmra.mxu0 %vm1577_vm1, %v1405_v61  ;;  %v1453_v30 = vrot.slane %v1439_v21, %v8060_v12  ;;  %v7703_v31 = vpack.i.b16 %v819_v63, %v1020_v23  ;;  %v857_v32 = vrot.slane %v7666_v15, %v8060_v12 }
  0x4f   : > { %v865_v33 = vcombine.high %v7667_v19, %v7667_v19  ;;  %7877 = vmatprep.mubr.msk.bf16.mxu0 %vm7993_vm0, %v7992_v2  ;;  %v1457_v34 = vcombine.low %v7701_v24, %v7702_v26  ;;  %v1472_v35 = vrot.slane %v1456_v27, %v8060_v12  ;;  %v872_v36 = vrot.slane %v7667_v19, %v8060_v12 }
  0x50   : > { %v895_v37 = vrot.slane %v7668_v25, %v8060_v12  ;;  %v1454_v38 = vcombine.low %v1446_v22, %v1453_v30  ;;  %v1458_v39 = vcombine.low %v7703_v31, %v834_v0  ;;  %v1504_v41 = vcombine.low %v841_v20, %v842_v28  ;;  %7891 = vmatprep.subr.bf16.mxu1 %v7992_v2 }
  0x51   : > { %v879_v40 = vrot.slane %v865_v33, %v8060_v12  ;;  %v1479_v42 = vrot.slane %v1457_v34, %v8060_v12  ;;  %v1487_v43 = vcombine.low %v1465_v18, %v1472_v35  ;;  %v880_v44 = vcombine.high %v872_v36, %v872_v36  ;;  %7892 = vmatpush3.bf16.msra.mxu1 %v7965_v10 }
  0x52   : > { %v1032_v45 = vunpack.i.h.s16 %v872_v36  ;;  %v1486_v46 = vrot.slane %v1458_v39, %v8060_v12  ;;  %v7704_v49 = vpack.i.b16 %v872_v36, %v857_v32  ;;  %v1514_v58 = vrot.slane %v1504_v41, %v8060_v12  ;;  %7893 = vmatprep.subr.bf16.mxu1 %v7992_v2 }
  0x53   : > { %v881_v47 = vcombine.high %v879_v40, %v879_v40  ;;  %v1034_v48 = vunpack.i.h.s16 %v879_v40  ;;  %v1036_v50 = vunpack.i.h.s16 %v880_v44  ;;  %v1495_v56 = vrot.slane %v1487_v43, %v8060_v12 }
  0x54   : > { %v7705_v51 = vpack.i.b16 %v879_v40, %v1032_v45  ;;  %v1488_v52 = vcombine.low %v1479_v42, %v1486_v46  ;;  %v1505_v55 = vcombine.low %v843_v29, %v7704_v49 }
  0x55   : > { %v1038_v53 = vunpack.i.h.s16 %v881_v47  ;;  %v7706_v54 = vpack.i.b16 %v880_v44, %v1034_v48  ;;  %v7707_v57 = vpack.i.b16 %v881_v47, %v1036_v50  ;;  %7894 = vmatpush3.bf16.msra.mxu1 %v7966_v11 }
  0x56   : > { %7878 = vmatmul.mubr.msk.bf16.gmra.mxu0 %vm1577_vm1, %v1454_v38  ;;  %v1502_v59 = vrot.slane %v1488_v52, %v8060_v12  ;;  %v1521_v62 = vrot.slane %v1505_v55, %v8060_v12  ;;  %7895 = vmatprep.subr.bf16.mxu1 %v7992_v2 }
  0x57   : > { %v7708_v60 = vpack.i.b16 %v895_v37, %v1038_v53  ;;  %v1506_v61 = vcombine.low %v7705_v51, %v7706_v54  ;;  %7881 = vmatprep.mubr.msk.bf16.mxu0 %vm7993_vm0, %v7992_v2 }
  0x58   : > { %v1503_v1 = vcombine.low %v1495_v56, %v1502_v59  ;;  %v1536_v4 = vcombine.low %v1514_v58, %v1521_v62 }
  0x59   : > { %v1507_v63 = vcombine.low %v7707_v57, %v7708_v60  ;;  %v1528_v0 = vrot.slane %v1506_v61, %v8060_v12  ;;  %7896 = vmatpush3.bf16.msra.mxu1 %v7967_v13 }
  0x5a   : > { %v1544_v6 = vrot.slane %v1536_v4, %v8060_v12 }
  0x5b   : > { %v1535_v3 = vrot.slane %v1507_v63, %v8060_v12 }
  0x5d   : > { %v1537_v5 = vcombine.low %v1528_v0, %v1535_v3 }
  0x5e   : > { %7882 = vmatmul.mubr.msk.bf16.gmra.mxu0 %vm1577_vm1, %v1503_v1 }
  0x5f   : > { %v1551_v7 = vrot.slane %v1537_v5, %v8060_v12  ;;  %7885 = vmatprep.mubr.msk.bf16.mxu0 %vm7993_vm0, %v7992_v2 }
  0x61   : > { %v1552_v8 = vcombine.low %v1544_v6, %v1551_v7 }
  0x66   : > { %7886 = vmatmul.mubr.msk.bf16.gmra.mxu0 %vm1577_vm1, %v1552_v8 }
  0xe6   : > { %v1639_v14 = vpop.f32.mrf.mxu0 }
  0xe7   : > { %v1728_v15 = vcombine.high %v1639_v14, %v1639_v14  ;;  %v1735_v16 = vrot.slane %v1639_v14, %v8060_v12 }
  0xe8   : > { %v7855_v17 = vpop.f32.mrf.mxu0 }
  0xe9   : > { %v1742_v18 = vrot.slane %v1728_v15, %v8060_v12  ;;  %v1743_v19 = vcombine.high %v1735_v16, %v1735_v16  ;;  %v1751_v20 = vrot.slane %v1735_v16, %v8060_v12 }
  0xea   : > { %v1642_v21 = vpop.f32.mrf.mxu0 }
  0xeb   : > { %v1744_v22 = vcombine.high %v1742_v18, %v1742_v18  ;;  %v1758_v23 = vrot.slane %v1742_v18, %v8060_v12  ;;  %v1765_v24 = vrot.slane %v1743_v19, %v8060_v12  ;;  %v1773_v25 = vcombine.high %v1751_v20, %v1751_v20 }
  0xec   : > { %v2754_v26 = vmax.f32 %v1751_v20, 0.0  ;;  %v1777_v27 = vcombine.high %v1642_v21, %v1642_v21  ;;  %v1784_v28 = vrot.slane %v1642_v21, %v8060_v12  ;;  %v7856_v29 = vpop.f32.mrf.mxu0 }
  0xed   : > { %v1772_v30 = vrot.slane %v1744_v22, %v8060_v12  ;;  %v1774_v31 = vcombine.high %v1758_v23, %v1758_v23  ;;  %v1775_v32 = vcombine.high %v1765_v24, %v1765_v24  ;;  %v2755_v33 = vmax.f32 %v1765_v24, 0.0 }
  0xee   : > { %v2756_v34 = vmax.f32 %v1773_v25, 0.0  ;;  %v2758_v35 = vmax.f32 %v1758_v23, 0.0  ;;  %v1791_v36 = vrot.slane %v1777_v27, %v8060_v12  ;;  %v1792_v37 = vcombine.high %v1784_v28, %v1784_v28  ;;  %v1647_v38 = vpop.f32.mrf.mxu0 }
  0xef   : > { %v1776_v39 = vcombine.high %v1772_v30, %v1772_v30  ;;  %v2757_v40 = vmax.f32 %v1775_v32, 0.0  ;;  %v2759_v41 = vmax.f32 %v1772_v30, 0.0  ;;  %v2760_v42 = vmax.f32 %v1774_v31, 0.0 }
  0xf0   : > { %v3042_v43 = vcombine.low %v2754_v26, %v2755_v33  ;;  %v1793_v44 = vcombine.high %v1791_v36, %v1791_v36  ;;  %v1800_v45 = vrot.slane %v1784_v28, %v8060_v12  ;;  %v1807_v46 = vrot.slane %v1791_v36, %v8060_v12  ;;  %v7859_v47 = vpop.f32.mrf.mxu0 }
  0xf1   : > { %v2761_v48 = vmax.f32 %v1776_v39, 0.0  ;;  %v3043_v49 = vcombine.low %v2756_v34, %v2757_v40  ;;  %v3044_v50 = vcombine.low %v2758_v35, %v2759_v41  ;;  %v1814_v51 = vrot.slane %v1792_v37, %v8060_v12 }
  0xf2   : > { %v1821_v52 = vrot.slane %v1793_v44, %v8060_v12  ;;  %v1822_v53 = vcombine.high %v1800_v45, %v1800_v45  ;;  %v1823_v54 = vcombine.high %v1807_v46, %v1807_v46  ;;  %v8250_v55 = vpop.f32.mrf.mxu0  ;;  %v3052_v57 = vrot.slane %v3042_v43, %v8060_v12 }
  0xf3   : > { %v3045_v56 = vcombine.low %v2760_v42, %v2761_v48  ;;  %v3059_v58 = vrot.slane %v3043_v49, %v8060_v12  ;;  %v1824_v59 = vcombine.high %v1814_v51, %v1814_v51  ;;  %v3066_v60 = vrot.slane %v3044_v50, %v8060_v12 }
  0xf4   : > { %v2762_v61 = vmax.f32 %v1800_v45, 0.0  ;;  %v2763_v62 = vmax.f32 %v1814_v51, 0.0  ;;  %v2764_v63 = vmax.f32 %v1822_v53, 0.0  ;;  %v7860_v0 = vpop.f32.mrf.mxu0  ;;  %v2766_v5 = vmax.f32 %v1807_v46, 0.0 }
  0xf5   : > { %v3073_v1 = vrot.slane %v3045_v56, %v8060_v12  ;;  %v3074_v3 = vcombine.low %v3052_v57, %v3059_v58  ;;  %v2765_v4 = vmax.f32 %v1824_v59, 0.0  ;;  %v2767_v6 = vmax.f32 %v1821_v52, 0.0 }
  0xf6   : > { %v2768_v7 = vmax.f32 %v1823_v54, 0.0  ;;  %v3097_v8 = vrot.slane %v2762_v61, %v8060_v12  ;;  %v8257_v9 = vpop.f32.mrf.mxu0  ;;  %v3105_v11 = vcombine.low %v2763_v62, %v2764_v63  ;;  %v1826_v14 = vcombine.high %v1647_v38, %v1647_v38 }
  0xf7   : > { %v3075_v10 = vcombine.low %v3066_v60, %v3073_v1  ;;  %v3106_v13 = vcombine.low %v2765_v4, %v2766_v5  ;;  %v1825_v15 = vcombine.high %v1821_v52, %v1821_v52  ;;  %v1833_v18 = vrot.slane %v1647_v38, %v8060_v12 }
  0xf8   : > { %v3104_v16 = vrot.slane %v3097_v8, %v8060_v12  ;;  %v3107_v17 = vcombine.low %v2767_v6, %v2768_v7  ;;  %v7863_v19 = vpop.f32.mrf.mxu0  ;;  %v3082_v20 = vrot.slane %v3074_v3, %v8060_v12  ;;  %v1840_v23 = vrot.slane %v1826_v14, %v8060_v12 }
  0xf9   : > { %v3089_v21 = vrot.slane %v3075_v10, %v8060_v12  ;;  %v3122_v22 = vrot.slane %v3106_v13, %v8060_v12  ;;  %v1841_v25 = vcombine.high %v1833_v18, %v1833_v18  ;;  %v1849_v26 = vrot.slane %v1833_v18, %v8060_v12 }
  0xfa   : > { %v7726_v24 = vpack.c.bf16 %v3104_v16, %v3104_v16  ;;  %v8266_v27 = vpop.f32.mrf.mxu0  ;;  %v3115_v29 = vrot.slane %v3105_v11, %v8060_v12  ;;  %v1842_v30 = vcombine.high %v1840_v23, %v1840_v23  ;;  %v1856_v31 = vrot.slane %v1840_v23, %v8060_v12 }
  0xfb   : > { %v3090_v28 = vcombine.low %v3082_v20, %v3089_v21  ;;  %v3129_v32 = vrot.slane %v3107_v17, %v8060_v12  ;;  %v1863_v33 = vrot.slane %v1841_v25, %v8060_v12  ;;  %v1871_v34 = vcombine.high %v1849_v26, %v1849_v26 }
  0xfc   : > { %v2769_v35 = vmax.f32 %v1825_v15, 0.0  ;;  %v7864_v36 = vpop.f32.mrf.mxu0  ;;  %v3137_v37 = vcombine.low %v3115_v29, %v3122_v22  ;;  %v1870_v39 = vrot.slane %v1842_v30, %v8060_v12  ;;  %v1872_v40 = vcombine.high %v1856_v31, %v1856_v31 }
  0xfd   : > { %v4082_v38 = vpack.c.bf16 %v3104_v16, %v3090_v28  ;;  %v8274_v41 = vrot.slane %v7726_v24, %v8060_v12  ;;  %v1873_v42 = vcombine.high %v1863_v33, %v1863_v33  ;;  %v2770_v43 = vmax.f32 %v1849_v26, 0.0 }
  0xfe   : > { %v2771_v44 = vmax.f32 %v1863_v33, 0.0  ;;  %v8276_v45 = vpop.f32.mrf.mxu0  ;;  %v1874_v47 = vcombine.high %v1870_v39, %v1870_v39  ;;  %v2774_v48 = vmax.f32 %v1856_v31, 0.0  ;;  %v2775_v49 = vmax.f32 %v1870_v39, 0.0 }
  0xff   : > { %v8279_v46 = vrot.slane %v4082_v38, %v8060_v12  ;;  %v2772_v50 = vmax.f32 %v1871_v34, 0.0  ;;  %v2773_v51 = vmax.f32 %v1873_v42, 0.0  ;;  %v3108_v52 = vcombine.low %v2769_v35, %v2770_v43 }
 0x100   : > { %v3160_v53 = vrot.slane %v2771_v44, %v8060_v12  ;;  %v7867_v54 = vpop.f32.mrf.mxu0  ;;  %v3145_v56 = vrot.slane %v3137_v37, %v8060_v12  ;;  %v2776_v57 = vmax.f32 %v1872_v40, 0.0  ;;  %v2777_v58 = vmax.f32 %v1874_v47, 0.0 }
 0x101   : > { %v3169_v59 = vcombine.low %v2774_v48, %v2775_v49  ;;  %v3136_v60 = vrot.slane %v3108_v52, %v8060_v12  ;;  %v3168_v62 = vcombine.low %v2772_v50, %v2773_v51  ;;  %v1875_v63 = vcombine.high %v8250_v55, %v8250_v55 }
 0x102   : > { %v3167_v61 = vrot.slane %v3160_v53, %v8060_v12  ;;  %v8287_v0 = vpop.f32.mrf.mxu0  ;;  %v4137_v1 = vcombine.high %v8279_v46, %v8279_v46  ;;  %v4151_v3 = vrot.slane %v8274_v41, %v8060_v12  ;;  %v3170_v4 = vcombine.low %v2776_v57, %v2777_v58 }
 0x103   : > { %v1882_v5 = vrot.slane %v8250_v55, %v8060_v12  ;;  %v3138_v6 = vcombine.low %v3129_v32, %v3136_v60  ;;  %v3178_v7 = vrot.slane %v3168_v62, %v8060_v12  ;;  %v3185_v8 = vrot.slane %v3169_v59, %v8060_v12 }
 0x104   : > { %v1889_v10 = vrot.slane %v1875_v63, %v8060_v12  ;;  %v7868_v11 = vpop.f32.mrf.mxu0  ;;  %v8300_v13 = vrot.slane %v8279_v46, %v8060_v12  ;;  %v1924_v16 = vcombine.high %v8257_v9, %v8257_v9  ;;  %v3192_v17 = vrot.slane %v3170_v4, %v8060_v12 }
 0x105   : > { %v1890_v14 = vcombine.high %v1882_v5, %v1882_v5  ;;  %v1898_v15 = vrot.slane %v1882_v5, %v8060_v12  ;;  %v3152_v55 = vrot.slane %v3138_v6, %v8060_v12  ;;  %v7727_v18 = vpack.c.bf16 %v3167_v61, %v3167_v61 }
 0x106   : > { %v1891_v19 = vcombine.high %v1889_v10, %v1889_v10  ;;  %v8307_v20 = vpop.f32.mrf.mxu0  ;;  %v1905_v21 = vrot.slane %v1889_v10, %v8060_v12  ;;  %v1931_v24 = vrot.slane %v8257_v9, %v8060_v12  ;;  %v3200_v26 = vcombine.low %v3178_v7, %v3185_v8 }
 0x107   : > { %v1912_v22 = vrot.slane %v1890_v14, %v8060_v12  ;;  %v1920_v23 = vcombine.high %v1898_v15, %v1898_v15  ;;  %v3153_v25 = vcombine.low %v3145_v56, %v3152_v55  ;;  %v2778_v29 = vmax.f32 %v1898_v15, 0.0 }
 0x108   : > { %v1919_v28 = vrot.slane %v1891_v19, %v8060_v12  ;;  %v7871_v30 = vpop.f32.mrf.mxu0  ;;  %v1921_v31 = vcombine.high %v1905_v21, %v1905_v21  ;;  %v8315_v36 = vrot.slane %v7727_v18, %v8060_v12  ;;  %v2782_v37 = vmax.f32 %v1905_v21, 0.0 }
 0x109   : > { %v1922_v32 = vcombine.high %v1912_v22, %v1912_v22  ;;  %v2779_v33 = vmax.f32 %v1912_v22, 0.0  ;;  %v2780_v34 = vmax.f32 %v1920_v23, 0.0  ;;  %v4083_v35 = vpack.c.bf16 %v3167_v61, %v3153_v25 }
 0x10a   : > { %v2783_v38 = vmax.f32 %v1919_v28, 0.0  ;;  %v8317_v39 = vpop.f32.mrf.mxu0  ;;  %v2784_v9 = vmax.f32 %v1921_v31, 0.0  ;;  %v1938_v47 = vrot.slane %v1924_v16, %v8060_v12  ;;  %v1939_v48 = vcombine.high %v1931_v24, %v1931_v24 }
 0x10b   : > { %v2781_v40 = vmax.f32 %v1922_v32, 0.0  ;;  %v3171_v42 = vcombine.low %v2778_v29, %v2779_v33  ;;  %v3223_v43 = vrot.slane %v2780_v34, %v8060_v12  ;;  %v4168_v44 = vrot.slane %v4083_v35, %v8060_v12 }
 0x10c   : > { %v1947_v49 = vrot.slane %v1931_v24, %v8060_v12  ;;  %v7872_v50 = vpop.f32.mrf.mxu0  ;;  %v3232_v54 = vcombine.low %v2783_v38, %v2784_v9  ;;  %v3208_v56 = vrot.slane %v3200_v26, %v8060_v12  ;;  %v1923_v57 = vcombine.high %v1919_v28, %v1919_v28 }
 0x10d   : > { %v3199_v51 = vrot.slane %v3171_v42, %v8060_v12  ;;  %v3230_v52 = vrot.slane %v3223_v43, %v8060_v12  ;;  %v3231_v53 = vcombine.low %v2781_v40, %v2782_v37  ;;  %v1940_v58 = vcombine.high %v1938_v47, %v1938_v47 }
 0x10e   : > { %v1954_v59 = vrot.slane %v1938_v47, %v8060_v12  ;;  %v8327_v60 = vpop.f32.mrf.mxu0  ;;  %v3248_v63 = vrot.slane %v3232_v54, %v8060_v12  ;;  %v4190_v5 = vrot.slane %v8315_v36, %v8060_v12  ;;  %v1961_v6 = vrot.slane %v1939_v48, %v8060_v12 }
 0x10f   : > { %v3201_v61 = vcombine.low %v3192_v17, %v3199_v51  ;;  %v3241_v62 = vrot.slane %v3231_v53, %v8060_v12  ;;  %v7728_v4 = vpack.c.bf16 %v3230_v52, %v3230_v52  ;;  %v1968_v7 = vrot.slane %v1940_v58, %v8060_v12 }
 0x110   : > { %v1969_v8 = vcombine.high %v1947_v49, %v1947_v49  ;;  %v7875_v10 = vpop.f32.mrf.mxu0  ;;  %v4176_v11 = vcombine.high %v4168_v44, %v4168_v44  ;;  %v8336_v14 = vrot.slane %v4168_v44, %v8060_v12  ;;  %v1970_v16 = vcombine.high %v1954_v59, %v1954_v59 }
 0x111   : > { %v3215_v15 = vrot.slane %v3201_v61, %v8060_v12  ;;  %v3263_v55 = vcombine.low %v3241_v62, %v3248_v63  ;;  %v1971_v17 = vcombine.high %v1961_v6, %v1961_v6  ;;  %v1972_v18 = vcombine.high %v1968_v7, %v1968_v7 }
 0x112   : > { %v2785_v19 = vmax.f32 %v1923_v57, 0.0  ;;  %v8339_v21 = vpop.f32.mrf.mxu0  ;;  %v8342_v23 = vrot.slane %v7728_v4, %v8060_v12  ;;  %v2786_v24 = vmax.f32 %v1947_v49, 0.0  ;;  %v2787_v25 = vmax.f32 %v1961_v6, 0.0 }
 0x113   : > { %v3216_v22 = vcombine.low %v3208_v56, %v3215_v15  ;;  %v2788_v26 = vmax.f32 %v1969_v8, 0.0  ;;  %v2789_v28 = vmax.f32 %v1971_v17, 0.0  ;;  %v2790_v29 = vmax.f32 %v1954_v59, 0.0 }
 0x114   : > { %v2791_v30 = vmax.f32 %v1968_v7, 0.0  ;;  %v7876_v31 = vpop.f32.mrf.mxu0  ;;  %v2792_v33 = vmax.f32 %v1970_v16, 0.0  ;;  %v2793_v34 = vmax.f32 %v1972_v18, 0.0  ;;  %v3233_v35 = vcombine.low %v2785_v19, %v2786_v24 }
 0x115   : > { %v4084_v32 = vpack.c.bf16 %v3230_v52, %v3216_v22  ;;  %v3234_v37 = vcombine.low %v2787_v25, %v2788_v26  ;;  %v3286_v38 = vrot.slane %v2789_v28, %v8060_v12  ;;  %v1973_v9 = vcombine.high %v8266_v27, %v8266_v27 }
 0x116   : > { %v3294_v40 = vcombine.low %v2790_v29, %v2791_v30  ;;  %v8347_v42 = vpop.f32.mrf.mxu0  ;;  %v3255_v44 = vrot.slane %v3233_v35, %v8060_v12  ;;  %v3295_v47 = vcombine.low %v2792_v33, %v2793_v34  ;;  %v1980_v48 = vrot.slane %v8266_v27, %v8060_v12 }
 0x117   : > { %v8350_v43 = vrot.slane %v4084_v32, %v8060_v12  ;;  %v8356_v49 = vrot.slane %v4176_v11, %v8060_v12  ;;  %v3262_v50 = vrot.slane %v3234_v37, %v8060_v12  ;;  %v3293_v51 = vrot.slane %v3286_v38, %v8060_v12 }
 0x118   : > { %v1987_v52 = vrot.slane %v1973_v9, %v8060_v12  ;;  %v7879_v53 = vpop.f32.mrf.mxu0  ;;  %v3271_v54 = vrot.slane %v3263_v55, %v8060_v12  ;;  %v3304_v56 = vrot.slane %v3294_v40, %v8060_v12  ;;  %v3311_v57 = vrot.slane %v3295_v47, %v8060_v12 }
 0x119   : > { %v1988_v58 = vcombine.high %v1980_v48, %v1980_v48  ;;  %v3264_v59 = vcombine.low %v3255_v44, %v3262_v50  ;;  %v7729_v61 = vpack.c.bf16 %v3293_v51, %v3293_v51  ;;  %v1996_v62 = vrot.slane %v1980_v48, %v8060_v12 }
 0x11a   : > { %v1989_v27 = vcombine.high %v1987_v52, %v1987_v52  ;;  %v8365_v63 = vpop.f32.mrf.mxu0  ;;  %v4215_v4 = vcombine.high %v8350_v43, %v8350_v43  ;;  %v4229_v6 = vrot.slane %v8342_v23, %v8060_v12  ;;  %v2003_v7 = vrot.slane %v1987_v52, %v8060_v12 }
 0x11b   : > { %v2010_v8 = vrot.slane %v1988_v58, %v8060_v12  ;;  %v3278_v10 = vrot.slane %v3264_v59, %v8060_v12  ;;  %v3326_v11 = vcombine.low %v3304_v56, %v3311_v57  ;;  %v2018_v16 = vcombine.high %v1996_v62, %v1996_v62 }
 0x11c   : > { %v2017_v15 = vrot.slane %v1989_v27, %v8060_v12  ;;  %v7880_v55 = vpop.f32.mrf.mxu0  ;;  %v8376_v17 = vrot.slane %v7729_v61, %v8060_v12  ;;  %v2019_v18 = vcombine.high %v2003_v7, %v2003_v7  ;;  %v2022_v22 = vcombine.high %v8276_v45, %v8276_v45 }
 0x11d   : > { %v2020_v19 = vcombine.high %v2010_v8, %v2010_v8  ;;  %v3279_v24 = vcombine.low %v3271_v54, %v3278_v10  ;;  %v2794_v26 = vmax.f32 %v1996_v62, 0.0  ;;  %v2795_v28 = vmax.f32 %v2010_v8, 0.0 }
 0x11e   : > { %v2021_v25 = vcombine.high %v2017_v15, %v2017_v15  ;;  %v8380_v29 = vpop.f32.mrf.mxu0  ;;  %v2796_v30 = vmax.f32 %v2018_v16, 0.0  ;;  %v2798_v32 = vmax.f32 %v2003_v7, 0.0  ;;  %v2799_v33 = vmax.f32 %v2017_v15, 0.0 }
 0x11f   : > { %v2797_v31 = vmax.f32 %v2020_v19, 0.0  ;;  %v4085_v34 = vpack.c.bf16 %v3293_v51, %v3279_v24  ;;  %v2800_v35 = vmax.f32 %v2019_v18, 0.0  ;;  %v3296_v37 = vcombine.low %v2794_v26, %v2795_v28 }
 0x120   : > { %v2029_v38 = vrot.slane %v8276_v45, %v8060_v12  ;;  %v7883_v40 = vpop.f32.mrf.mxu0  ;;  %v8386_v9 = vrot.slane %v8350_v43, %v8060_v12  ;;  %v3349_v47 = vrot.slane %v2798_v32, %v8060_v12  ;;  %v2036_v48 = vrot.slane %v2022_v22, %v8060_v12 }
 0x121   : > { %v3297_v44 = vcombine.low %v2796_v30, %v2797_v31  ;;  %v3334_v50 = vrot.slane %v3326_v11, %v8060_v12  ;;  %v4246_v52 = vrot.slane %v4085_v34, %v8060_v12  ;;  %v3318_v51 = vrot.slane %v3296_v37, %v8060_v12 }
 0x122   : > { %v2037_v53 = vcombine.high %v2029_v38, %v2029_v38  ;;  %v8393_v54 = vpop.f32.mrf.mxu0  ;;  %v3356_v56 = vrot.slane %v3349_v47, %v8060_v12  ;;  %v2038_v57 = vcombine.high %v2036_v48, %v2036_v48  ;;  %v2045_v58 = vrot.slane %v2029_v38, %v8060_v12 }
 0x123   : > { %v3325_v45 = vrot.slane %v3297_v44, %v8060_v12  ;;  %v3357_v61 = vcombine.low %v2799_v33, %v2800_v35  ;;  %v2052_v27 = vrot.slane %v2036_v48, %v8060_v12  ;;  %v2801_v62 = vmax.f32 %v2021_v25, 0.0 }
 0x124   : > { %v7884_v7 = vpop.f32.mrf.mxu0  ;;  %v7730_v10 = vpack.c.bf16 %v3356_v56, %v3356_v56  ;;  %v2059_v11 = vrot.slane %v2037_v53, %v8060_v12  ;;  %v2066_v15 = vrot.slane %v2038_v57, %v8060_v12  ;;  %v4254_v16 = vcombine.high %v4246_v52, %v4246_v52 }
 0x125   : > { %v3327_v8 = vcombine.low %v3318_v51, %v3325_v45  ;;  %v8404_v55 = vrot.slane %v4246_v52, %v8060_v12  ;;  %v2067_v18 = vcombine.high %v2045_v58, %v2045_v58  ;;  %v2068_v19 = vcombine.high %v2052_v27, %v2052_v27 }
 0x126   : > { %v8406_v22 = vpop.f32.mrf.mxu0  ;;  %v2069_v26 = vcombine.high %v2059_v11, %v2059_v11  ;;  %v2070_v28 = vcombine.high %v2066_v15, %v2066_v15  ;;  %v2802_v25 = vmax.f32 %v2045_v58, 0.0  ;;  %v8410_v30 = vrot.slane %v7730_v10, %v8060_v12 }
 0x127   : > { %v3341_v24 = vrot.slane %v3327_v8, %v8060_v12  ;;  %v2803_v31 = vmax.f32 %v2059_v11, 0.0  ;;  %v2804_v32 = vmax.f32 %v2067_v18, 0.0  ;;  %v2807_v33 = vmax.f32 %v2066_v15, 0.0 }
 0x128   : > { %v7887_v34 = vpop.f32.mrf.mxu0  ;;  %v2805_v37 = vmax.f32 %v2069_v26, 0.0  ;;  %v2806_v38 = vmax.f32 %v2052_v27, 0.0  ;;  %v2808_v40 = vmax.f32 %v2068_v19, 0.0  ;;  %v2809_v44 = vmax.f32 %v2070_v28, 0.0 }
 0x129   : > { %v3342_v35 = vcombine.low %v3334_v50, %v3341_v24  ;;  %v3358_v47 = vcombine.low %v2801_v62, %v2802_v25  ;;  %v3359_v48 = vcombine.low %v2803_v31, %v2804_v32  ;;  %v3412_v52 = vrot.slane %v2807_v33, %v8060_v12 }
 0x12a   : > { %v3360_v53 = vcombine.low %v2805_v37, %v2806_v38  ;;  %v2071_v45 = vcombine.high %v8287_v0, %v8287_v0  ;;  %v2078_v57 = vrot.slane %v8287_v0, %v8060_v12  ;;  %v8417_v58 = vpop.f32.mrf.mxu0  ;;  %v3367_v50 = vrot.slane %v3357_v61, %v8060_v12 }
 0x12b   : > { %v4086_v51 = vpack.c.bf16 %v3356_v56, %v3342_v35  ;;  %v3374_v27 = vrot.slane %v3358_v47, %v8060_v12  ;;  %v3419_v7 = vrot.slane %v3412_v52, %v8060_v12  ;;  %v3420_v62 = vcombine.low %v2808_v40, %v2809_v44 }
 0x12c   : > { %v3381_v8 = vrot.slane %v3359_v48, %v8060_v12  ;;  %v3388_v56 = vrot.slane %v3360_v53, %v8060_v12  ;;  %v2085_v10 = vrot.slane %v2071_v45, %v8060_v12  ;;  %v2086_v11 = vcombine.high %v2078_v57, %v2078_v57  ;;  %v7888_v15 = vpop.f32.mrf.mxu0 }
 0x12d   : > { %v8426_v18 = vrot.slane %v4254_v16, %v8060_v12  ;;  %v3389_v61 = vcombine.low %v3367_v50, %v3374_v27  ;;  %v2094_v19 = vrot.slane %v2078_v57, %v8060_v12  ;;  %v8432_v24 = vrot.slane %v4086_v51, %v8060_v12 }
 0x12e   : > { %v3390_v26 = vcombine.low %v3381_v8, %v3388_v56  ;;  %v2087_v28 = vcombine.high %v2085_v10, %v2085_v10  ;;  %v2101_v25 = vrot.slane %v2085_v10, %v8060_v12  ;;  %v3430_v31 = vrot.slane %v3420_v62, %v8060_v12 }
 0x12f   : > { %v7731_v32 = vpack.c.bf16 %v3419_v7, %v3419_v7  ;;  %v2108_v33 = vrot.slane %v2086_v11, %v8060_v12  ;;  %v2116_v16 = vcombine.high %v2094_v19, %v2094_v19  ;;  %v3397_v34 = vrot.slane %v3389_v61, %v8060_v12 }
 0x130   : > { %v3404_v35 = vrot.slane %v3390_v26, %v8060_v12  ;;  %v2115_v37 = vrot.slane %v2087_v28, %v8060_v12  ;;  %v2117_v38 = vcombine.high %v2101_v25, %v2101_v25  ;;  %v2810_v44 = vmax.f32 %v2094_v19, 0.0 }
 0x131   : > { %v2118_v40 = vcombine.high %v2108_v33, %v2108_v33  ;;  %v2811_v47 = vmax.f32 %v2108_v33, 0.0  ;;  %v2812_v48 = vmax.f32 %v2116_v16, 0.0  ;;  %v2814_v51 = vmax.f32 %v2101_v25, 0.0 }
 0x132   : > { %v3405_v52 = vcombine.low %v3397_v34, %v3404_v35  ;;  %v2815_v53 = vmax.f32 %v2115_v37, 0.0  ;;  %v2816_v45 = vmax.f32 %v2117_v38, 0.0  ;;  %v2120_v27 = vcombine.high %v8307_v20, %v8307_v20 }
 0x133   : > { %v2813_v57 = vmax.f32 %v2118_v40, 0.0  ;;  %v3421_v50 = vcombine.low %v2810_v44, %v2811_v47  ;;  %v2127_v62 = vrot.slane %v8307_v20, %v8060_v12  ;;  %v2119_v56 = vcombine.high %v2115_v37, %v2115_v37 }
 0x134   : > { %v4087_v8 = vpack.c.bf16 %v3419_v7, %v3405_v52  ;;  %v3423_v10 = vcombine.low %v2814_v51, %v2815_v53  ;;  %v3475_v11 = vrot.slane %v2816_v45, %v8060_v12  ;;  %v2134_v19 = vrot.slane %v2120_v27, %v8060_v12 }
 0x135   : > { %v3422_v15 = vcombine.low %v2812_v48, %v2813_v57  ;;  %v3437_v61 = vrot.slane %v3421_v50, %v8060_v12  ;;  %v2135_v26 = vcombine.high %v2127_v62, %v2127_v62  ;;  %v2143_v16 = vrot.slane %v2127_v62, %v8060_v12 }
 0x136   : > { %v4324_v28 = vrot.slane %v4087_v8, %v8060_v12  ;;  %v3451_v25 = vrot.slane %v3423_v10, %v8060_v12  ;;  %v3482_v33 = vrot.slane %v3475_v11, %v8060_v12  ;;  %v2136_v34 = vcombine.high %v2134_v19, %v2134_v19 }
 0x137   : > { %v3444_v20 = vrot.slane %v3422_v15, %v8060_v12  ;;  %v3452_v7 = vcombine.low %v3430_v31, %v3437_v61  ;;  %v2150_v35 = vrot.slane %v2134_v19, %v8060_v12  ;;  %v8456_v38 = vrot.slane %v7731_v32, %v8060_v12 }
 0x138   : > { %v7732_v40 = vpack.c.bf16 %v3482_v33, %v3482_v33  ;;  %v2157_v44 = vrot.slane %v2135_v26, %v8060_v12  ;;  %v2164_v48 = vrot.slane %v2136_v34, %v8060_v12  ;;  %v2165_v52 = vcombine.high %v2143_v16, %v2143_v16 }
 0x139   : > { %v3453_v47 = vcombine.low %v3444_v20, %v3451_v25  ;;  %v2817_v51 = vmax.f32 %v2119_v56, 0.0  ;;  %v4332_v53 = vcombine.high %v4324_v28, %v4324_v28  ;;  %v3460_v31 = vrot.slane %v3452_v7, %v8060_v12 }
 0x13a   : > { %v2166_v45 = vcombine.high %v2150_v35, %v2150_v35  ;;  %v2167_v57 = vcombine.high %v2157_v44, %v2157_v44  ;;  %v8463_v27 = vrot.slane %v7732_v40, %v8060_v12  ;;  %v2168_v32 = vcombine.high %v2164_v48, %v2164_v48 }
 0x13b   : > { %v3467_v50 = vrot.slane %v3453_v47, %v8060_v12  ;;  %v2819_v62 = vmax.f32 %v2157_v44, 0.0  ;;  %v2818_v8 = vmax.f32 %v2143_v16, 0.0  ;;  %v2820_v10 = vmax.f32 %v2165_v52, 0.0 }
 0x13c   : > { %v2821_v11 = vmax.f32 %v2167_v57, 0.0  ;;  %v2822_v15 = vmax.f32 %v2150_v35, 0.0  ;;  %v2823_v19 = vmax.f32 %v2164_v48, 0.0  ;;  %v2824_v26 = vmax.f32 %v2166_v45, 0.0 }
 0x13d   : > { %v3468_v61 = vcombine.low %v3460_v31, %v3467_v50  ;;  %v2825_v56 = vmax.f32 %v2168_v32, 0.0  ;;  %v3483_v25 = vcombine.low %v2817_v51, %v2818_v8  ;;  %v3484_v20 = vcombine.low %v2819_v62, %v2820_v10 }
 0x13e   : > { %v3485_v7 = vcombine.low %v2821_v11, %v2822_v15  ;;  %v2169_v34 = vcombine.high %v8317_v39, %v8317_v39  ;;  %v3486_v0 = vcombine.low %v2823_v19, %v2824_v26  ;;  %v2176_v16 = vrot.slane %v8317_v39, %v8060_v12 }
 0x13f   : > { %v4088_v47 = vpack.c.bf16 %v3482_v33, %v3468_v61  ;;  %v3538_v40 = vrot.slane %v2825_v56, %v8060_v12  ;;  %v3493_v44 = vrot.slane %v3483_v25, %v8060_v12  ;;  %v3500_v35 = vrot.slane %v3484_v20, %v8060_v12 }
 0x140   : > { %v3507_v48 = vrot.slane %v3485_v7, %v8060_v12  ;;  %v2183_v52 = vrot.slane %v2169_v34, %v8060_v12  ;;  %v8475_v51 = vrot.slane %v4324_v28, %v8060_v12  ;;  %v8478_v31 = vrot.slane %v4332_v53, %v8060_v12 }
 0x141   : > { %v3514_v33 = vrot.slane %v3486_v0, %v8060_v12  ;;  %v2184_v45 = vcombine.high %v2176_v16, %v2176_v16  ;;  %v3515_v57 = vcombine.low %v3493_v44, %v3500_v35  ;;  %v2192_v39 = vrot.slane %v2176_v16, %v8060_v12 }
 0x142   : > { %v2185_v50 = vcombine.high %v2183_v52, %v2183_v52  ;;  %v2199_v32 = vrot.slane %v2183_v52, %v8060_v12  ;;  %v8484_v62 = vrot.slane %v4088_v47, %v8060_v12  ;;  %v3545_v53 = vrot.slane %v3538_v40, %v8060_v12 }
 0x143   : > { %v3516_v28 = vcombine.low %v3507_v48, %v3514_v33  ;;  %v2206_v10 = vrot.slane %v2184_v45, %v8060_v12  ;;  %v2214_v11 = vcombine.high %v2192_v39, %v2192_v39  ;;  %v3523_v61 = vrot.slane %v3515_v57, %v8060_v12 }
 0x144   : > { %v2213_v0 = vrot.slane %v2185_v50, %v8060_v12  ;;  %v2215_v15 = vcombine.high %v2199_v32, %v2199_v32  ;;  %v2826_v56 = vmax.f32 %v2192_v39, 0.0  ;;  %v2830_v34 = vmax.f32 %v2199_v32, 0.0 }
 0x145   : > { %v3530_v19 = vrot.slane %v3516_v28, %v8060_v12  ;;  %v2216_v26 = vcombine.high %v2206_v10, %v2206_v10  ;;  %v2827_v20 = vmax.f32 %v2206_v10, 0.0  ;;  %v2828_v7 = vmax.f32 %v2214_v11, 0.0 }
 0x146   : > { %v2217_v25 = vcombine.high %v2213_v0, %v2213_v0  ;;  %v2831_v44 = vmax.f32 %v2213_v0, 0.0  ;;  %v2832_v35 = vmax.f32 %v2215_v15, 0.0  ;;  %v2218_v52 = vcombine.high %v8327_v60, %v8327_v60 }
 0x147   : > { %v3531_v47 = vcombine.low %v3523_v61, %v3530_v19  ;;  %v2829_v16 = vmax.f32 %v2216_v26, 0.0  ;;  %v3546_v40 = vcombine.low %v2826_v56, %v2827_v20  ;;  %v2225_v33 = vrot.slane %v8327_v60, %v8060_v12 }
 0x148   : > { %v2833_v48 = vmax.f32 %v2217_v25, 0.0  ;;  %v7733_v57 = vpack.c.bf16 %v3545_v53, %v3545_v53  ;;  %v3548_v39 = vcombine.low %v2830_v34, %v2831_v44  ;;  %v2232_v10 = vrot.slane %v2218_v52, %v8060_v12 }
 0x149   : > { %v4089_v45 = vpack.c.bf16 %v3545_v53, %v3531_v47  ;;  %v3547_v50 = vcombine.low %v2828_v7, %v2829_v16  ;;  %v2233_v0 = vcombine.high %v2225_v33, %v2225_v33  ;;  %v3556_v11 = vrot.slane %v3546_v40, %v8060_v12 }
 0x14a   : > { %v3549_v32 = vcombine.low %v2832_v35, %v2833_v48  ;;  %v3570_v61 = vrot.slane %v3548_v39, %v8060_v12  ;;  %v2241_v19 = vrot.slane %v2225_v33, %v8060_v12  ;;  %v2234_v53 = vcombine.high %v2232_v10, %v2232_v10 }
 0x14b   : > { %v3563_v15 = vrot.slane %v3547_v50, %v8060_v12  ;;  %v2248_v26 = vrot.slane %v2232_v10, %v8060_v12  ;;  %v2255_v56 = vrot.slane %v2233_v0, %v8060_v12  ;;  %v8508_v25 = vrot.slane %v7733_v57, %v8060_v12 }
 0x14c   : > { %v3577_v60 = vrot.slane %v3549_v32, %v8060_v12  ;;  %v2263_v7 = vcombine.high %v2241_v19, %v2241_v19  ;;  %v2267_v34 = vcombine.high %v8339_v21, %v8339_v21  ;;  %v2262_v16 = vrot.slane %v2234_v53, %v8060_v12 }
 0x14d   : > { %v3578_v20 = vcombine.low %v3556_v11, %v3563_v15  ;;  %v2264_v44 = vcombine.high %v2248_v26, %v2248_v26  ;;  %v2265_v35 = vcombine.high %v2255_v56, %v2255_v56  ;;  %v8514_v48 = vrot.slane %v4089_v45, %v8060_v12 }
 0x14e   : > { %v3579_v47 = vcombine.low %v3570_v61, %v3577_v60  ;;  %v2834_v40 = vmax.f32 %v2241_v19, 0.0  ;;  %v2835_v52 = vmax.f32 %v2255_v56, 0.0  ;;  %v2836_v33 = vmax.f32 %v2263_v7, 0.0 }
 0x14f   : > { %v3586_v50 = vrot.slane %v3578_v20, %v8060_v12  ;;  %v2837_v57 = vmax.f32 %v2265_v35, 0.0  ;;  %v2838_v39 = vmax.f32 %v2248_v26, 0.0  ;;  %v2839_v32 = vmax.f32 %v2262_v16, 0.0 }
 0x150   : > { %v2840_v10 = vmax.f32 %v2264_v44, 0.0  ;;  %v3593_v0 = vrot.slane %v3579_v47, %v8060_v12  ;;  %v3601_v11 = vrot.slane %v2834_v40, %v8060_v12  ;;  %v3609_v15 = vcombine.low %v2835_v52, %v2836_v33 }
 0x151   : > { %v2266_v61 = vcombine.high %v2262_v16, %v2262_v16  ;;  %v3610_v60 = vcombine.low %v2837_v57, %v2838_v39  ;;  %v2274_v45 = vrot.slane %v8339_v21, %v8060_v12  ;;  %v2281_v19 = vrot.slane %v2267_v34, %v8060_v12 }
 0x152   : > { %v3594_v53 = vcombine.low %v3586_v50, %v3593_v0  ;;  %v3608_v56 = vrot.slane %v3601_v11, %v8060_v12  ;;  %v3611_v20 = vcombine.low %v2839_v32, %v2840_v10  ;;  %v3619_v26 = vrot.slane %v3609_v15, %v8060_v12 }
 0x153   : > { %v3626_v7 = vrot.slane %v3610_v60, %v8060_v12  ;;  %v2282_v44 = vcombine.high %v2274_v45, %v2274_v45  ;;  %v2283_v47 = vcombine.high %v2281_v19, %v2281_v19  ;;  %v2290_v35 = vrot.slane %v2274_v45, %v8060_v12 }
 0x154   : > { %v4090_v40 = vpack.c.bf16 %v3608_v56, %v3594_v53  ;;  %v7734_v52 = vpack.c.bf16 %v3608_v56, %v3608_v56  ;;  %v2297_v21 = vrot.slane %v2281_v19, %v8060_v12  ;;  %v8533_v39 = vrot.slane %v8514_v48, %v8060_v12 }
 0x155   : > { %v3641_v34 = vcombine.low %v3619_v26, %v3626_v7  ;;  %v2304_v33 = vrot.slane %v2282_v44, %v8060_v12  ;;  %v2311_v50 = vrot.slane %v2283_v47, %v8060_v12  ;;  %v2312_v57 = vcombine.high %v2290_v35, %v2290_v35 }
 0x156   : > { %v3633_v32 = vrot.slane %v3611_v20, %v8060_v12  ;;  %v2313_v10 = vcombine.high %v2297_v21, %v2297_v21  ;;  %v2841_v0 = vmax.f32 %v2266_v61, 0.0  ;;  %v8537_v11 = vrot.slane %v4090_v40, %v8060_v12 }
 0x157   : > { %v2314_v15 = vcombine.high %v2304_v33, %v2304_v33  ;;  %v2315_v60 = vcombine.high %v2311_v50, %v2311_v50  ;;  %v2843_v45 = vmax.f32 %v2304_v33, 0.0  ;;  %v3649_v19 = vrot.slane %v3641_v34, %v8060_v12 }
 0x158   : > { %v8541_v53 = vrot.slane %v7734_v52, %v8060_v12  ;;  %v2842_v56 = vmax.f32 %v2290_v35, 0.0  ;;  %v2844_v26 = vmax.f32 %v2312_v57, 0.0  ;;  %v2846_v44 = vmax.f32 %v2297_v21, 0.0 }
 0x159   : > { %v2845_v7 = vmax.f32 %v2314_v15, 0.0  ;;  %v2847_v47 = vmax.f32 %v2311_v50, 0.0  ;;  %v2848_v16 = vmax.f32 %v2313_v10, 0.0  ;;  %v2849_v20 = vmax.f32 %v2315_v60, 0.0 }
 0x15a   : > { %v3612_v8 = vcombine.low %v2841_v0, %v2842_v56  ;;  %v3664_v61 = vrot.slane %v2843_v45, %v8060_v12  ;;  %v2316_v40 = vcombine.high %v8347_v42, %v8347_v42  ;;  %v2323_v35 = vrot.slane %v8347_v42, %v8060_v12 }
 0x15b   : > { %v3672_v34 = vcombine.low %v2844_v26, %v2845_v7  ;;  %v3673_v28 = vcombine.low %v2846_v44, %v2847_v47  ;;  %v3674_v50 = vcombine.low %v2848_v16, %v2849_v20  ;;  %v8558_v45 = vrot.slane %v8537_v11, %v8060_v12 }
 0x15c   : > { %v3640_v52 = vrot.slane %v3612_v8, %v8060_v12  ;;  %v3671_v21 = vrot.slane %v3664_v61, %v8060_v12  ;;  %v2330_v57 = vrot.slane %v2316_v40, %v8060_v12  ;;  %v2331_v15 = vcombine.high %v2323_v35, %v2323_v35 }
 0x15d   : > { %v3682_v10 = vrot.slane %v3672_v34, %v8060_v12  ;;  %v3689_v0 = vrot.slane %v3673_v28, %v8060_v12  ;;  %v2339_v60 = vrot.slane %v2323_v35, %v8060_v12  ;;  %v3696_v47 = vrot.slane %v3674_v50, %v8060_v12 }
 0x15e   : > { %v3642_v56 = vcombine.low %v3633_v32, %v3640_v52  ;;  %v7735_v42 = vpack.c.bf16 %v3671_v21, %v3671_v21  ;;  %v2332_v26 = vcombine.high %v2330_v57, %v2330_v57  ;;  %v2346_v16 = vrot.slane %v2330_v57, %v8060_v12 }
 0x15f   : > { %v2353_v7 = vrot.slane %v2331_v15, %v8060_v12  ;;  %v2361_v44 = vcombine.high %v2339_v60, %v2339_v60  ;;  %v4158_v32 = vrot.slane %v4137_v1, %v8060_v12  ;;  %v3704_v61 = vcombine.low %v3682_v10, %v3689_v0 }
 0x160   : > { %v3656_v28 = vrot.slane %v3642_v56, %v8060_v12  ;;  %v8567_v20 = vrot.slane %v2332_v26, %v8060_v12  ;;  %v2362_v40 = vcombine.high %v2346_v16, %v2346_v16  ;;  %v8574_v57 = vrot.slane %v7735_v42, %v8060_v12 }
 0x161   : > { %v2363_v34 = vcombine.high %v2353_v7, %v2353_v7  ;;  %v2851_v35 = vmax.f32 %v2353_v7, 0.0  ;;  %v2850_v15 = vmax.f32 %v2339_v60, 0.0  ;;  %v2852_v56 = vmax.f32 %v2361_v44, 0.0 }
 0x162   : > { %v3657_v52 = vcombine.low %v3649_v19, %v3656_v28  ;;  %v2854_v50 = vmax.f32 %v2346_v16, 0.0  ;;  %v2855_v26 = vmax.f32 %v8567_v20, 0.0  ;;  %v2856_v33 = vmax.f32 %v2362_v40, 0.0 }
 0x163   : > { %v2853_v8 = vmax.f32 %v2363_v34, 0.0  ;;  %v3675_v37 = vcombine.low %v2850_v15, %v2851_v35  ;;  %v3727_v46 = vrot.slane %v2852_v56, %v8060_v12  ;;  %v4198_v1 = vcombine.high %v8336_v14, %v8336_v14 }
 0x164   : > { %v4091_v59 = vpack.c.bf16 %v3671_v21, %v3657_v52  ;;  %v3736_v0 = vcombine.low %v2855_v26, %v2856_v33  ;;  %v8582_v19 = vcombine.high %v8356_v49, %v8356_v49  ;;  %v4756_v60 = vunpack.i.h.s16 %v8336_v14 }
 0x165   : > { %v3735_v10 = vcombine.low %v2853_v8, %v2854_v50  ;;  %v3703_v16 = vrot.slane %v3675_v37, %v8060_v12  ;;  %v3734_v21 = vrot.slane %v3727_v46, %v8060_v12  ;;  %v4758_v7 = vunpack.i.h.s16 %v8356_v49 }
 0x166   : > { %v4480_v42 = vrot.slane %v4091_v59, %v8060_v12  ;;  %v3752_v28 = vrot.slane %v3736_v0, %v8060_v12  ;;  %v4760_v8 = vunpack.i.h.s16 %v4198_v1  ;;  %v7742_v33 = vpack.i.b16 %v8336_v14, %v4151_v3 }
 0x167   : > { %v3745_v44 = vrot.slane %v3735_v10, %v8060_v12  ;;  %v3712_v40 = vrot.slane %v3704_v61, %v8060_v12  ;;  %v3705_v37 = vcombine.low %v3696_v47, %v3703_v16  ;;  %v2364_v35 = vcombine.high %v8567_v20, %v8567_v20 }
 0x168   : > { %v4488_v34 = vcombine.high %v4480_v42, %v4480_v42  ;;  %v7743_v52 = vpack.i.b16 %v8356_v49, %v4756_v60  ;;  %v7744_v15 = vpack.i.b16 %v4198_v1, %v4758_v7  ;;  %v7745_v56 = vpack.i.b16 %v8582_v19, %v4760_v8 }
 0x169   : > { %v3719_v50 = vrot.slane %v3705_v37, %v8060_v12  ;;  %v8603_v41 = vcombine.low %v3745_v44, %v3752_v28  ;;  %v7736_v3 = vpack.c.bf16 %v3734_v21, %v3734_v21  ;;  %v4962_v14 = vcombine.low %v8300_v13, %v4158_v32 }
 0x16a   : > { %v8607_v61 = vrot.slane %v4480_v42, %v8060_v12  ;;  %v7782_v47 = vcombine.high %v8300_v13, %v4158_v32  ;;  %v4964_v26 = vcombine.low %v7742_v33, %v7743_v52  ;;  %v4965_v46 = vcombine.low %v7744_v15, %v7745_v56 }
 0x16b   : > { %v8611_v20 = vrot.slane %v4488_v34, %v8060_v12  ;;  %v3720_v49 = vcombine.low %v3712_v40, %v3719_v50  ;;  %v4972_v1 = vrot.slane %v4962_v14, %v8060_v12  ;;  %v2365_v10 = vcombine.high %v8365_v63, %v8365_v63 }
 0x16c   : > { %v4979_v0 = vrot.slane %v7782_v47, %v8060_v12  ;;  %v4986_v60 = vrot.slane %v4964_v26, %v8060_v12  ;;  %v4993_v42 = vrot.slane %v4965_v46, %v8060_v12  ;;  %v2372_v13 = vrot.slane %v8365_v63, %v8060_v12 }
 0x16d   : > { %v3775_v32 = vrot.slane %v8603_v41, %v8060_v12  ;;  %v4092_v16 = vpack.c.bf16 %v3734_v21, %v3720_v49  ;;  %v8624_v7 = vrot.slane %v7736_v3, %v8060_v12  ;;  %v2379_v44 = vrot.slane %v2365_v10, %v8060_v12 }
 0x16e   : > { %v4994_v28 = vcombine.low %v4972_v1, %v4979_v0  ;;  %v4995_v8 = vcombine.low %v4986_v60, %v4993_v42  ;;  %v2380_v33 = vcombine.high %v2372_v13, %v2372_v13  ;;  %v2388_v40 = vrot.slane %v2372_v13, %v8060_v12 }
 0x16f   : > { %v2381_v34 = vcombine.high %v2379_v44, %v2379_v44  ;;  %v2395_v37 = vrot.slane %v2379_v44, %v8060_v12  ;;  %v2857_v52 = vmax.f32 %v2364_v35, 0.0  ;;  %v2414_v63 = vcombine.high %v8380_v29, %v8380_v29 }
 0x170   : > { %v5002_v15 = vrot.slane %v4994_v28, %v8060_v12  ;;  %v5009_v21 = vrot.slane %v4995_v8, %v8060_v12  ;;  %v2402_v56 = vrot.slane %v2380_v33, %v8060_v12  ;;  %v2410_v50 = vcombine.high %v2388_v40, %v2388_v40 }
 0x171   : > { %v8635_v3 = vrot.slane %v4092_v16, %v8060_v12  ;;  %v2409_v14 = vrot.slane %v2381_v34, %v8060_v12  ;;  %v2411_v47 = vcombine.high %v2395_v37, %v2395_v37  ;;  %v2421_v26 = vrot.slane %v8380_v29, %v8060_v12 }
 0x172   : > { %v5010_v35 = vcombine.low %v5002_v15, %v5009_v21  ;;  %v2412_v46 = vcombine.high %v2402_v56, %v2402_v56  ;;  %v2858_v49 = vmax.f32 %v2388_v40, 0.0  ;;  %v2859_v1 = vmax.f32 %v2402_v56, 0.0 }
 0x173   : > { %v2413_v10 = vcombine.high %v2409_v14, %v2409_v14  ;;  %v2860_v0 = vmax.f32 %v2410_v50, 0.0  ;;  %v2862_v60 = vmax.f32 %v2395_v37, 0.0  ;;  %v2863_v42 = vmax.f32 %v2409_v14, 0.0 }
 0x174   : > { %7898 = vmatmul.mubr.msk.bf16.vlgmr.msra.gmra.mxu1 %vm1577_vm1, %v5010_v35  ;;  %v2861_v13 = vmax.f32 %v2412_v46, 0.0  ;;  %v2864_v44 = vmax.f32 %v2411_v47, 0.0  ;;  %v3737_v16 = vcombine.low %v2857_v52, %v2858_v49  ;;  %v2428_v28 = vrot.slane %v2414_v63, %v8060_v12 }
 0x175   : > { %v2865_v8 = vmax.f32 %v2413_v10, 0.0  ;;  %v3738_v33 = vcombine.low %v2859_v1, %v2860_v0  ;;  %v3798_v34 = vcombine.low %v2862_v60, %v2863_v42  ;;  %v2429_v59 = vcombine.high %v2421_v26, %v2421_v26  ;;  %7901 = vmatprep.mubr.msk.bf16.mxu1 %vm7993_vm0, %v7992_v2 }
 0x176   : > { %v3759_v29 = vrot.slane %v3737_v16, %v8060_v12  ;;  %v3790_v40 = vrot.slane %v2861_v13, %v8060_v12  ;;  %v2430_v37 = vcombine.high %v2428_v28, %v2428_v28  ;;  %v2437_v15 = vrot.slane %v2421_v26, %v8060_v12 }
 0x177   : > { %v4541_v21 = vrot.slane %v8624_v7, %v8060_v12  ;;  %v3766_v52 = vrot.slane %v3738_v33, %v8060_v12  ;;  %v3799_v63 = vcombine.low %v2864_v44, %v2865_v8  ;;  %v2444_v56 = vrot.slane %v2428_v28, %v8060_v12 }
 0x178   : > { %v3797_v50 = vrot.slane %v3790_v40, %v8060_v12  ;;  %v2451_v14 = vrot.slane %v2429_v59, %v8060_v12  ;;  %v8654_v47 = vrot.slane %v2430_v37, %v8060_v12  ;;  %v2459_v35 = vcombine.high %v2437_v15, %v2437_v15 }
 0x179   : > { %v3768_v46 = vcombine.low %v3759_v29, %v3766_v52  ;;  %v3808_v49 = vrot.slane %v3798_v34, %v8060_v12  ;;  %v3815_v26 = vrot.slane %v3799_v63, %v8060_v12  ;;  %v2460_v1 = vcombine.high %v2444_v56, %v2444_v56 }
 0x17a   : > { %v4527_v10 = vcombine.high %v8635_v3, %v8635_v3  ;;  %v7737_v0 = vpack.c.bf16 %v3797_v50, %v3797_v50  ;;  %v2461_v60 = vcombine.high %v2451_v14, %v2451_v14  ;;  %v2867_v42 = vmax.f32 %v2451_v14, 0.0 }
 0x17b   : > { %v3782_v13 = vrot.slane %v3768_v46, %v8060_v12  ;;  %v3830_v44 = vcombine.low %v3808_v49, %v3815_v26  ;;  %v2866_v59 = vmax.f32 %v2437_v15, 0.0  ;;  %v2870_v16 = vmax.f32 %v2444_v56, 0.0 }
 0x17c   : > { %v2868_v28 = vmax.f32 %v2459_v35, 0.0  ;;  %v2869_v8 = vmax.f32 %v2461_v60, 0.0  ;;  %v2871_v33 = vmax.f32 %v8654_v47, 0.0  ;;  %v2872_v29 = vmax.f32 %v2460_v1, 0.0 }
 0x17d   : > { %v8664_v34 = vrot.slane %v8635_v3, %v8060_v12  ;;  %v3783_v40 = vcombine.low %v3775_v32, %v3782_v13  ;;  %v3800_v37 = vcombine.low %v2866_v59, %v2867_v42  ;;  %v3853_v52 = vrot.slane %v2870_v16, %v8060_v12 }
 0x17e   : > { %v8671_v63 = vrot.slane %v7737_v0, %v8060_v12  ;;  %v2462_v15 = vcombine.high %v8654_v47, %v8654_v47  ;;  %v3801_v56 = vcombine.low %v2868_v28, %v2869_v8  ;;  %v4236_v14 = vrot.slane %v4215_v4, %v8060_v12 }
 0x17f   : > { %v3838_v35 = vrot.slane %v3830_v44, %v8060_v12  ;;  %v4093_v46 = vpack.c.bf16 %v3797_v50, %v3783_v40  ;;  %v8681_v41 = vrot.slane %v3853_v52, %v8060_v12  ;;  %v4237_v32 = vcombine.high %v8386_v9, %v8386_v9 }
 0x180   : > { %v3822_v49 = vrot.slane %v3800_v37, %v8060_v12  ;;  %v3829_v26 = vrot.slane %v3801_v56, %v8060_v12  ;;  %v8687_v47 = vcombine.low %v2871_v33, %v2872_v29  ;;  %v4238_v1 = vcombine.high %v4236_v14, %v4236_v14 }
 0x181   : > { %v4558_v0 = vrot.slane %v4093_v46, %v8060_v12  ;;  %v7738_v43 = vpack.c.bf16 %v8681_v41, %v8681_v41  ;;  %v4762_v4 = vunpack.i.h.s16 %v8582_v19  ;;  %v4774_v50 = vunpack.i.h.s16 %v8404_v55 }
 0x182   : > { %v3831_v60 = vcombine.low %v3822_v49, %v3829_v26  ;;  %v8696_v42 = vcombine.high %v8404_v55, %v8404_v55  ;;  %v4776_v13 = vunpack.i.h.s16 %v8426_v18  ;;  %v7747_v44 = vpack.i.b16 %v8404_v55, %v4229_v6 }
 0x183   : > { %v4566_v59 = vcombine.high %v4558_v0, %v4558_v0  ;;  %v4580_v16 = vrot.slane %v8671_v63, %v8060_v12  ;;  %v7746_v19 = vpack.i.b16 %v4190_v5, %v4762_v4  ;;  %v5012_v28 = vcombine.low %v4236_v14, %v4237_v32 }
 0x184   : > { %v3845_v8 = vrot.slane %v3831_v60, %v8060_v12  ;;  %v7748_v33 = vpack.i.b16 %v8426_v18, %v4774_v50  ;;  %v7749_v29 = vpack.i.b16 %v8696_v42, %v4776_v13  ;;  %v5013_v40 = vcombine.low %v4238_v1, %v7747_v44 }
 0x185   : > { %v8712_v23 = vrot.slane %v4558_v0, %v8060_v12  ;;  %v3871_v6 = vrot.slane %v8687_v47, %v8060_v12  ;;  %v8717_v55 = vrot.slane %v7738_v43, %v8060_v12  ;;  %v5011_v36 = vcombine.low %v7746_v19, %v8386_v9 }
 0x186   : > { %v8721_v5 = vrot.slane %v4566_v59, %v8060_v12  ;;  %v3846_v37 = vcombine.low %v3838_v35, %v3845_v8  ;;  %v5014_v52 = vcombine.low %v7748_v33, %v7749_v29  ;;  %v2463_v56 = vcombine.high %v8393_v54, %v8393_v54 }
 0x187   : > { %v5021_v14 = vrot.slane %v5011_v36, %v8060_v12  ;;  %v5028_v46 = vrot.slane %v5012_v28, %v8060_v12  ;;  %v2470_v32 = vrot.slane %v8393_v54, %v8060_v12  ;;  %v2512_v49 = vcombine.high %v8406_v22, %v8406_v22 }
 0x188   : > { %v5035_v9 = vrot.slane %v5013_v40, %v8060_v12  ;;  %v5042_v26 = vrot.slane %v5014_v52, %v8060_v12  ;;  %v2477_v35 = vrot.slane %v2463_v56, %v8060_v12  ;;  %v2873_v47 = vmax.f32 %v2462_v15, 0.0 }
 0x189   : > { %v4094_v1 = vpack.c.bf16 %v8681_v41, %v3846_v37  ;;  %v5043_v0 = vcombine.low %v5021_v14, %v5028_v46  ;;  %v2478_v43 = vcombine.high %v2470_v32, %v2470_v32  ;;  %v2486_v4 = vrot.slane %v2470_v32, %v8060_v12 }
 0x18a   : > { %v5044_v50 = vcombine.low %v5035_v9, %v5042_v26  ;;  %v2479_v60 = vcombine.high %v2477_v35, %v2477_v35  ;;  %v2493_v54 = vrot.slane %v2477_v35, %v8060_v12  ;;  %v2519_v13 = vrot.slane %v8406_v22, %v8060_v12 }
 0x18b   : > { %v5051_v44 = vrot.slane %v5043_v0, %v8060_v12  ;;  %v2500_v59 = vrot.slane %v2478_v43, %v8060_v12  ;;  %v2508_v19 = vcombine.high %v2486_v4, %v2486_v4  ;;  %v2526_v15 = vrot.slane %v2512_v49, %v8060_v12 }
 0x18c   : > { %v5058_v41 = vrot.slane %v5044_v50, %v8060_v12  ;;  %v2507_v28 = vrot.slane %v2479_v60, %v8060_v12  ;;  %v2509_v8 = vcombine.high %v2493_v54, %v2493_v54  ;;  %v2874_v33 = vmax.f32 %v2486_v4, 0.0 }
 0x18d   : > { %v2510_v29 = vcombine.high %v2500_v59, %v2500_v59  ;;  %v2875_v40 = vmax.f32 %v2500_v59, 0.0  ;;  %v2876_v36 = vmax.f32 %v2508_v19, 0.0  ;;  %v2878_v37 = vmax.f32 %v2493_v54, 0.0 }
 0x18e   : > { %v5059_v52 = vcombine.low %v5051_v44, %v5058_v41  ;;  %v2511_v56 = vcombine.high %v2507_v28, %v2507_v28  ;;  %v2879_v22 = vmax.f32 %v2507_v28, 0.0  ;;  %v2880_v14 = vmax.f32 %v2509_v8, 0.0 }
 0x18f   : > { %v2877_v46 = vmax.f32 %v2510_v29, 0.0  ;;  %v3862_v32 = vcombine.low %v2873_v47, %v2874_v33  ;;  %v3863_v9 = vcombine.low %v2875_v40, %v2876_v36  ;;  %v2527_v26 = vcombine.high %v2519_v13, %v2519_v13 }
 0x190   : > { %7902 = vmatmul.mubr.msk.bf16.gmra.mxu1 %vm1577_vm1, %v5059_v52  ;;  %v2881_v49 = vmax.f32 %v2511_v56, 0.0  ;;  %v3916_v35 = vrot.slane %v2879_v22, %v8060_v12  ;;  %v2528_v0 = vcombine.high %v2526_v15, %v2526_v15  ;;  %v2535_v43 = vrot.slane %v2519_v13, %v8060_v12 }
 0x191   : > { %v3864_v4 = vcombine.low %v2877_v46, %v2878_v37  ;;  %v3878_v50 = vrot.slane %v3862_v32, %v8060_v12  ;;  %v3885_v60 = vrot.slane %v3863_v9, %v8060_v12  ;;  %v2542_v54 = vrot.slane %v2526_v15, %v8060_v12  ;;  %7905 = vmatprep.mubr.msk.bf16.mxu1 %vm7993_vm0, %v7992_v2 }
 0x192   : > { %v3923_v47 = vrot.slane %v3916_v35, %v8060_v12  ;;  %v3924_v44 = vcombine.low %v2880_v14, %v2881_v49  ;;  %v2549_v59 = vrot.slane %v2527_v26, %v8060_v12  ;;  %v8755_v19 = vrot.slane %v2528_v0, %v8060_v12 }
 0x193   : > { %v3892_v13 = vrot.slane %v3864_v4, %v8060_v12  ;;  %v3893_v41 = vcombine.low %v3871_v6, %v3878_v50  ;;  %v2557_v28 = vcombine.high %v2535_v43, %v2535_v43  ;;  %v2558_v8 = vcombine.high %v2542_v54, %v2542_v54 }
 0x194   : > { %v8759_v33 = vrot.slane %v4094_v1, %v8060_v12  ;;  %v4619_v15 = vrot.slane %v8717_v55, %v8060_v12  ;;  %v3934_v29 = vrot.slane %v3924_v44, %v8060_v12  ;;  %v2559_v40 = vcombine.high %v2549_v59, %v2549_v59 }
 0x195   : > { %v3894_v36 = vcombine.low %v3885_v60, %v3892_v13  ;;  %v7739_v37 = vpack.c.bf16 %v3923_v47, %v3923_v47  ;;  %v2882_v52 = vmax.f32 %v2535_v43, 0.0  ;;  %v2883_v56 = vmax.f32 %v2549_v59, 0.0 }
 0x196   : > { %v3901_v22 = vrot.slane %v3893_v41, %v8060_v12  ;;  %v2884_v14 = vmax.f32 %v2557_v28, 0.0  ;;  %v2885_v46 = vmax.f32 %v2559_v40, 0.0  ;;  %v2886_v6 = vmax.f32 %v2542_v54, 0.0 }
 0x197   : > { %v3908_v32 = vrot.slane %v3894_v36, %v8060_v12  ;;  %v2887_v1 = vmax.f32 %v8755_v19, 0.0  ;;  %v2888_v9 = vmax.f32 %v2558_v8, 0.0  ;;  %v3925_v26 = vcombine.low %v2882_v52, %v2883_v56 }
 0x198   : > { %v3926_v49 = vcombine.low %v2884_v14, %v2885_v46  ;;  %v4277_v35 = vcombine.high %v8426_v18, %v8426_v18  ;;  %v4300_v0 = vrot.slane %v8432_v24, %v8060_v12  ;;  %v9367_v43 = vcombine.high %v8432_v24, %v8432_v24 }
 0x199   : > { %v3909_v50 = vcombine.low %v3901_v22, %v3908_v32  ;;  %v3927_v60 = vcombine.low %v2886_v6, %v2887_v1  ;;  %v3941_v54 = vrot.slane %v3925_v26, %v8060_v12  ;;  %v3979_v44 = vrot.slane %v2888_v9, %v8060_v12 }
 0x19a   : > { %v4314_v4 = vrot.slane %v9367_v43, %v8060_v12  ;;  %v3948_v59 = vrot.slane %v3926_v49, %v8060_v12  ;;  %v4778_v13 = vunpack.i.h.s16 %v8696_v42  ;;  %v4780_v41 = vunpack.i.h.s16 %v4277_v35 }
 0x19b   : > { %v4792_v18 = vunpack.i.h.s16 %v8475_v51  ;;  %v4095_v28 = vpack.c.bf16 %v3923_v47, %v3909_v50  ;;  %v3955_v8 = vrot.slane %v3927_v60, %v8060_v12  ;;  %v3956_v40 = vcombine.low %v3934_v29, %v3941_v54 }
 0x19c   : > { %v3986_v24 = vrot.slane %v3979_v44, %v8060_v12  ;;  %v7750_v36 = vpack.i.b16 %v4277_v35, %v4778_v13  ;;  %v9368_v52 = vrot.slane %v8376_v17, %v8060_v12  ;;  %v9369_v22 = vrot.slane %v8410_v30, %v8060_v12 }
 0x19d   : > { %v7753_v42 = vpack.i.b16 %v8478_v31, %v4792_v18  ;;  %v4605_v47 = vcombine.high %v8759_v33, %v8759_v33  ;;  %v8793_v46 = vrot.slane %v4095_v28, %v8060_v12  ;;  %v3957_v29 = vcombine.low %v3948_v59, %v3955_v8 }
 0x19e   : > { %v7751_v56 = vpack.i.b16 %v9368_v52, %v4780_v41  ;;  %v7752_v14 = vpack.i.b16 %v8475_v51, %v9369_v22  ;;  %v7740_v6 = vpack.c.bf16 %v3986_v24, %v3986_v24  ;;  %v5061_v1 = vcombine.low %v4300_v0, %v4314_v4 }
 0x19f   : > { %v7783_v9 = vcombine.high %v4300_v0, %v4314_v4  ;;  %v8796_v26 = vrot.slane %v7739_v37, %v8060_v12  ;;  %v2560_v30 = vcombine.high %v8755_v19, %v8755_v19  ;;  %v3964_v49 = vrot.slane %v3956_v40, %v8060_v12 }
 0x1a0   : > { %v5060_v32 = vcombine.low %v7750_v36, %v7751_v56  ;;  %v5063_v17 = vcombine.low %v7752_v14, %v7753_v42  ;;  %v3971_v35 = vrot.slane %v3957_v29, %v8060_v12  ;;  %v5077_v50 = vrot.slane %v5061_v1, %v8060_v12 }
 0x1a1   : > { %v5084_v60 = vrot.slane %v7783_v9, %v8060_v12  ;;  %v4644_v0 = vcombine.high %v8793_v46, %v8793_v46  ;;  %v8810_v37 = vrot.slane %v8793_v46, %v8060_v12  ;;  %v2561_v4 = vcombine.high %v8417_v58, %v8417_v58 }
 0x1a2   : > { %v5070_v43 = vrot.slane %v5060_v32, %v8060_v12  ;;  %v5091_v54 = vrot.slane %v5063_v17, %v8060_v12  ;;  %v3972_v19 = vcombine.low %v3964_v49, %v3971_v35  ;;  %v8815_v44 = vrot.slane %v7740_v6, %v8060_v12 }
 0x1a3   : > { %v2568_v41 = vrot.slane %v8417_v58, %v8060_v12  ;;  %v2575_v28 = vrot.slane %v2561_v4, %v8060_v12  ;;  %v2889_v8 = vmax.f32 %v2560_v30, 0.0  ;;  %v4346_v40 = vrot.slane %v8456_v38, %v8060_v12 }
 0x1a4   : > { %v5092_v59 = vcombine.low %v5070_v43, %v5077_v50  ;;  %v5093_v13 = vcombine.low %v5084_v60, %v5091_v54  ;;  %v4096_v18 = vpack.c.bf16 %v3986_v24, %v3972_v19  ;;  %v4354_v24 = vcombine.high %v8475_v51, %v8475_v51 }
 0x1a5   : > { %v2576_v56 = vcombine.high %v2568_v41, %v2568_v41  ;;  %v2584_v22 = vrot.slane %v2568_v41, %v8060_v12  ;;  %v2577_v42 = vcombine.high %v2575_v28, %v2575_v28  ;;  %v2591_v58 = vrot.slane %v2575_v28, %v8060_v12 }
 0x1a6   : > { %v5100_v36 = vrot.slane %v5092_v59, %v8060_v12  ;;  %v5107_v52 = vrot.slane %v5093_v13, %v8060_v12  ;;  %v8826_v14 = vrot.slane %v4096_v18, %v8060_v12  ;;  %v4355_v17 = vcombine.high %v8478_v31, %v8478_v31 }
 0x1a7   : > { %v2598_v29 = vrot.slane %v2576_v56, %v8060_v12  ;;  %v2606_v38 = vcombine.high %v2584_v22, %v2584_v22  ;;  %v2890_v6 = vmax.f32 %v2584_v22, 0.0  ;;  %v2605_v32 = vrot.slane %v2577_v42, %v8060_v12 }
 0x1a8   : > { %v5108_v46 = vcombine.low %v5100_v36, %v5107_v52  ;;  %v2607_v1 = vcombine.high %v2591_v58, %v2591_v58  ;;  %v2894_v9 = vmax.f32 %v2591_v58, 0.0  ;;  %v4378_v54 = vrot.slane %v8484_v62, %v8060_v12 }
 0x1a9   : > { %v2608_v30 = vcombine.high %v2598_v29, %v2598_v29  ;;  %v2891_v49 = vmax.f32 %v2598_v29, 0.0  ;;  %v2892_v35 = vmax.f32 %v2606_v38, 0.0  ;;  %v3987_v43 = vcombine.low %v2889_v8, %v2890_v6 }
 0x1aa   : > { %7906 = vmatmul.mubr.msk.bf16.gmra.mxu1 %vm1577_vm1, %v5108_v46  ;;  %v2609_v50 = vcombine.high %v2605_v32, %v2605_v32  ;;  %v2895_v51 = vmax.f32 %v2605_v32, 0.0  ;;  %v2896_v60 = vmax.f32 %v2607_v1, 0.0  ;;  %v9370_v13 = vcombine.high %v8484_v62, %v8484_v62 }
 0x1ab   : > { %7909 = vmatprep.mubr.msk.bf16.mxu1 %vm7993_vm0, %v7992_v2  ;;  %v2893_v19 = vmax.f32 %v2608_v30, 0.0  ;;  %v3988_v4 = vcombine.low %v2891_v49, %v2892_v35  ;;  %v3997_v59 = vrot.slane %v3987_v43, %v8060_v12  ;;  %v4393_v8 = vcombine.high %v4378_v54, %v4378_v54 }
 0x1ac   : > { %v4392_v41 = vrot.slane %v9370_v13, %v8060_v12  ;;  %v2897_v18 = vmax.f32 %v2609_v50, 0.0  ;;  %v3990_v28 = vcombine.low %v2895_v51, %v2896_v60  ;;  %v4794_v36 = vunpack.i.h.s16 %v8478_v31 }
 0x1ad   : > { %v3989_v52 = vcombine.low %v2893_v19, %v2894_v9  ;;  %v4004_v56 = vrot.slane %v3988_v4, %v8060_v12  ;;  %v4796_v42 = vunpack.i.h.s16 %v4354_v24  ;;  %v4798_v29 = vunpack.i.h.s16 %v4355_v17 }
 0x1ae   : > { %v4394_v22 = vcombine.high %v4392_v41, %v4392_v41  ;;  %v4018_v58 = vrot.slane %v3990_v28, %v8060_v12  ;;  %v4042_v46 = vrot.slane %v2897_v18, %v8060_v12  ;;  %v7754_v38 = vpack.i.b16 %v4354_v24, %v4794_v36 }
 0x1af   : > { %v4011_v6 = vrot.slane %v3989_v52, %v8060_v12  ;;  %v4019_v62 = vcombine.low %v3997_v59, %v4004_v56  ;;  %v7755_v32 = vpack.i.b16 %v4355_v17, %v4796_v42  ;;  %v9371_v1 = vrot.slane %v8463_v27, %v8060_v12 }
 0x1b0   : > { %v8855_v9 = vrot.slane %v4644_v0, %v8060_v12  ;;  %v4683_v30 = vcombine.high %v8826_v14, %v8826_v14  ;;  %v7756_v49 = vpack.i.b16 %v4346_v40, %v4798_v29  ;;  %v5111_v35 = vcombine.low %v4392_v41, %v4393_v8 }
 0x1b1   : > { %v7757_v31 = vpack.i.b16 %v8533_v39, %v9371_v1  ;;  %v4020_v43 = vcombine.low %v4011_v6, %v4018_v58  ;;  %v8860_v24 = vrot.slane %v4042_v46, %v8060_v12  ;;  %v5109_v50 = vcombine.low %v7754_v38, %v7755_v32 }
 0x1b2   : > { %v4027_v17 = vrot.slane %v4019_v62, %v8060_v12  ;;  %v5110_v60 = vcombine.low %v7756_v49, %v4378_v54  ;;  %v4424_v27 = vrot.slane %v8508_v25, %v8060_v12  ;;  %v9372_v0 = vcombine.high %v8514_v48, %v8514_v48 }
 0x1b3   : > { %v5112_v51 = vcombine.low %v4394_v22, %v7757_v31  ;;  %v4034_v40 = vrot.slane %v4020_v43, %v8060_v12  ;;  %v5133_v4 = vrot.slane %v5111_v35, %v8060_v12  ;;  %v4432_v13 = vcombine.high %v8533_v39, %v8533_v39 }
 0x1b4   : > { %v4431_v19 = vrot.slane %v9372_v0, %v8060_v12  ;;  %v5119_v41 = vrot.slane %v5109_v50, %v8060_v12  ;;  %v5126_v54 = vrot.slane %v5110_v60, %v8060_v12  ;;  %v9373_v25 = vcombine.high %v8537_v11, %v8537_v11 }
 0x1b5   : > { %v5140_v59 = vrot.slane %v5112_v51, %v8060_v12  ;;  %v4035_v28 = vcombine.low %v4027_v17, %v4034_v40  ;;  %v4810_v36 = vunpack.i.h.s16 %v8533_v39  ;;  %v4814_v22 = vunpack.i.h.s16 %v4432_v13 }
 0x1b6   : > { %v4433_v18 = vcombine.high %v4431_v19, %v4431_v19  ;;  %v4470_v48 = vrot.slane %v9373_v25, %v8060_v12  ;;  %v4812_v52 = vunpack.i.h.s16 %v4431_v19  ;;  %v5141_v56 = vcombine.low %v5119_v41, %v5126_v54 }
 0x1b7   : > { %v5142_v8 = vcombine.low %v5133_v4, %v5140_v59  ;;  %v4097_v46 = vpack.c.bf16 %v8860_v24, %v4035_v28  ;;  %v7758_v38 = vpack.i.b16 %v4431_v19, %v4810_v36  ;;  %v4510_v35 = vcombine.high %v8607_v61, %v8607_v61 }
 0x1b8   : > { %v4816_v42 = vunpack.i.h.s16 %v4433_v18  ;;  %v5160_v58 = vcombine.low %v8558_v45, %v4470_v48  ;;  %v7759_v6 = vpack.i.b16 %v4432_v13, %v4812_v52  ;;  %v5149_v62 = vrot.slane %v5141_v56, %v8060_v12 }
 0x1b9   : > { %v5156_v29 = vrot.slane %v5142_v8, %v8060_v12  ;;  %v7760_v11 = vpack.i.b16 %v4433_v18, %v4814_v22  ;;  %v7784_v1 = vcombine.high %v8558_v45, %v4470_v48  ;;  %v8887_v39 = vrot.slane %v4097_v46, %v8060_v12 }
 0x1ba   : > { %v7761_v32 = vpack.i.b16 %v4424_v27, %v4816_v42  ;;  %v5158_v31 = vcombine.low %v7758_v38, %v7759_v6  ;;  %v5182_v49 = vrot.slane %v5160_v58, %v8060_v12  ;;  %v4511_v17 = vcombine.high %v8611_v20, %v8611_v20 }
 0x1bb   : > { %v5157_v43 = vcombine.low %v5149_v62, %v5156_v29  ;;  %v5189_v51 = vrot.slane %v7784_v1, %v8060_v12  ;;  %v7741_v60 = vpack.c.bf16 %v8860_v24, %v8860_v24  ;;  %v4722_v45 = vcombine.high %v8887_v39, %v8887_v39 }
 0x1bc   : > { %v5159_v50 = vcombine.low %v7760_v11, %v7761_v32  ;;  %v5168_v27 = vrot.slane %v5158_v31, %v8060_v12  ;;  %v4548_v0 = vrot.slane %v4527_v10, %v8060_v12  ;;  %v4549_v4 = vcombine.high %v8664_v34, %v8664_v34 }
 0x1bd   : > { %7910 = vmatmul.mubr.msk.bf16.gmra.mxu1 %vm1577_vm1, %v5157_v43  ;;  %v5191_v40 = vcombine.low %v5182_v49, %v5189_v51  ;;  %v4828_v59 = vunpack.i.h.s16 %v8607_v61  ;;  %v4830_v13 = vunpack.i.h.s16 %v8611_v20  ;;  %v4832_v41 = vunpack.i.h.s16 %v4510_v35 }
 0x1be   : > { %v5175_v19 = vrot.slane %v5159_v50, %v8060_v12  ;;  %7913 = vmatprep.mubr.msk.bf16.mxu1 %vm7993_vm0, %v7992_v2  ;;  %v4834_v54 = vunpack.i.h.s16 %v4511_v17  ;;  %v9374_v3 = vrot.slane %v8541_v53, %v8060_v12  ;;  %v5210_v28 = vcombine.low %v4548_v0, %v4549_v4 }
 0x1bf   : > { %v5205_v25 = vrot.slane %v5191_v40, %v8060_v12  ;;  %v7763_v48 = vpack.i.b16 %v8611_v20, %v4828_v59  ;;  %v8920_v8 = vrot.slane %v8887_v39, %v8060_v12  ;;  %v7764_v36 = vpack.i.b16 %v4510_v35, %v4830_v13 }
 0x1c0   : > { %v7762_v10 = vpack.i.b16 %v8607_v61, %v9374_v3  ;;  %v5190_v18 = vcombine.low %v5168_v27, %v5175_v19  ;;  %v7765_v52 = vpack.i.b16 %v4511_v17, %v4832_v41  ;;  %v9375_v56 = vrot.slane %v8574_v57, %v8060_v12 }
 0x1c1   : > { %v5238_v61 = vrot.slane %v5210_v28, %v8060_v12  ;;  %v4588_v58 = vcombine.high %v8712_v23, %v8712_v23  ;;  %v4589_v29 = vcombine.high %v8721_v5, %v8721_v5  ;;  %v4612_v38 = vrot.slane %v8759_v33, %v8060_v12 }
 0x1c2   : > { %v7766_v22 = vpack.i.b16 %v9375_v56, %v4834_v54  ;;  %v5198_v53 = vrot.slane %v5190_v18, %v8060_v12  ;;  %v5207_v42 = vcombine.low %v7762_v10, %v7763_v48  ;;  %v5208_v20 = vcombine.low %v7764_v36, %v7765_v52 }
 0x1c3   : > { %v4626_v62 = vrot.slane %v4605_v47, %v8060_v12  ;;  %v4846_v11 = vunpack.i.h.s16 %v8712_v23  ;;  %v4848_v1 = vunpack.i.h.s16 %v8721_v5  ;;  %v4850_v31 = vunpack.i.h.s16 %v4588_v58 }
 0x1c4   : > { %v5209_v46 = vcombine.low %v7766_v22, %v8664_v34  ;;  %v5206_v6 = vcombine.low %v5198_v53, %v5205_v25  ;;  %v5217_v57 = vrot.slane %v5207_v42, %v8060_v12  ;;  %v5224_v32 = vrot.slane %v5208_v20, %v8060_v12 }
 0x1c5   : > { %v4550_v49 = vcombine.high %v4548_v0, %v4548_v0  ;;  %v4852_v35 = vunpack.i.h.s16 %v4589_v29  ;;  %v7767_v43 = vpack.i.b16 %v8712_v23, %v4541_v21  ;;  %v5259_v33 = vcombine.low %v4612_v38, %v4626_v62 }
 0x1c6   : > { %v5231_v34 = vrot.slane %v5209_v46, %v8060_v12  ;;  %7914 = vmatmul.mubr.msk.bf16.gmra.mxu1 %vm1577_vm1, %v5206_v6  ;;  %v5239_v47 = vcombine.low %v5217_v57, %v5224_v32  ;;  %v7768_v51 = vpack.i.b16 %v8721_v5, %v4846_v11  ;;  %v7769_v17 = vpack.i.b16 %v4588_v58, %v4848_v1 }
 0x1c7   : > { %7917 = vmatprep.mubr.msk.bf16.mxu1 %vm7993_vm0, %v7992_v2  ;;  %v7770_v27 = vpack.i.b16 %v4589_v29, %v4850_v31  ;;  %v7771_v0 = vpack.i.b16 %v4580_v16, %v4852_v35  ;;  %v5256_v19 = vcombine.low %v4550_v49, %v7767_v43  ;;  %v5287_v40 = vrot.slane %v5259_v33, %v8060_v12 }
 0x1c8   : > { %v5240_v50 = vcombine.low %v5231_v34, %v5238_v61  ;;  %v5247_v7 = vrot.slane %v5239_v47, %v8060_v12  ;;  %v5257_v23 = vcombine.low %v7768_v51, %v7769_v17  ;;  %v4666_v4 = vcombine.high %v8810_v37, %v8810_v37 }
 0x1c9   : > { %v5258_v59 = vcombine.low %v7770_v27, %v7771_v0  ;;  %v5266_v5 = vrot.slane %v5256_v19, %v8060_v12  ;;  %v4658_v13 = vrot.slane %v8796_v26, %v8060_v12  ;;  %v4667_v63 = vcombine.high %v8855_v9, %v8855_v9 }
 0x1ca   : > { %v5254_v21 = vrot.slane %v5240_v50, %v8060_v12  ;;  %v5273_v41 = vrot.slane %v5257_v23, %v8060_v12  ;;  %v4864_v54 = vunpack.i.h.s16 %v8810_v37  ;;  %v4866_v3 = vunpack.i.h.s16 %v8855_v9 }
 0x1cb   : > { %v5280_v10 = vrot.slane %v5258_v59, %v8060_v12  ;;  %v4868_v18 = vunpack.i.h.s16 %v4666_v4  ;;  %v4870_v25 = vunpack.i.h.s16 %v4667_v63  ;;  %v7772_v48 = vpack.i.b16 %v8810_v37, %v4619_v15 }
 0x1cc   : > { %v5255_v16 = vcombine.low %v5247_v7, %v5254_v21  ;;  %v5288_v26 = vcombine.low %v5266_v5, %v5273_v41  ;;  %v7773_v28 = vpack.i.b16 %v8855_v9, %v4864_v54  ;;  %v7774_v36 = vpack.i.b16 %v4666_v4, %v4866_v3 }
 0x1cd   : > { %v7785_v52 = vcombine.high %v4612_v38, %v4626_v62  ;;  %v5289_v56 = vcombine.low %v5280_v10, %v5287_v40  ;;  %v4690_v22 = vrot.slane %v8826_v14, %v8060_v12  ;;  %v7775_v53 = vpack.i.b16 %v4667_v63, %v4868_v18 }
 0x1ce   : > { %7918 = vmatmul.mubr.msk.bf16.gmra.mxu1 %vm1577_vm1, %v5255_v16  ;;  %v7776_v42 = vpack.i.b16 %v4658_v13, %v4870_v25  ;;  %v4697_v61 = vrot.slane %v8815_v44, %v8060_v12  ;;  %v4721_v55 = vrot.slane %v7741_v60, %v8060_v12  ;;  %v5306_v15 = vcombine.low %v7772_v48, %v7773_v28 }
 0x1cf   : > { %7921 = vmatprep.mubr.msk.bf16.mxu1 %vm7993_vm0, %v7992_v2  ;;  %v4704_v37 = vrot.slane %v4683_v30, %v8060_v12  ;;  %v5296_v9 = vrot.slane %v5288_v26, %v8060_v12  ;;  %v5303_v58 = vrot.slane %v5289_v56, %v8060_v12  ;;  %v5307_v20 = vcombine.low %v7774_v36, %v7775_v53 }
 0x1d0   : > { %v5308_v44 = vcombine.low %v7776_v42, %v4690_v22  ;;  %v5315_v46 = vrot.slane %v7785_v52, %v8060_v12  ;;  %v5322_v24 = vrot.slane %v5306_v15, %v8060_v12  ;;  %v4743_v60 = vrot.slane %v4722_v45, %v8060_v12 }
 0x1d1   : > { %v4744_v29 = vcombine.high %v8920_v8, %v8920_v8  ;;  %v5329_v14 = vrot.slane %v5307_v20, %v8060_v12  ;;  %v4705_v38 = vcombine.high %v4690_v22, %v4690_v22  ;;  %v4882_v6 = vunpack.i.h.s16 %v8920_v8 }
 0x1d2   : > { %v5336_v30 = vrot.slane %v5308_v44, %v8060_v12  ;;  %v4706_v57 = vcombine.high %v4704_v37, %v4704_v37  ;;  %v4745_v62 = vcombine.high %v4743_v60, %v4743_v60  ;;  %v4884_v11 = vunpack.i.h.s16 %v4743_v60 }
 0x1d3   : > { %v4886_v32 = vunpack.i.h.s16 %v4744_v29  ;;  %v5304_v34 = vcombine.low %v5296_v9, %v5303_v58  ;;  %v5337_v1 = vcombine.low %v5315_v46, %v5322_v24  ;;  %v7777_v39 = vpack.i.b16 %v8920_v8, %v4697_v61 }
 0x1d4   : > { %v5338_v31 = vcombine.low %v5329_v14, %v5336_v30  ;;  %v4736_v45 = vrot.slane %v4721_v55, %v8060_v12  ;;  %v4888_v49 = vunpack.i.h.s16 %v4745_v62  ;;  %v7778_v35 = vpack.i.b16 %v4743_v60, %v4882_v6 }
 0x1d5   : > { %v7779_v43 = vpack.i.b16 %v4744_v29, %v4884_v11  ;;  %v5354_v47 = vcombine.low %v4704_v37, %v4705_v38  ;;  %v5355_v50 = vcombine.low %v4706_v57, %v7777_v39  ;;  %v7780_v51 = vpack.i.b16 %v4745_v62, %v4886_v32 }
 0x1d6   : > { %7922 = vmatmul.mubr.msk.bf16.gmra.mxu1 %vm1577_vm1, %v5304_v34  ;;  %v5352_v33 = vrot.slane %v5338_v31, %v8060_v12  ;;  %v7781_v17 = vpack.i.b16 %v4736_v45, %v4888_v49  ;;  %v5345_v0 = vrot.slane %v5337_v1, %v8060_v12 }
 0x1d7   : > { %7925 = vmatprep.mubr.msk.bf16.mxu1 %vm7993_vm0, %v7992_v2  ;;  %v5356_v27 = vcombine.low %v7778_v35, %v7779_v43  ;;  %v5371_v8 = vrot.slane %v5355_v50, %v8060_v12  ;;  %v5364_v7 = vrot.slane %v5354_v47, %v8060_v12 }
 0x1d8   : > { %v5357_v19 = vcombine.low %v7780_v51, %v7781_v17  ;;  %v5353_v40 = vcombine.low %v5345_v0, %v5352_v33 }
 0x1d9   : > { %v5378_v21 = vrot.slane %v5356_v27, %v8060_v12  ;;  %v5386_v4 = vcombine.low %v5364_v7, %v5371_v8 }
 0x1da   : > { %v5385_v23 = vrot.slane %v5357_v19, %v8060_v12 }
 0x1db   : > { %v5394_v13 = vrot.slane %v5386_v4, %v8060_v12 }
 0x1dc   : > { %v5387_v59 = vcombine.low %v5378_v21, %v5385_v23 }
 0x1de   : > { %7926 = vmatmul.mubr.msk.bf16.gmra.mxu1 %vm1577_vm1, %v5353_v40  ;;  %v5401_v5 = vrot.slane %v5387_v59, %v8060_v12 }
 0x1df   : > { %7929 = vmatprep.mubr.msk.bf16.mxu1 %vm7993_vm0, %v7992_v2 }
 0x1e0   : > { %v5402_v63 = vcombine.low %v5394_v13, %v5401_v5 }
 0x1e6   : > { %7930 = vmatmul.mubr.msk.bf16.gmra.mxu1 %vm1577_vm1, %v5402_v63 }
 0x234   : > { %v5488_v16 = vpop.f32.mrf.mxu1 }
 0x235   : > { %v5577_v41 = vcombine.high %v5488_v16, %v5488_v16  ;;  %v5584_v54 = vrot.slane %v5488_v16, %v8060_v12 }
 0x236   : > { %v7899_v3 = vpop.f32.mrf.mxu1 }
 0x237   : > { %v5591_v10 = vrot.slane %v5577_v41, %v8060_v12  ;;  %v5592_v18 = vcombine.high %v5584_v54, %v5584_v54  ;;  %v5600_v2 = vrot.slane %v5584_v54, %v8060_v12 }
 0x238   : > { %v5491_v25 = vpop.f32.mrf.mxu1 }
 0x239   : > { %v5593_v48 = vcombine.high %v5591_v10, %v5591_v10  ;;  %v5614_v26 = vrot.slane %v5592_v18, %v8060_v12  ;;  %v5633_v28 = vrot.slane %v5491_v25, %v8060_v12  ;;  %v5607_v52 = vrot.slane %v5591_v10, %v8060_v12 }
 0x23a   : > { %v7900_v36 = vpop.f32.mrf.mxu1  ;;  %v5626_v24 = vcombine.high %v5491_v25, %v5491_v25 }
 0x23b   : > { %v5621_v56 = vrot.slane %v5593_v48, %v8060_v12  ;;  %v6459_v22 = vcombine.low %v5600_v2, %v5614_v26  ;;  %v7799_v53 = vcombine.high %v5600_v2, %v5614_v26  ;;  %v5649_v42 = vrot.slane %v5633_v28, %v8060_v12 }
 0x23c   : > { %v5641_v29 = vcombine.high %v5633_v28, %v5633_v28  ;;  %v5640_v6 = vrot.slane %v5626_v24, %v8060_v12 }
 0x23d   : > { %v6461_v61 = vcombine.low %v5607_v52, %v5621_v56  ;;  %v7800_v55 = vcombine.high %v5607_v52, %v5621_v56  ;;  %v6469_v15 = vrot.slane %v6459_v22, %v8060_v12  ;;  %v6476_v37 = vrot.slane %v7799_v53, %v8060_v12 }
 0x23e   : > { %v6514_v44 = vrot.slane %v5649_v42, %v8060_v12  ;;  %v5663_v57 = vrot.slane %v5641_v29, %v8060_v12  ;;  %v5642_v62 = vcombine.high %v5640_v6, %v5640_v6  ;;  %v5656_v11 = vrot.slane %v5640_v6, %v8060_v12 }
 0x23f   : > { %v6483_v9 = vrot.slane %v6461_v61, %v8060_v12  ;;  %v6490_v58 = vrot.slane %v7800_v55, %v8060_v12  ;;  %v6491_v20 = vcombine.low %v6469_v15, %v6476_v37  ;;  %v5671_v34 = vcombine.high %v5649_v42, %v5649_v42 }
 0x240   : > { %v6521_v60 = vrot.slane %v6514_v44, %v8060_v12  ;;  %v5673_v32 = vcombine.high %v5663_v57, %v5663_v57  ;;  %v5670_v1 = vrot.slane %v5642_v62, %v8060_v12  ;;  %v5672_v31 = vcombine.high %v5656_v11, %v5656_v11 }
 0x241   : > { %v6492_v46 = vcombine.low %v6483_v9, %v6490_v58  ;;  %v6499_v14 = vrot.slane %v6491_v20, %v8060_v12  ;;  %v6522_v45 = vcombine.low %v5663_v57, %v5671_v34 }
 0x242   : > { %7501 = vst.msk [vmem:[%s9035_s16 + $0x8] sm:$0x1] %vm7500_vm2, %v6521_v60  ;;  %v6523_v39 = vcombine.low %v5673_v32, %v5656_v11  ;;  %v5674_v35 = vcombine.high %v5670_v1, %v5670_v1  ;;  %v6524_v47 = vcombine.low %v5670_v1, %v5672_v31 }
 0x243   : > { %v6506_v30 = vrot.slane %v6492_v46, %v8060_v12  ;;  %v6532_v8 = vrot.slane %v6522_v45, %v8060_v12 }
 0x244   : > { %v6539_v50 = vrot.slane %v6523_v39, %v8060_v12  ;;  %v6546_v4 = vrot.slane %v6524_v47, %v8060_v12 }
 0x245   : > { %v6507_v38 = vcombine.low %v6499_v14, %v6506_v30 }
 0x246   : > { %v6554_v23 = vcombine.low %v6532_v8, %v6539_v50 }
 0x247   : > { %7499 = vst.msk [vmem:[%s9035_s16] sm:$0xff] %vm1577_vm1, %v6507_v38 }
 0x248   : > { %v6562_v36 = vrot.slane %v6554_v23, %v8060_v12 }
 0x250   : > { %v5496_v49 = vpop.f32.mrf.mxu1 }
 0x251   : > { %v5675_v43 = vcombine.high %v5496_v49, %v5496_v49  ;;  %v5682_v33 = vrot.slane %v5496_v49, %v8060_v12 }
 0x252   : > { %v7903_v51 = vpop.f32.mrf.mxu1 }
 0x253   : > { %v5689_v17 = vrot.slane %v5675_v43, %v8060_v12  ;;  %v5690_v27 = vcombine.high %v5682_v33, %v5682_v33  ;;  %v5698_v0 = vrot.slane %v5682_v33, %v8060_v12 }
 0x254   : > { %v5499_v19 = vpop.f32.mrf.mxu1 }
 0x255   : > { %v5691_v40 = vcombine.high %v5689_v17, %v5689_v17  ;;  %v5712_v7 = vrot.slane %v5690_v27, %v8060_v12  ;;  %v6525_v21 = vcombine.low %v5674_v35, %v5698_v0  ;;  %v5731_v59 = vrot.slane %v5499_v19, %v8060_v12 }
 0x256   : > { %v7904_v5 = vpop.f32.mrf.mxu1  ;;  %v5705_v13 = vrot.slane %v5689_v17, %v8060_v12  ;;  %v5724_v3 = vcombine.high %v5499_v19, %v5499_v19 }
 0x257   : > { %v5719_v63 = vrot.slane %v5691_v40, %v8060_v12  ;;  %v6553_v16 = vrot.slane %v6525_v21, %v8060_v12  ;;  %v6577_v41 = vrot.slane %v5712_v7, %v8060_v12  ;;  %v7801_v54 = vcombine.high %v5698_v0, %v5712_v7 }
 0x258   : > { %v5739_v10 = vcombine.high %v5731_v59, %v5731_v59  ;;  %v5747_v18 = vrot.slane %v5731_v59, %v8060_v12  ;;  %v5738_v42 = vrot.slane %v5724_v3, %v8060_v12 }
 0x259   : > { %v6555_v25 = vcombine.low %v6546_v4, %v6553_v16  ;;  %v6584_v48 = vrot.slane %v6577_v41, %v8060_v12  ;;  %v6586_v2 = vcombine.low %v5705_v13, %v5719_v63  ;;  %v7802_v26 = vcombine.high %v5705_v13, %v5719_v63 }
 0x25a   : > { %v5761_v28 = vrot.slane %v5739_v10, %v8060_v12  ;;  %v5769_v22 = vcombine.high %v5747_v18, %v5747_v18  ;;  %v6595_v53 = vrot.slane %v7801_v54, %v8060_v12  ;;  %v5740_v44 = vcombine.high %v5738_v42, %v5738_v42 }
 0x25b   : > { %v6569_v52 = vrot.slane %v6555_v25, %v8060_v12  ;;  %v6602_v56 = vrot.slane %v6586_v2, %v8060_v12  ;;  %7503 = vst.msk [vmem:[%s9035_s16 + $0x18] sm:$0x1] %vm7500_vm2, %v6584_v48  ;;  %v6609_v37 = vrot.slane %v7802_v26, %v8060_v12  ;;  %v5754_v46 = vrot.slane %v5738_v42, %v8060_v12 }
 0x25c   : > { %v6588_v61 = vcombine.low %v5747_v18, %v5761_v28  ;;  %v6640_v15 = vrot.slane %v5769_v22, %v8060_v12  ;;  %v5768_v14 = vrot.slane %v5740_v44, %v8060_v12  ;;  %v5771_v38 = vcombine.high %v5761_v28, %v5761_v28 }
 0x25d   : > { %v6570_v55 = vcombine.low %v6562_v36, %v6569_v52  ;;  %v6617_v9 = vcombine.low %v6595_v53, %v6602_v56  ;;  %v5770_v30 = vcombine.high %v5754_v46, %v5754_v46 }
 0x25e   : > { %v6616_v58 = vrot.slane %v6588_v61, %v8060_v12  ;;  %v6647_v20 = vrot.slane %v6640_v15, %v8060_v12  ;;  %v6648_v57 = vcombine.low %v5771_v38, %v5754_v46  ;;  %v5772_v1 = vcombine.high %v5768_v14, %v5768_v14 }
 0x25f   : > { %7502 = vst.msk [vmem:[%s9035_s16 + $0x10] sm:$0xff] %vm1577_vm1, %v6570_v55  ;;  %v6625_v60 = vrot.slane %v6617_v9, %v8060_v12  ;;  %v6649_v62 = vcombine.low %v5768_v14, %v5770_v30 }
 0x260   : > { %v6618_v24 = vcombine.low %v6609_v37, %v6616_v58  ;;  %7505 = vst.msk [vmem:[%s9035_s16 + $0x28] sm:$0x1] %vm7500_vm2, %v6647_v20  ;;  %v6658_v35 = vrot.slane %v6648_v57, %v8060_v12 }
 0x261   : > { %v6665_v43 = vrot.slane %v6649_v62, %v8060_v12 }
 0x262   : > { %v6632_v29 = vrot.slane %v6618_v24, %v8060_v12 }
 0x263   : > { %v6680_v23 = vcombine.low %v6658_v35, %v6665_v43 }
 0x264   : > { %v6633_v6 = vcombine.low %v6625_v60, %v6632_v29 }
 0x265   : > { %v6688_v36 = vrot.slane %v6680_v23, %v8060_v12 }
 0x266   : > { %7504 = vst.msk [vmem:[%s9035_s16 + $0x20] sm:$0xff] %vm1577_vm1, %v6633_v6 }
 0x26a   : > { %v5504_v11 = vpop.f32.mrf.mxu1 }
 0x26b   : > { %v5773_v32 = vcombine.high %v5504_v11, %v5504_v11  ;;  %v5780_v34 = vrot.slane %v5504_v11, %v8060_v12 }
 0x26c   : > { %v7907_v31 = vpop.f32.mrf.mxu1 }
 0x26d   : > { %v5787_v39 = vrot.slane %v5773_v32, %v8060_v12  ;;  %v5788_v45 = vcombine.high %v5780_v34, %v5780_v34  ;;  %v5796_v49 = vrot.slane %v5780_v34, %v8060_v12 }
 0x26e   : > { %v5507_v33 = vpop.f32.mrf.mxu1 }
 0x26f   : > { %v5789_v47 = vcombine.high %v5787_v39, %v5787_v39  ;;  %v5810_v50 = vrot.slane %v5788_v45, %v8060_v12  ;;  %v5818_v51 = vcombine.high %v5796_v49, %v5796_v49  ;;  %v6650_v17 = vcombine.low %v5772_v1, %v5796_v49 }
 0x270   : > { %v5822_v27 = vcombine.high %v5507_v33, %v5507_v33  ;;  %v5829_v0 = vrot.slane %v5507_v33, %v8060_v12  ;;  %v7908_v8 = vpop.f32.mrf.mxu1  ;;  %v5803_v19 = vrot.slane %v5787_v39, %v8060_v12 }
 0x271   : > { %v5817_v40 = vrot.slane %v5789_v47, %v8060_v12  ;;  %v5820_v7 = vcombine.high %v5810_v50, %v5810_v50  ;;  %v6651_v21 = vcombine.low %v5810_v50, %v5818_v51  ;;  %v6672_v4 = vrot.slane %v6650_v17, %v8060_v12 }
 0x272   : > { %v5836_v59 = vrot.slane %v5822_v27, %v8060_v12  ;;  %v5837_v5 = vcombine.high %v5829_v0, %v5829_v0  ;;  %v5845_v54 = vrot.slane %v5829_v0, %v8060_v12 }
 0x273   : > { %v6679_v13 = vrot.slane %v6651_v21, %v8060_v12  ;;  %v6703_v63 = vrot.slane %v5820_v7, %v8060_v12  ;;  %v6711_v16 = vcombine.low %v5803_v19, %v5817_v40  ;;  %v7803_v41 = vcombine.high %v5803_v19, %v5817_v40 }
 0x274   : > { %v5852_v3 = vrot.slane %v5836_v59, %v8060_v12  ;;  %v5859_v10 = vrot.slane %v5837_v5, %v8060_v12  ;;  %v5838_v56 = vcombine.high %v5836_v59, %v5836_v59 }
 0x275   : > { %v6681_v18 = vcombine.low %v6672_v4, %v6679_v13  ;;  %v6710_v25 = vrot.slane %v6703_v63, %v8060_v12  ;;  %v6721_v48 = vrot.slane %v6711_v16, %v8060_v12  ;;  %v6728_v2 = vrot.slane %v7803_v41, %v8060_v12 }
 0x276   : > { %v6713_v26 = vcombine.low %v5845_v54, %v5859_v10  ;;  %v7804_v28 = vcombine.high %v5845_v54, %v5859_v10  ;;  %v6766_v22 = vrot.slane %v5852_v3, %v8060_v12  ;;  %v5866_v9 = vrot.slane %v5838_v56, %v8060_v12 }
 0x277   : > { %v6695_v52 = vrot.slane %v6681_v18, %v8060_v12  ;;  %7507 = vst.msk [vmem:[%s9035_s16 + $0x38] sm:$0x1] %vm7500_vm2, %v6710_v25  ;;  %v6743_v53 = vcombine.low %v6721_v48, %v6728_v2  ;;  %v5868_v58 = vcombine.high %v5852_v3, %v5852_v3 }
 0x278   : > { %v6735_v42 = vrot.slane %v6713_v26, %v8060_v12  ;;  %v6742_v61 = vrot.slane %v7804_v28, %v8060_v12  ;;  %v6773_v15 = vrot.slane %v6766_v22, %v8060_v12  ;;  %v5870_v30 = vcombine.high %v5866_v9, %v5866_v9 }
 0x279   : > { %v6696_v55 = vcombine.low %v6688_v36, %v6695_v52  ;;  %v6751_v20 = vrot.slane %v6743_v53, %v8060_v12  ;;  %v6774_v14 = vcombine.low %v5866_v9, %v5868_v58 }
 0x27a   : > { %v6744_v37 = vcombine.low %v6735_v42, %v6742_v61  ;;  %7509 = vst.msk [vmem:[%s9035_s16 + $0x48] sm:$0x1] %vm7500_vm2, %v6773_v15 }
 0x27b   : > { %7506 = vst.msk [vmem:[%s9035_s16 + $0x30] sm:$0xff] %vm1577_vm1, %v6696_v55  ;;  %v6784_v39 = vrot.slane %v6774_v14, %v8060_v12 }
 0x27c   : > { %v6758_v44 = vrot.slane %v6744_v37, %v8060_v12 }
 0x27d   : > { %v5512_v46 = vpop.f32.mrf.mxu1 }
 0x27e   : > { %v6759_v24 = vcombine.low %v6751_v20, %v6758_v44  ;;  %v5871_v60 = vcombine.high %v5512_v46, %v5512_v46  ;;  %v5878_v29 = vrot.slane %v5512_v46, %v8060_v12 }
 0x27f   : > { %v7911_v38 = vpop.f32.mrf.mxu1 }
 0x280   : > { %7508 = vst.msk [vmem:[%s9035_s16 + $0x40] sm:$0xff] %vm1577_vm1, %v6759_v24  ;;  %v5885_v6 = vrot.slane %v5871_v60, %v8060_v12  ;;  %v5886_v57 = vcombine.high %v5878_v29, %v5878_v29  ;;  %v5894_v62 = vrot.slane %v5878_v29, %v8060_v12 }
 0x281   : > { %v5515_v11 = vpop.f32.mrf.mxu1 }
 0x282   : > { %v5887_v32 = vcombine.high %v5885_v6, %v5885_v6  ;;  %v5908_v34 = vrot.slane %v5886_v57, %v8060_v12  ;;  %v5916_v1 = vcombine.high %v5894_v62, %v5894_v62  ;;  %v6775_v31 = vcombine.low %v5870_v30, %v5894_v62 }
 0x283   : > { %v5920_v45 = vcombine.high %v5515_v11, %v5515_v11  ;;  %v5927_v49 = vrot.slane %v5515_v11, %v8060_v12  ;;  %v7912_v35 = vpop.f32.mrf.mxu1  ;;  %v5901_v43 = vrot.slane %v5885_v6, %v8060_v12 }
 0x284   : > { %v5915_v33 = vrot.slane %v5887_v32, %v8060_v12  ;;  %v5918_v47 = vcombine.high %v5908_v34, %v5908_v34  ;;  %v6776_v50 = vcombine.low %v5908_v34, %v5916_v1  ;;  %v6791_v51 = vrot.slane %v6775_v31, %v8060_v12 }
 0x285   : > { %v5934_v17 = vrot.slane %v5920_v45, %v8060_v12  ;;  %v5935_v27 = vcombine.high %v5927_v49, %v5927_v49  ;;  %v5943_v0 = vrot.slane %v5927_v49, %v8060_v12 }
 0x286   : > { %v5520_v8 = vpop.f32.mrf.mxu1  ;;  %v6777_v19 = vcombine.low %v5918_v47, %v5901_v43  ;;  %v6798_v40 = vrot.slane %v6776_v50, %v8060_v12  ;;  %v6829_v7 = vrot.slane %v5915_v33, %v8060_v12  ;;  %v7805_v21 = vcombine.high %v5901_v43, %v5915_v33 }
 0x287   : > { %v6806_v23 = vcombine.low %v6784_v39, %v6791_v51  ;;  %v5936_v4 = vcombine.high %v5934_v17, %v5934_v17  ;;  %v5950_v59 = vrot.slane %v5934_v17, %v8060_v12  ;;  %v5957_v5 = vrot.slane %v5935_v27, %v8060_v12 }
 0x288   : > { %v7915_v13 = vpop.f32.mrf.mxu1  ;;  %v6805_v63 = vrot.slane %v6777_v19, %v8060_v12  ;;  %v6836_v16 = vrot.slane %v6829_v7, %v8060_v12  ;;  %v6847_v41 = vrot.slane %v7805_v21, %v8060_v12  ;;  %v5969_v54 = vcombine.high %v5520_v8, %v5520_v8 }
 0x289   : > { %v6814_v3 = vrot.slane %v6806_v23, %v8060_v12  ;;  %v5964_v10 = vrot.slane %v5936_v4, %v8060_v12  ;;  %v5966_v18 = vcombine.high %v5950_v59, %v5950_v59  ;;  %v6838_v25 = vcombine.low %v5943_v0, %v5957_v5 }
 0x28a   : > { %v5523_v48 = vpop.f32.mrf.mxu1  ;;  %v6807_v2 = vcombine.low %v6798_v40, %v6805_v63  ;;  %7511 = vst.msk [vmem:[%s9035_s16 + $0x58] sm:$0x1] %vm7500_vm2, %v6836_v16  ;;  %v7806_v26 = vcombine.high %v5943_v0, %v5957_v5  ;;  %v5976_v28 = vrot.slane %v5520_v8, %v8060_v12  ;;  %v5983_v36 = vrot.slane %v5969_v54, %v8060_v12 }
 0x28b   : > { %v6840_v52 = vcombine.low %v5950_v59, %v5964_v10  ;;  %v6854_v56 = vrot.slane %v6838_v25, %v8060_v12  ;;  %v6892_v22 = vrot.slane %v5966_v18, %v8060_v12  ;;  %v5968_v53 = vcombine.high %v5964_v10, %v5964_v10 }
 0x28c   : > { %v7916_v42 = vpop.f32.mrf.mxu1  ;;  %v6821_v61 = vrot.slane %v6807_v2, %v8060_v12  ;;  %v6861_v55 = vrot.slane %v7806_v26, %v8060_v12  ;;  %v5984_v15 = vcombine.high %v5976_v28, %v5976_v28  ;;  %v5985_v37 = vcombine.high %v5983_v36, %v5983_v36 }
 0x28d   : > { %v6868_v9 = vrot.slane %v6840_v52, %v8060_v12  ;;  %v6869_v58 = vcombine.low %v6847_v41, %v6854_v56  ;;  %v6899_v20 = vrot.slane %v6892_v22, %v8060_v12  ;;  %v5992_v44 = vrot.slane %v5976_v28, %v8060_v12 }
 0x28e   : > { %v5528_v46 = vpop.f32.mrf.mxu1  ;;  %v6822_v24 = vcombine.low %v6814_v3, %v6821_v61  ;;  %v5999_v60 = vrot.slane %v5983_v36, %v8060_v12  ;;  %v6006_v29 = vrot.slane %v5984_v15, %v8060_v12  ;;  %v6013_v14 = vrot.slane %v5985_v37, %v8060_v12 }
 0x28f   : > { %v6870_v30 = vcombine.low %v6861_v55, %v6868_v9  ;;  %v6877_v38 = vrot.slane %v6869_v58, %v8060_v12  ;;  %7513 = vst.msk [vmem:[%s9035_s16 + $0x68] sm:$0x1] %vm7500_vm2, %v6899_v20  ;;  %v6014_v6 = vcombine.high %v5992_v44, %v5992_v44  ;;  %v6900_v57 = vcombine.low %v5968_v53, %v5992_v44 }
 0x290   : > { %v7919_v62 = vpop.f32.mrf.mxu1  ;;  %7510 = vst.msk [vmem:[%s9035_s16 + $0x50] sm:$0xff] %vm1577_vm1, %v6822_v24  ;;  %v6015_v11 = vcombine.high %v5999_v60, %v5999_v60  ;;  %v6016_v32 = vcombine.high %v6006_v29, %v6006_v29  ;;  %v6017_v34 = vcombine.high %v6013_v14, %v6013_v14  ;;  %v6018_v1 = vcombine.high %v5523_v48, %v5523_v48 }
 0x291   : > { %v6884_v31 = vrot.slane %v6870_v30, %v8060_v12  ;;  %v6901_v39 = vcombine.low %v6006_v29, %v6014_v6  ;;  %v6910_v45 = vrot.slane %v6900_v57, %v8060_v12  ;;  %v6025_v49 = vrot.slane %v5523_v48, %v8060_v12 }
 0x292   : > { %v5531_v35 = vpop.f32.mrf.mxu1  ;;  %v6902_v43 = vcombine.low %v6016_v32, %v5999_v60  ;;  %v6903_v33 = vcombine.low %v6013_v14, %v6015_v11  ;;  %v6955_v47 = vrot.slane %v6017_v34, %v8060_v12  ;;  %v6032_v50 = vrot.slane %v6018_v1, %v8060_v12 }
 0x293   : > { %v6885_v51 = vcombine.low %v6877_v38, %v6884_v31  ;;  %v6917_v17 = vrot.slane %v6901_v39, %v8060_v12  ;;  %v6033_v27 = vcombine.high %v6025_v49, %v6025_v49  ;;  %v6041_v0 = vrot.slane %v6025_v49, %v8060_v12 }
 0x294   : > { %v7920_v8 = vpop.f32.mrf.mxu1  ;;  %v6924_v19 = vrot.slane %v6902_v43, %v8060_v12  ;;  %v6931_v40 = vrot.slane %v6903_v33, %v8060_v12  ;;  %v6962_v7 = vrot.slane %v6955_v47, %v8060_v12  ;;  %v6034_v21 = vcombine.high %v6032_v50, %v6032_v50 }
 0x295   : > { %7512 = vst.msk [vmem:[%s9035_s16 + $0x60] sm:$0xff] %vm1577_vm1, %v6885_v51  ;;  %v6932_v23 = vcombine.low %v6910_v45, %v6917_v17  ;;  %v6048_v4 = vrot.slane %v6032_v50, %v8060_v12  ;;  %v6055_v59 = vrot.slane %v6033_v27, %v8060_v12  ;;  %v6067_v5 = vcombine.high %v5528_v46, %v5528_v46 }
 0x296   : > { %v9173_v13 = vpop.f32.mrf.mxu1  ;;  %v6933_v63 = vcombine.low %v6924_v19, %v6931_v40  ;;  %7515 = vst.msk [vmem:[%s9035_s16 + $0x78] sm:$0x1] %vm7500_vm2, %v6962_v7  ;;  %v6062_v16 = vrot.slane %v6034_v21, %v8060_v12  ;;  %v6074_v41 = vrot.slane %v5528_v46, %v8060_v12  ;;  %v6116_v54 = vcombine.high %v5531_v35, %v5531_v35 }
 0x297   : > { %v6940_v3 = vrot.slane %v6932_v23, %v8060_v12  ;;  %v6963_v10 = vcombine.low %v6041_v0, %v6055_v59  ;;  %v7807_v18 = vcombine.high %v6041_v0, %v6055_v59  ;;  %v6081_v25 = vrot.slane %v6067_v5, %v8060_v12 }
 0x298   : > { %v7923_v48 = vpop.f32.mrf.mxu1  ;;  %v6947_v2 = vrot.slane %v6933_v63, %v8060_v12  ;;  %v6965_v26 = vcombine.low %v6048_v4, %v6062_v16  ;;  %v7808_v28 = vcombine.high %v6048_v4, %v6062_v16  ;;  %v6082_v36 = vcombine.high %v6074_v41, %v6074_v41 }
 0x299   : > { %v6973_v52 = vrot.slane %v6963_v10, %v8060_v12  ;;  %v6980_v56 = vrot.slane %v7807_v18, %v8060_v12  ;;  %v6083_v22 = vcombine.high %v6081_v25, %v6081_v25  ;;  %v6090_v53 = vrot.slane %v6074_v41, %v8060_v12 }
 0x29a   : > { %v9185_v42 = vpop.f32.mrf.mxu1  ;;  %v6948_v61 = vcombine.low %v6940_v3, %v6947_v2  ;;  %v6987_v55 = vrot.slane %v6965_v26, %v8060_v12  ;;  %v6994_v15 = vrot.slane %v7808_v28, %v8060_v12  ;;  %v6097_v37 = vrot.slane %v6081_v25, %v8060_v12 }
 0x29b   : > { %v6995_v9 = vcombine.low %v6973_v52, %v6980_v56  ;;  %v6104_v58 = vrot.slane %v6082_v36, %v8060_v12  ;;  %v6111_v20 = vrot.slane %v6083_v22, %v8060_v12  ;;  %v6112_v44 = vcombine.high %v6090_v53, %v6090_v53 }
 0x29c   : > { %v7924_v46 = vpop.f32.mrf.mxu1  ;;  %7514 = vst.msk [vmem:[%s9035_s16 + $0x70] sm:$0xff] %vm1577_vm1, %v6948_v61  ;;  %v6996_v24 = vcombine.low %v6987_v55, %v6994_v15  ;;  %v6113_v60 = vcombine.high %v6097_v37, %v6097_v37  ;;  %v7018_v29 = vrot.slane %v6090_v53, %v8060_v12  ;;  %v6123_v14 = vrot.slane %v5531_v35, %v8060_v12 }
 0x29d   : > { %v7003_v30 = vrot.slane %v6995_v9, %v8060_v12  ;;  %v6114_v38 = vcombine.high %v6104_v58, %v6104_v58  ;;  %v7026_v6 = vcombine.low %v6104_v58, %v6112_v44  ;;  %v6115_v57 = vcombine.high %v6111_v20, %v6111_v20 }
 0x29e   : > { %v9197_v62 = vpop.f32.mrf.mxu1  ;;  %v7010_v11 = vrot.slane %v6996_v24, %v8060_v12  ;;  %v7025_v32 = vrot.slane %v7018_v29, %v8060_v12  ;;  %v7028_v34 = vcombine.low %v6111_v20, %v6113_v60  ;;  %v6130_v1 = vrot.slane %v6116_v54, %v8060_v12 }
 0x29f   : > { %v7027_v31 = vcombine.low %v6114_v38, %v6097_v37  ;;  %v7036_v39 = vrot.slane %v7026_v6, %v8060_v12  ;;  %v6131_v45 = vcombine.high %v6123_v14, %v6123_v14  ;;  %v6139_v49 = vrot.slane %v6123_v14, %v8060_v12 }
 0x2a0   : > { %v7927_v35 = vpop.f32.mrf.mxu1  ;;  %v7011_v43 = vcombine.low %v7003_v30, %v7010_v11  ;;  %7517 = vst.msk [vmem:[%s9035_s16 + $0x88] sm:$0x1] %vm7500_vm2, %v7025_v32  ;;  %v6132_v33 = vcombine.high %v6130_v1, %v6130_v1  ;;  %v6146_v47 = vrot.slane %v6130_v1, %v8060_v12  ;;  %v7050_v50 = vrot.slane %v7028_v34, %v8060_v12 }
 0x2a1   : > { %v7043_v51 = vrot.slane %v7027_v31, %v8060_v12  ;;  %v6153_v17 = vrot.slane %v6131_v45, %v8060_v12  ;;  %v7029_v27 = vcombine.low %v6115_v57, %v6139_v49  ;;  %v6165_v0 = vcombine.high %v9173_v13, %v9173_v13 }
 0x2a2   : > { %v9212_v8 = vpop.f32.mrf.mxu1  ;;  %7516 = vst.msk [vmem:[%s9035_s16 + $0x80] sm:$0xff] %vm1577_vm1, %v7011_v43  ;;  %v6160_v19 = vrot.slane %v6132_v33, %v8060_v12  ;;  %v6172_v40 = vrot.slane %v9173_v13, %v8060_v12  ;;  %v6214_v7 = vcombine.high %v9185_v42, %v9185_v42  ;;  %v6221_v21 = vrot.slane %v9185_v42, %v8060_v12 }
 0x2a3   : > { %v7058_v23 = vcombine.low %v7036_v39, %v7043_v51  ;;  %v7057_v4 = vrot.slane %v7029_v27, %v8060_v12  ;;  %v7081_v59 = vrot.slane %v6153_v17, %v8060_v12  ;;  %v7809_v5 = vcombine.high %v6139_v49, %v6153_v17 }
 0x2a4   : > { %v7928_v63 = vpop.f32.mrf.mxu1  ;;  %v7090_v16 = vcombine.low %v6146_v47, %v6160_v19  ;;  %v7810_v41 = vcombine.high %v6146_v47, %v6160_v19  ;;  %v6179_v54 = vrot.slane %v6165_v0, %v8060_v12  ;;  %v6180_v3 = vcombine.high %v6172_v40, %v6172_v40 }
 0x2a5   : > { %v7066_v13 = vrot.slane %v7058_v23, %v8060_v12  ;;  %v7059_v10 = vcombine.low %v7050_v50, %v7057_v4  ;;  %v7088_v18 = vrot.slane %v7081_v59, %v8060_v12  ;;  %v7099_v25 = vrot.slane %v7809_v5, %v8060_v12 }
 0x2a6   : > { %v9229_v48 = vpop.f32.mrf.mxu1  ;;  %v7106_v2 = vrot.slane %v7090_v16, %v8060_v12  ;;  %v7113_v26 = vrot.slane %v7810_v41, %v8060_v12  ;;  %v6181_v28 = vcombine.high %v6179_v54, %v6179_v54  ;;  %v6188_v36 = vrot.slane %v6172_v40, %v8060_v12 }
 0x2a7   : > { %v7073_v52 = vrot.slane %v7059_v10, %v8060_v12  ;;  %7519 = vst.msk [vmem:[%s9035_s16 + $0x98] sm:$0x1] %vm7500_vm2, %v7088_v18  ;;  %v6195_v56 = vrot.slane %v6179_v54, %v8060_v12  ;;  %v6202_v22 = vrot.slane %v6180_v3, %v8060_v12  ;;  %v6228_v53 = vrot.slane %v6214_v7, %v8060_v12 }
 0x2a8   : > { %v7931_v42 = vpop.f32.mrf.mxu1  ;;  %v7121_v61 = vcombine.low %v7099_v25, %v7106_v2  ;;  %v6209_v55 = vrot.slane %v6181_v28, %v8060_v12  ;;  %v6210_v15 = vcombine.high %v6188_v36, %v6188_v36  ;;  %v6229_v37 = vcombine.high %v6221_v21, %v6221_v21 }
 0x2a9   : > { %v7074_v9 = vcombine.low %v7066_v13, %v7073_v52  ;;  %v6211_v58 = vcombine.high %v6195_v56, %v6195_v56  ;;  %v6212_v20 = vcombine.high %v6202_v22, %v6202_v22  ;;  %v7092_v44 = vcombine.low %v6188_v36, %v6202_v22 }
 0x2aa   : > { %v9241_v46 = vpop.f32.mrf.mxu1  ;;  %v7129_v24 = vrot.slane %v7121_v61, %v8060_v12  ;;  %v7144_v60 = vrot.slane %v6210_v15, %v8060_v12  ;;  %v6213_v29 = vcombine.high %v6209_v55, %v6209_v55  ;;  %v6230_v14 = vcombine.high %v6228_v53, %v6228_v53 }
 0x2ab   : > { %7518 = vst.msk [vmem:[%s9035_s16 + $0x90] sm:$0xff] %vm1577_vm1, %v7074_v9  ;;  %v7120_v30 = vrot.slane %v7092_v44, %v8060_v12  ;;  %v7152_v38 = vcombine.low %v6212_v20, %v6195_v56  ;;  %v7153_v6 = vcombine.low %v6209_v55, %v6211_v58  ;;  %v6237_v57 = vrot.slane %v6221_v21, %v8060_v12 }
 0x2ac   : > { %v7932_v11 = vpop.f32.mrf.mxu1  ;;  %v7151_v32 = vrot.slane %v7144_v60, %v8060_v12  ;;  %v6244_v34 = vrot.slane %v6228_v53, %v8060_v12  ;;  %v6251_v1 = vrot.slane %v6229_v37, %v8060_v12  ;;  %v6258_v31 = vrot.slane %v6230_v14, %v8060_v12 }
 0x2ad   : > { %v7122_v39 = vcombine.low %v7113_v26, %v7120_v30  ;;  %v7162_v45 = vrot.slane %v7152_v38, %v8060_v12  ;;  %v7169_v49 = vrot.slane %v7153_v6, %v8060_v12  ;;  %v6259_v35 = vcombine.high %v6237_v57, %v6237_v57 }
 0x2ae   : > { %7521 = vst.msk [vmem:[%s9035_s16 + $0xa8] sm:$0x1] %vm7500_vm2, %v7151_v32  ;;  %v6261_v43 = vcombine.high %v6251_v1, %v6251_v1  ;;  %v7154_v33 = vcombine.low %v6213_v29, %v6237_v57  ;;  %v7215_v47 = vcombine.low %v6244_v34, %v6258_v31  ;;  %v7811_v50 = vcombine.high %v6244_v34, %v6258_v31 }
 0x2af   : > { %v7136_v51 = vrot.slane %v7122_v39, %v8060_v12  ;;  %v7184_v17 = vcombine.low %v7162_v45, %v7169_v49  ;;  %v7155_v27 = vcombine.low %v6251_v1, %v6259_v35  ;;  %v6263_v0 = vcombine.high %v9197_v62, %v9197_v62 }
 0x2b0   : > { %v7176_v19 = vrot.slane %v7154_v33, %v8060_v12  ;;  %v7207_v40 = vrot.slane %v6261_v43, %v8060_v12  ;;  %v7225_v7 = vrot.slane %v7215_v47, %v8060_v12  ;;  %v7232_v21 = vrot.slane %v7811_v50, %v8060_v12 }
 0x2b1   : > { %v7137_v23 = vcombine.low %v7129_v24, %v7136_v51  ;;  %v7183_v4 = vrot.slane %v7155_v27, %v8060_v12  ;;  %v6270_v59 = vrot.slane %v9197_v62, %v8060_v12  ;;  %v7192_v5 = vrot.slane %v7184_v17, %v8060_v12 }
 0x2b2   : > { %v7214_v63 = vrot.slane %v7207_v40, %v8060_v12  ;;  %v6277_v16 = vrot.slane %v6263_v0, %v8060_v12  ;;  %v6312_v41 = vcombine.high %v9212_v8, %v9212_v8  ;;  %v7247_v3 = vcombine.low %v7225_v7, %v7232_v21 }
 0x2b3   : > { %7520 = vst.msk [vmem:[%s9035_s16 + $0xa0] sm:$0xff] %vm1577_vm1, %v7137_v23  ;;  %v7185_v54 = vcombine.low %v7176_v19, %v7183_v4  ;;  %v6278_v13 = vcombine.high %v6270_v59, %v6270_v59  ;;  %v6319_v10 = vrot.slane %v9212_v8, %v8060_v12  ;;  %v6286_v18 = vrot.slane %v6270_v59, %v8060_v12 }
 0x2b4   : > { %7523 = vst.msk [vmem:[%s9035_s16 + $0xb8] sm:$0x1] %vm7500_vm2, %v7214_v63  ;;  %v6279_v62 = vcombine.high %v6277_v16, %v6277_v16  ;;  %v6293_v25 = vrot.slane %v6277_v16, %v8060_v12  ;;  %v6326_v2 = vrot.slane %v6312_v41, %v8060_v12  ;;  %v6361_v6 = vcombine.high %v9229_v48, %v9229_v48 }
 0x2b5   : > { %v7199_v26 = vrot.slane %v7185_v54, %v8060_v12  ;;  %v6300_v28 = vrot.slane %v6278_v13, %v8060_v12  ;;  %v6327_v36 = vcombine.high %v6319_v10, %v6319_v10  ;;  %v6335_v52 = vrot.slane %v6319_v10, %v8060_v12 }
 0x2b6   : > { %v6307_v56 = vrot.slane %v6279_v62, %v8060_v12  ;;  %v6309_v8 = vcombine.high %v6293_v25, %v6293_v25  ;;  %v7270_v22 = vrot.slane %v6293_v25, %v8060_v12  ;;  %v6328_v53 = vcombine.high %v6326_v2, %v6326_v2 }
 0x2b7   : > { %v7200_v42 = vcombine.low %v7192_v5, %v7199_v26  ;;  %v7217_v61 = vcombine.low %v6286_v18, %v6300_v28  ;;  %v7812_v55 = vcombine.high %v6286_v18, %v6300_v28  ;;  %v6342_v15 = vrot.slane %v6326_v2, %v8060_v12 }
 0x2b8   : > { %v7277_v37 = vrot.slane %v7270_v22, %v8060_v12  ;;  %v7278_v9 = vcombine.low %v6307_v56, %v6309_v8  ;;  %v6311_v58 = vcombine.high %v6307_v56, %v6307_v56  ;;  %v6349_v20 = vrot.slane %v6327_v36, %v8060_v12 }
 0x2b9   : > { %7522 = vst.msk [vmem:[%s9035_s16 + $0xb0] sm:$0xff] %vm1577_vm1, %v7200_v42  ;;  %v7239_v44 = vrot.slane %v7217_v61, %v8060_v12  ;;  %v7246_v24 = vrot.slane %v7812_v55, %v8060_v12  ;;  %v6356_v60 = vrot.slane %v6328_v53, %v8060_v12  ;;  %v6357_v29 = vcombine.high %v6335_v52, %v6335_v52 }
 0x2ba   : > { %7525 = vst.msk [vmem:[%s9035_s16 + $0xc8] sm:$0x1] %vm7500_vm2, %v7277_v37  ;;  %v6359_v14 = vcombine.high %v6349_v20, %v6349_v20  ;;  %v7279_v30 = vcombine.low %v6311_v58, %v6335_v52  ;;  %v7288_v38 = vrot.slane %v7278_v9, %v8060_v12  ;;  %v6368_v39 = vrot.slane %v9229_v48, %v8060_v12 }
 0x2bb   : > { %v7248_v57 = vcombine.low %v7239_v44, %v7246_v24  ;;  %v7280_v11 = vcombine.low %v6349_v20, %v6357_v29  ;;  %v7333_v32 = vrot.slane %v6356_v60, %v8060_v12  ;;  %v7813_v34 = vcombine.high %v6342_v15, %v6356_v60 }
 0x2bc   : > { %v7281_v1 = vcombine.low %v6359_v14, %v6342_v15  ;;  %v7295_v31 = vrot.slane %v7279_v30, %v8060_v12  ;;  %v6375_v45 = vrot.slane %v6361_v6, %v8060_v12  ;;  %v7255_v49 = vrot.slane %v7247_v3, %v8060_v12 }
 0x2bd   : > { %v7262_v35 = vrot.slane %v7248_v57, %v8060_v12  ;;  %v7302_v43 = vrot.slane %v7280_v11, %v8060_v12  ;;  %v7340_v33 = vrot.slane %v7333_v32, %v8060_v12  ;;  %v6376_v51 = vcombine.high %v6368_v39, %v6368_v39 }
 0x2be   : > { %v7309_v47 = vrot.slane %v7281_v1, %v8060_v12  ;;  %v7310_v50 = vcombine.low %v7288_v38, %v7295_v31  ;;  %v6377_v17 = vcombine.high %v6375_v45, %v6375_v45  ;;  %v7351_v0 = vrot.slane %v7813_v34, %v8060_v12 }
 0x2bf   : > { %v7263_v27 = vcombine.low %v7255_v49, %v7262_v35  ;;  %7527 = vst.msk [vmem:[%s9035_s16 + $0xd8] sm:$0x1] %vm7500_vm2, %v7340_v33  ;;  %v6391_v48 = vrot.slane %v6375_v45, %v8060_v12  ;;  %v6410_v19 = vcombine.high %v9241_v46, %v9241_v46  ;;  %v6384_v7 = vrot.slane %v6368_v39, %v8060_v12 }
 0x2c0   : > { %v7311_v40 = vcombine.low %v7302_v43, %v7309_v47  ;;  %v6398_v21 = vrot.slane %v6376_v51, %v8060_v12  ;;  %v6405_v23 = vrot.slane %v6377_v17, %v8060_v12  ;;  %v7318_v4 = vrot.slane %v7310_v50, %v8060_v12 }
 0x2c1   : > { %7524 = vst.msk [vmem:[%s9035_s16 + $0xc0] sm:$0xff] %vm1577_vm1, %v7263_v27  ;;  %v6407_v59 = vcombine.high %v6391_v48, %v6391_v48  ;;  %v6417_v5 = vrot.slane %v9241_v46, %v8060_v12  ;;  %v6424_v63 = vrot.slane %v6410_v19, %v8060_v12 }
 0x2c2   : > { %v7325_v16 = vrot.slane %v7311_v40, %v8060_v12  ;;  %v7342_v41 = vcombine.low %v6384_v7, %v6398_v21  ;;  %v7814_v54 = vcombine.high %v6384_v7, %v6398_v21  ;;  %v7344_v3 = vcombine.low %v6391_v48, %v6405_v23 }
 0x2c3   : > { %v7396_v13 = vrot.slane %v6407_v59, %v8060_v12  ;;  %v6409_v10 = vcombine.high %v6405_v23, %v6405_v23  ;;  %v6425_v62 = vcombine.high %v6417_v5, %v6417_v5  ;;  %v6426_v18 = vcombine.high %v6424_v63, %v6424_v63 }
 0x2c4   : > { %v7326_v25 = vcombine.low %v7318_v4, %v7325_v16  ;;  %v7358_v2 = vrot.slane %v7342_v41, %v8060_v12  ;;  %v7365_v26 = vrot.slane %v7814_v54, %v8060_v12  ;;  %v7372_v46 = vrot.slane %v7344_v3, %v8060_v12 }
 0x2c5   : > { %v7403_v28 = vrot.slane %v7396_v13, %v8060_v12  ;;  %v6433_v36 = vrot.slane %v6417_v5, %v8060_v12  ;;  %v6440_v52 = vrot.slane %v6424_v63, %v8060_v12  ;;  %v6447_v56 = vrot.slane %v6425_v62, %v8060_v12 }
 0x2c6   : > { %7526 = vst.msk [vmem:[%s9035_s16 + $0xd0] sm:$0xff] %vm1577_vm1, %v7326_v25  ;;  %v7373_v8 = vcombine.low %v7351_v0, %v7358_v2  ;;  %v7374_v22 = vcombine.low %v7365_v26, %v7372_v46  ;;  %v6454_v53 = vrot.slane %v6426_v18, %v8060_v12 }
 0x2c7   : > { %7529 = vst.msk [vmem:[%s9035_s16 + $0xe8] sm:$0x1] %vm7500_vm2, %v7403_v28  ;;  %v6455_v42 = vcombine.high %v6433_v36, %v6433_v36  ;;  %v6456_v61 = vcombine.high %v6440_v52, %v6440_v52  ;;  %v6457_v55 = vcombine.high %v6447_v56, %v6447_v56  ;;  %v7404_v15 = vcombine.low %v6409_v10, %v6433_v36 }
 0x2c8   : > { %v7381_v37 = vrot.slane %v7373_v8, %v8060_v12  ;;  %v7388_v9 = vrot.slane %v7374_v22, %v8060_v12  ;;  %v6458_v58 = vcombine.high %v6454_v53, %v6454_v53 }
 0x2c9   : > { %v7405_v20 = vcombine.low %v6447_v56, %v6455_v42  ;;  %v7406_v44 = vcombine.low %v6457_v55, %v6440_v52  ;;  %v7407_v24 = vcombine.low %v6454_v53, %v6456_v61  ;;  %v7414_v60 = vrot.slane %v7404_v15, %v8060_v12 }
 0x2ca   : > { %v7389_v29 = vcombine.low %v7381_v37, %v7388_v9  ;;  %v7459_v14 = vrot.slane %v6458_v58, %v8060_v12 }
 0x2cb   : > { %v7421_v30 = vrot.slane %v7405_v20, %v8060_v12  ;;  %v7428_v38 = vrot.slane %v7406_v44, %v8060_v12  ;;  %v7435_v6 = vrot.slane %v7407_v24, %v8060_v12 }
 0x2cc   : > { %7528 = vst.msk [vmem:[%s9035_s16 + $0xe0] sm:$0xff] %vm1577_vm1, %v7389_v29  ;;  %v7466_v57 = vrot.slane %v7459_v14, %v8060_v12 }
 0x2cd   : > { %v7436_v11 = vcombine.low %v7414_v60, %v7421_v30  ;;  %v7437_v32 = vcombine.low %v7428_v38, %v7435_v6 }
 0x2ce   : > { %7531 = vst.msk [vmem:[%s9035_s16 + $0xf8] sm:$0x1] %vm7500_vm2, %v7466_v57 }
 0x2cf   : > { %v7444_v34 = vrot.slane %v7436_v11, %v8060_v12  ;;  %v7451_v1 = vrot.slane %v7437_v32, %v8060_v12 }
 0x2d1   : > { %v7452_v31 = vcombine.low %v7444_v34, %v7451_v1 }
 0x2d3   : > { %7530 = vst.msk [vmem:[%s9035_s16 + $0xf0] sm:$0xff] %vm1577_vm1, %v7452_v31 }
 0x2d4 PF: > { %s13_s14 = sadd.s32 1, %s7990_s14   ;;  %s9376_s12 = smov %s7986_s13 }
 0x2d5   : > { %p10_p5 = scmp.ge.s32.totalorder %s13_s14, 4   ;;  %s9377_s13 = smov %s9379_s15 }
 0x2d7   :  { %12 = sbr.rel (!%p10_p5) target bundleno = 2 (0x2), region = 62 }

// kernel: optce_deblur_forward.7
= control target key start
LH: loop header
LB: loop body
LE: loop exit
PB: predicated region body
PF: predicated region fallthrough
CT: control target
= control target key end

     0   :  { %s3266_s21 = smov 0   ;;  %s4849_s0 = inlined_call_operand.vmem [shape: f32[2,16,16,32], index: 0, kind: input, shape index: {}]   ;;  %s4850_s1 = inlined_call_operand.vmem [shape: f32[2,16,16,32], index: 1, kind: input, shape index: {}]   ;;  %s4851_s2 = inlined_call_operand.vmem [shape: f32[2,16,16,32], index: 2, kind: input, shape index: {}]   ;;  %s4852_s3 = inlined_call_operand.vmem [shape: f32[2,16,16,3], index: 3, kind: input, shape index: {}]   ;;  %s4853_s4 = inlined_call_operand.vmem [shape: bf16[288,3], index: 4, kind: input, shape index: {}]   ;;  %s4854_s5 = inlined_call_operand.vmem [shape: f32[1,3], index: 5, kind: input, shape index: {}]   ;;  %s4855_s6 = inlined_call_operand.vmem [shape: f32[2,16,16,3], index: 6, kind: output, shape index: {}]  }
   0x1 LB: > { %s2470_s22 = sadd.s32 4294967295, %s3225_s21   ;;  %p2474_p0 = scmp.ge.s32.totalorder %s3225_s21, 1  ;;  %s3225_s21 = sphi %s3266_s21, %s16_s21  }
   0x2   : > { %p242_p1 = scmp.lt.s32.totalorder %s3225_s21, 3 }
   0x4   : > { %p243_p2 = pnand %p2474_p0, %p242_p1 }
   0x6   : > { %246 = sbr.rel (%p243_p2) target bundleno = 558 (0x22e), region = 44 }
   0xb   : > { %vm575_vm0 = vcmask 1040384   ;;  %vm741_vm1 = vcmask 1046528   ;;  %v3227_v0 = vmov 0.0   ;;  %vm918_vm2 = vcmask 1045504   ;;  %p287_p3 = scmp.lt.s32.totalorder %s2470_s22, 1  ;;  %s3228_s9 = smov 32  }
   0xc   : > { %v3274_v1 = vrot.slane %v3227_v0, 7  ;;  %s3229_s10 = smov 64   ;;  %s3230_s16 = smov 96   ;;  %vm1555_vm3 = vcmask 261120   ;;  %vm1588_vm4 = vcmask 523264   ;;  %vm1621_vm5 = vcmask 785408  }
   0xd   : > { %s5113_s22 = smov (!%p287_p3, %s2470_s22), 1  ;;  %vm2346_vm6 = vcmask 23552  }
   0xe   : > { %v3278_v2 = vsel %vm575_vm0, 0.0, %v3274_v1  ;;  %v692_v3 = vsel %vm575_vm0, %v3274_v1, 0.0  ;;  %v743_v4 = vrot.slane %v3274_v1, 1  ;;  %v920_v5 = vrot.slane %v3274_v1, 2  ;;  %s3286_s23 = sshll.u32 %s5113_s22, 8 }
   0xf   : > { %v742_v6 = vrot.slane %v3278_v2, 1  ;;  %v745_v7 = vrot.slane %v692_v3, 1  ;;  %v919_v8 = vrot.slane %v3278_v2, 2  ;;  %v922_v9 = vrot.slane %v692_v3, 2  ;;  %s3300_s26 = scalar_lea.vmem %s4849_s0, %s3286_s23  ;;  %s3306_s29 = scalar_lea.vmem %s4850_s1, %s3286_s23 }
  0x10   : > { %s3318_s8 = scalar_lea.vmem %s4851_s2, %s3286_s23  ;;  %v315_v17 = vld [vmem:[%s3300_s26 + $0x10] sm:$0xff]  ;;  %v316_v18 = vld [vmem:[%s3300_s26 + $0x18] sm:$0xff]  ;;  %v313_v25 = vld [vmem:[%s3300_s26] sm:$0xff]  ;;  %s4675_s11 = scalar_lea.vmem %s4852_s3, %s3286_s23 }
  0x11   : > { %v744_v10 = vsel %vm741_vm1, %v742_v6, %v743_v4  ;;  %v746_v11 = vsel %vm741_vm1, %v743_v4, %v745_v7  ;;  %v3291_v12 = vsel %vm918_vm2, %v919_v8, %v920_v5  ;;  %v3294_v13 = vsel %vm918_vm2, %v920_v5, %v922_v9  ;;  %v347_v19 = vld [vmem:[%s3306_s29 + $0x10] sm:$0xff]  ;;  %v348_v20 = vld [vmem:[%s3306_s29 + $0x18] sm:$0xff]  ;;  %v314_v26 = vld [vmem:[%s3300_s26 + $0x8] sm:$0xff] }
  0x12   : > { %4944 = vst [vmem:[#allocation2_spill] sm:$0xff] %v3291_v12  ;;  %4945 = vst [vmem:[#allocation3_spill] sm:$0xff] %v3294_v13  ;;  %v3308_v14 = vpack.i.bf16 %v746_v11, %v744_v10  ;;  %v2726_v15 = vpack.i.bf16 %v3294_v13, %v3291_v12  ;;  %v379_v21 = vadd.f32 %v347_v19, %v315_v17  ;;  %v411_v22 = vld [vmem:[%s3318_s8 + $0x10] sm:$0xff]  ;;  %v412_v23 = vld [vmem:[%s3318_s8 + $0x18] sm:$0xff] }
  0x13   : > { %v380_v24 = vadd.f32 %v348_v20, %v316_v18  ;;  %v345_v28 = vld [vmem:[%s3306_s29] sm:$0xff]  ;;  %v346_v29 = vld [vmem:[%s3306_s29 + $0x8] sm:$0xff]  ;;  %v319_v46 = vld [vmem:[%s3300_s26 + $0x30] sm:$0xff] }
  0x14   : > { %4946 = vst [vmem:[#allocation4_spill] sm:$0xff] %v3308_v14  ;;  %2722 = vrot.lane.b32.xlu0 %v3308_v14, %s3228_s9  ;;  %2727 = vrot.lane.b32.xlu1 %v2726_v15, %s3229_s10  ;;  %v443_v27 = vadd.f32 %v411_v22, %v379_v21  ;;  %v409_v30 = vld [vmem:[%s3318_s8] sm:$0xff]  ;;  %v377_v32 = vadd.f32 %v345_v28, %v313_v25  ;;  %v410_v34 = vld [vmem:[%s3318_s8 + $0x8] sm:$0xff] }
  0x15   : > { %v444_v31 = vadd.f32 %v412_v23, %v380_v24  ;;  %v378_v33 = vadd.f32 %v346_v29, %v314_v26  ;;  %v317_v35 = vld [vmem:[%s3300_s26 + $0x20] sm:$0xff]  ;;  %v318_v36 = vld [vmem:[%s3300_s26 + $0x28] sm:$0xff]  ;;  %v320_v47 = vld [vmem:[%s3300_s26 + $0x38] sm:$0xff] }
  0x16   : > { %v475_v37 = vmax.f32 %v443_v27, 0.0  ;;  %v349_v38 = vld [vmem:[%s3306_s29 + $0x20] sm:$0xff]  ;;  %v350_v39 = vld [vmem:[%s3306_s29 + $0x28] sm:$0xff]  ;;  %v441_v42 = vadd.f32 %v409_v30, %v377_v32  ;;  %v351_v50 = vld [vmem:[%s3306_s29 + $0x30] sm:$0xff] }
  0x17   : > { %v413_v40 = vld [vmem:[%s3318_s8 + $0x20] sm:$0xff]  ;;  %v476_v41 = vmax.f32 %v444_v31, 0.0  ;;  %v442_v43 = vadd.f32 %v410_v34, %v378_v33  ;;  %v381_v44 = vadd.f32 %v349_v38, %v317_v35  ;;  %v414_v45 = vld [vmem:[%s3318_s8 + $0x28] sm:$0xff]  ;;  %v382_v49 = vadd.f32 %v350_v39, %v318_v36  ;;  %v352_v51 = vld [vmem:[%s3306_s29 + $0x38] sm:$0xff] }
  0x18   : > { %v581_v48 = vrot.slane %v475_v37, 7  ;;  %v473_v53 = vmax.f32 %v441_v42, 0.0  ;;  %v383_v58 = vadd.f32 %v351_v50, %v319_v46  ;;  %v384_v59 = vadd.f32 %v352_v51, %v320_v47  ;;  %v415_v60 = vld [vmem:[%s3318_s8 + $0x30] sm:$0xff]  ;;  %v416_v10 = vld [vmem:[%s3318_s8 + $0x38] sm:$0xff]  ;;  %v321_v15 = vld [vmem:[%s3300_s26 + $0x40] sm:$0xff] }
  0x19   : > { %v582_v52 = vrot.slane %v476_v41, 7  ;;  %v474_v54 = vmax.f32 %v442_v43, 0.0  ;;  %v445_v55 = vadd.f32 %v413_v40, %v381_v44  ;;  %v446_v57 = vadd.f32 %v414_v45, %v382_v49  ;;  %v322_v21 = vld [vmem:[%s3300_s26 + $0x48] sm:$0xff]  ;;  %v353_v22 = vld [vmem:[%s3306_s29 + $0x40] sm:$0xff]  ;;  %v323_v38 = vld [vmem:[%s3300_s26 + $0x50] sm:$0xff] }
  0x1a   : > { %v3346_v56 = vsel %vm575_vm0, 0.0, %v581_v48  ;;  %v578_v0 = vrot.slane %v473_v53, 7  ;;  %v447_v11 = vadd.f32 %v415_v60, %v383_v58  ;;  %v354_v23 = vld [vmem:[%s3306_s29 + $0x48] sm:$0xff]  ;;  %v448_v30 = vadd.f32 %v416_v10, %v384_v59  ;;  %v417_v32 = vld [vmem:[%s3318_s8 + $0x40] sm:$0xff]  ;;  %v355_v39 = vld [vmem:[%s3306_s29 + $0x50] sm:$0xff] }
  0x1b   : > { %4947 = vst [vmem:[#allocation5_spill] sm:$0xff] %v3346_v56  ;;  %v3350_v61 = vsel %vm575_vm0, %v581_v48, %v582_v52  ;;  %v3353_v62 = vsel %vm575_vm0, %v582_v52, 0.0  ;;  %v752_v63 = vrot.slane %v3346_v56, 1  ;;  %v579_v6 = vrot.slane %v474_v54, 7  ;;  %v418_v37 = vld [vmem:[%s3318_s8 + $0x48] sm:$0xff]  ;;  %v324_v44 = vld [vmem:[%s3300_s26 + $0x58] sm:$0xff] }
  0x1c   : > { %4948 = vst [vmem:[#allocation6_spill] sm:$0xff] %v3350_v61  ;;  %v3358_v3 = vpack.i.bf16 %v3350_v61, %v3346_v56  ;;  %v753_v4 = vrot.slane %v3350_v61, 1  ;;  %v755_v5 = vrot.slane %v3353_v62, 1  ;;  %v3363_v7 = vsel %vm575_vm0, 0.0, %v578_v0  ;;  %v356_v45 = vld [vmem:[%s3306_s29 + $0x58] sm:$0xff]  ;;  %v419_v54 = vld [vmem:[%s3318_s8 + $0x50] sm:$0xff] }
  0x1d   : > { %4949 = vst [vmem:[#allocation7_spill] sm:$0xff] %v3363_v7  ;;  %v477_v8 = vmax.f32 %v445_v55, 0.0  ;;  %v478_v9 = vmax.f32 %v446_v57, 0.0  ;;  %v3376_v19 = vsel %vm575_vm0, %v578_v0, %v579_v6  ;;  %v3379_v20 = vsel %vm575_vm0, %v579_v6, 0.0  ;;  %v435_v12 = vld [vmem:[%s3318_s8 + $0xd0] sm:$0xff] }
  0x1e   : > { %2732 = vrot.lane.b32.xlu0 %v3358_v3, %s3229_s10  ;;  %v3370_v17 = vsel %vm741_vm1, %v752_v63, %v753_v4  ;;  %v3373_v18 = vsel %vm741_vm1, %v753_v4, %v755_v5  ;;  %4952 = vst [vmem:[#allocation10_spill] sm:$0xff] %v3376_v19  ;;  %v747_v25 = vrot.slane %v3363_v7, 1  ;;  %v748_v26 = vrot.slane %v3376_v19, 1  ;;  %v420_v5 = vld [vmem:[%s3318_s8 + $0x58] sm:$0xff] }
  0x1f   : > { %4950 = vst [vmem:[#allocation8_spill] sm:$0xff] %v3370_v17  ;;  %4951 = vst [vmem:[#allocation9_spill] sm:$0xff] %v3373_v18  ;;  %v3386_v24 = vpack.i.bf16 %v3373_v18, %v3370_v17  ;;  %v750_v27 = vrot.slane %v3379_v20, 1  ;;  %v584_v28 = vrot.slane %v477_v8, 7  ;;  %v585_v29 = vrot.slane %v478_v9, 7  ;;  %v424_v17 = vld [vmem:[%s3318_s8 + $0x78] sm:$0xff] }
  0x20   : > { %v479_v31 = vmax.f32 %v447_v11, 0.0  ;;  %v3395_v33 = vsel %vm741_vm1, %v747_v25, %v748_v26  ;;  %v385_v35 = vadd.f32 %v353_v22, %v321_v15  ;;  %v386_v36 = vadd.f32 %v354_v23, %v322_v21  ;;  %v3201_v11 = vld [vmem:[%s4853_s4 + $0x78] sm:$0xff]   ;;  %v337_v25 = vld [vmem:[%s3300_s26 + $0xc0] sm:$0xff] }
  0x21   : > { %2742 = vrot.lane.b32.xlu1 %v3386_v24, %s3228_s9  ;;  %4953 = vst [vmem:[#allocation11_spill] sm:$0xff] %v3395_v33  ;;  %v3398_v34 = vsel %vm741_vm1, %v748_v26, %v750_v27  ;;  %v3406_v41 = vsel %vm575_vm0, %v584_v28, %v585_v29  ;;  %v3409_v42 = vsel %vm575_vm0, 0.0, %v584_v28  ;;  %v3412_v43 = vsel %vm575_vm0, %v585_v29, 0.0  ;;  %v3202_v26 = vld [vmem:[%s4853_s4 + $0x38] sm:$0xff]   ;;  %2527 = vmatprep.subr.bf16.mxu0 %v3201_v11 }
  0x22   : > { %4954 = vst [vmem:[#allocation12_spill] sm:$0xff] %v3398_v34  ;;  %v2736_v40 = vpack.i.bf16 %v3398_v34, %v3395_v33  ;;  %4955 = vst [vmem:[#allocation13_spill] sm:$0xff] %v3406_v41  ;;  %v757_v46 = vrot.slane %v3409_v42, 1  ;;  %v758_v47 = vrot.slane %v3406_v41, 1  ;;  %v760_v48 = vrot.slane %v3412_v43, 1  ;;  %2693 = vmatprep.subr.bf16.mxu1 %v3201_v11  ;;  %2528 = vmatpush3.bf16.msra.mxu0 %v3202_v26 }
  0x23   : > { %4956 = vst [vmem:[#allocation14_spill] sm:$0xff] %v3409_v42  ;;  %v480_v49 = vmax.f32 %v448_v30, 0.0  ;;  %v587_v50 = vrot.slane %v479_v31, 7  ;;  %v449_v51 = vadd.f32 %v417_v32, %v385_v35  ;;  %v450_v52 = vadd.f32 %v418_v37, %v386_v36  ;;  %v338_v30 = vld [vmem:[%s3300_s26 + $0xc8] sm:$0xff]  ;;  %v369_v31 = vld [vmem:[%s3306_s29 + $0xc0] sm:$0xff]  ;;  %2701 = vmatpush3.bf16.msra.mxu1 %v3202_v26 }
  0x24   : > { %2737 = vrot.lane.b32.xlu0 %v2736_v40, %s3228_s9  ;;  %v387_v53 = vadd.f32 %v355_v39, %v323_v38  ;;  %v3422_v55 = vsel %vm741_vm1, %v757_v46, %v758_v47  ;;  %v3425_v57 = vsel %vm741_vm1, %v758_v47, %v760_v48  ;;  %v388_v59 = vadd.f32 %v356_v45, %v324_v44  ;;  %v370_v32 = vld [vmem:[%s3306_s29 + $0xc8] sm:$0xff]  ;;  %v433_v39 = vld [vmem:[%s3318_s8 + $0xc0] sm:$0xff]  ;;  %v3203_v44 = vld [vmem:[%s4853_s4 + $0x70] sm:$0xff]  }
  0x25   : > { %4957 = vst [vmem:[#allocation15_spill] sm:$0xff] %v3422_v55  ;;  %4958 = vst [vmem:[#allocation16_spill] sm:$0xff] %v3425_v57  ;;  %v588_v58 = vrot.slane %v480_v49, 7  ;;  %v3429_v60 = vpack.i.bf16 %v3425_v57, %v3422_v55  ;;  %v3432_v63 = vsel %vm575_vm0, 0.0, %v587_v50  ;;  %v481_v0 = vmax.f32 %v449_v51, 0.0  ;;  %v434_v40 = vld [vmem:[%s3318_s8 + $0xc8] sm:$0xff]  ;;  %2529 = vmatprep.subr.bf16.mxu0 %v3203_v44  ;;  %2694 = vmatprep.subr.bf16.mxu1 %v3203_v44 }
  0x26   : > { %v482_v4 = vmax.f32 %v450_v52, 0.0  ;;  %v762_v9 = vrot.slane %v3432_v63, 1  ;;  %v451_v10 = vadd.f32 %v419_v54, %v387_v53  ;;  %v452_v27 = vadd.f32 %v420_v5, %v388_v59  ;;  %v335_v49 = vld [vmem:[%s3300_s26 + $0xb0] sm:$0xff]  ;;  %v3205_v52 = vld [vmem:[%s4853_s4 + $0x68] sm:$0xff]  }
  0x27   : > { %v3436_v6 = vsel %vm575_vm0, %v587_v50, %v588_v58  ;;  %v3439_v8 = vsel %vm575_vm0, %v588_v58, 0.0  ;;  %2747 = vrot.lane.b32.xlu1 %v3429_v60, %s3228_s9  ;;  %v590_v22 = vrot.slane %v481_v0, 7  ;;  %v924_v29 = vrot.slane %v3363_v7, 2  ;;  %v367_v50 = vld [vmem:[%s3306_s29 + $0xb0] sm:$0xff]  ;;  %v336_v0 = vld [vmem:[%s3300_s26 + $0xb8] sm:$0xff] }
  0x28   : > { %v763_v15 = vrot.slane %v3436_v6, 1  ;;  %v765_v21 = vrot.slane %v3439_v8, 1  ;;  %v591_v23 = vrot.slane %v482_v4, 7  ;;  %v483_v28 = vmax.f32 %v451_v10, 0.0  ;;  %v3204_v51 = vld [vmem:[%s4853_s4 + $0x30] sm:$0xff]   ;;  %v368_v4 = vld [vmem:[%s3306_s29 + $0xb8] sm:$0xff] }
  0x29   : > { %v3467_v38 = vsel %vm575_vm0, 0.0, %v590_v22  ;;  %v484_v54 = vmax.f32 %v452_v27, 0.0  ;;  %v925_v59 = vrot.slane %v3376_v19, 2  ;;  %v402_v10 = vadd.f32 %v370_v32, %v338_v30  ;;  %2530 = vmatpush3.bf16.msra.mxu0 %v3204_v51  ;;  %2702 = vmatpush3.bf16.msra.mxu1 %v3204_v51  ;;  %v3207_v32 = vld [vmem:[%s4853_s4 + $0x60] sm:$0xff]   ;;  %v340_v51 = vld [vmem:[%s3300_s26 + $0xd8] sm:$0xff] }
  0x2a   : > { %v3458_v35 = vsel %vm741_vm1, %v762_v9, %v763_v15  ;;  %v3461_v36 = vsel %vm741_vm1, %v763_v15, %v765_v21  ;;  %v3464_v37 = vsel %vm575_vm0, %v590_v22, %v591_v23  ;;  %4962 = vst [vmem:[#allocation20_spill] sm:$0xff] %v3467_v38  ;;  %v3479_v46 = vsel %vm575_vm0, %v591_v23, 0.0  ;;  %v431_v15 = vld [vmem:[%s3318_s8 + $0xb0] sm:$0xff]  ;;  %v3206_v22 = vld [vmem:[%s4853_s4 + $0x28] sm:$0xff]   ;;  %2531 = vmatprep.subr.bf16.mxu0 %v3205_v52 }
  0x2b   : > { %4959 = vst [vmem:[#allocation17_spill] sm:$0xff] %v3458_v35  ;;  %4960 = vst [vmem:[#allocation18_spill] sm:$0xff] %v3461_v36  ;;  %v3476_v45 = vpack.i.bf16 %v3461_v36, %v3458_v35  ;;  %v767_v47 = vrot.slane %v3467_v38, 1  ;;  %v768_v48 = vrot.slane %v3464_v37, 1  ;;  %v770_v53 = vrot.slane %v3479_v46, 1  ;;  %v339_v21 = vld [vmem:[%s3300_s26 + $0xd0] sm:$0xff]  ;;  %2695 = vmatprep.subr.bf16.mxu1 %v3205_v52 }
  0x2c   : > { %4961 = vst [vmem:[#allocation19_spill] sm:$0xff] %v3464_v37  ;;  %v593_v58 = vrot.slane %v483_v28, 7  ;;  %v401_v9 = vadd.f32 %v369_v31, %v337_v25  ;;  %v927_v11 = vrot.slane %v3379_v20, 2  ;;  %v3509_v26 = vrot.slane %v484_v54, 7  ;;  %v371_v31 = vld [vmem:[%s3306_s29 + $0xd0] sm:$0xff]  ;;  %v3215_v35 = vld [vmem:[%s4853_s4 + $0x40] sm:$0xff]  }
  0x2d   : > { %2752 = vrot.lane.b32.xlu0 %v3476_v45, %s3228_s9  ;;  %v3498_v5 = vsel %vm741_vm1, %v767_v47, %v768_v48  ;;  %v3507_v23 = vsel %vm741_vm1, %v768_v48, %v770_v53  ;;  %v466_v30 = vadd.f32 %v434_v40, %v402_v10  ;;  %v3528_v47 = vsel %vm918_vm2, %v924_v29, %v925_v59 }
  0x2e   : > { %4963 = vst [vmem:[#allocation21_spill] sm:$0xff] %v3498_v5  ;;  %4964 = vst [vmem:[#allocation22_spill] sm:$0xff] %v3507_v23  ;;  %v3512_v27 = vsel %vm575_vm0, 0.0, %v593_v58  ;;  %v3516_v20 = vpack.i.bf16 %v3507_v23, %v3498_v5  ;;  %v465_v28 = vadd.f32 %v433_v39, %v401_v9  ;;  %v3525_v44 = vsel %vm575_vm0, %v593_v58, %v3509_v26  ;;  %v432_v39 = vld [vmem:[%s3318_s8 + $0xb8] sm:$0xff] }
  0x2f   : > { %4965 = vst [vmem:[#allocation23_spill] sm:$0xff] %v3512_v27  ;;  %v772_v25 = vrot.slane %v3512_v27, 1  ;;  %4966 = vst [vmem:[#allocation24_spill] sm:$0xff] %v3525_v44  ;;  %v399_v48 = vadd.f32 %v367_v50, %v335_v49  ;;  %v4857_v40 = vrot.slane %v3525_v44, 1  ;;  %v498_v54 = vmax.f32 %v466_v30, 0.0  ;;  %v372_v9 = vld [vmem:[%s3306_s29 + $0xd8] sm:$0xff]  ;;  %2532 = vmatpush3.bf16.msra.mxu0 %v3206_v22  ;;  %2703 = vmatpush3.bf16.msra.mxu1 %v3206_v22 }
  0x30   : > { %2757 = vrot.lane.b32.xlu1 %v3516_v20, %s3228_s9  ;;  %v497_v53 = vmax.f32 %v465_v28, 0.0  ;;  %v400_v52 = vadd.f32 %v368_v4, %v336_v0  ;;  %v3537_v10 = vsel %vm918_vm2, %v925_v59, %v927_v11  ;;  %v929_v16 = vrot.slane %v3346_v56, 2  ;;  %v436_v49 = vld [vmem:[%s3318_s8 + $0xd8] sm:$0xff]  ;;  %v3208_v50 = vld [vmem:[%s4853_s4 + $0x20] sm:$0xff]   ;;  %2533 = vmatprep.subr.bf16.mxu0 %v3207_v32  ;;  %v374_v56 = vld [vmem:[%s3306_s29 + $0xe8] sm:$0xff] }
  0x31   : > { %v463_v58 = vadd.f32 %v431_v15, %v399_v48  ;;  %v403_v29 = vadd.f32 %v371_v31, %v339_v21  ;;  %v3209_v28 = vld [vmem:[%s4853_s4 + $0x58] sm:$0xff]   ;;  %v3551_v59 = vsel %vm741_vm1, %v772_v25, %v4857_v40  ;;  %v615_v4 = vrot.slane %v498_v54, 7  ;;  %2696 = vmatprep.subr.bf16.mxu1 %v3207_v32 }
  0x32   : > { %4967 = vst [vmem:[#allocation25_spill] sm:$0xff] %v3551_v59  ;;  %v614_v0 = vrot.slane %v497_v53, 7  ;;  %v464_v11 = vadd.f32 %v432_v39, %v400_v52  ;;  %v2761_v15 = vpack.i.bf16 %v3528_v47, %v3551_v59  ;;  %v4860_v30 = vrot.slane %v3350_v61, 2  ;;  %v3210_v32 = vld [vmem:[%s4853_s4 + $0x18] sm:$0xff]  }
  0x33   : > { %v495_v21 = vmax.f32 %v463_v58, 0.0  ;;  %v404_v31 = vadd.f32 %v372_v9, %v340_v51  ;;  %v3563_v53 = vsel %vm575_vm0, %v615_v4, 0.0  ;;  %2534 = vmatpush3.bf16.msra.mxu0 %v3208_v50  ;;  %v467_v58 = vadd.f32 %v435_v12, %v403_v29  ;;  %2704 = vmatpush3.bf16.msra.mxu1 %v3208_v50 }
  0x34   : > { %v3557_v48 = vsel %vm575_vm0, %v614_v0, %v615_v4  ;;  %v3560_v22 = vsel %vm575_vm0, 0.0, %v614_v0  ;;  %v496_v25 = vmax.f32 %v464_v11, 0.0  ;;  %2762 = vrot.lane.b32.xlu0 %v2761_v15, %s3228_s9  ;;  %v987_v52 = vrot.slane %v3563_v53, 2  ;;  %2535 = vmatprep.subr.bf16.mxu0 %v3209_v28  ;;  %v3211_v4 = vld [vmem:[%s4853_s4 + $0x50] sm:$0xff]  }
  0x35   : > { %4968 = vst [vmem:[#allocation26_spill] sm:$0xff] %v3557_v48  ;;  %4969 = vst [vmem:[#allocation27_spill] sm:$0xff] %v3560_v22  ;;  %v984_v39 = vrot.slane %v3560_v22, 2  ;;  %v985_v51 = vrot.slane %v3557_v48, 2  ;;  %v611_v54 = vrot.slane %v495_v21, 7  ;;  %v468_v0 = vadd.f32 %v436_v49, %v404_v31  ;;  %2697 = vmatprep.subr.bf16.mxu1 %v3209_v28  ;;  %v3212_v28 = vld [vmem:[%s4853_s4 + $0x10] sm:$0xff]  }
  0x36   : > { %v612_v9 = vrot.slane %v496_v25, 7  ;;  %v2776_v15 = vpack.i.bf16 %v3376_v19, %v3363_v7  ;;  %v330_v7 = vld [vmem:[%s3300_s26 + $0x88] sm:$0xff]  ;;  %v4995_v19 = vrot.slane %v3525_v44, 1 }
  0x37   : > { %v3576_v11 = vsel %vm918_vm2, %v984_v39, %v985_v51  ;;  %v3581_v21 = vsel %vm575_vm0, 0.0, %v611_v54  ;;  %v3584_v40 = vsel %vm918_vm2, %v985_v51, %v987_v52  ;;  %v499_v39 = vmax.f32 %v467_v58, 0.0  ;;  %2536 = vmatpush3.bf16.msra.mxu0 %v3210_v32  ;;  %v3213_v58 = vld [vmem:[%s4853_s4 + $0x48] sm:$0xff]   ;;  %2705 = vmatpush3.bf16.msra.mxu1 %v3210_v32 }
  0x38   : > { %4970 = vst [vmem:[#allocation28_spill] sm:$0xff] %v3576_v11  ;;  %4971 = vst [vmem:[#allocation29_spill] sm:$0xff] %v3581_v21  ;;  %v2766_v12 = vpack.i.bf16 %v3576_v11, %v3537_v10  ;;  %v3589_v29 = vsel %vm575_vm0, %v611_v54, %v612_v9  ;;  %v802_v49 = vrot.slane %v3581_v21, 1  ;;  %v704_v50 = vsel %vm575_vm0, %v612_v9, 0.0  ;;  %2772 = vrot.lane.b32.xlu0 %v3386_v24, %s3230_s16  ;;  %v3214_v32 = vld [vmem:[%s4853_s4 + $0x8] sm:$0xff]  }
  0x39   : > { %4972 = vst [vmem:[#allocation30_spill] sm:$0xff] %v3584_v40  ;;  %4973 = vst [vmem:[#allocation31_spill] sm:$0xff] %v3589_v29  ;;  %v803_v31 = vrot.slane %v3589_v29, 1  ;;  %v805_v25 = vrot.slane %v704_v50, 1  ;;  %v500_v51 = vmax.f32 %v468_v0, 0.0  ;;  %v3603_v54 = vsel %vm918_vm2, %v929_v16, %v4860_v30  ;;  %2537 = vmatprep.subr.bf16.mxu0 %v3211_v4  ;;  %2698 = vmatprep.subr.bf16.mxu1 %v3211_v4 }
  0x3a   : > { %2767 = vrot.lane.b32.xlu1 %v2766_v12, %s3228_s9  ;;  %v979_v52 = vrot.slane %v3581_v21, 2  ;;  %v980_v24 = vrot.slane %v3589_v29, 2  ;;  %v982_v9 = vrot.slane %v704_v50, 2  ;;  %v617_v13 = vrot.slane %v499_v39, 7  ;;  %v425_v29 = vld [vmem:[%s3318_s8 + $0x80] sm:$0xff] }
  0x3b   : > { %v3611_v0 = vsel %vm741_vm1, %v802_v49, %v803_v31  ;;  %v3614_v12 = vsel %vm741_vm1, %v803_v31, %v805_v25  ;;  %v618_v5 = vrot.slane %v500_v51, 7  ;;  %v932_v30 = vrot.slane %v3353_v62, 2  ;;  %2538 = vmatpush3.bf16.msra.mxu0 %v3212_v28  ;;  %2706 = vmatpush3.bf16.msra.mxu1 %v3212_v28  ;;  %v3216_v51 = vld [vmem:[%s4853_s4] sm:$0xff]  }
  0x3c   : > { %4974 = vst [vmem:[#allocation32_spill] sm:$0xff] %v3611_v0  ;;  %4975 = vst [vmem:[#allocation33_spill] sm:$0xff] %v3614_v12  ;;  %v2781_v16 = vpack.i.bf16 %v3611_v0, %v3584_v40  ;;  %v2786_v50 = vpack.i.bf16 %v3603_v54, %v3614_v12  ;;  %v3625_v49 = vsel %vm575_vm0, 0.0, %v617_v13  ;;  %v3643_v25 = vsel %vm918_vm2, %v979_v52, %v980_v24  ;;  %v375_v0 = vld [vmem:[%s3306_s29 + $0xf0] sm:$0xff] }
  0x3d   : > { %v3622_v23 = vsel %vm575_vm0, %v617_v13, %v618_v5  ;;  %4977 = vst [vmem:[#allocation35_spill] sm:$0xff] %v3625_v49  ;;  %v3628_v31 = vsel %vm575_vm0, %v618_v5, 0.0  ;;  %v812_v13 = vrot.slane %v3625_v49, 1  ;;  %4978 = vst [vmem:[#allocation36_spill] sm:$0xff] %v3643_v25  ;;  %v989_v39 = vrot.slane %v3625_v49, 2  ;;  %2539 = vmatprep.subr.bf16.mxu0 %v3213_v58  ;;  %2699 = vmatprep.subr.bf16.mxu1 %v3213_v58 }
  0x3e   : > { %4976 = vst [vmem:[#allocation34_spill] sm:$0xff] %v3622_v23  ;;  %2777 = vrot.lane.b32.xlu1 %v2776_v15, %s3230_s16  ;;  %2782 = vrot.lane.b32.xlu0 %v2781_v16, %s3228_s9  ;;  %v3637_v62 = vpack.i.bf16 %v3622_v23, %v3625_v49  ;;  %v813_v5 = vrot.slane %v3622_v23, 1  ;;  %v815_v4 = vrot.slane %v3628_v31, 1  ;;  %v3646_v15 = vsel %vm918_vm2, %v980_v24, %v982_v9  ;;  %v341_v16 = vld [vmem:[%s3300_s26 + $0xe0] sm:$0xff]  ;;  %v342_v24 = vld [vmem:[%s3300_s26 + $0xe8] sm:$0xff] }
  0x3f   : > { %4979 = vst [vmem:[#allocation37_spill] sm:$0xff] %v3646_v15  ;;  %v373_v9 = vld [vmem:[%s3306_s29 + $0xe0] sm:$0xff]  ;;  %2540 = vmatpush3.bf16.msra.mxu0 %v3214_v32  ;;  %v3672_v28 = vpack.i.bf16 %v3646_v15, %v3643_v25  ;;  %v406_v12 = vadd.f32 %v374_v56, %v342_v24  ;;  %2707 = vmatpush3.bf16.msra.mxu1 %v3214_v32  ;;  %v934_v15 = vrot.slane %v3409_v42, 2  ;;  %v935_v25 = vrot.slane %v3406_v41, 2  ;;  %v439_v24 = vld [vmem:[%s3318_s8 + $0xf0] sm:$0xff] }
  0x40   : > { %v3655_v36 = vsel %vm741_vm1, %v812_v13, %v813_v5  ;;  %v3658_v52 = vsel %vm741_vm1, %v813_v5, %v815_v4  ;;  %v437_v49 = vld [vmem:[%s3318_s8 + $0xe0] sm:$0xff]  ;;  %v4981_v13 = vrot.slane %v3350_v61, 2  ;;  %v438_v4 = vld [vmem:[%s3318_s8 + $0xe8] sm:$0xff]  ;;  %v405_v57 = vadd.f32 %v373_v9, %v341_v16  ;;  %2541 = vmatprep.subr.bf16.mxu0 %v3215_v35  ;;  %2700 = vmatprep.subr.bf16.mxu1 %v3215_v35  ;;  %v343_v61 = vld [vmem:[%s3300_s26 + $0xf0] sm:$0xff] }
  0x41   : > { %4980 = vst [vmem:[#allocation38_spill] sm:$0xff] %v3672_v28  ;;  %v2801_v58 = vpack.i.bf16 %v3658_v52, %v3655_v36  ;;  %v3696_v56 = vpack.i.bf16 %v3557_v48, %v3560_v22  ;;  %v937_v35 = vrot.slane %v3412_v43, 2  ;;  %v807_v9 = vrot.slane %v3560_v22, 1 }
  0x42   : > { %2787 = vrot.lane.b32.xlu1 %v2786_v50, %s3228_s9  ;;  %2792 = vrot.lane.b32.xlu0 %v3637_v62, %s3229_s10  ;;  %v3679_v5 = vsel %vm918_vm2, %v4981_v13, %v932_v30  ;;  %v4982_v50 = vrot.slane %v3622_v23, 2  ;;  %v469_v30 = vadd.f32 %v437_v49, %v405_v57  ;;  %v470_v13 = vadd.f32 %v438_v4, %v406_v12  ;;  %v376_v57 = vld [vmem:[%s3306_s29 + $0xf8] sm:$0xff] }
  0x43   : > { %2542 = vmatpush3.bf16.msra.mxu0 %v3216_v51  ;;  %4984 = vst [vmem:[#allocation40_spill] sm:$0xff] %v3696_v56  ;;  %v3705_v12 = vpack.i.bf16 %v3406_v41, %v3409_v42  ;;  %2708 = vmatpush3.bf16.msra.mxu1 %v3216_v51  ;;  %v3713_v4 = vsel %vm918_vm2, %v935_v25, %v937_v35  ;;  %v422_v42 = vld [vmem:[%s3318_s8 + $0x68] sm:$0xff] }
  0x44   : > { %v3685_v55 = vsel %vm918_vm2, %v989_v39, %v4982_v50  ;;  %v344_v39 = vld [vmem:[%s3300_s26 + $0xf8] sm:$0xff]  ;;  %v501_v49 = vmax.f32 %v469_v30, 0.0  ;;  %v502_v16 = vmax.f32 %v470_v13, 0.0  ;;  %v407_v43 = vadd.f32 %v375_v0, %v343_v61 }
  0x45   : > { %4983 = vst [vmem:[#allocation39_spill] sm:$0xff] %v3685_v55  ;;  %v2811_v32 = vpack.i.bf16 %v3685_v55, %v3679_v5  ;;  %v808_v50 = vrot.slane %v3557_v48, 1  ;;  %v408_v13 = vadd.f32 %v376_v57, %v344_v39  ;;  %v440_v61 = vld [vmem:[%s3318_s8 + $0xf8] sm:$0xff]  ;;  %v4986_v30 = vrot.slane %v3622_v23, 2 }
  0x46   : > { %2797 = vrot.lane.b32.xlu1 %v3672_v28, %s3229_s10  ;;  %2802 = vrot.lane.b32.xlu0 %v2801_v58, %s3230_s16  ;;  %v3710_v58 = vsel %vm918_vm2, %v934_v15, %v935_v25  ;;  %v992_v28 = vrot.slane %v3628_v31, 2  ;;  %v2821_v15 = vpack.i.bf16 %v3537_v10, %v3528_v47  ;;  %v810_v25 = vrot.slane %v3563_v53, 1  ;;  %v360_v23 = vld [vmem:[%s3306_s29 + $0x78] sm:$0xff] }
  0x47   : > { %v620_v51 = vrot.slane %v501_v49, 7  ;;  %v471_v0 = vadd.f32 %v439_v24, %v407_v43  ;;  %v621_v35 = vrot.slane %v502_v16, 7  ;;  %v3727_v31 = vsel %vm741_vm1, %v807_v9, %v808_v50 }
  0x48   : > { %4985 = vst [vmem:[#allocation41_spill] sm:$0xff] %v3727_v31  ;;  %v3732_v39 = vsel %vm918_vm2, %v4986_v30, %v992_v28  ;;  %v472_v57 = vadd.f32 %v440_v61, %v408_v13  ;;  %v3738_v47 = vsel %vm741_vm1, %v808_v50, %v810_v25  ;;  %v2851_v24 = vpack.i.bf16 %v3584_v40, %v3576_v11 }
  0x49   : > { %4987 = vst [vmem:[#allocation42_spill] sm:$0xff] %v3732_v39  ;;  %4988 = vst [vmem:[#allocation43_spill] sm:$0xff] %v3738_v47  ;;  %v3741_v10 = vsel %vm575_vm0, 0.0, %v620_v51  ;;  %v503_v53 = vmax.f32 %v471_v0, 0.0  ;;  %v3745_v49 = vsel %vm575_vm0, %v620_v51, %v621_v35  ;;  %v3748_v28 = vsel %vm575_vm0, %v621_v35, 0.0 }
  0x4a   : > { %2807 = vrot.lane.b32.xlu1 %v3696_v56, %s3230_s16  ;;  %2812 = vrot.lane.b32.xlu0 %v2811_v32, %s3228_s9  ;;  %4989 = vst [vmem:[#allocation44_spill] sm:$0xff] %v3741_v10  ;;  %v942_v32 = vrot.slane %v3439_v8, 2  ;;  %v504_v16 = vmax.f32 %v472_v57, 0.0  ;;  %v4878_v9 = vrot.slane %v3436_v6, 2  ;;  %v2836_v50 = vpack.i.bf16 %v3727_v31, %v3732_v39  ;;  %v423_v56 = vld [vmem:[%s3318_s8 + $0x70] sm:$0xff] }
  0x4b   : > { %v623_v43 = vrot.slane %v503_v53, 7  ;;  %v2841_v30 = vpack.i.bf16 %v3710_v58, %v3738_v47  ;;  %v817_v8 = vrot.slane %v3741_v10, 1  ;;  %v820_v25 = vrot.slane %v3748_v28, 1  ;;  %v331_v31 = vld [vmem:[%s3300_s26 + $0x90] sm:$0xff] }
  0x4c   : > { %v624_v13 = vrot.slane %v504_v16, 7  ;;  %v3768_v61 = vsel %vm918_vm2, %v4878_v9, %v942_v32  ;;  %v3776_v11 = vpack.i.bf16 %v3745_v49, %v3741_v10  ;;  %v994_v32 = vrot.slane %v3741_v10, 2  ;;  %v326_v10 = vld [vmem:[%s3300_s26 + $0x68] sm:$0xff]  ;;  %v363_v47 = vld [vmem:[%s3306_s29 + $0x90] sm:$0xff] }
  0x4d   : > { %v691_v51 = vsel %vm575_vm0, 0.0, %v623_v43  ;;  %v4993_v22 = vrot.slane %v3745_v49, 2  ;;  %v3843_v21 = vpack.i.bf16 %v3436_v6, %v3432_v63  ;;  %v997_v34 = vrot.slane %v3748_v28, 2 }
  0x4e   : > { %2817 = vrot.lane.b32.xlu1 %v3705_v12, %s3229_s10  ;;  %2822 = vrot.lane.b32.xlu0 %v2821_v15, %s3229_s10  ;;  %v818_v15 = vrot.slane %v3745_v49, 1  ;;  %v625_v0 = vsel %vm575_vm0, %v623_v43, %v624_v13  ;;  %v708_v35 = vsel %vm575_vm0, %v624_v13, 0.0  ;;  %v1230_v57 = vrot.slane %v691_v51, 2 }
  0x4f   : > { %v3772_v53 = vpack.i.bf16 %v625_v0, %v691_v51  ;;  %v1196_v16 = vrot.slane %v708_v35, 1  ;;  %v1231_v40 = vrot.slane %v625_v0, 2  ;;  %v1233_v43 = vrot.slane %v708_v35, 2  ;;  %v325_v35 = vld [vmem:[%s3300_s26 + $0x60] sm:$0xff] }
  0x50   : > { %v3828_v48 = vsel %vm918_vm2, %v994_v32, %v4993_v22  ;;  %v426_v32 = vld [vmem:[%s3318_s8 + $0x88] sm:$0xff] }
  0x51   : > { %v3789_v9 = vsel %vm918_vm2, %v1230_v57, %v1231_v40  ;;  %4994 = vst [vmem:[#allocation48_spill] sm:$0xff] %v3828_v48 }
  0x52   : > { %2827 = vrot.lane.b32.xlu1 %v3429_v60, %s3230_s16  ;;  %2832 = vrot.lane.b32.xlu0 %v3358_v3, %s3230_s16  ;;  %v1193_v60 = vrot.slane %v691_v51, 1  ;;  %v1194_v3 = vrot.slane %v625_v0, 1  ;;  %4990 = vst [vmem:[#allocation45_spill] sm:$0xff] %v3789_v9 }
  0x54   : > { %v3783_v51 = vsel %vm741_vm1, %v1193_v60, %v1194_v3  ;;  %v3786_v0 = vsel %vm741_vm1, %v1194_v3, %v1196_v16  ;;  %v3801_v60 = vsel %vm918_vm2, %v1231_v40, %v1233_v43  ;;  %v357_v3 = vld [vmem:[%s3306_s29 + $0x60] sm:$0xff]  ;;  %v358_v16 = vld [vmem:[%s3306_s29 + $0x68] sm:$0xff]  ;;  %v328_v40 = vld [vmem:[%s3300_s26 + $0x78] sm:$0xff] }
  0x55   : > { %4991 = vst [vmem:[#allocation46_spill] sm:$0xff] %v3801_v60  ;;  %v359_v43 = vld [vmem:[%s3306_s29 + $0x70] sm:$0xff]  ;;  %v389_v41 = vadd.f32 %v357_v3, %v325_v35  ;;  %v361_v3 = vld [vmem:[%s3306_s29 + $0x80] sm:$0xff] }
  0x56   : > { %2837 = vrot.lane.b32.xlu1 %v2836_v50, %s3228_s9  ;;  %2842 = vrot.lane.b32.xlu0 %v2841_v30, %s3228_s9  ;;  %v3793_v50 = vsel %vm741_vm1, %v817_v8, %v818_v15  ;;  %v3796_v30 = vsel %vm741_vm1, %v818_v15, %v820_v25  ;;  %v421_v8 = vld [vmem:[%s3318_s8 + $0x60] sm:$0xff]  ;;  %v3812_v15 = vsel %vm575_vm0, %v3509_v26, 0.0  ;;  %v327_v25 = vld [vmem:[%s3300_s26 + $0x70] sm:$0xff]  ;;  %v390_v26 = vadd.f32 %v358_v16, %v326_v10 }
  0x57   : > { %4992 = vst [vmem:[#allocation47_spill] sm:$0xff] %v3812_v15  ;;  %v2856_v57 = vpack.i.bf16 %v3796_v30, %v3793_v50  ;;  %v775_v13 = vrot.slane %v3812_v15, 1  ;;  %v453_v35 = vadd.f32 %v421_v8, %v389_v41  ;;  %v362_v16 = vld [vmem:[%s3306_s29 + $0x88] sm:$0xff]  ;;  %v391_v22 = vadd.f32 %v359_v43, %v327_v25  ;;  %v332_v8 = vld [vmem:[%s3300_s26 + $0x98] sm:$0xff] }
  0x58   : > { %v454_v10 = vadd.f32 %v422_v42, %v390_v26  ;;  %v364_v26 = vld [vmem:[%s3306_s29 + $0x98] sm:$0xff]  ;;  %v394_v43 = vadd.f32 %v362_v16, %v330_v7  ;;  %v395_v15 = vadd.f32 %v363_v47, %v331_v31 }
  0x59   : > { %v3836_v18 = vsel %vm741_vm1, %v4995_v19, %v775_v13  ;;  %v2866_v19 = vpack.i.bf16 %v3828_v48, %v3713_v4  ;;  %v485_v41 = vmax.f32 %v453_v35, 0.0  ;;  %v392_v13 = vadd.f32 %v360_v23, %v328_v40  ;;  %v428_v16 = vld [vmem:[%s3318_s8 + $0x98] sm:$0xff] }
  0x5a   : > { %2847 = vrot.lane.b32.xlu1 %v3776_v11, %s3229_s10  ;;  %2852 = vrot.lane.b32.xlu0 %v2851_v24, %s3229_s10  ;;  %v329_v24 = vld [vmem:[%s3300_s26 + $0x80] sm:$0xff]  ;;  %4996 = vst [vmem:[#allocation49_spill] sm:$0xff] %v3836_v18  ;;  %v486_v42 = vmax.f32 %v454_v10, 0.0  ;;  %v455_v33 = vadd.f32 %v423_v56, %v391_v22  ;;  %v458_v44 = vadd.f32 %v426_v32, %v394_v43  ;;  %v366_v43 = vld [vmem:[%s3306_s29 + $0xa8] sm:$0xff] }
  0x5b   : > { %v393_v25 = vadd.f32 %v361_v3, %v329_v24  ;;  %v3856_v18 = vrot.slane %v485_v41, 7  ;;  %v396_v27 = vadd.f32 %v364_v26, %v332_v8  ;;  %v2876_v23 = vpack.i.bf16 %v3679_v5, %v3603_v54  ;;  %v427_v3 = vld [vmem:[%s3318_s8 + $0x90] sm:$0xff]  ;;  %v334_v26 = vld [vmem:[%s3300_s26 + $0xa8] sm:$0xff] }
  0x5c   : > { %v3858_v59 = vrot.slane %v486_v42, 7  ;;  %v5000_v24 = vrot.slane %v3436_v6, 2  ;;  %v2906_v32 = vpack.i.bf16 %v3732_v39, %v3685_v55  ;;  %v333_v42 = vld [vmem:[%s3300_s26 + $0xa0] sm:$0xff] }
  0x5d   : > { %v457_v14 = vadd.f32 %v425_v29, %v393_v25  ;;  %v939_v29 = vrot.slane %v3432_v63, 2  ;;  %v460_v41 = vadd.f32 %v428_v16, %v396_v27  ;;  %v365_v25 = vld [vmem:[%s3306_s29 + $0xa0] sm:$0xff] }
  0x5e   : > { %2857 = vrot.lane.b32.xlu1 %v2856_v57, %s3230_s16  ;;  %2862 = vrot.lane.b32.xlu0 %v3637_v62, %s3230_s16  ;;  %v456_v57 = vadd.f32 %v424_v17, %v392_v13  ;;  %v487_v62 = vmax.f32 %v455_v33, 0.0  ;;  %v3868_v7 = vsel %vm575_vm0, %v3856_v18, %v3858_v59  ;;  %v4998_v17 = vrot.slane %v3745_v49, 2 }
  0x5f   : > { %4997 = vst [vmem:[#allocation50_spill] sm:$0xff] %v3868_v7  ;;  %v489_v40 = vmax.f32 %v457_v14, 0.0  ;;  %v490_v14 = vmax.f32 %v458_v44, 0.0  ;;  %v492_v8 = vmax.f32 %v460_v41, 0.0 }
  0x60   : > { %v488_v56 = vmax.f32 %v456_v57, 0.0  ;;  %v3873_v33 = vsel %vm918_vm2, %v4998_v17, %v997_v34  ;;  %v3876_v31 = vrot.slane %v487_v62, 7  ;;  %v3888_v34 = vsel %vm918_vm2, %v939_v29, %v5000_v24  ;;  %v429_v17 = vld [vmem:[%s3318_s8 + $0xa0] sm:$0xff] }
  0x61   : > { %4999 = vst [vmem:[#allocation51_spill] sm:$0xff] %v3873_v33  ;;  %v2891_v28 = vpack.i.bf16 %v3655_v36, %v3873_v33  ;;  %v3900_v10 = vrot.slane %v489_v40, 7  ;;  %v3904_v22 = vrot.slane %v490_v14, 7  ;;  %v3926_v62 = vrot.slane %v492_v8, 7 }
  0x62   : > { %2867 = vrot.lane.b32.xlu1 %v2866_v19, %s3228_s9  ;;  %2872 = vrot.lane.b32.xlu0 %v3843_v21, %s3229_s10  ;;  %v3878_v47 = vrot.slane %v488_v56, 7  ;;  %v459_v19 = vadd.f32 %v427_v3, %v395_v15  ;;  %v398_v56 = vadd.f32 %v366_v43, %v334_v26  ;;  %v430_v15 = vld [vmem:[%s3318_s8 + $0xa8] sm:$0xff]  ;;  %v5003_v29 = vpack.i.bf16 %v3789_v9, %v3768_v61 }
  0x63   : > { %v3916_v44 = vsel %vm575_vm0, %v3900_v10, %v3904_v22  ;;  %v2931_v40 = vpack.i.bf16 %v3713_v4, %v3710_v58  ;;  %v945_v14 = vrot.slane %v3464_v37, 2  ;;  %v2956_v8 = vpack.i.bf16 %v3274_v1, %v3278_v2 }
  0x64   : > { %v3893_v35 = vsel %vm575_vm0, %v3876_v31, %v3878_v47  ;;  %5002 = vst [vmem:[#allocation53_spill] sm:$0xff] %v3916_v44  ;;  %v491_v13 = vmax.f32 %v459_v19, 0.0  ;;  %v462_v3 = vadd.f32 %v430_v15, %v398_v56  ;;  %v2961_v26 = vpack.i.bf16 %v3873_v33, %v3828_v48 }
  0x65   : > { %5001 = vst [vmem:[#allocation52_spill] sm:$0xff] %v3893_v35  ;;  %v4079_v48 = vsel %vm575_vm0, 0.0, %v3900_v10  ;;  %v701_v39 = vsel %vm575_vm0, %v3904_v22, 0.0  ;;  %v965_v55 = vrot.slane %v3916_v44, 2 }
  0x66   : > { %2877 = vrot.lane.b32.xlu1 %v2876_v23, %s3229_s10  ;;  %2882 = vrot.lane.b32.xlu0 %v3476_v45, %s3230_s16  ;;  %v2896_v45 = vpack.i.bf16 %v3888_v34, %v3658_v52  ;;  %v3924_v57 = vrot.slane %v491_v13, 7  ;;  %v397_v23 = vadd.f32 %v365_v25, %v333_v42  ;;  %v2946_v42 = vpack.i.bf16 %v3793_v50, %v3801_v60  ;;  %v5006_v25 = vld [vmem:[#allocation23_spill] sm:$0xff] }
  0x67   : > { %v949_v43 = vrot.slane %v5006_v25, 2  ;;  %5021 = vst [vmem:[#allocation63_spill] sm:$0xff] %v4079_v48 }
  0x68   : > { %v3932_v27 = vsel %vm575_vm0, %v3924_v57, %v3926_v62  ;;  %v461_v24 = vadd.f32 %v429_v17, %v397_v23  ;;  %v5007_v23 = vld [vmem:[#allocation24_spill] sm:$0xff] }
  0x69   : > { %v950_v56 = vrot.slane %v5007_v23, 2 }
  0x6a   : > { %2887 = vrot.lane.b32.xlu1 %v3705_v12, %s3230_s16  ;;  %2892 = vrot.lane.b32.xlu0 %v2891_v28, %s3228_s9  ;;  %v2911_v12 = vpack.i.bf16 %v3786_v0, %v3783_v51  ;;  %v2926_v28 = vpack.i.bf16 %v3464_v37, %v3467_v38  ;;  %v493_v16 = vmax.f32 %v461_v24, 0.0  ;;  %v2981_v24 = vpack.i.bf16 %v5007_v23, %v5006_v25 }
  0x6b   : > { %v3990_v15 = vsel %vm918_vm2, %v949_v43, %v950_v56 }
  0x6c   : > { %5009 = vst [vmem:[#allocation57_spill] sm:$0xff] %v3990_v15 }
  0x6e   : > { %2897 = vrot.lane.b32.xlu1 %v2896_v45, %s3228_s9  ;;  %2902 = vrot.lane.b32.xlu0 %v3772_v53, %s3229_s10  ;;  %v944_v45 = vrot.slane %v3467_v38, 2 }
  0x72   : > { %2907 = vrot.lane.b32.xlu1 %v2906_v32, %s3229_s10  ;;  %2912 = vrot.lane.b32.xlu0 %v2911_v12, %s3230_s16  ;;  %v494_v32 = vmax.f32 %v462_v3, 0.0  ;;  %v3952_v12 = vsel %vm918_vm2, %v944_v45, %v945_v14  ;;  %v5012_v45 = vld [vmem:[#allocation47_spill] sm:$0xff] }
  0x73   : > { %5004 = vst [vmem:[#allocation54_spill] sm:$0xff] %v3952_v12  ;;  %v2951_v13 = vpack.i.bf16 %v3952_v12, %v3796_v30 }
  0x74   : > { %v3954_v19 = vrot.slane %v494_v32, 7  ;;  %v5014_v32 = vld [vmem:[#allocation49_spill] sm:$0xff] }
  0x76   : > { %2917 = vrot.lane.b32.xlu1 %v3776_v11, %s3230_s16  ;;  %2922 = vrot.lane.b32.xlu0 %v5003_v29, %s3228_s9  ;;  %v3949_v11 = vrot.slane %v493_v16, 7  ;;  %v3994_v29 = vsel %vm575_vm0, 0.0, %v3856_v18  ;;  %v955_v16 = vrot.slane %v3868_v7, 2  ;;  %v2986_v18 = vpack.i.bf16 %v3768_v61, %v3888_v34 }
  0x77   : > { %5010 = vst [vmem:[#allocation58_spill] sm:$0xff] %v3994_v29  ;;  %v954_v3 = vrot.slane %v3994_v29, 2 }
  0x78   : > { %v3959_v41 = vsel %vm575_vm0, %v3949_v11, %v3954_v19 }
  0x79   : > { %5005 = vst [vmem:[#allocation55_spill] sm:$0xff] %v3959_v41 }
  0x7a   : > { %2927 = vrot.lane.b32.xlu1 %v2926_v28, %s3229_s10  ;;  %2932 = vrot.lane.b32.xlu0 %v2931_v40, %s3229_s10 }
  0x7e   : > { %2937 = vrot.lane.b32.xlu1 %v3516_v20, %s3230_s16  ;;  %2942 = vrot.lane.b32.xlu0 %v3843_v21, %s3230_s16  ;;  %v3978_v20 = vld [vmem:[%s4853_s4 + $0x88] sm:$0xff]   ;;  %v947_v21 = vrot.slane %v3479_v46, 2  ;;  %v5011_v46 = vld [vmem:[#allocation4_spill] sm:$0xff] }
  0x7f   : > { %2657 = vmatprep.subr.bf16.mxu1 %v3978_v20 }
  0x80   : > { %v3987_v17 = vsel %vm918_vm2, %v945_v14, %v947_v21  ;;  %v952_v14 = vrot.slane %v5012_v45, 2  ;;  %v699_v21 = vsel %vm575_vm0, %v3858_v59, 0.0 }
  0x81   : > { %5008 = vst [vmem:[#allocation56_spill] sm:$0xff] %v3987_v17  ;;  %v2976_v40 = vpack.i.bf16 %v3990_v15, %v3987_v17  ;;  %v780_v45 = vrot.slane %v699_v21, 1  ;;  %v957_v59 = vrot.slane %v699_v21, 2  ;;  %v4051_v21 = vsel %vm575_vm0, 0.0, %v3876_v31 }
  0x82   : > { %2947 = vrot.lane.b32.xlu1 %v2946_v42, %s3228_s9  ;;  %2952 = vrot.lane.b32.xlu0 %v2951_v13, %s3228_s9  ;;  %v4014_v13 = vsel %vm918_vm2, %v950_v56, %v952_v14  ;;  %v777_v56 = vrot.slane %v3994_v29, 1  ;;  %5019 = vst [vmem:[#allocation61_spill] sm:$0xff] %v4051_v21  ;;  %v959_v60 = vrot.slane %v4051_v21, 2  ;;  %v4092_v10 = vpack.i.bf16 %v3893_v35, %v4051_v21 }
  0x83   : > { %5015 = vst [vmem:[#allocation4_spill] sm:$0xff] %v4014_v13 }
  0x86   : > { %2957 = vrot.lane.b32.xlu1 %v2956_v8, %s3229_s10  ;;  %2962 = vrot.lane.b32.xlu0 %v2961_v26, %s3229_s10  ;;  %v4017_v8 = vsel %vm918_vm2, %v954_v3, %v955_v16  ;;  %v4019_v26 = vpop.permute.xlu0 %2722  ;;  %v4031_v14 = vpop.permute.xlu1 %2727 }
  0x87   : > { %5016 = vst [vmem:[#allocation47_spill] sm:$0xff] %v4017_v8 }
  0x8a   : > { %2967 = vrot.lane.b32.xlu1 %v5011_v46, %s3230_s16  ;;  %2972 = vrot.lane.b32.xlu0 %v3772_v53, %s3230_s16  ;;  %v5013_v53 = vld [vmem:[#allocation25_spill] sm:$0xff]  ;;  %v3001_v46 = vpack.i.bf16 %v4017_v8, %v4014_v13 }
  0x8b   : > { %v2991_v42 = vpack.i.bf16 %v5014_v32, %v5013_v53 }
  0x8e   : > { %2977 = vrot.lane.b32.xlu1 %v2976_v40, %s3228_s9  ;;  %2982 = vrot.lane.b32.xlu0 %v2981_v24, %s3229_s10  ;;  %v778_v40 = vrot.slane %v3868_v7, 1 }
  0x90   : > { %v4033_v3 = vpop.permute.xlu0 %2732  ;;  %v4044_v43 = vsel %vm741_vm1, %v777_v56, %v778_v40  ;;  %v4047_v9 = vsel %vm741_vm1, %v778_v40, %v780_v45  ;;  %v783_v45 = vrot.slane %v3893_v35, 1 }
  0x91   : > { %5017 = vst [vmem:[#allocation59_spill] sm:$0xff] %v4044_v43  ;;  %5018 = vst [vmem:[#allocation60_spill] sm:$0xff] %v4047_v9  ;;  %v4065_v56 = vpack.i.bf16 %v4047_v9, %v4044_v43  ;;  %v2735_v53 = vunpack.i.h.bf16 %v4033_v3 }
  0x92   : > { %2987 = vrot.lane.b32.xlu1 %v2986_v18, %s3229_s10  ;;  %2992 = vrot.lane.b32.xlu0 %v2991_v42, %s3230_s16  ;;  %v4039_v18 = vpack.i.bf16 %v3868_v7, %v3994_v29  ;;  %v3011_v42 = vpack.i.bf16 %v3987_v17, %v3952_v12  ;;  %v967_v29 = vrot.slane %v701_v39, 2  ;;  %v4173_v17 = vpack.i.bf16 %v3916_v44, %v4079_v48 }
  0x93   : > { %v4067_v31 = vpop.permute.xlu1 %2742 }
  0x96   : > { %2997 = vrot.lane.b32.xlu1 %v2926_v28, %s3230_s16  ;;  %3002 = vrot.lane.b32.xlu0 %v3001_v46, %s3228_s9  ;;  %v700_v28 = vsel %vm575_vm0, %v3878_v47, 0.0  ;;  %v4056_v46 = vsel %vm918_vm2, %v955_v16, %v957_v59  ;;  %v4071_v40 = vpop.permute.xlu0 %2737  ;;  %v782_v16 = vrot.slane %v4051_v21, 1  ;;  %v964_v47 = vrot.slane %v4079_v48, 2 }
  0x97   : > { %5020 = vst [vmem:[#allocation62_spill] sm:$0xff] %v4056_v46  ;;  %v785_v59 = vrot.slane %v700_v28, 1  ;;  %v962_v33 = vrot.slane %v700_v28, 2  ;;  %v3026_v28 = vpack.i.bf16 %v5014_v32, %v4056_v46  ;;  %v4114_v21 = vsel %vm918_vm2, %v965_v55, %v967_v29 }
  0x98   : > { %v4095_v7 = vsel %vm741_vm1, %v782_v16, %v783_v45  ;;  %v4111_v9 = vsel %vm918_vm2, %v964_v47, %v965_v55  ;;  %v4129_v47 = vsel %vm575_vm0, 0.0, %v3924_v57  ;;  %v4135_v29 = vsel %vm575_vm0, %v3926_v62, 0.0 }
  0x99   : > { %5022 = vst [vmem:[#allocation64_spill] sm:$0xff] %v4095_v7  ;;  %v4098_v22 = vsel %vm741_vm1, %v783_v45, %v785_v59  ;;  %v4100_v23 = vpop.permute.xlu1 %2747  ;;  %5026 = vst [vmem:[#allocation68_spill] sm:$0xff] %v4129_v47  ;;  %v969_v45 = vrot.slane %v4129_v47, 2  ;;  %v970_v59 = vrot.slane %v3932_v27, 2  ;;  %v4146_v57 = vsel %vm575_vm0, %v3954_v19, 0.0 }
  0x9a   : > { %3007 = vrot.lane.b32.xlu1 %v4039_v18, %s3229_s10  ;;  %3012 = vrot.lane.b32.xlu0 %v3011_v42, %s3229_s10  ;;  %v960_v42 = vrot.slane %v3893_v35, 2  ;;  %5023 = vst [vmem:[#allocation65_spill] sm:$0xff] %v4098_v22  ;;  %v975_v16 = vrot.slane %v3959_v41, 2  ;;  %v977_v62 = vrot.slane %v4146_v57, 2  ;;  %v787_v19 = vrot.slane %v4079_v48, 1  ;;  %v5031_v48 = vld [vmem:[#allocation11_spill] sm:$0xff] }
  0x9b   : > { %v4224_v32 = vpack.i.bf16 %v4114_v21, %v4111_v9 }
  0x9c   : > { %v4103_v25 = vsel %vm918_vm2, %v959_v60, %v960_v42  ;;  %v3036_v60 = vpack.i.bf16 %v4014_v13, %v3990_v15 }
  0x9d   : > { %5024 = vst [vmem:[#allocation66_spill] sm:$0xff] %v4103_v25 }
  0x9e   : > { %3017 = vrot.lane.b32.xlu1 %v4065_v56, %s3230_s16  ;;  %3022 = vrot.lane.b32.xlu0 %v2981_v24, %s3230_s16  ;;  %v4106_v24 = vsel %vm918_vm2, %v960_v42, %v962_v33  ;;  %v4125_v33 = vpack.i.bf16 %v4098_v22, %v4095_v7  ;;  %v972_v42 = vrot.slane %v4135_v29, 2  ;;  %v788_v7 = vrot.slane %v3916_v44, 1 }
  0x9f   : > { %5025 = vst [vmem:[#allocation67_spill] sm:$0xff] %v4106_v24  ;;  %v4108_v43 = vpop.permute.xlu0 %2752  ;;  %v790_v22 = vrot.slane %v701_v39, 1  ;;  %v2734_v44 = vunpack.i.l.bf16 %v4033_v3 }
  0xa0   : > { %v4169_v12 = vsel %vm918_vm2, %v970_v59, %v972_v42  ;;  %v2724_v42 = vunpack.i.l.bf16 %v4019_v26 }
  0xa2   : > { %3027 = vrot.lane.b32.xlu1 %v3026_v28, %s3228_s9  ;;  %3032 = vrot.lane.b32.xlu0 %v4092_v10, %s3229_s10  ;;  %v4142_v28 = vsel %vm575_vm0, 0.0, %v3949_v11  ;;  %v4154_v35 = vpop.permute.xlu1 %2757  ;;  %v4158_v11 = vpack.i.bf16 %v4106_v24, %v4103_v25  ;;  %v4179_v24 = vsel %vm918_vm2, %v975_v16, %v977_v62 }
  0xa3   : > { %5027 = vst [vmem:[#allocation69_spill] sm:$0xff] %v4142_v28  ;;  %v974_v55 = vrot.slane %v4142_v28, 2 }
  0xa5   : > { %v4176_v25 = vsel %vm918_vm2, %v974_v55, %v975_v16  ;;  %v2725_v16 = vunpack.i.h.bf16 %v4019_v26  ;;  %v2730_v26 = vunpack.i.h.bf16 %v4031_v14 }
  0xa6   : > { %3037 = vrot.lane.b32.xlu1 %v3036_v60, %s3229_s10  ;;  %3042 = vrot.lane.b32.xlu0 %v4125_v33, %s3230_s16  ;;  %v4162_v15 = vpop.permute.xlu0 %2762  ;;  %v4166_v60 = vsel %vm918_vm2, %v969_v45, %v970_v59  ;;  %v4188_v45 = vsel %vm741_vm1, %v787_v19, %v788_v7  ;;  %v4191_v59 = vsel %vm741_vm1, %v788_v7, %v790_v22 }
  0xa7   : > { %5028 = vst [vmem:[#allocation70_spill] sm:$0xff] %v4162_v15  ;;  %v2765_v13 = vunpack.i.h.bf16 %v4162_v15  ;;  %5029 = vst [vmem:[#allocation71_spill] sm:$0xff] %v4188_v45  ;;  %v3066_v22 = vpack.i.bf16 %v4056_v46, %v4017_v8  ;;  %v4204_v55 = vpack.i.bf16 %v4191_v59, %v4188_v45  ;;  %v2729_v15 = vunpack.i.l.bf16 %v4031_v14  ;;  %v5032_v45 = vld [vmem:[#allocation12_spill] sm:$0xff] }
  0xa8   : > { %5030 = vst [vmem:[#allocation72_spill] sm:$0xff] %v4191_v59 }
  0xa9   : > { %v1654_v19 = vsel %vm1555_vm3, %v5031_v48, %v2765_v13  ;;  %v1557_v48 = vsel %vm1555_vm3, %v3274_v1, %v2725_v16  ;;  %v1556_v13 = vsel %vm1555_vm3, %v3278_v2, %v2724_v42 }
  0xaa   : > { %3047 = vrot.lane.b32.xlu1 %v4039_v18, %s3230_s16  ;;  %3052 = vrot.lane.b32.xlu0 %v4158_v11, %s3228_s9  ;;  %v2773_v62 = vpop.permute.xlu0 %2772  ;;  %v1686_v14 = vsel %vm1588_vm4, %v1654_v19, %v2734_v44  ;;  %v1589_v1 = vsel %vm1588_vm4, %v1556_v13, %v2729_v15  ;;  %v1590_v2 = vsel %vm1588_vm4, %v1557_v48, %v2730_v26 }
  0xab   : > { %v2774_v39 = vunpack.i.l.bf16 %v2773_v62  ;;  %v2775_v38 = vunpack.i.h.bf16 %v2773_v62 }
  0xac   : > { %v2768_v18 = vpop.permute.xlu1 %2767 }
  0xad   : > { %v2769_v7 = vunpack.i.l.bf16 %v2768_v18  ;;  %v2770_v16 = vunpack.i.h.bf16 %v2768_v18 }
  0xae   : > { %3057 = vrot.lane.b32.xlu1 %v4065_v56, %s3228_s9  ;;  %3062 = vrot.lane.b32.xlu0 %v4173_v17, %s3229_s10  ;;  %v1718_v56 = vsel %vm1621_vm5, %v1686_v14, %v2774_v39 }
  0xaf   : > { %v1655_v59 = vsel %vm1555_vm3, %v5032_v45, %v2769_v7  ;;  %v793_v7 = vrot.slane %v3932_v27, 1 }
  0xb0   : > { %v2778_v8 = vpop.permute.xlu1 %2777  ;;  %v2783_v3 = vpop.permute.xlu0 %2782  ;;  %v1687_v62 = vsel %vm1588_vm4, %v1655_v59, %v2735_v53  ;;  %v792_v53 = vrot.slane %v4129_v47, 1 }
  0xb1   : > { %v2780_v46 = vunpack.i.h.bf16 %v2778_v8  ;;  %v2779_v37 = vunpack.i.l.bf16 %v2778_v8  ;;  %v1719_v44 = vsel %vm1621_vm5, %v1687_v62, %v2775_v38  ;;  %v2784_v39 = vunpack.i.l.bf16 %v2783_v3 }
  0xb2   : > { %3067 = vrot.lane.b32.xlu1 %v3066_v22, %s3229_s10  ;;  %3072 = vrot.lane.b32.xlu0 %v4204_v55, %s3230_s16  ;;  %v1751_v45 = vpack.c.bf16 %v1719_v44, %v1718_v56  ;;  %v795_v22 = vrot.slane %v4135_v29, 1  ;;  %v4250_v29 = vsel %vm741_vm1, %v792_v53, %v793_v7  ;;  %v2785_v56 = vunpack.i.h.bf16 %v2783_v3 }
  0xb3   : > { %v1622_v8 = vsel %vm1621_vm5, %v1589_v1, %v2779_v37  ;;  %v1623_v59 = vsel %vm1621_vm5, %v1590_v2, %v2780_v46  ;;  %v4245_v37 = vpack.i.bf16 %v3932_v27, %v4129_v47  ;;  %v5033_v46 = vld [vmem:[#allocation43_spill] sm:$0xff] }
  0xb4   : > { %v4235_v42 = vpop.permute.xlu1 %2787  ;;  %v2793_v15 = vpop.permute.xlu0 %2792  ;;  %v1750_v19 = vpack.c.bf16 %v1623_v59, %v1622_v8  ;;  %1992 = vmatprep.mubr.bf16.mxu0 %v1751_v45  ;;  %v1679_v18 = vsel %vm1555_vm3, %v5033_v46, %v2784_v39  ;;  %v4253_v14 = vsel %vm741_vm1, %v793_v7, %v795_v22  ;;  %v798_v22 = vrot.slane %v3959_v41, 1 }
  0xb5   : > { %v2795_v26 = vunpack.i.h.bf16 %v2793_v15  ;;  %v2794_v38 = vunpack.i.l.bf16 %v2793_v15  ;;  %v2789_v1 = vunpack.i.l.bf16 %v4235_v42  ;;  %v4266_v59 = vpack.i.bf16 %v4253_v14, %v4250_v29 }
  0xb6   : > { %3077 = vrot.lane.b32.xlu1 %v4092_v10, %s3230_s16  ;;  %1993 = vmatmul.mubr.bf16.vlgmr.msra.gmra.mxu0 %v1750_v19  ;;  %v5034_v10 = vld [vmem:[#allocation41_spill] sm:$0xff] }
  0xb7   : > { %3082 = vrot.lane.b32.xlu0 %v4224_v32, %s3228_s9  ;;  %v1678_v62 = vsel %vm1555_vm3, %v5034_v10, %v2770_v16  ;;  %v1711_v53 = vsel %vm1588_vm4, %v1679_v18, %v2795_v26  ;;  %v800_v26 = vrot.slane %v4146_v57, 1 }
  0xb8   : > { %v2798_v48 = vpop.permute.xlu1 %2797  ;;  %v2803_v13 = vpop.permute.xlu0 %2802  ;;  %v1710_v39 = vsel %vm1588_vm4, %v1678_v62, %v2794_v38  ;;  %v5035_v38 = vld [vmem:[#allocation29_spill] sm:$0xff] }
  0xb9   : > { %v2805_v2 = vunpack.i.h.bf16 %v2803_v13  ;;  %v2804_v44 = vunpack.i.l.bf16 %v2803_v13  ;;  %v2800_v45 = vunpack.i.h.bf16 %v2798_v48  ;;  %v2799_v8 = vunpack.i.l.bf16 %v2798_v48  ;;  %v5036_v48 = vld [vmem:[#allocation31_spill] sm:$0xff] }
  0xba   : > { %3087 = vrot.lane.b32.xlu1 %v4125_v33, %s3228_s9  ;;  %v797_v33 = vrot.slane %v4142_v28, 1  ;;  %v1580_v18 = vsel %vm1555_vm3, %v5035_v38, %v2785_v56  ;;  %v1581_v13 = vsel %vm1555_vm3, %v5036_v48, %v2789_v1  ;;  %v4290_v1 = vpack.i.bf16 %v4169_v12, %v4166_v60 }
  0xbb   : > { %3092 = vrot.lane.b32.xlu0 %v4245_v37, %s3229_s10  ;;  %v1742_v3 = vsel %vm1621_vm5, %v1710_v39, %v2804_v44  ;;  %v1743_v16 = vsel %vm1621_vm5, %v1711_v53, %v2805_v2  ;;  %v1613_v2 = vsel %vm1588_vm4, %v1580_v18, %v2799_v8  ;;  %v1614_v39 = vsel %vm1588_vm4, %v1581_v13, %v2800_v45  ;;  %v3218_v13 = vld [vmem:[%s4853_s4 + $0x80] sm:$0xff]  }
  0xbc   : > { %v2808_v15 = vpop.permute.xlu1 %2807  ;;  %v4270_v19 = vpop.permute.xlu0 %2812  ;;  %v1787_v7 = vpack.c.bf16 %v1743_v16, %v1742_v3  ;;  %v2740_v8 = vunpack.i.h.bf16 %v4071_v40  ;;  %v2739_v45 = vunpack.i.l.bf16 %v4071_v40  ;;  %v4299_v18 = vsel %vm741_vm1, %v798_v22, %v800_v26  ;;  %v5037_v40 = vld [vmem:[#allocation9_spill] sm:$0xff] }
  0xbd   : > { %v2810_v62 = vunpack.i.h.bf16 %v2808_v15  ;;  %v2809_v44 = vunpack.i.l.bf16 %v2808_v15  ;;  %v2814_v53 = vunpack.i.l.bf16 %v4270_v19 }
  0xbe   : > { %3097 = vrot.lane.b32.xlu1 %v4158_v11, %s3229_s10  ;;  %2088 = vmatprep.mubr.bf16.mxu1 %v1787_v7  ;;  %v2790_v11 = vunpack.i.h.bf16 %v4235_v42  ;;  %v4296_v7 = vsel %vm741_vm1, %v797_v33, %v798_v22  ;;  %v4312_v33 = vpack.i.bf16 %v3959_v41, %v4142_v28  ;;  %v5038_v22 = vld [vmem:[#allocation10_spill] sm:$0xff] }
  0xbf   : > { %3102 = vrot.lane.b32.xlu0 %v4266_v59, %s3230_s16  ;;  %v1646_v57 = vsel %vm1621_vm5, %v1613_v2, %v2809_v44  ;;  %v1647_v56 = vsel %vm1621_vm5, %v1614_v39, %v2810_v62  ;;  %v1657_v42 = vsel %vm1555_vm3, %v5037_v40, %v2814_v53  ;;  %v1559_v26 = vsel %vm1555_vm3, %v5038_v22, %v2740_v8 }
  0xc0   : > { %v2818_v3 = vpop.permute.xlu1 %2817  ;;  %v2823_v16 = vpop.permute.xlu0 %2822  ;;  %v1786_v15 = vpack.c.bf16 %v1647_v56, %v1646_v57  ;;  %v5039_v57 = vld [vmem:[#allocation7_spill] sm:$0xff]  ;;  %v4322_v53 = vpack.i.bf16 %v4299_v18, %v4296_v7 }
  0xc1   : > { %v2820_v62 = vunpack.i.h.bf16 %v2818_v3  ;;  %v2819_v44 = vunpack.i.l.bf16 %v2818_v3  ;;  %v2825_v2 = vunpack.i.h.bf16 %v2823_v16  ;;  %v2824_v39 = vunpack.i.l.bf16 %v2823_v16  ;;  %v5040_v3 = vld [vmem:[#allocation8_spill] sm:$0xff] }
  0xc2   : > { %3107 = vrot.lane.b32.xlu1 %v4173_v17, %s3230_s16  ;;  %2089 = vmatmul.mubr.bf16.vlgmr.msra.gmra.mxu1 %v1786_v15  ;;  %v1558_v56 = vsel %vm1555_vm3, %v5039_v57, %v2739_v45  ;;  %v1656_v17 = vsel %vm1555_vm3, %v5040_v3, %v2790_v11 }
  0xc3   : > { %3112 = vrot.lane.b32.xlu0 %v4290_v1, %s3228_s9  ;;  %2658 = vmatpush3.bf16.msra.mxu1 %v3978_v20  ;;  %v1688_v8 = vsel %vm1588_vm4, %v1656_v17, %v2819_v44  ;;  %v1689_v45 = vsel %vm1588_vm4, %v1657_v42, %v2820_v62  ;;  %v1591_v22 = vsel %vm1588_vm4, %v1558_v56, %v2824_v39 }
  0xc4   : > { %v2828_v16 = vpop.permute.xlu1 %2827  ;;  %v2833_v15 = vpop.permute.xlu0 %2832  ;;  %2659 = vmatprep.subr.bf16.mxu1 %v3218_v13  ;;  %v1592_v11 = vsel %vm1588_vm4, %v1559_v26, %v2825_v2 }
  0xc5   : > { %v2830_v40 = vunpack.i.h.bf16 %v2828_v16  ;;  %v2829_v28 = vunpack.i.l.bf16 %v2828_v16  ;;  %v2835_v41 = vunpack.i.h.bf16 %v2833_v15  ;;  %v2834_v47 = vunpack.i.l.bf16 %v2833_v15 }
  0xc6   : > { %3117 = vrot.lane.b32.xlu1 %v4204_v55, %s3228_s9 }
  0xc7   : > { %3122 = vrot.lane.b32.xlu0 %v4312_v33, %s3229_s10  ;;  %v1720_v20 = vsel %vm1621_vm5, %v1688_v8, %v2829_v28  ;;  %v1721_v57 = vsel %vm1621_vm5, %v1689_v45, %v2830_v40  ;;  %v1624_v3 = vsel %vm1621_vm5, %v1591_v22, %v2834_v47  ;;  %v1625_v44 = vsel %vm1621_vm5, %v1592_v11, %v2835_v41  ;;  %v5041_v40 = vld [vmem:[#allocation26_spill] sm:$0xff]  ;;  %v5042_v22 = vld [vmem:[#allocation27_spill] sm:$0xff] }
  0xc8   : > { %v2838_v17 = vpop.permute.xlu1 %2837  ;;  %v2843_v62 = vpop.permute.xlu0 %2842  ;;  %v1754_v42 = vpack.c.bf16 %v1721_v57, %v1720_v20  ;;  %v1753_v39 = vpack.c.bf16 %v1625_v44, %v1624_v3  ;;  %2660 = vmatpush3.bf16.msra.mxu1 %v3218_v13  ;;  %v4343_v28 = vpack.i.bf16 %v4179_v24, %v4176_v25  ;;  %v2815_v47 = vunpack.i.h.bf16 %v4270_v19  ;;  %v5043_v3 = vld [vmem:[#allocation32_spill] sm:$0xff]  ;;  %v5044_v44 = vld [vmem:[#allocation33_spill] sm:$0xff] }
  0xc9   : > { %v2844_v55 = vunpack.i.l.bf16 %v2843_v62  ;;  %v2840_v41 = vunpack.i.h.bf16 %v2838_v17  ;;  %v2839_v2 = vunpack.i.l.bf16 %v2838_v17  ;;  %v4354_v19 = vpack.i.bf16 %v5036_v48, %v5035_v38 }
  0xca   : > { %3127 = vrot.lane.b32.xlu1 %v4224_v32, %s3229_s10  ;;  %2000 = vmatprep.mubr.bf16.mxu0 %v1754_v42  ;;  %v1680_v45 = vsel %vm1555_vm3, %v3655_v36, %v2815_v47  ;;  %v3161_v17 = vpack.i.bf16 %v5044_v44, %v5043_v3 }
  0xcb   : > { %3132 = vrot.lane.b32.xlu0 %v4322_v53, %s3230_s16  ;;  %2001 = vmatmul.mubr.bf16.gmra.mxu0 %v1753_v39  ;;  %v1583_v8 = vsel %vm1555_vm3, %v5041_v40, %v2844_v55  ;;  %v1582_v11 = vsel %vm1555_vm3, %v5042_v22, %v2840_v41  ;;  %v1681_v20 = vsel %vm1555_vm3, %v3658_v52, %v2839_v2 }
  0xcc   : > { %v2848_v26 = vpop.permute.xlu1 %2847  ;;  %v2853_v56 = vpop.permute.xlu0 %2852 }
  0xcd   : > { %v2850_v13 = vunpack.i.h.bf16 %v2848_v26  ;;  %v2849_v16 = vunpack.i.l.bf16 %v2848_v26  ;;  %v2855_v15 = vunpack.i.h.bf16 %v2853_v56  ;;  %v2854_v32 = vunpack.i.l.bf16 %v2853_v56 }
  0xce   : > { %3137 = vrot.lane.b32.xlu1 %v4245_v37, %s3230_s16 }
  0xcf   : > { %3142 = vrot.lane.b32.xlu0 %v4343_v28, %s3228_s9  ;;  %v1712_v38 = vsel %vm1588_vm4, %v1680_v45, %v2849_v16  ;;  %v1713_v48 = vsel %vm1588_vm4, %v1681_v20, %v2850_v13  ;;  %v1615_v36 = vsel %vm1588_vm4, %v1582_v11, %v2854_v32  ;;  %v1616_v47 = vsel %vm1588_vm4, %v1583_v8, %v2855_v15 }
  0xd0   : > { %v2858_v37 = vpop.permute.xlu1 %2857  ;;  %v2863_v57 = vpop.permute.xlu0 %2862  ;;  %v2845_v45 = vunpack.i.h.bf16 %v2843_v62  ;;  %v2745_v20 = vunpack.i.h.bf16 %v4067_v31  ;;  %v5046_v62 = vld [vmem:[#allocation15_spill] sm:$0xff] }
  0xd1   : > { %v2860_v42 = vunpack.i.h.bf16 %v2858_v37  ;;  %v2859_v39 = vunpack.i.l.bf16 %v2858_v37  ;;  %v2865_v55 = vunpack.i.h.bf16 %v2863_v57  ;;  %v2864_v26 = vunpack.i.l.bf16 %v2863_v57 }
  0xd2   : > { %3147 = vrot.lane.b32.xlu1 %v4266_v59, %s3228_s9  ;;  %v5045_v59 = vld [vmem:[#allocation16_spill] sm:$0xff] }
  0xd3   : > { %3152 = vrot.lane.b32.xlu0 %v4354_v19, %s3229_s10  ;;  %v1744_v52 = vsel %vm1621_vm5, %v1712_v38, %v2859_v39  ;;  %v1745_v41 = vsel %vm1621_vm5, %v1713_v48, %v2860_v42  ;;  %v1648_v2 = vsel %vm1621_vm5, %v1615_v36, %v2864_v26  ;;  %v1649_v56 = vsel %vm1621_vm5, %v1616_v47, %v2865_v55 }
  0xd4   : > { %v2868_v16 = vpop.permute.xlu1 %2867  ;;  %v2873_v13 = vpop.permute.xlu0 %2872  ;;  %v1790_v40 = vpack.c.bf16 %v1745_v41, %v1744_v52  ;;  %v1789_v32 = vpack.c.bf16 %v1649_v56, %v1648_v2  ;;  %v2744_v42 = vunpack.i.l.bf16 %v4067_v31  ;;  %v1658_v39 = vsel %vm1555_vm3, %v5046_v62, %v2845_v45  ;;  %v5048_v56 = vld [vmem:[#allocation6_spill] sm:$0xff] }
  0xd5   : > { %v2869_v15 = vunpack.i.l.bf16 %v2868_v16  ;;  %v2875_v8 = vunpack.i.h.bf16 %v2873_v13  ;;  %v2874_v22 = vunpack.i.l.bf16 %v2873_v13  ;;  %v1561_v13 = vsel %vm1555_vm3, %v5048_v56, %v2745_v20 }
  0xd6   : > { %3157 = vrot.lane.b32.xlu1 %v4290_v1, %s3229_s10  ;;  %2096 = vmatprep.mubr.bf16.mxu1 %v1790_v40  ;;  %v5049_v40 = vld [vmem:[#allocation5_spill] sm:$0xff] }
  0xd7   : > { %v1659_v11 = vsel %vm1555_vm3, %v5045_v59, %v2869_v15  ;;  %3162 = vrot.lane.b32.xlu0 %v3161_v17, %s3230_s16  ;;  %2097 = vmatmul.mubr.bf16.gmra.mxu1 %v1789_v32  ;;  %v1690_v38 = vsel %vm1588_vm4, %v1658_v39, %v2874_v22  ;;  %v5047_v17 = vld [vmem:[#allocation38_spill] sm:$0xff]  ;;  %v1560_v32 = vsel %vm1555_vm3, %v5049_v40, %v2744_v42  ;;  %v5050_v59 = vld [vmem:[#allocation40_spill] sm:$0xff] }
  0xd8   : > { %v2878_v37 = vpop.permute.xlu1 %2877  ;;  %v2883_v57 = vpop.permute.xlu0 %2882  ;;  %v1691_v1 = vsel %vm1588_vm4, %v1659_v11, %v2875_v8  ;;  %v5052_v40 = vld [vmem:[#allocation34_spill] sm:$0xff] }
  0xd9   : > { %v2885_v55 = vunpack.i.h.bf16 %v2883_v57  ;;  %v2884_v26 = vunpack.i.l.bf16 %v2883_v57  ;;  %v2880_v48 = vunpack.i.h.bf16 %v2878_v37  ;;  %v2879_v36 = vunpack.i.l.bf16 %v2878_v37 }
  0xda   : > { %3167 = vrot.lane.b32.xlu1 %v4312_v33, %s3230_s16  ;;  %v3191_v37 = vpack.i.bf16 %v5033_v46, %v5034_v10  ;;  %v2870_v57 = vunpack.i.h.bf16 %v2868_v16 }
  0xdb   : > { %3172 = vrot.lane.b32.xlu0 %v5047_v17, %s3228_s9  ;;  %v1722_v47 = vsel %vm1621_vm5, %v1690_v38, %v2884_v26  ;;  %v1723_v31 = vsel %vm1621_vm5, %v1691_v1, %v2885_v55  ;;  %v1594_v33 = vsel %vm1588_vm4, %v1561_v13, %v2880_v48  ;;  %v1593_v8 = vsel %vm1588_vm4, %v1560_v32, %v2879_v36 }
  0xdc   : > { %v2888_v52 = vpop.permute.xlu1 %2887  ;;  %v2893_v41 = vpop.permute.xlu0 %2892  ;;  %v1757_v2 = vpack.c.bf16 %v1723_v31, %v1722_v47  ;;  %v1682_v1 = vsel %vm1555_vm3, %v3793_v50, %v2870_v57 }
  0xdd   : > { %v2890_v45 = vunpack.i.h.bf16 %v2888_v52  ;;  %v2889_v15 = vunpack.i.l.bf16 %v2888_v52  ;;  %v2894_v22 = vunpack.i.l.bf16 %v2893_v41  ;;  %v2895_v10 = vunpack.i.h.bf16 %v2893_v41  ;;  %v5051_v41 = vld [vmem:[#allocation35_spill] sm:$0xff] }
  0xde   : > { %3177 = vrot.lane.b32.xlu1 %v4322_v53, %s3228_s9  ;;  %2008 = vmatprep.mubr.bf16.mxu0 %v1757_v2 }
  0xdf   : > { %3182 = vrot.lane.b32.xlu0 %v5050_v59, %s3229_s10  ;;  %v1626_v11 = vsel %vm1621_vm5, %v1593_v8, %v2889_v15  ;;  %v1627_v20 = vsel %vm1621_vm5, %v1594_v33, %v2890_v45  ;;  %v1683_v53 = vsel %vm1555_vm3, %v3796_v30, %v2894_v22  ;;  %v1584_v13 = vsel %vm1555_vm3, %v5051_v41, %v2895_v10  ;;  %v5054_v10 = vld [vmem:[#allocation13_spill] sm:$0xff] }
  0xe0   : > { %v2898_v42 = vpop.permute.xlu1 %2897  ;;  %v2903_v62 = vpop.permute.xlu0 %2902  ;;  %v1756_v39 = vpack.c.bf16 %v1627_v20, %v1626_v11  ;;  %v2750_v11 = vunpack.i.h.bf16 %v4100_v23  ;;  %v2749_v20 = vunpack.i.l.bf16 %v4100_v23 }
  0xe1   : > { %v2905_v55 = vunpack.i.h.bf16 %v2903_v62  ;;  %v2904_v26 = vunpack.i.l.bf16 %v2903_v62  ;;  %v2899_v16 = vunpack.i.l.bf16 %v2898_v42 }
  0xe2   : > { %3187 = vrot.lane.b32.xlu1 %v4343_v28, %s3229_s10  ;;  %2009 = vmatmul.mubr.bf16.gmra.mxu0 %v1756_v39 }
  0xe3   : > { %3192 = vrot.lane.b32.xlu0 %v3191_v37, %s3230_s16  ;;  %v1714_v17 = vsel %vm1588_vm4, %v1682_v1, %v2904_v26  ;;  %v1715_v47 = vsel %vm1588_vm4, %v1683_v53, %v2905_v55  ;;  %v1585_v32 = vsel %vm1555_vm3, %v5052_v40, %v2899_v16  ;;  %v2900_v37 = vunpack.i.h.bf16 %v2898_v42 }
  0xe4   : > { %v2908_v38 = vpop.permute.xlu1 %2907  ;;  %v2913_v46 = vpop.permute.xlu0 %2912  ;;  %v1563_v16 = vsel %vm1555_vm3, %v5054_v10, %v2750_v11 }
  0xe5   : > { %v2915_v48 = vunpack.i.h.bf16 %v2913_v46  ;;  %v2914_v36 = vunpack.i.l.bf16 %v2913_v46  ;;  %v2910_v28 = vunpack.i.h.bf16 %v2908_v38  ;;  %v2909_v31 = vunpack.i.l.bf16 %v2908_v38  ;;  %v5053_v38 = vld [vmem:[#allocation18_spill] sm:$0xff] }
  0xe6   : > { %3197 = vrot.lane.b32.xlu1 %v4354_v19, %s3230_s16  ;;  %s4691_s16 = scalar_lea.vmem %s4855_s6, %s3286_s23 }
  0xe7   : > { %v1746_v30 = vsel %vm1621_vm5, %v1714_v17, %v2914_v36  ;;  %v1747_v52 = vsel %vm1621_vm5, %v1715_v47, %v2915_v48  ;;  %v1617_v33 = vsel %vm1588_vm4, %v1584_v13, %v2909_v31  ;;  %v1618_v8 = vsel %vm1588_vm4, %v1585_v32, %v2910_v28  ;;  %v5055_v48 = vld [vmem:[#allocation14_spill] sm:$0xff]  ;;  %v5056_v17 = vld [vmem:[#allocation17_spill] sm:$0xff] }
  0xe8   : > { %v2918_v50 = vpop.permute.xlu1 %2917  ;;  %v2923_v2 = vpop.permute.xlu0 %2922  ;;  %v1793_v56 = vpack.c.bf16 %v1747_v52, %v1746_v30  ;;  %v1562_v36 = vsel %vm1555_vm3, %v5055_v48, %v2749_v20  ;;  %v1660_v23 = vsel %vm1555_vm3, %v5056_v17, %v2900_v37 }
  0xe9   : > { %v2920_v45 = vunpack.i.h.bf16 %v2918_v50  ;;  %v2919_v15 = vunpack.i.l.bf16 %v2918_v50  ;;  %v2924_v19 = vunpack.i.l.bf16 %v2923_v2  ;;  %v2925_v11 = vunpack.i.h.bf16 %v2923_v2 }
  0xea   : > { %2104 = vmatprep.mubr.bf16.mxu1 %v1793_v56 }
  0xeb   : > { %v1650_v22 = vsel %vm1621_vm5, %v1617_v33, %v2919_v15  ;;  %v1651_v59 = vsel %vm1621_vm5, %v1618_v8, %v2920_v45  ;;  %v1661_v46 = vsel %vm1555_vm3, %v5053_v38, %v2924_v19  ;;  %v1684_v38 = vsel %vm1555_vm3, %v3783_v51, %v2925_v11 }
  0xec   : > { %v2928_v57 = vpop.permute.xlu1 %2927  ;;  %v2933_v62 = vpop.permute.xlu0 %2932  ;;  %v1792_v39 = vpack.c.bf16 %v1651_v59, %v1650_v22 }
  0xed   : > { %v2930_v55 = vunpack.i.h.bf16 %v2928_v57  ;;  %v2929_v26 = vunpack.i.l.bf16 %v2928_v57  ;;  %v2935_v53 = vunpack.i.h.bf16 %v2933_v62  ;;  %v2934_v1 = vunpack.i.l.bf16 %v2933_v62 }
  0xee   : > { %2105 = vmatmul.mubr.bf16.gmra.mxu1 %v1792_v39 }
  0xef   : > { %v1692_v50 = vsel %vm1588_vm4, %v1660_v23, %v2929_v26  ;;  %v1693_v56 = vsel %vm1588_vm4, %v1661_v46, %v2930_v55  ;;  %v1596_v41 = vsel %vm1588_vm4, %v1563_v16, %v2935_v53  ;;  %v1595_v13 = vsel %vm1588_vm4, %v1562_v36, %v2934_v1  ;;  %v5057_v46 = vld [vmem:[#allocation44_spill] sm:$0xff] }
  0xf0   : > { %v2938_v42 = vpop.permute.xlu1 %2937  ;;  %v2943_v47 = vpop.permute.xlu0 %2942 }
  0xf1   : > { %v2940_v28 = vunpack.i.h.bf16 %v2938_v42  ;;  %v2939_v31 = vunpack.i.l.bf16 %v2938_v42  ;;  %v2945_v30 = vunpack.i.h.bf16 %v2943_v47  ;;  %v2944_v52 = vunpack.i.l.bf16 %v2943_v47 }
  0xf3   : > { %v1724_v40 = vsel %vm1621_vm5, %v1692_v50, %v2939_v31  ;;  %v1725_v32 = vsel %vm1621_vm5, %v1693_v56, %v2940_v28  ;;  %v1628_v45 = vsel %vm1621_vm5, %v1595_v13, %v2944_v52  ;;  %v1629_v15 = vsel %vm1621_vm5, %v1596_v41, %v2945_v30 }
  0xf4   : > { %v2948_v33 = vpop.permute.xlu1 %2947  ;;  %v2953_v8 = vpop.permute.xlu0 %2952  ;;  %v1760_v19 = vpack.c.bf16 %v1725_v32, %v1724_v40  ;;  %v1759_v22 = vpack.c.bf16 %v1629_v15, %v1628_v45  ;;  %v1752_v40 = vpack.c.bf16 %v3679_v5, %v3603_v54 }
  0xf5   : > { %v2954_v59 = vunpack.i.l.bf16 %v2953_v8  ;;  %v2950_v20 = vunpack.i.h.bf16 %v2948_v33  ;;  %v2949_v37 = vunpack.i.l.bf16 %v2948_v33  ;;  %v2955_v32 = vunpack.i.h.bf16 %v2953_v8 }
  0xf6   : > { %2016 = vmatprep.mubr.bf16.mxu0 %v1760_v19  ;;  %v5058_v19 = vld [vmem:[#allocation22_spill] sm:$0xff] }
  0xf7   : > { %2017 = vmatmul.mubr.bf16.gmra.mxu0 %v1759_v22  ;;  %v1587_v1 = vsel %vm1555_vm3, %v3745_v49, %v2954_v59  ;;  %v1586_v10 = vsel %vm1555_vm3, %v5057_v46, %v2950_v20  ;;  %v1685_v2 = vsel %vm1555_vm3, %v3786_v0, %v2949_v37  ;;  %v2755_v59 = vunpack.i.h.bf16 %v4108_v43 }
  0xf8   : > { %v2958_v57 = vpop.permute.xlu1 %2957  ;;  %v2963_v62 = vpop.permute.xlu0 %2962  ;;  %v2754_v37 = vunpack.i.l.bf16 %v4108_v43  ;;  %v1758_v43 = vpack.c.bf16 %v3768_v61, %v3888_v34  ;;  %v2760_v34 = vunpack.i.h.bf16 %v4154_v35 }
  0xf9   : > { %v2960_v39 = vunpack.i.h.bf16 %v2958_v57  ;;  %v2959_v55 = vunpack.i.l.bf16 %v2958_v57  ;;  %v2965_v26 = vunpack.i.h.bf16 %v2963_v62  ;;  %v2964_v53 = vunpack.i.l.bf16 %v2963_v62  ;;  %v5059_v57 = vld [vmem:[#allocation21_spill] sm:$0xff] }
  0xfa   : > { %v1662_v54 = vsel %vm1555_vm3, %v5059_v57, %v2955_v32 }
  0xfb   : > { %v1716_v47 = vsel %vm1588_vm4, %v1684_v38, %v2959_v55  ;;  %v1717_v28 = vsel %vm1588_vm4, %v1685_v2, %v2960_v39  ;;  %v1619_v49 = vsel %vm1588_vm4, %v1586_v10, %v2964_v53  ;;  %v1620_v51 = vsel %vm1588_vm4, %v1587_v1, %v2965_v26 }
  0xfc   : > { %v2968_v16 = vpop.permute.xlu1 %2967  ;;  %v2973_v48 = vpop.permute.xlu0 %2972  ;;  %v1565_v2 = vsel %vm1555_vm3, %v3436_v6, %v2755_v59 }
  0xfd   : > { %v2970_v36 = vunpack.i.h.bf16 %v2968_v16  ;;  %v2969_v17 = vunpack.i.l.bf16 %v2968_v16  ;;  %v2975_v23 = vunpack.i.h.bf16 %v2973_v48  ;;  %v2974_v42 = vunpack.i.l.bf16 %v2973_v48 }
  0xfe   : > { %v1564_v16 = vsel %vm1555_vm3, %v3432_v63, %v2754_v37  ;;  %v2759_v63 = vunpack.i.l.bf16 %v4154_v35 }
  0xff   : > { %v1748_v31 = vsel %vm1621_vm5, %v1716_v47, %v2969_v17  ;;  %v1749_v30 = vsel %vm1621_vm5, %v1717_v28, %v2970_v36  ;;  %v1652_v0 = vsel %vm1621_vm5, %v1619_v49, %v2974_v42  ;;  %v1653_v52 = vsel %vm1621_vm5, %v1620_v51, %v2975_v23 }
 0x100   : > { %v2978_v50 = vpop.permute.xlu1 %2977  ;;  %v2983_v56 = vpop.permute.xlu0 %2982  ;;  %v1796_v41 = vpack.c.bf16 %v1749_v30, %v1748_v31  ;;  %v1795_v13 = vpack.c.bf16 %v1653_v52, %v1652_v0  ;;  %v5060_v47 = vpack.c.bf16 %v3713_v4, %v3710_v58  ;;  %v5061_v4 = vld [vmem:[#allocation49_spill] sm:$0xff] }
 0x101   : > { %v2979_v45 = vunpack.i.l.bf16 %v2978_v50  ;;  %v2985_v15 = vunpack.i.h.bf16 %v2983_v56  ;;  %v2984_v33 = vunpack.i.l.bf16 %v2983_v56  ;;  %v2980_v28 = vunpack.i.h.bf16 %v2978_v50  ;;  %v5064_v50 = vld [vmem:[#allocation25_spill] sm:$0xff] }
 0x102   : > { %2112 = vmatprep.mubr.bf16.mxu1 %v1796_v41  ;;  %v5062_v41 = vld [vmem:[#allocation19_spill] sm:$0xff] }
 0x103   : > { %v1663_v22 = vsel %vm1555_vm3, %v5058_v19, %v2979_v45  ;;  %2113 = vmatmul.mubr.bf16.gmra.mxu1 %v1795_v13  ;;  %v1694_v39 = vsel %vm1588_vm4, %v1662_v54, %v2984_v33  ;;  %v1567_v13 = vsel %vm1555_vm3, %v5062_v41, %v2760_v34  ;;  %v1664_v32 = vsel %vm1555_vm3, %v5064_v50, %v2980_v28  ;;  %v5065_v54 = vld [vmem:[#allocation56_spill] sm:$0xff]  ;;  %v5073_v28 = vld [vmem:[#allocation59_spill] sm:$0xff] }
 0x104   : > { %v2988_v11 = vpop.permute.xlu1 %2987  ;;  %v2993_v20 = vpop.permute.xlu0 %2992  ;;  %2661 = vmatprep.mubr.msk.bf16.mxu1 %vm1555_vm3, %v1752_v40  ;;  %v1695_v62 = vsel %vm1588_vm4, %v1663_v22, %v2985_v15  ;;  %v5063_v40 = vld [vmem:[#allocation20_spill] sm:$0xff] }
 0x105   : > { %v2995_v5 = vunpack.i.h.bf16 %v2993_v20  ;;  %v2994_v8 = vunpack.i.l.bf16 %v2993_v20  ;;  %v2990_v55 = vunpack.i.h.bf16 %v2988_v11  ;;  %v2989_v26 = vunpack.i.l.bf16 %v2988_v11 }
 0x106   : > { %v1566_v35 = vsel %vm1555_vm3, %v5063_v40, %v2759_v63 }
 0x107   : > { %v1726_v53 = vsel %vm1621_vm5, %v1694_v39, %v2994_v8  ;;  %v1727_v1 = vsel %vm1621_vm5, %v1695_v62, %v2995_v5  ;;  %v1597_v17 = vsel %vm1588_vm4, %v1564_v16, %v2989_v26  ;;  %v1598_v23 = vsel %vm1588_vm4, %v1565_v2, %v2990_v55  ;;  %v5066_v5 = vld [vmem:[#allocation54_spill] sm:$0xff]  ;;  %v5069_v2 = vld [vmem:[#allocation57_spill] sm:$0xff] }
 0x108   : > { %v2998_v38 = vpop.permute.xlu1 %2997  ;;  %v3003_v46 = vpop.permute.xlu0 %3002  ;;  %v1763_v10 = vpack.c.bf16 %v1727_v1, %v1726_v53  ;;  %v5067_v8 = vpack.c.bf16 %v5065_v54, %v5066_v5 }
 0x109   : > { %v3000_v48 = vunpack.i.h.bf16 %v2998_v38  ;;  %v2999_v36 = vunpack.i.l.bf16 %v2998_v38  ;;  %v3004_v42 = vunpack.i.l.bf16 %v3003_v46 }
 0x10a   : > { %2024 = vmatprep.mubr.bf16.mxu0 %v1763_v10 }
 0x10b   : > { %2662 = vmatmul.mubr.msk.bf16.vlgmr.msra.gmra.mxu1 %vm1555_vm3, %v5060_v47  ;;  %v1630_v61 = vsel %vm1621_vm5, %v1597_v17, %v2999_v36  ;;  %v1631_v6 = vsel %vm1621_vm5, %v1598_v23, %v3000_v48  ;;  %v1665_v56 = vsel %vm1555_vm3, %v5061_v4, %v3004_v42  ;;  %v3005_v48 = vunpack.i.h.bf16 %v3003_v46  ;;  %v5071_v42 = vld [vmem:[#allocation60_spill] sm:$0xff]  ;;  %v5074_v4 = vld [vmem:[#allocation62_spill] sm:$0xff] }
 0x10c   : > { %v3008_v49 = vpop.permute.xlu1 %3007  ;;  %v3013_v51 = vpop.permute.xlu0 %3012  ;;  %v1762_v31 = vpack.c.bf16 %v1631_v6, %v1630_v61  ;;  %2665 = vmatprep.mubr.msk.bf16.mxu1 %vm1555_vm3, %v1758_v43  ;;  %v5068_v43 = vld [vmem:[#allocation4_spill] sm:$0xff]  ;;  %v5072_v61 = vld [vmem:[#allocation70_spill] sm:$0xff] }
 0x10d   : > { %v3010_v30 = vunpack.i.h.bf16 %v3008_v49  ;;  %v3009_v0 = vunpack.i.l.bf16 %v3008_v49  ;;  %v3015_v52 = vunpack.i.h.bf16 %v3013_v51  ;;  %v3014_v58 = vunpack.i.l.bf16 %v3013_v51 }
 0x10e   : > { %2025 = vmatmul.mubr.bf16.gmra.mxu0 %v1762_v31  ;;  %v5070_v16 = vpack.c.bf16 %v5068_v43, %v5069_v2  ;;  %v2764_v6 = vunpack.i.l.bf16 %v5072_v61  ;;  %v1666_v49 = vsel %vm1555_vm3, %v5073_v28, %v3005_v48  ;;  %v5083_v2 = vld [vmem:[#allocation64_spill] sm:$0xff]  ;;  %v5084_v48 = vpack.c.bf16 %v4114_v21, %v4111_v9 }
 0x10f   : > { %v1696_v11 = vsel %vm1588_vm4, %v1664_v32, %v3009_v0  ;;  %v1697_v20 = vsel %vm1588_vm4, %v1665_v56, %v3010_v30  ;;  %v1600_v37 = vsel %vm1588_vm4, %v1567_v13, %v3015_v52  ;;  %v1599_v57 = vsel %vm1588_vm4, %v1566_v35, %v3014_v58  ;;  %v5075_v56 = vld [vmem:[#allocation47_spill] sm:$0xff] }
 0x110   : > { %v3018_v45 = vpop.permute.xlu1 %3017  ;;  %v3023_v15 = vpop.permute.xlu0 %3022  ;;  %v5076_v41 = vpack.c.bf16 %v5074_v4, %v5075_v56 }
 0x111   : > { %v3020_v33 = vunpack.i.h.bf16 %v3018_v45  ;;  %v3019_v19 = vunpack.i.l.bf16 %v3018_v45  ;;  %v3025_v22 = vunpack.i.h.bf16 %v3023_v15  ;;  %v3024_v59 = vunpack.i.l.bf16 %v3023_v15  ;;  %v5077_v45 = vld [vmem:[#allocation67_spill] sm:$0xff]  ;;  %v5078_v15 = vld [vmem:[#allocation66_spill] sm:$0xff] }
 0x113   : > { %2666 = vmatmul.mubr.msk.bf16.gmra.mxu1 %vm1555_vm3, %v5067_v8  ;;  %v1728_v62 = vsel %vm1621_vm5, %v1696_v11, %v3019_v19  ;;  %v1729_v39 = vsel %vm1621_vm5, %v1697_v20, %v3020_v33  ;;  %v1632_v55 = vsel %vm1621_vm5, %v1599_v57, %v3024_v59  ;;  %v1633_v26 = vsel %vm1621_vm5, %v1600_v37, %v3025_v22  ;;  %v5080_v19 = vld [vmem:[#allocation23_spill] sm:$0xff]  ;;  %v5081_v59 = vld [vmem:[#allocation24_spill] sm:$0xff] }
 0x114   : > { %v3028_v53 = vpop.permute.xlu1 %3027  ;;  %v3033_v1 = vpop.permute.xlu0 %3032  ;;  %v1766_v38 = vpack.c.bf16 %v1729_v39, %v1728_v62  ;;  %v1765_v10 = vpack.c.bf16 %v1633_v26, %v1632_v55  ;;  %2669 = vmatprep.mubr.msk.bf16.mxu1 %vm1555_vm3, %v5070_v16  ;;  %v5079_v33 = vpack.c.bf16 %v5077_v45, %v5078_v15  ;;  %v1568_v22 = vsel %vm1555_vm3, %v5080_v19, %v2764_v6 }
 0x115   : > { %v3029_v36 = vunpack.i.l.bf16 %v3028_v53  ;;  %v3035_v17 = vunpack.i.h.bf16 %v3033_v1  ;;  %v3034_v23 = vunpack.i.l.bf16 %v3033_v1  ;;  %v3030_v51 = vunpack.i.h.bf16 %v3028_v53 }
 0x116   : > { %2032 = vmatprep.mubr.bf16.mxu0 %v1766_v38 }
 0x117   : > { %v1667_v47 = vsel %vm1555_vm3, %v5071_v42, %v3029_v36  ;;  %2033 = vmatmul.mubr.bf16.gmra.mxu0 %v1765_v10  ;;  %v1698_v0 = vsel %vm1588_vm4, %v1666_v49, %v3034_v23  ;;  %v1569_v11 = vsel %vm1555_vm3, %v5081_v59, %v3030_v51  ;;  %v5082_v10 = vld [vmem:[#allocation65_spill] sm:$0xff]  ;;  %v5085_v23 = vpack.c.bf16 %v4169_v12, %v4166_v60 }
 0x118   : > { %v3038_v34 = vpop.permute.xlu1 %3037  ;;  %v3043_v63 = vpop.permute.xlu0 %3042  ;;  %v1699_v46 = vsel %vm1588_vm4, %v1667_v47, %v3035_v17  ;;  %v5087_v12 = vld [vmem:[#allocation37_spill] sm:$0xff] }
 0x119   : > { %v3045_v31 = vunpack.i.h.bf16 %v3043_v63  ;;  %v3044_v30 = vunpack.i.l.bf16 %v3043_v63  ;;  %v3040_v52 = vunpack.i.h.bf16 %v3038_v34  ;;  %v3039_v58 = vunpack.i.l.bf16 %v3038_v34 }
 0x11b   : > { %2670 = vmatmul.mubr.msk.bf16.gmra.mxu1 %vm1555_vm3, %v5076_v41  ;;  %v1730_v13 = vsel %vm1621_vm5, %v1698_v0, %v3044_v30  ;;  %v1731_v40 = vsel %vm1621_vm5, %v1699_v46, %v3045_v31  ;;  %v1601_v57 = vsel %vm1588_vm4, %v1568_v22, %v3039_v58  ;;  %v1602_v54 = vsel %vm1588_vm4, %v1569_v11, %v3040_v52  ;;  %v5086_v30 = vld [vmem:[#allocation36_spill] sm:$0xff]  ;;  %v5088_v46 = vld [vmem:[#allocation50_spill] sm:$0xff] }
 0x11c   : > { %v3048_v35 = vpop.permute.xlu1 %3047  ;;  %v3053_v50 = vpop.permute.xlu0 %3052  ;;  %v1769_v32 = vpack.c.bf16 %v1731_v40, %v1730_v13  ;;  %2673 = vmatprep.mubr.msk.bf16.mxu1 %vm1555_vm3, %v5079_v33  ;;  %v1782_v60 = vpack.c.bf16 %v5087_v12, %v5086_v30  ;;  %v5089_v52 = vld [vmem:[#allocation58_spill] sm:$0xff]  ;;  %v5099_v30 = vld [vmem:[#allocation48_spill] sm:$0xff]  ;;  %v5100_v12 = vld [vmem:[#allocation51_spill] sm:$0xff] }
 0x11d   : > { %v3050_v20 = vunpack.i.h.bf16 %v3048_v35  ;;  %v3049_v37 = vunpack.i.l.bf16 %v3048_v35  ;;  %v3055_v5 = vunpack.i.h.bf16 %v3053_v50  ;;  %v3054_v8 = vunpack.i.l.bf16 %v3053_v50 }
 0x11e   : > { %2040 = vmatprep.mubr.bf16.mxu0 %v1769_v32  ;;  %v5090_v35 = vpack.c.bf16 %v4179_v24, %v4176_v25  ;;  %v5093_v25 = vld [vmem:[#allocation72_spill] sm:$0xff] }
 0x11f   : > { %v1634_v62 = vsel %vm1621_vm5, %v1601_v57, %v3049_v37  ;;  %v1635_v39 = vsel %vm1621_vm5, %v1602_v54, %v3050_v20  ;;  %v1669_v43 = vsel %vm1555_vm3, %v5082_v10, %v3055_v5  ;;  %v1668_v16 = vsel %vm1555_vm3, %v5083_v2, %v3054_v8  ;;  %v5091_v20 = vld [vmem:[#allocation28_spill] sm:$0xff]  ;;  %v5092_v37 = vld [vmem:[#allocation30_spill] sm:$0xff]  ;;  %v5094_v54 = vld [vmem:[#allocation71_spill] sm:$0xff] }
 0x120   : > { %v3058_v55 = vpop.permute.xlu1 %3057  ;;  %v3063_v26 = vpop.permute.xlu0 %3062  ;;  %v1768_v53 = vpack.c.bf16 %v1635_v39, %v1634_v62  ;;  %v1785_v57 = vpack.c.bf16 %v5092_v37, %v5091_v20  ;;  %v5095_v39 = vld [vmem:[#allocation39_spill] sm:$0xff] }
 0x121   : > { %v3065_v1 = vunpack.i.h.bf16 %v3063_v26  ;;  %v3064_v38 = vunpack.i.l.bf16 %v3063_v26  ;;  %v3060_v42 = vunpack.i.h.bf16 %v3058_v55  ;;  %v3059_v47 = vunpack.i.l.bf16 %v3058_v55  ;;  %v5096_v55 = vld [vmem:[#allocation42_spill] sm:$0xff] }
 0x122   : > { %2041 = vmatmul.mubr.bf16.gmra.mxu0 %v1768_v53  ;;  %v1788_v26 = vpack.c.bf16 %v5096_v55, %v5095_v39 }
 0x123   : > { %2674 = vmatmul.mubr.msk.bf16.gmra.mxu1 %vm1555_vm3, %v5084_v48  ;;  %v1700_v34 = vsel %vm1588_vm4, %v1668_v16, %v3064_v38  ;;  %v1701_v63 = vsel %vm1588_vm4, %v1669_v43, %v3065_v1  ;;  %v1571_v0 = vsel %vm1555_vm3, %v5088_v46, %v3060_v42  ;;  %v1570_v58 = vsel %vm1555_vm3, %v5089_v52, %v3059_v47 }
 0x124   : > { %v3068_v36 = vpop.permute.xlu1 %3067  ;;  %v3073_v17 = vpop.permute.xlu0 %3072  ;;  %2677 = vmatprep.mubr.msk.bf16.mxu1 %vm1555_vm3, %v5085_v23 }
 0x125   : > { %v3075_v61 = vunpack.i.h.bf16 %v3073_v17  ;;  %v3074_v6 = vunpack.i.l.bf16 %v3073_v17  ;;  %v3070_v28 = vunpack.i.h.bf16 %v3068_v36  ;;  %v3069_v49 = vunpack.i.l.bf16 %v3068_v36  ;;  %v5097_v36 = vld [vmem:[#allocation52_spill] sm:$0xff] }
 0x127   : > { %v1732_v9 = vsel %vm1621_vm5, %v1700_v34, %v3074_v6  ;;  %v1733_v21 = vsel %vm1621_vm5, %v1701_v63, %v3075_v61  ;;  %v1603_v13 = vsel %vm1588_vm4, %v1570_v58, %v3069_v49  ;;  %v1604_v40 = vsel %vm1588_vm4, %v1571_v0, %v3070_v28  ;;  %v5098_v61 = vld [vmem:[#allocation61_spill] sm:$0xff] }
 0x128   : > { %v3078_v51 = vpop.permute.xlu1 %3077  ;;  %v1772_v31 = vpack.c.bf16 %v1733_v21, %v1732_v9 }
 0x129   : > { %v3080_v4 = vunpack.i.h.bf16 %v3078_v51  ;;  %v3079_v56 = vunpack.i.l.bf16 %v3078_v51  ;;  %v3083_v41 = vpop.permute.xlu0 %3082 }
 0x12a   : > { %2048 = vmatprep.mubr.bf16.mxu0 %v1772_v31  ;;  %v3085_v45 = vunpack.i.h.bf16 %v3083_v41  ;;  %v3084_v15 = vunpack.i.l.bf16 %v3083_v41 }
 0x12b   : > { %2678 = vmatmul.mubr.msk.bf16.gmra.mxu1 %vm1555_vm3, %v5090_v35  ;;  %v1636_v50 = vsel %vm1621_vm5, %v1603_v13, %v3079_v56  ;;  %v1637_v32 = vsel %vm1621_vm5, %v1604_v40, %v3080_v4 }
 0x12c   : > { %v3088_v33 = vpop.permute.xlu1 %3087  ;;  %v1771_v19 = vpack.c.bf16 %v1637_v32, %v1636_v50  ;;  %2681 = vmatprep.mubr.msk.bf16.mxu1 %vm1555_vm3, %v1782_v60  ;;  %v1671_v24 = vsel %vm1555_vm3, %v5093_v25, %v3085_v45  ;;  %v1670_v5 = vsel %vm1555_vm3, %v5094_v54, %v3084_v15  ;;  %v1791_v60 = vpack.c.bf16 %v5100_v12, %v5099_v30  ;;  %v5101_v32 = vld [vmem:[#allocation46_spill] sm:$0xff]  ;;  %v5102_v45 = vld [vmem:[#allocation45_spill] sm:$0xff] }
 0x12d   : > { %v3093_v22 = vpop.permute.xlu0 %3092  ;;  %v3090_v8 = vunpack.i.h.bf16 %v3088_v33  ;;  %v3089_v53 = vunpack.i.l.bf16 %v3088_v33  ;;  %v5103_v15 = vpack.c.bf16 %v5101_v32, %v5102_v45 }
 0x12e   : > { %2049 = vmatmul.mubr.bf16.gmra.mxu0 %v1771_v19  ;;  %v3095_v59 = vunpack.i.h.bf16 %v3093_v22  ;;  %v3094_v11 = vunpack.i.l.bf16 %v3093_v22 }
 0x12f   : > { %v1573_v17 = vsel %vm1555_vm3, %v5097_v36, %v3090_v8  ;;  %v1572_v6 = vsel %vm1555_vm3, %v5098_v61, %v3089_v53 }
 0x130   : > { %v3098_v62 = vpop.permute.xlu1 %3097  ;;  %v1702_v16 = vsel %vm1588_vm4, %v1670_v5, %v3094_v11  ;;  %v1703_v48 = vsel %vm1588_vm4, %v1671_v24, %v3095_v59  ;;  %v5105_v5 = vld [vmem:[#allocation63_spill] sm:$0xff] }
 0x131   : > { %v3103_v1 = vpop.permute.xlu0 %3102  ;;  %v3100_v38 = vunpack.i.h.bf16 %v3098_v62  ;;  %v3099_v10 = vunpack.i.l.bf16 %v3098_v62 }
 0x132   : > { %v3105_v43 = vunpack.i.h.bf16 %v3103_v1  ;;  %v3104_v2 = vunpack.i.l.bf16 %v3103_v1 }
 0x133   : > { %2682 = vmatmul.mubr.msk.bf16.gmra.mxu1 %vm1555_vm3, %v1785_v57  ;;  %v1605_v9 = vsel %vm1588_vm4, %v1572_v6, %v3099_v10  ;;  %v1606_v21 = vsel %vm1588_vm4, %v1573_v17, %v3100_v38  ;;  %v5104_v57 = vld [vmem:[#allocation53_spill] sm:$0xff]  ;;  %v5106_v38 = vld [vmem:[#allocation3_spill] sm:$0xff]  ;;  %v5107_v10 = vld [vmem:[#allocation2_spill] sm:$0xff] }
 0x134   : > { %v3108_v23 = vpop.permute.xlu1 %3107  ;;  %v1734_v42 = vsel %vm1621_vm5, %v1702_v16, %v3104_v2  ;;  %v1735_v47 = vsel %vm1621_vm5, %v1703_v48, %v3105_v43  ;;  %2685 = vmatprep.mubr.msk.bf16.mxu1 %vm1555_vm3, %v1788_v26  ;;  %v5108_v43 = vpack.c.bf16 %v5106_v38, %v5107_v10 }
 0x135   : > { %v3110_v34 = vunpack.i.h.bf16 %v3108_v23  ;;  %v3109_v63 = vunpack.i.l.bf16 %v3108_v23  ;;  %v3113_v28 = vpop.permute.xlu0 %3112  ;;  %v1775_v49 = vpack.c.bf16 %v1735_v47, %v1734_v42 }
 0x136   : > { %v3115_v46 = vunpack.i.h.bf16 %v3113_v28  ;;  %v3114_v0 = vunpack.i.l.bf16 %v3113_v28 }
 0x137   : > { %2056 = vmatprep.mubr.bf16.mxu0 %v1775_v49  ;;  %v1638_v51 = vsel %vm1621_vm5, %v1605_v9, %v3109_v63  ;;  %v1639_v31 = vsel %vm1621_vm5, %v1606_v21, %v3110_v34 }
 0x138   : > { %v3118_v52 = vpop.permute.xlu1 %3117  ;;  %v1774_v58 = vpack.c.bf16 %v1639_v31, %v1638_v51  ;;  %v1673_v13 = vsel %vm1555_vm3, %v4253_v14, %v3115_v46  ;;  %v1672_v40 = vsel %vm1555_vm3, %v4250_v29, %v3114_v0 }
 0x139   : > { %v3123_v4 = vpop.permute.xlu0 %3122  ;;  %v3120_v35 = vunpack.i.h.bf16 %v3118_v52  ;;  %v3119_v33 = vunpack.i.l.bf16 %v3118_v52  ;;  %v5109_v52 = vld [vmem:[#allocation68_spill] sm:$0xff] }
 0x13a   : > { %2057 = vmatmul.mubr.bf16.gmra.mxu0 %v1774_v58  ;;  %v3125_v56 = vunpack.i.h.bf16 %v3123_v4  ;;  %v3124_v41 = vunpack.i.l.bf16 %v3123_v4 }
 0x13b   : > { %2686 = vmatmul.mubr.msk.bf16.gmra.mxu1 %vm1555_vm3, %v1791_v60  ;;  %v1575_v29 = vsel %vm1555_vm3, %v5104_v57, %v3120_v35  ;;  %v1574_v8 = vsel %vm1555_vm3, %v5105_v5, %v3119_v33 }
 0x13c   : > { %v3128_v50 = vpop.permute.xlu1 %3127  ;;  %2689 = vmatprep.mubr.msk.bf16.mxu1 %vm1555_vm3, %v5103_v15  ;;  %v1704_v37 = vsel %vm1588_vm4, %v1672_v40, %v3124_v41  ;;  %v1705_v14 = vsel %vm1588_vm4, %v1673_v13, %v3125_v56 }
 0x13d   : > { %v3133_v19 = vpop.permute.xlu0 %3132  ;;  %v3130_v22 = vunpack.i.h.bf16 %v3128_v50  ;;  %v3129_v59 = vunpack.i.l.bf16 %v3128_v50 }
 0x13e   : > { %v3135_v11 = vunpack.i.h.bf16 %v3133_v19  ;;  %v3134_v20 = vunpack.i.l.bf16 %v3133_v19 }
 0x13f   : > { %v1607_v53 = vsel %vm1588_vm4, %v1574_v8, %v3129_v59  ;;  %v1608_v1 = vsel %vm1588_vm4, %v1575_v29, %v3130_v22 }
 0x140   : > { %v3138_v25 = vpop.permute.xlu1 %3137  ;;  %v1736_v24 = vsel %vm1621_vm5, %v1704_v37, %v3134_v20  ;;  %v1737_v54 = vsel %vm1621_vm5, %v1705_v14, %v3135_v11 }
 0x141   : > { %v3140_v62 = vunpack.i.h.bf16 %v3138_v25  ;;  %v3139_v39 = vunpack.i.l.bf16 %v3138_v25  ;;  %v3143_v55 = vpop.permute.xlu0 %3142  ;;  %v1778_v26 = vpack.c.bf16 %v1737_v54, %v1736_v24 }
 0x142   : > { %v3145_v48 = vunpack.i.h.bf16 %v3143_v55  ;;  %v3144_v36 = vunpack.i.l.bf16 %v3143_v55 }
 0x143   : > { %2064 = vmatprep.mubr.bf16.mxu0 %v1778_v26  ;;  %2690 = vmatmul.mubr.msk.bf16.gmra.mxu1 %vm1555_vm3, %v5108_v43  ;;  %v1640_v2 = vsel %vm1621_vm5, %v1607_v53, %v3139_v39  ;;  %v1641_v16 = vsel %vm1621_vm5, %v1608_v1, %v3140_v62  ;;  %v5110_v39 = vld [vmem:[#allocation55_spill] sm:$0xff]  ;;  %v5111_v53 = vld [vmem:[#allocation69_spill] sm:$0xff] }
 0x144   : > { %v3148_v17 = vpop.permute.xlu1 %3147  ;;  %v1777_v23 = vpack.c.bf16 %v1641_v16, %v1640_v2  ;;  %v1675_v6 = vsel %vm1555_vm3, %v4299_v18, %v3145_v48  ;;  %v1674_v34 = vsel %vm1555_vm3, %v4296_v7, %v3144_v36 }
 0x145   : > { %v3153_v42 = vpop.permute.xlu0 %3152  ;;  %v3150_v63 = vunpack.i.h.bf16 %v3148_v17  ;;  %v3149_v49 = vunpack.i.l.bf16 %v3148_v17 }
 0x146   : > { %2065 = vmatmul.mubr.bf16.gmra.mxu0 %v1777_v23  ;;  %v3155_v47 = vunpack.i.h.bf16 %v3153_v42  ;;  %v3154_v61 = vunpack.i.l.bf16 %v3153_v42 }
 0x147   : > { %v1577_v46 = vsel %vm1555_vm3, %v3932_v27, %v3150_v63  ;;  %v1576_v58 = vsel %vm1555_vm3, %v5109_v52, %v3149_v49 }
 0x148   : > { %v3158_v28 = vpop.permute.xlu1 %3157  ;;  %v1706_v12 = vsel %vm1588_vm4, %v1674_v34, %v3154_v61  ;;  %v1707_v60 = vsel %vm1588_vm4, %v1675_v6, %v3155_v47 }
 0x149   : > { %v3163_v9 = vpop.permute.xlu0 %3162  ;;  %v3160_v21 = vunpack.i.h.bf16 %v3158_v28  ;;  %v3159_v51 = vunpack.i.l.bf16 %v3158_v28 }
 0x14a   : > { %v3165_v31 = vunpack.i.h.bf16 %v3163_v9  ;;  %v3164_v30 = vunpack.i.l.bf16 %v3163_v9 }
 0x14b   : > { %v1609_v40 = vsel %vm1588_vm4, %v1576_v58, %v3159_v51  ;;  %v1610_v35 = vsel %vm1588_vm4, %v1577_v46, %v3160_v21 }
 0x14c   : > { %v3168_v0 = vpop.permute.xlu1 %3167  ;;  %v1738_v18 = vsel %vm1621_vm5, %v1706_v12, %v3164_v30  ;;  %v1739_v7 = vsel %vm1621_vm5, %v1707_v60, %v3165_v31 }
 0x14d   : > { %v3170_v4 = vunpack.i.h.bf16 %v3168_v0  ;;  %v3169_v56 = vunpack.i.l.bf16 %v3168_v0  ;;  %v3173_v41 = vpop.permute.xlu0 %3172  ;;  %v1781_v13 = vpack.c.bf16 %v1739_v7, %v1738_v18 }
 0x14e   : > { %v3175_v32 = vunpack.i.h.bf16 %v3173_v41  ;;  %v3174_v45 = vunpack.i.l.bf16 %v3173_v41 }
 0x14f   : > { %2072 = vmatprep.mubr.bf16.mxu0 %v1781_v13  ;;  %v1642_v50 = vsel %vm1621_vm5, %v1609_v40, %v3169_v56  ;;  %v1643_v27 = vsel %vm1621_vm5, %v1610_v35, %v3170_v4 }
 0x150   : > { %v3178_v15 = vpop.permute.xlu1 %3177  ;;  %v1780_v33 = vpack.c.bf16 %v1643_v27, %v1642_v50  ;;  %v1677_v11 = vsel %vm1555_vm3, %v5044_v44, %v3175_v32  ;;  %v1676_v20 = vsel %vm1555_vm3, %v5043_v3, %v3174_v45 }
 0x151   : > { %v3183_v19 = vpop.permute.xlu0 %3182  ;;  %v3180_v37 = vunpack.i.h.bf16 %v3178_v15  ;;  %v3179_v57 = vunpack.i.l.bf16 %v3178_v15 }
 0x152   : > { %2073 = vmatmul.mubr.bf16.gmra.mxu0 %v1780_v33  ;;  %v3185_v22 = vunpack.i.h.bf16 %v3183_v19  ;;  %v3184_v59 = vunpack.i.l.bf16 %v3183_v19 }
 0x153   : > { %v1579_v55 = vsel %vm1555_vm3, %v5110_v39, %v3180_v37  ;;  %v1578_v1 = vsel %vm1555_vm3, %v5111_v53, %v3179_v57  ;;  %v4682_v37 = vld [vmem:[%s4854_s5] ss:$0 sm:$0xff] }
 0x154   : > { %v3188_v14 = vpop.permute.xlu1 %3187  ;;  %v1708_v8 = vsel %vm1588_vm4, %v1676_v20, %v3184_v59  ;;  %v1709_v62 = vsel %vm1588_vm4, %v1677_v11, %v3185_v22  ;;  %v2282_v39 = vld [vmem:[%s4675_s11] sm:$0xff] }
 0x155   : > { %v3193_v29 = vpop.permute.xlu0 %3192  ;;  %v3190_v25 = vunpack.i.h.bf16 %v3188_v14  ;;  %v3189_v24 = vunpack.i.l.bf16 %v3188_v14 }
 0x156   : > { %v3195_v54 = vunpack.i.h.bf16 %v3193_v29  ;;  %v3194_v5 = vunpack.i.l.bf16 %v3193_v29 }
 0x157   : > { %v1611_v2 = vsel %vm1588_vm4, %v1578_v1, %v3189_v24  ;;  %v1612_v16 = vsel %vm1588_vm4, %v1579_v55, %v3190_v25  ;;  %v2284_v25 = vld [vmem:[%s4675_s11 + $0x10] sm:$0xff] }
 0x158   : > { %v3198_v26 = vpop.permute.xlu1 %3197  ;;  %v1740_v44 = vsel %vm1621_vm5, %v1708_v8, %v3194_v5  ;;  %v1741_v3 = vsel %vm1621_vm5, %v1709_v62, %v3195_v54 }
 0x159   : > { %v3200_v38 = vunpack.i.h.bf16 %v3198_v26  ;;  %v3199_v10 = vunpack.i.l.bf16 %v3198_v26  ;;  %v1784_v43 = vpack.c.bf16 %v1741_v3, %v1740_v44 }
 0x15b   : > { %2080 = vmatprep.mubr.bf16.mxu0 %v1784_v43  ;;  %v1644_v48 = vsel %vm1621_vm5, %v1611_v2, %v3199_v10  ;;  %v1645_v36 = vsel %vm1621_vm5, %v1612_v16, %v3200_v38  ;;  %v2285_v38 = vld [vmem:[%s4675_s11 + $0x18] sm:$0xff] }
 0x15c   : > { %v1783_v17 = vpack.c.bf16 %v1645_v36, %v1644_v48 }
 0x15e   : > { %2081 = vmatmul.mubr.bf16.gmra.mxu0 %v1783_v17  ;;  %v2283_v17 = vld [vmem:[%s4675_s11 + $0x8] sm:$0xff] }
 0x176   : > { %v2543_v63 = vpop.f32.mrf.mxu0 }
 0x178   : > { %v2544_v9 = vpop.f32.mrf.mxu0 }
 0x179   : > { %v2545_v59 = vadd.f32 %v2544_v9, %v2543_v63 }
 0x17a   : > { %v2546_v30 = vpop.f32.mrf.mxu0 }
 0x17b   : > { %v1995_v8 = vadd.f32 %v2545_v59, %v4682_v37 }
 0x17c   : > { %v2547_v60 = vpop.f32.mrf.mxu0 }
 0x17d   : > { %v2548_v24 = vadd.f32 %v2547_v60, %v2546_v30 }
 0x17f   : > { %v1998_v48 = vadd.f32 %v2548_v24, %v4682_v37 }
 0x182   : > { %v2615_v23 = vpop.f32.mrf.mxu1 }
 0x184   : > { %v2616_v42 = vpop.f32.mrf.mxu1 }
 0x185   : > { %v4653_v47 = vadd.f32 %v2616_v42, %v2615_v23 }
 0x186   : > { %v2618_v61 = vpop.f32.mrf.mxu1 }
 0x188   : > { %v2619_v6 = vpop.f32.mrf.mxu1 }
 0x189   : > { %v4655_v34 = vadd.f32 %v2619_v6, %v2618_v61 }
 0x18b   : > { %v2549_v46 = vpop.f32.mrf.mxu0 }
 0x18d   : > { %v2550_v0 = vpop.f32.mrf.mxu0 }
 0x18e   : > { %v2551_v19 = vadd.f32 %v2550_v0, %v2549_v46  ;;  %v2286_v0 = vld [vmem:[%s4675_s11 + $0x20] sm:$0xff] }
 0x18f   : > { %v2552_v18 = vpop.f32.mrf.mxu0 }
 0x190   : > { %v2003_v57 = vadd.f32 %v2551_v19, %v4682_v37  ;;  %v2287_v19 = vld [vmem:[%s4675_s11 + $0x28] sm:$0xff] }
 0x191   : > { %v2553_v52 = vpop.f32.mrf.mxu0 }
 0x192   : > { %v2554_v14 = vadd.f32 %v2553_v52, %v2552_v18 }
 0x194   : > { %v2006_v53 = vadd.f32 %v2554_v14, %v4682_v37 }
 0x197   : > { %v2621_v28 = vpop.f32.mrf.mxu1 }
 0x199   : > { %v2622_v49 = vpop.f32.mrf.mxu1 }
 0x19a   : > { %v4657_v21 = vadd.f32 %v2622_v49, %v2621_v28  ;;  %v2288_v49 = vld [vmem:[%s4675_s11 + $0x30] sm:$0xff] }
 0x19b   : > { %v2624_v51 = vpop.f32.mrf.mxu1 }
 0x19d   : > { %v2625_v31 = vpop.f32.mrf.mxu1 }
 0x19e   : > { %v4659_v12 = vadd.f32 %v2625_v31, %v2624_v51 }
 0x1a2   : > { %v2555_v56 = vpop.f32.mrf.mxu0 }
 0x1a4   : > { %v2556_v35 = vpop.f32.mrf.mxu0 }
 0x1a5   : > { %v2557_v10 = vadd.f32 %v2556_v35, %v2555_v56 }
 0x1a6   : > { %v2558_v50 = vpop.f32.mrf.mxu0 }
 0x1a7   : > { %v2011_v60 = vadd.f32 %v2557_v10, %v4682_v37 }
 0x1a8   : > { %v2559_v27 = vpop.f32.mrf.mxu0 }
 0x1a9   : > { %v2560_v9 = vadd.f32 %v2559_v27, %v2558_v50 }
 0x1ab   : > { %v2014_v27 = vadd.f32 %v2560_v9, %v4682_v37 }
 0x1ae   : > { %v2627_v7 = vpop.f32.mrf.mxu1 }
 0x1b0   : > { %v2628_v58 = vpop.f32.mrf.mxu1 }
 0x1b1   : > { %v4661_v4 = vadd.f32 %v2628_v58, %v2627_v7 }
 0x1b2   : > { %v2630_v41 = vpop.f32.mrf.mxu1 }
 0x1b4   : > { %v2631_v13 = vpop.f32.mrf.mxu1 }
 0x1b5   : > { %v4663_v40 = vadd.f32 %v2631_v13, %v2630_v41  ;;  %v2289_v41 = vld [vmem:[%s4675_s11 + $0x38] sm:$0xff] }
 0x1b7   : > { %v2561_v32 = vpop.f32.mrf.mxu0 }
 0x1b9   : > { %v2562_v15 = vpop.f32.mrf.mxu0 }
 0x1ba   : > { %v2563_v55 = vadd.f32 %v2562_v15, %v2561_v32 }
 0x1bb   : > { %v2564_v11 = vpop.f32.mrf.mxu0 }
 0x1bc   : > { %v2019_v63 = vadd.f32 %v2563_v55, %v4682_v37  ;;  %v2290_v55 = vld [vmem:[%s4675_s11 + $0x40] sm:$0xff] }
 0x1bd   : > { %v2565_v54 = vpop.f32.mrf.mxu0 }
 0x1be   : > { %v2566_v23 = vadd.f32 %v2565_v54, %v2564_v11 }
 0x1c0   : > { %v2022_v52 = vadd.f32 %v2566_v23, %v4682_v37 }
 0x1c3   : > { %v4665_v45 = vpop.f32.mrf.mxu1 }
 0x1c5   : > { %v4667_v33 = vpop.f32.mrf.mxu1 }
 0x1c7   : > { %v4669_v22 = vpop.f32.mrf.mxu1 }
 0x1c9   : > { %v4677_v20 = vpop.f32.mrf.mxu1 }
 0x1cb   : > { %v2663_v29 = vpop.f32.mrf.mxu1 }
 0x1cc   : > { %v2164_v5 = vadd.f32 %v2663_v29, %v2003_v57 }
 0x1cd   : > { %v2155_v62 = vpop.f32.mrf.mxu1 }
 0x1ce   : > { %v2316_v26 = vadd.f32 %v2284_v25, %v2164_v5  ;;  %v2156_v44 = vadd.f32 %v2155_v62, %v1995_v8  ;;  %v2567_v3 = vpop.f32.mrf.mxu0  ;;  %v2292_v8 = vld [vmem:[%s4675_s11 + $0x50] sm:$0xff] }
 0x1cf   : > { %v2664_v1 = vpop.f32.mrf.mxu1 }
 0x1d0   : > { %2349 = vst.msk [vmem:[%s4691_s16 + $0x10] sm:$0xff] %vm2346_vm6, %v2316_v26  ;;  %v2314_v43 = vadd.f32 %v2282_v39, %v2156_v44  ;;  %v2167_v2 = vadd.f32 %v2664_v1, %v2006_v53  ;;  %v2568_v16 = vpop.f32.mrf.mxu0 }
 0x1d1   : > { %v2158_v36 = vpop.f32.mrf.mxu1  ;;  %v2569_v13 = vadd.f32 %v2568_v16, %v2567_v3 }
 0x1d2   : > { %2347 = vst.msk [vmem:[%s4691_s16] sm:$0xff] %vm2346_vm6, %v2314_v43  ;;  %v2317_v42 = vadd.f32 %v2285_v38, %v2167_v2  ;;  %v2159_v61 = vadd.f32 %v2158_v36, %v1998_v48  ;;  %v2570_v6 = vpop.f32.mrf.mxu0  ;;  %v2293_v2 = vld [vmem:[%s4675_s11 + $0x58] sm:$0xff]  ;;  %v2291_v48 = vld [vmem:[%s4675_s11 + $0x48] sm:$0xff] }
 0x1d3   : > { %v2667_v28 = vpop.f32.mrf.mxu1  ;;  %v2027_v5 = vadd.f32 %v2569_v13, %v4682_v37 }
 0x1d4   : > { %2350 = vst.msk [vmem:[%s4691_s16 + $0x18] sm:$0xff] %vm2346_vm6, %v2317_v42  ;;  %v2315_v51 = vadd.f32 %v2283_v17, %v2159_v61  ;;  %v2180_v31 = vadd.f32 %v2667_v28, %v2019_v63  ;;  %v2571_v30 = vpop.f32.mrf.mxu0 }
 0x1d5   : > { %v2171_v46 = vpop.f32.mrf.mxu1  ;;  %v2572_v25 = vadd.f32 %v2571_v30, %v2570_v6  ;;  %v2294_v30 = vld [vmem:[%s4675_s11 + $0x60] sm:$0xff] }
 0x1d6   : > { %2348 = vst.msk [vmem:[%s4691_s16 + $0x8] sm:$0xff] %vm2346_vm6, %v2315_v51  ;;  %v2320_v18 = vadd.f32 %v2288_v49, %v2180_v31  ;;  %v2172_v7 = vadd.f32 %v2171_v46, %v2011_v60 }
 0x1d7   : > { %v2573_v58 = vpop.f32.mrf.mxu0  ;;  %v2668_v56 = vpop.f32.mrf.mxu1  ;;  %v2030_v43 = vadd.f32 %v2572_v25, %v4682_v37 }
 0x1d8   : > { %2353 = vst.msk [vmem:[%s4691_s16 + $0x30] sm:$0xff] %vm2346_vm6, %v2320_v18  ;;  %v2318_v35 = vadd.f32 %v2286_v0, %v2172_v7  ;;  %v2183_v50 = vadd.f32 %v2668_v56, %v2022_v52  ;;  %v2295_v56 = vld [vmem:[%s4675_s11 + $0x68] sm:$0xff] }
 0x1d9   : > { %v2574_v32 = vpop.f32.mrf.mxu0  ;;  %v2174_v15 = vpop.f32.mrf.mxu1 }
 0x1da   : > { %2351 = vst.msk [vmem:[%s4691_s16 + $0x20] sm:$0xff] %vm2346_vm6, %v2318_v35  ;;  %v2321_v59 = vadd.f32 %v2289_v41, %v2183_v50  ;;  %v2575_v11 = vadd.f32 %v2574_v32, %v2573_v58  ;;  %v2175_v14 = vadd.f32 %v2174_v15, %v2014_v27 }
 0x1db   : > { %v2576_v57 = vpop.f32.mrf.mxu0  ;;  %v2671_v29 = vpop.f32.mrf.mxu1 }
 0x1dc   : > { %2354 = vst.msk [vmem:[%s4691_s16 + $0x38] sm:$0xff] %vm2346_vm6, %v2321_v59  ;;  %v2319_v24 = vadd.f32 %v2287_v19, %v2175_v14  ;;  %v2035_v54 = vadd.f32 %v2575_v11, %v4682_v37 }
 0x1dd   : > { %v2577_v62 = vpop.f32.mrf.mxu0  ;;  %v2187_v39 = vpop.f32.mrf.mxu1 }
 0x1de   : > { %2352 = vst.msk [vmem:[%s4691_s16 + $0x28] sm:$0xff] %vm2346_vm6, %v2319_v24  ;;  %v2196_v26 = vadd.f32 %v2671_v29, %v2035_v54  ;;  %v2578_v44 = vadd.f32 %v2577_v62, %v2576_v57  ;;  %v2188_v3 = vadd.f32 %v2187_v39, %v2027_v5  ;;  %v2296_v57 = vld [vmem:[%s4675_s11 + $0x70] sm:$0xff]  ;;  %v2297_v39 = vld [vmem:[%s4675_s11 + $0x78] sm:$0xff] }
 0x1df   : > { %v2672_v53 = vpop.f32.mrf.mxu1 }
 0x1e0   : > { %v2324_v1 = vadd.f32 %v2292_v8, %v2196_v26  ;;  %v2322_v38 = vadd.f32 %v2290_v55, %v2188_v3  ;;  %v2038_v10 = vadd.f32 %v2578_v44, %v4682_v37  ;;  %v2099_v3 = vadd.f32 %v4657_v21, %v4682_v37 }
 0x1e1   : > { %v2190_v16 = vpop.f32.mrf.mxu1 }
 0x1e2   : > { %2357 = vst.msk [vmem:[%s4691_s16 + $0x50] sm:$0xff] %vm2346_vm6, %v2324_v1  ;;  %2355 = vst.msk [vmem:[%s4691_s16 + $0x40] sm:$0xff] %vm2346_vm6, %v2322_v38  ;;  %v2199_v36 = vadd.f32 %v2672_v53, %v2038_v10  ;;  %v2191_v17 = vadd.f32 %v2190_v16, %v2030_v43  ;;  %v2579_v23 = vpop.f32.mrf.mxu0  ;;  %v2308_v38 = vld [vmem:[%s4675_s11 + $0xd0] sm:$0xff] }
 0x1e3   : > { %v2675_v42 = vpop.f32.mrf.mxu1 }
 0x1e4   : > { %v2325_v61 = vadd.f32 %v2293_v2, %v2199_v36  ;;  %v2323_v6 = vadd.f32 %v2291_v48, %v2191_v17  ;;  %v2580_v63 = vpop.f32.mrf.mxu0  ;;  %v2091_v2 = vadd.f32 %v4653_v47, %v4682_v37  ;;  %v2306_v36 = vld [vmem:[%s4675_s11 + $0xc0] sm:$0xff]  ;;  %v2635_v17 = vadd.f32 %v4667_v33, %v4665_v45  ;;  %v2309_v47 = vld [vmem:[%s4675_s11 + $0xd8] sm:$0xff] }
 0x1e5   : > { %v2581_v28 = vadd.f32 %v2580_v63, %v2579_v23  ;;  %v2203_v49 = vpop.f32.mrf.mxu1  ;;  %v2094_v33 = vadd.f32 %v4655_v34, %v4682_v37 }
 0x1e6   : > { %2358 = vst.msk [vmem:[%s4691_s16 + $0x58] sm:$0xff] %vm2346_vm6, %v2325_v61  ;;  %2356 = vst.msk [vmem:[%s4691_s16 + $0x48] sm:$0xff] %vm2346_vm6, %v2323_v6  ;;  %v2582_v9 = vpop.f32.mrf.mxu0  ;;  %v2102_v61 = vadd.f32 %v4659_v12, %v4682_v37  ;;  %v2307_v12 = vld [vmem:[%s4675_s11 + $0xc8] sm:$0xff] }
 0x1e7   : > { %v2043_v51 = vadd.f32 %v2581_v28, %v4682_v37  ;;  %v2676_v31 = vpop.f32.mrf.mxu1  ;;  %v2298_v28 = vld [vmem:[%s4675_s11 + $0x80] sm:$0xff] }
 0x1e8   : > { %v2583_v60 = vpop.f32.mrf.mxu0 }
 0x1e9   : > { %v2204_v46 = vadd.f32 %v2203_v49, %v2043_v51  ;;  %v2584_v0 = vadd.f32 %v2583_v60, %v2582_v9  ;;  %v2206_v18 = vpop.f32.mrf.mxu1  ;;  %v2638_v60 = vadd.f32 %v4677_v20, %v4669_v22  ;;  %v2107_v20 = vadd.f32 %v4661_v4, %v4682_v37 }
 0x1eb   : > { %v2326_v7 = vadd.f32 %v2294_v30, %v2204_v46  ;;  %v2046_v52 = vadd.f32 %v2584_v0, %v4682_v37  ;;  %v4741_v58 = vpop.f32.mrf.mxu1 }
 0x1ed   : > { %2359 = vst.msk [vmem:[%s4691_s16 + $0x60] sm:$0xff] %vm2346_vm6, %v2326_v7  ;;  %v2207_v41 = vadd.f32 %v2206_v18, %v2046_v52  ;;  %v2219_v13 = vpop.f32.mrf.mxu1  ;;  %v2115_v18 = vadd.f32 %v2635_v17, %v4682_v37  ;;  %v2301_v17 = vld [vmem:[%s4675_s11 + $0x98] sm:$0xff] }
 0x1ee   : > { %v2585_v35 = vpop.f32.mrf.mxu0 }
 0x1ef   : > { %v2327_v50 = vadd.f32 %v2295_v56, %v2207_v41  ;;  %v4746_v27 = vpop.f32.mrf.mxu1  ;;  %v2312_v56 = vld [vmem:[%s4675_s11 + $0xf0] sm:$0xff]  ;;  %v2299_v41 = vld [vmem:[%s4675_s11 + $0x88] sm:$0xff] }
 0x1f0   : > { %v2586_v32 = vpop.f32.mrf.mxu0 }
 0x1f1   : > { %2360 = vst.msk [vmem:[%s4691_s16 + $0x68] sm:$0xff] %vm2346_vm6, %v2327_v50  ;;  %v2587_v15 = vadd.f32 %v2586_v32, %v2585_v35  ;;  %v2222_v19 = vpop.f32.mrf.mxu1  ;;  %v2310_v32 = vld [vmem:[%s4675_s11 + $0xe0] sm:$0xff] }
 0x1f2   : > { %v2588_v59 = vpop.f32.mrf.mxu0 }
 0x1f3   : > { %v2051_v11 = vadd.f32 %v2587_v15, %v4682_v37  ;;  %v4751_v14 = vpop.f32.mrf.mxu1 }
 0x1f4   : > { %v2589_v29 = vpop.f32.mrf.mxu0 }
 0x1f5   : > { %v2212_v25 = vadd.f32 %v2675_v42, %v2051_v11  ;;  %v2590_v24 = vadd.f32 %v2589_v29, %v2588_v59  ;;  %v4754_v54 = vpop.f32.mrf.mxu1 }
 0x1f7   : > { %v2328_v5 = vadd.f32 %v2296_v57, %v2212_v25  ;;  %v2054_v8 = vadd.f32 %v2590_v24, %v4682_v37  ;;  %v4757_v62 = vpop.f32.mrf.mxu1  ;;  %v2118_v57 = vadd.f32 %v2638_v60, %v4682_v37  ;;  %v2313_v24 = vld [vmem:[%s4675_s11 + $0xf8] sm:$0xff] }
 0x1f9   : > { %2361 = vst.msk [vmem:[%s4691_s16 + $0x70] sm:$0xff] %vm2346_vm6, %v2328_v5  ;;  %v2215_v55 = vadd.f32 %v2676_v31, %v2054_v8  ;;  %v4762_v26 = vpop.f32.mrf.mxu1  ;;  %v2110_v8 = vadd.f32 %v4663_v40, %v4682_v37 }
 0x1fa   : > { %v2591_v44 = vpop.f32.mrf.mxu0 }
 0x1fb   : > { %v2329_v53 = vadd.f32 %v2297_v39, %v2215_v55  ;;  %v2687_v1 = vpop.f32.mrf.mxu1 }
 0x1fc   : > { %v2260_v10 = vadd.f32 %v2687_v1, %v2099_v3  ;;  %v2592_v43 = vpop.f32.mrf.mxu0 }
 0x1fd   : > { %2362 = vst.msk [vmem:[%s4691_s16 + $0x78] sm:$0xff] %vm2346_vm6, %v2329_v53  ;;  %v2593_v16 = vadd.f32 %v2592_v43, %v2591_v44  ;;  %v2251_v48 = vpop.f32.mrf.mxu1  ;;  %v2311_v44 = vld [vmem:[%s4675_s11 + $0xe8] sm:$0xff] }
 0x1fe   : > { %v2340_v21 = vadd.f32 %v2308_v38, %v2260_v10  ;;  %v2252_v23 = vadd.f32 %v2251_v48, %v2091_v2  ;;  %v2594_v42 = vpop.f32.mrf.mxu0  ;;  %v2300_v10 = vld [vmem:[%s4675_s11 + $0x90] sm:$0xff] }
 0x1ff   : > { %v2059_v6 = vadd.f32 %v2593_v16, %v4682_v37  ;;  %v2688_v63 = vpop.f32.mrf.mxu1 }
 0x200   : > { %2373 = vst.msk [vmem:[%s4691_s16 + $0xd0] sm:$0xff] %vm2346_vm6, %v2340_v21  ;;  %v2338_v49 = vadd.f32 %v2306_v36, %v2252_v23  ;;  %v2263_v9 = vadd.f32 %v2688_v63, %v2102_v61  ;;  %v2595_v45 = vpop.f32.mrf.mxu0 }
 0x201   : > { %v2220_v51 = vadd.f32 %v2219_v13, %v2059_v6  ;;  %v2596_v31 = vadd.f32 %v2595_v45, %v2594_v42  ;;  %v2254_v30 = vpop.f32.mrf.mxu1 }
 0x202   : > { %2371 = vst.msk [vmem:[%s4691_s16 + $0xc0] sm:$0xff] %vm2346_vm6, %v2338_v49  ;;  %v2341_v46 = vadd.f32 %v2309_v47, %v2263_v9  ;;  %v2255_v0 = vadd.f32 %v2254_v30, %v2094_v33  ;;  %v2302_v47 = vld [vmem:[%s4675_s11 + $0xa0] sm:$0xff] }
 0x203   : > { %v2330_v7 = vadd.f32 %v2298_v28, %v2220_v51  ;;  %v2062_v52 = vadd.f32 %v2596_v31, %v4682_v37  ;;  %v2691_v34 = vpop.f32.mrf.mxu1 }
 0x204   : > { %2374 = vst.msk [vmem:[%s4691_s16 + $0xd8] sm:$0xff] %vm2346_vm6, %v2341_v46  ;;  %v2339_v13 = vadd.f32 %v2307_v12, %v2255_v0  ;;  %v2276_v22 = vadd.f32 %v2691_v34, %v2115_v18  ;;  %v2304_v0 = vld [vmem:[%s4675_s11 + $0xb0] sm:$0xff] }
 0x205   : > { %2363 = vst.msk [vmem:[%s4691_s16 + $0x80] sm:$0xff] %vm2346_vm6, %v2330_v7  ;;  %v2223_v35 = vadd.f32 %v2222_v19, %v2062_v52  ;;  %v2267_v50 = vpop.f32.mrf.mxu1 }
 0x206   : > { %2372 = vst.msk [vmem:[%s4691_s16 + $0xc8] sm:$0xff] %vm2346_vm6, %v2339_v13  ;;  %v2344_v15 = vadd.f32 %v2312_v56, %v2276_v22  ;;  %v2268_v59 = vadd.f32 %v2267_v50, %v2107_v20  ;;  %v2597_v11 = vpop.f32.mrf.mxu0 }
 0x207   : > { %v2331_v29 = vadd.f32 %v2299_v41, %v2223_v35  ;;  %v2692_v25 = vpop.f32.mrf.mxu1  ;;  %v2305_v41 = vld [vmem:[%s4675_s11 + $0xb8] sm:$0xff] }
 0x208   : > { %2377 = vst.msk [vmem:[%s4691_s16 + $0xf0] sm:$0xff] %vm2346_vm6, %v2344_v15  ;;  %v2342_v4 = vadd.f32 %v2310_v32, %v2268_v59  ;;  %v2279_v19 = vadd.f32 %v2692_v25, %v2118_v57  ;;  %v2598_v5 = vpop.f32.mrf.mxu0 }
 0x209   : > { %2364 = vst.msk [vmem:[%s4691_s16 + $0x88] sm:$0xff] %vm2346_vm6, %v2331_v29  ;;  %v2599_v39 = vadd.f32 %v2598_v5, %v2597_v11  ;;  %v2270_v55 = vpop.f32.mrf.mxu1 }
 0x20a   : > { %2375 = vst.msk [vmem:[%s4691_s16 + $0xe0] sm:$0xff] %vm2346_vm6, %v2342_v4  ;;  %v2345_v3 = vadd.f32 %v2313_v24, %v2279_v19  ;;  %v2271_v53 = vadd.f32 %v2270_v55, %v2110_v8  ;;  %v2600_v1 = vpop.f32.mrf.mxu0 }
 0x20b   : > { %v2067_v38 = vadd.f32 %v2599_v39, %v4682_v37 }
 0x20c   : > { %2378 = vst.msk [vmem:[%s4691_s16 + $0xf8] sm:$0xff] %vm2346_vm6, %v2345_v3  ;;  %v2343_v40 = vadd.f32 %v2311_v44, %v2271_v53  ;;  %v2601_v43 = vpop.f32.mrf.mxu0 }
 0x20d   : > { %v2228_v2 = vadd.f32 %v4741_v58, %v2067_v38  ;;  %v2602_v16 = vadd.f32 %v2601_v43, %v2600_v1 }
 0x20e   : > { %2376 = vst.msk [vmem:[%s4691_s16 + $0xe8] sm:$0xff] %vm2346_vm6, %v2343_v40 }
 0x20f   : > { %v2332_v48 = vadd.f32 %v2300_v10, %v2228_v2  ;;  %v2070_v36 = vadd.f32 %v2602_v16, %v4682_v37 }
 0x211   : > { %2365 = vst.msk [vmem:[%s4691_s16 + $0x90] sm:$0xff] %vm2346_vm6, %v2332_v48  ;;  %v2231_v21 = vadd.f32 %v4746_v27, %v2070_v36  ;;  %v2303_v27 = vld [vmem:[%s4675_s11 + $0xa8] sm:$0xff] }
 0x212   : > { %v2603_v23 = vpop.f32.mrf.mxu0 }
 0x213   : > { %v2333_v42 = vadd.f32 %v2301_v17, %v2231_v21 }
 0x214   : > { %v2604_v61 = vpop.f32.mrf.mxu0 }
 0x215   : > { %2366 = vst.msk [vmem:[%s4691_s16 + $0x98] sm:$0xff] %vm2346_vm6, %v2333_v42  ;;  %v2605_v58 = vadd.f32 %v2604_v61, %v2603_v23 }
 0x216   : > { %v2606_v6 = vpop.f32.mrf.mxu0 }
 0x217   : > { %v2075_v63 = vadd.f32 %v2605_v58, %v4682_v37 }
 0x218   : > { %v2607_v28 = vpop.f32.mrf.mxu0 }
 0x219   : > { %v2236_v49 = vadd.f32 %v4754_v54, %v2075_v63  ;;  %v2608_v9 = vadd.f32 %v2607_v28, %v2606_v6 }
 0x21b   : > { %v2334_v45 = vadd.f32 %v2302_v47, %v2236_v49  ;;  %v2078_v33 = vadd.f32 %v2608_v9, %v4682_v37 }
 0x21d   : > { %2367 = vst.msk [vmem:[%s4691_s16 + $0xa0] sm:$0xff] %vm2346_vm6, %v2334_v45  ;;  %v2239_v51 = vadd.f32 %v4762_v26, %v2078_v33 }
 0x21e   : > { %v2609_v31 = vpop.f32.mrf.mxu0 }
 0x21f   : > { %v2335_v30 = vadd.f32 %v2303_v27, %v2239_v51 }
 0x220   : > { %v2610_v12 = vpop.f32.mrf.mxu0 }
 0x221   : > { %2368 = vst.msk [vmem:[%s4691_s16 + $0xa8] sm:$0xff] %vm2346_vm6, %v2335_v30  ;;  %v2611_v60 = vadd.f32 %v2610_v12, %v2609_v31 }
 0x222   : > { %v2612_v46 = vpop.f32.mrf.mxu0 }
 0x223   : > { %v2083_v54 = vadd.f32 %v2611_v60, %v4682_v37 }
 0x224   : > { %v2613_v18 = vpop.f32.mrf.mxu0 }
 0x225   : > { %v2244_v7 = vadd.f32 %v4751_v14, %v2083_v54  ;;  %v2614_v52 = vadd.f32 %v2613_v18, %v2612_v46 }
 0x227   : > { %v2336_v34 = vadd.f32 %v2304_v0, %v2244_v7  ;;  %v2086_v56 = vadd.f32 %v2614_v52, %v4682_v37 }
 0x229   : > { %2369 = vst.msk [vmem:[%s4691_s16 + $0xb0] sm:$0xff] %vm2346_vm6, %v2336_v34  ;;  %v2247_v26 = vadd.f32 %v4757_v62, %v2086_v56 }
 0x22b   : > { %v2337_v13 = vadd.f32 %v2305_v41, %v2247_v26 }
 0x22d   : > { %2370 = vst.msk [vmem:[%s4691_s16 + $0xb8] sm:$0xff] %vm2346_vm6, %v2337_v13 }
 0x22e PF: > { %s16_s21 = sadd.s32 1, %s3225_s21  }
 0x22f   : > { %p13_p4 = scmp.ge.s32.totalorder %s16_s21, 4  }
 0x231   :  { %15 = sbr.rel (!%p13_p4) target bundleno = 1 (0x1), region = 83 }

</bundles_post_ra>
